<compile_context>
chip_gen: v5e
topology: v5e:2x2
jax: 0.10.0
libtpu: 0.0.40
codegen_flags: <defaults>
</compile_context>

<pallas_src>
import jax
import jax.numpy as jnp
import numpy as np
from jax.experimental import pallas as pl
from jax.experimental.pallas import tpu as pltpu

H = 28
W = 28
P = H * W              # 784 flattened spatial rows
CIN = 128              # input channels (lanes)
GROUPS = 32
CMID = 64              # 2 taps * 32 groups
COUT = 128

NBLK = 2               # row-blocks (megacore parallel / pipelining)
PB = P // NBLK         # 392 output rows per block (14 h-rows), multiple of 8
HALO = 32              # extra u rows each side (needs >= 29), multiple of 8
EXT = PB + 2 * HALO    # 456 u rows computed per block
XOFF = 8               # offset of the ext band inside xpad (room for w-taps)
XCOPY = EXT - HALO     # 424 real x rows copied per block (other 32 are pad)
XPAD = EXT + 2 * XOFF  # 472 rows in the x staging buffer
WOFF = (-HALO) % W     # 24: w coordinate of ext row r is (r + WOFF) % W


def _conv_kernel(x_ref, a_ref, b_ref, y_ref, xpad_ref, u_ref):
    # x_ref : (P, CIN)        full input, resident across grid steps
    # a_ref : (3*CIN, CMID)   stage-A weights, K = (w-tap, in-channel)
    # b_ref : (9*CMID, COUT)  stage-B weights, K = (kh1, kh2, mid-channel)
    # y_ref : (PB, COUT)      this block's output rows
    # xpad  : (XPAD, CIN)     zero-framed copy of the x rows this block needs
    # u_ref : (EXT, CMID)     stage-A result for block rows +- HALO
    i = pl.program_id(0)

    # ---- stage 0: stage-A input band = block rows +- HALO, zero outside image.
    # Zero only the pad rows; the interior is a single aligned copy from x.
    xpad_ref[pl.ds(0, XOFF + HALO), :] = jnp.zeros((XOFF + HALO, CIN), jnp.float32)
    xpad_ref[pl.ds(XOFF + XCOPY, XPAD - XOFF - XCOPY), :] = jnp.zeros(
        (XPAD - XOFF - XCOPY, CIN), jnp.float32)

    @pl.when(i == 0)
    def _():
        # ext rows = flat [-HALO, PB + HALO); valid part is x[0:XCOPY]
        xpad_ref[pl.ds(XOFF + HALO, XCOPY), :] = x_ref[pl.ds(0, XCOPY), :]

    @pl.when(i == 1)
    def _():
        # ext rows = flat [PB - HALO, P + HALO); valid part is x[PB-HALO:P]
        xpad_ref[pl.ds(XOFF, XCOPY), :] = x_ref[pl.ds(PB - HALO, XCOPY), :]

    # ---- stage A: depthwise 3-tap conv along W + sum over groups of 4 channels,
    #      fused into a single (EXT, 384) x (384, 64) MXU matmul.
    we = jax.lax.rem(jax.lax.broadcasted_iota(jnp.int32, (EXT, 1), 0) + WOFF, W)
    xl = jnp.where(we != 0, xpad_ref[pl.ds(XOFF - 1, EXT), :], 0.0)      # tap w-1
    xc = xpad_ref[pl.ds(XOFF, EXT), :]                                   # tap w
    xr = jnp.where(we != W - 1, xpad_ref[pl.ds(XOFF + 1, EXT), :], 0.0)  # tap w+1
    xcat = jnp.concatenate([xl, xc, xr], axis=1)                         # (EXT, 384)
    u_ref[...] = jnp.dot(xcat, a_ref[...], preferred_element_type=jnp.float32)

    # ---- stage B: 3x3 conv CMID -> COUT, fused into a single
    #      (PB, 576) x (576, 128) MXU matmul (9 shifted/masked taps along K).
    wb = jax.lax.rem(jax.lax.broadcasted_iota(jnp.int32, (PB, 1), 0), W)
    kh2_mask = [wb != 0, None, wb != W - 1]
    pieces = []
    for kh1 in range(3):
        for kh2 in range(3):
            start = HALO + (kh1 - 1) * W + (kh2 - 1)        # static, in [3, 61]
            us = u_ref[pl.ds(start, PB), :]
            if kh2_mask[kh2] is not None:
                us = jnp.where(kh2_mask[kh2], us, 0.0)
            pieces.append(us)
    ucat = jnp.concatenate(pieces, axis=1)                  # (PB, 576)
    y_ref[...] = jnp.dot(ucat, b_ref[...], preferred_element_type=jnp.float32)


def kernel_manual_2_forward(x_nchw, w1, w2):
    """x_nchw: (1,128,28,28), w1: (128,32,3,3,2), w2: (128,3,2) -> (1,128,28,28)."""
    x = jnp.transpose(x_nchw[0], (1, 2, 0)).reshape(P, CIN)              # (784, 128)

    # Stage-A weight:  A[t*128 + c, m*32 + g] = w2[c, t, m] * (c // 4 == g)
    onehot = (jnp.arange(CIN)[:, None] // 4
              == jnp.arange(GROUPS)[None, :]).astype(jnp.float32)        # (128, 32)
    A = jnp.einsum('ctm,cg->tcmg', w2, onehot).reshape(3 * CIN, CMID)    # (384, 64)

    # Stage-B weight:  B[(kh1*3+kh2)*64 + m*32 + g, i] = w1[i, g, kh1, kh2, m]
    B = jnp.transpose(w1, (2, 3, 4, 1, 0)).reshape(9 * CMID, COUT)       # (576, 128)

    grid_spec = pltpu.PrefetchScalarGridSpec(
        num_scalar_prefetch=0,
        grid=(NBLK,),
        in_specs=[
            pl.BlockSpec((P, CIN), lambda i: (0, 0)),        # x resident (both blocks)
            pl.BlockSpec((3 * CIN, CMID), lambda i: (0, 0)),
            pl.BlockSpec((9 * CMID, COUT), lambda i: (0, 0)),
        ],
        out_specs=pl.BlockSpec((PB, COUT), lambda i: (i, 0)),
        scratch_shapes=[
            pltpu.VMEM((XPAD, CIN), jnp.float32),
            pltpu.VMEM((EXT, CMID), jnp.float32),
        ],
    )
    y = pl.pallas_call(
        _conv_kernel,
        out_shape=jax.ShapeDtypeStruct((P, COUT), jnp.float32),
        grid_spec=grid_spec,
        compiler_params=pltpu.CompilerParams(
            dimension_semantics=("parallel",),
            vmem_limit_bytes=32 * 1024 * 1024),
    )(x, A, B)

    return jnp.transpose(y.reshape(H, W, COUT), (2, 0, 1))[None]         # NCHW


def reference(x_nchw, w1, w2):
    """Pure-JAX re-implementation of the PyTorch forward (for verification)."""
    x = x_nchw[0]                                                        # (128,28,28)
    xp = jnp.pad(x, ((0, 0), (0, 0), (1, 1)))
    t4 = jnp.zeros((CIN, H, W, 2), jnp.float32)
    for kh in range(3):
        t4 = t4 + xp[:, :, kh:kh + W, None] * w2[:, kh, :][:, None, None, :]
    u = t4.reshape(GROUPS, 4, H, W, 2).sum(axis=1)                       # (32,28,28,2)
    up = jnp.pad(u, ((0, 0), (1, 1), (1, 1), (0, 0)))
    y = jnp.zeros((COUT, H, W), jnp.float32)
    for kh1 in range(3):
        for kh2 in range(3):
            patch = up[:, kh1:kh1 + H, kh2:kh2 + W, :]                   # (32,28,28,2)
            y = y + jnp.einsum('ghwm,igm->ihw', patch, w1[:, :, kh1, kh2, :],
                               precision=jax.lax.Precision.HIGHEST)
    return y[None]


if __name__ == "__main__":
    key = jax.random.PRNGKey(0)
    kx, k1, k2 = jax.random.split(key, 3)
    # Shapes dictated by the hard-coded reshapes in the PyTorch module.
    x = jax.random.normal(kx, (1, 128, 28, 28), jnp.float32)
    w1 = jax.random.normal(k1, (128, 32, 3, 3, 2), jnp.float32)   # weights[0]
    w2 = jax.random.normal(k2, (128, 3, 2), jnp.float32)          # weights[1]
    # TODO(synk): self.shift_direction is unused in forward(); nothing to port.

    y = jax.jit(kernel_manual_2_forward)(x, w1, w2)
    y = jax.block_until_ready(y)

    y_ref = reference(x, w1, w2)
    assert y.shape == (1, 128, 28, 28)
    np.testing.assert_allclose(np.asarray(y), np.asarray(y_ref),
                               rtol=1e-2, atol=1e-1)
    print("KERNEL_OK")
</pallas_src>

<mosaic_0001>
module attributes {stable_mosaic.version = 11 : i64} {
  func.func @_conv_kernel(%arg0: i32, %arg1: memref<784x128xf32, #tpu.memory_space<vmem>>, %arg2: memref<384x64xf32, #tpu.memory_space<vmem>>, %arg3: memref<576x128xf32, #tpu.memory_space<vmem>>, %arg4: memref<392x128xf32, #tpu.memory_space<vmem>>, %arg5: memref<472x128xf32, #tpu.memory_space<vmem>>, %arg6: memref<456x64xf32, #tpu.memory_space<vmem>>) attributes {dimension_semantics = [#tpu.dimension_semantics<parallel>], iteration_bounds = array<i64: 2>, scalar_prefetch = 0 : i64, scratch_operands = 2 : i64, tpu.core_type = #tpu.core_type<tc>, window_params = [{pipeline_mode = #tpu.pipeline_mode<synchronous>, transform_indices = @transform_0, window_bounds = array<i64: 784, 128>}, {pipeline_mode = #tpu.pipeline_mode<synchronous>, transform_indices = @transform_1, window_bounds = array<i64: 384, 64>}, {pipeline_mode = #tpu.pipeline_mode<synchronous>, transform_indices = @transform_2, window_bounds = array<i64: 576, 128>}, {transform_indices = @transform_3, window_bounds = array<i64: 392, 128>}]} {
    %cst = arith.constant 0.000000e+00 : f32
    %0 = vector.broadcast %cst : f32 to vector<40x128xf32>
    %c0 = arith.constant 0 : index
    %c0_0 = arith.constant 0 : index
    %1 = vector.load %arg5[%c0, %c0_0] : memref<472x128xf32, #tpu.memory_space<vmem>>, vector<40x128xf32>
    tpu.vector_store %arg5[%c0, %c0_0], %0 {strides = array<i32>} : memref<472x128xf32, #tpu.memory_space<vmem>>, vector<40x128xf32>,
    %cst_1 = arith.constant 0.000000e+00 : f32
    %2 = vector.broadcast %cst_1 : f32 to vector<40x128xf32>
    %c432 = arith.constant 432 : index
    %c0_2 = arith.constant 0 : index
    %3 = vector.load %arg5[%c432, %c0_2] : memref<472x128xf32, #tpu.memory_space<vmem>>, vector<40x128xf32>
    tpu.vector_store %arg5[%c432, %c0_2], %2 {strides = array<i32>} : memref<472x128xf32, #tpu.memory_space<vmem>>, vector<40x128xf32>,
    %c0_i32 = arith.constant 0 : i32
    %4 = arith.cmpi eq, %arg0, %c0_i32 : i32
    %5 = arith.extui %4 : i1 to i32
    %c0_i32_3 = arith.constant 0 : i32
    %6 = arith.cmpi ne, %5, %c0_i32_3 : i32
    scf.if %6 {
      %c0_39 = arith.constant 0 : index
      %c0_40 = arith.constant 0 : index
      %78 = vector.load %arg1[%c0_39, %c0_40] : memref<784x128xf32, #tpu.memory_space<vmem>>, vector<424x128xf32>
      %c40 = arith.constant 40 : index
      %c0_41 = arith.constant 0 : index
      %79 = vector.load %arg5[%c40, %c0_41] : memref<472x128xf32, #tpu.memory_space<vmem>>, vector<424x128xf32>
      tpu.vector_store %arg5[%c40, %c0_41], %78 {strides = array<i32>} : memref<472x128xf32, #tpu.memory_space<vmem>>, vector<424x128xf32>,
    } else {
    }
    %c1_i32 = arith.constant 1 : i32
    %7 = arith.cmpi eq, %arg0, %c1_i32 : i32
    %8 = arith.extui %7 : i1 to i32
    %c0_i32_4 = arith.constant 0 : i32
    %9 = arith.cmpi ne, %8, %c0_i32_4 : i32
    scf.if %9 {
      %c360 = arith.constant 360 : index
      %c0_39 = arith.constant 0 : index
      %78 = vector.load %arg1[%c360, %c0_39] : memref<784x128xf32, #tpu.memory_space<vmem>>, vector<424x128xf32>
      %c8_40 = arith.constant 8 : index
      %c0_41 = arith.constant 0 : index
      %79 = vector.load %arg5[%c8_40, %c0_41] : memref<472x128xf32, #tpu.memory_space<vmem>>, vector<424x128xf32>
      tpu.vector_store %arg5[%c8_40, %c0_41], %78 {strides = array<i32>} : memref<472x128xf32, #tpu.memory_space<vmem>>, vector<424x128xf32>,
    } else {
    }
    %10 = tpu.iota {dimensions = array<i32: 0>} : vector<456x1xi32>
    %c24_i32 = arith.constant 24 : i32
    %11 = vector.broadcast %c24_i32 : i32 to vector<456x1xi32>
    %12 = arith.addi %10, %11 : vector<456x1xi32>
    %c28_i32 = arith.constant 28 : i32
    %13 = vector.broadcast %c28_i32 : i32 to vector<456x1xi32>
    %14 = arith.remsi %12, %13 : vector<456x1xi32>
    %c0_i32_5 = arith.constant 0 : i32
    %15 = vector.broadcast %c0_i32_5 : i32 to vector<456x1xi32>
    %16 = arith.cmpi ne, %14, %15 : vector<456x1xi32>
    %c7 = arith.constant 7 : index
    %c0_6 = arith.constant 0 : index
    %17 = vector.load %arg5[%c7, %c0_6] : memref<472x128xf32, #tpu.memory_space<vmem>>, vector<456x128xf32>
    %cst_7 = arith.constant 0.000000e+00 : f32
    %18 = vector.shape_cast %16 : vector<456x1xi1> to vector<456x1xi1>
    %19 = vector.broadcast %18 : vector<456x1xi1> to vector<456x128xi1>
    %20 = vector.broadcast %cst_7 : f32 to vector<456x128xf32>
    %21 = arith.select %19, %17, %20 : vector<456x128xi1>, vector<456x128xf32>
    %c8 = arith.constant 8 : index
    %c0_8 = arith.constant 0 : index
    %22 = vector.load %arg5[%c8, %c0_8] : memref<472x128xf32, #tpu.memory_space<vmem>>, vector<456x128xf32>
    %c27_i32 = arith.constant 27 : i32
    %23 = vector.broadcast %c27_i32 : i32 to vector<456x1xi32>
    %24 = arith.cmpi ne, %14, %23 : vector<456x1xi32>
    %c9 = arith.constant 9 : index
    %c0_9 = arith.constant 0 : index
    %25 = vector.load %arg5[%c9, %c0_9] : memref<472x128xf32, #tpu.memory_space<vmem>>, vector<456x128xf32>
    %cst_10 = arith.constant 0.000000e+00 : f32
    %26 = vector.shape_cast %24 : vector<456x1xi1> to vector<456x1xi1>
    %27 = vector.broadcast %26 : vector<456x1xi1> to vector<456x128xi1>
    %28 = vector.broadcast %cst_10 : f32 to vector<456x128xf32>
    %29 = arith.select %27, %25, %28 : vector<456x128xi1>, vector<456x128xf32>
    %30 = tpu.concatenate %21, %22, %29 in 1 : vector<456x128xf32>, vector<456x128xf32>, vector<456x128xf32> -> vector<456x384xf32>
    %c0_11 = arith.constant 0 : index
    %c0_12 = arith.constant 0 : index
    %31 = vector.load %arg2[%c0_11, %c0_12] : memref<384x64xf32, #tpu.memory_space<vmem>>, vector<384x64xf32>
    %cst_13 = arith.constant dense<0.000000e+00> : vector<456x64xf32>
    %32 = tpu.matmul %30, %31, %cst_13 {dimension_numbers = #tpu.dot_dimension_numbers<[1], [0], [0], [1], [0, 0, 1, 1], [], []>} : vector<456x384xf32>, vector<384x64xf32>, vector<456x64xf32> -> vector<456x64xf32>
    %c0_14 = arith.constant 0 : index
    %c0_15 = arith.constant 0 : index
    %33 = vector.load %arg6[%c0_14, %c0_15] : memref<456x64xf32, #tpu.memory_space<vmem>>, vector<456x64xf32>
    tpu.vector_store %arg6[%c0_14, %c0_15], %32 {strides = array<i32>} : memref<456x64xf32, #tpu.memory_space<vmem>>, vector<456x64xf32>,
    %34 = tpu.iota {dimensions = array<i32: 0>} : vector<392x1xi32>
    %c28_i32_16 = arith.constant 28 : i32
    %35 = vector.broadcast %c28_i32_16 : i32 to vector<392x1xi32>
    %36 = arith.remsi %34, %35 : vector<392x1xi32>
    %c0_i32_17 = arith.constant 0 : i32
    %37 = vector.broadcast %c0_i32_17 : i32 to vector<392x1xi32>
    %38 = arith.cmpi ne, %36, %37 : vector<392x1xi32>
    %c27_i32_18 = arith.constant 27 : i32
    %39 = vector.broadcast %c27_i32_18 : i32 to vector<392x1xi32>
    %40 = arith.cmpi ne, %36, %39 : vector<392x1xi32>
    %c3 = arith.constant 3 : index
    %c0_19 = arith.constant 0 : index
    %41 = vector.load %arg6[%c3, %c0_19] : memref<456x64xf32, #tpu.memory_space<vmem>>, vector<392x64xf32>
    %cst_20 = arith.constant 0.000000e+00 : f32
    %42 = vector.shape_cast %38 : vector<392x1xi1> to vector<392x1xi1>
    %43 = vector.broadcast %42 : vector<392x1xi1> to vector<392x64xi1>
    %44 = vector.broadcast %cst_20 : f32 to vector<392x64xf32>
    %45 = arith.select %43, %41, %44 : vector<392x64xi1>, vector<392x64xf32>
    %c4 = arith.constant 4 : index
    %c0_21 = arith.constant 0 : index
    %46 = vector.load %arg6[%c4, %c0_21] : memref<456x64xf32, #tpu.memory_space<vmem>>, vector<392x64xf32>
    %c5 = arith.constant 5 : index
    %c0_22 = arith.constant 0 : index
    %47 = vector.load %arg6[%c5, %c0_22] : memref<456x64xf32, #tpu.memory_space<vmem>>, vector<392x64xf32>
    %cst_23 = arith.constant 0.000000e+00 : f32
    %48 = vector.shape_cast %40 : vector<392x1xi1> to vector<392x1xi1>
    %49 = vector.broadcast %48 : vector<392x1xi1> to vector<392x64xi1>
    %50 = vector.broadcast %cst_23 : f32 to vector<392x64xf32>
    %51 = arith.select %49, %47, %50 : vector<392x64xi1>, vector<392x64xf32>
    %c31 = arith.constant 31 : index
    %c0_24 = arith.constant 0 : index
    %52 = vector.load %arg6[%c31, %c0_24] : memref<456x64xf32, #tpu.memory_space<vmem>>, vector<392x64xf32>
    %cst_25 = arith.constant 0.000000e+00 : f32
    %53 = vector.shape_cast %38 : vector<392x1xi1> to vector<392x1xi1>
    %54 = vector.broadcast %53 : vector<392x1xi1> to vector<392x64xi1>
    %55 = vector.broadcast %cst_25 : f32 to vector<392x64xf32>
    %56 = arith.select %54, %52, %55 : vector<392x64xi1>, vector<392x64xf32>
    %c32 = arith.constant 32 : index
    %c0_26 = arith.constant 0 : index
    %57 = vector.load %arg6[%c32, %c0_26] : memref<456x64xf32, #tpu.memory_space<vmem>>, vector<392x64xf32>
    %c33 = arith.constant 33 : index
    %c0_27 = arith.constant 0 : index
    %58 = vector.load %arg6[%c33, %c0_27] : memref<456x64xf32, #tpu.memory_space<vmem>>, vector<392x64xf32>
    %cst_28 = arith.constant 0.000000e+00 : f32
    %59 = vector.shape_cast %40 : vector<392x1xi1> to vector<392x1xi1>
    %60 = vector.broadcast %59 : vector<392x1xi1> to vector<392x64xi1>
    %61 = vector.broadcast %cst_28 : f32 to vector<392x64xf32>
    %62 = arith.select %60, %58, %61 : vector<392x64xi1>, vector<392x64xf32>
    %c59 = arith.constant 59 : index
    %c0_29 = arith.constant 0 : index
    %63 = vector.load %arg6[%c59, %c0_29] : memref<456x64xf32, #tpu.memory_space<vmem>>, vector<392x64xf32>
    %cst_30 = arith.constant 0.000000e+00 : f32
    %64 = vector.shape_cast %38 : vector<392x1xi1> to vector<392x1xi1>
    %65 = vector.broadcast %64 : vector<392x1xi1> to vector<392x64xi1>
    %66 = vector.broadcast %cst_30 : f32 to vector<392x64xf32>
    %67 = arith.select %65, %63, %66 : vector<392x64xi1>, vector<392x64xf32>
    %c60 = arith.constant 60 : index
    %c0_31 = arith.constant 0 : index
    %68 = vector.load %arg6[%c60, %c0_31] : memref<456x64xf32, #tpu.memory_space<vmem>>, vector<392x64xf32>
    %c61 = arith.constant 61 : index
    %c0_32 = arith.constant 0 : index
    %69 = vector.load %arg6[%c61, %c0_32] : memref<456x64xf32, #tpu.memory_space<vmem>>, vector<392x64xf32>
    %cst_33 = arith.constant 0.000000e+00 : f32
    %70 = vector.shape_cast %40 : vector<392x1xi1> to vector<392x1xi1>
    %71 = vector.broadcast %70 : vector<392x1xi1> to vector<392x64xi1>
    %72 = vector.broadcast %cst_33 : f32 to vector<392x64xf32>
    %73 = arith.select %71, %69, %72 : vector<392x64xi1>, vector<392x64xf32>
    %74 = tpu.concatenate %45, %46, %51, %56, %57, %62, %67, %68, %73 in 1 : vector<392x64xf32>, vector<392x64xf32>, vector<392x64xf32>, vector<392x64xf32>, vector<392x64xf32>, vector<392x64xf32>, vector<392x64xf32>, vector<392x64xf32>, vector<392x64xf32> -> vector<392x576xf32>
    %c0_34 = arith.constant 0 : index
    %c0_35 = arith.constant 0 : index
    %75 = vector.load %arg3[%c0_34, %c0_35] : memref<576x128xf32, #tpu.memory_space<vmem>>, vector<576x128xf32>
    %cst_36 = arith.constant dense<0.000000e+00> : vector<392x128xf32>
    %76 = tpu.matmul %74, %75, %cst_36 {dimension_numbers = #tpu.dot_dimension_numbers<[1], [0], [0], [1], [0, 0, 1, 1], [], []>} : vector<392x576xf32>, vector<576x128xf32>, vector<392x128xf32> -> vector<392x128xf32>
    %c0_37 = arith.constant 0 : index
    %c0_38 = arith.constant 0 : index
    %77 = vector.load %arg4[%c0_37, %c0_38] : memref<392x128xf32, #tpu.memory_space<vmem>>, vector<392x128xf32>
    tpu.vector_store %arg4[%c0_37, %c0_38], %76 {strides = array<i32>} : memref<392x128xf32, #tpu.memory_space<vmem>>, vector<392x128xf32>,
    return
  }
  func.func @transform_0(%arg0: i32) -> (i32, i32) {
    %c0_i32 = arith.constant 0 : i32
    %c0_i32_0 = arith.constant 0 : i32
    %c0_i32_1 = arith.constant 0 : i32
    return %c0_i32, %c0_i32_0 : i32, i32
  }
  func.func @transform_1(%arg0: i32) -> (i32, i32) {
    %c0_i32 = arith.constant 0 : i32
    %c0_i32_0 = arith.constant 0 : i32
    %c0_i32_1 = arith.constant 0 : i32
    return %c0_i32, %c0_i32_0 : i32, i32
  }
  func.func @transform_2(%arg0: i32) -> (i32, i32) {
    %c0_i32 = arith.constant 0 : i32
    %c0_i32_0 = arith.constant 0 : i32
    %c0_i32_1 = arith.constant 0 : i32
    return %c0_i32, %c0_i32_0 : i32, i32
  }
  func.func @transform_3(%arg0: i32) -> (i32, i32) {
    %c0_i32 = arith.constant 0 : i32
    %c0_i32_0 = arith.constant 0 : i32
    return %arg0, %c0_i32 : i32, i32
  }
}

</mosaic_0001>

<bundles_post_ra>
// kernel: kernel_manual_2_forward.1
= control target key start
LH: loop header
LB: loop body
LE: loop exit
PB: predicated region body
PF: predicated region fallthrough
CT: control target
= control target key end

     0   :  { %s8607_s12 = smov 0   ;;  %s13141_s0 = inlined_call_operand.vmem [shape: f32[784,128], index: 0, kind: input, shape index: {}]   ;;  %s13142_s1 = inlined_call_operand.vmem [shape: f32[384,64], index: 1, kind: input, shape index: {}]   ;;  %s13143_s2 = inlined_call_operand.vmem [shape: f32[576,128], index: 2, kind: input, shape index: {}]   ;;  %s13144_s3 = inlined_call_operand.vmem [shape: f32[784,128], index: 3, kind: output, shape index: {}]  }
   0x1 LB: > { %s8613_s13 = sadd.s32 4294967295, %s8582_s12   ;;  %p7997_p0 = scmp.ge.s32.totalorder %s8582_s12, 1  ;;  %s8582_s12 = sphi %s8607_s12, %s13_s12  }
   0x2   : > { %p127_p1 = scmp.lt.s32.totalorder %s8582_s12, 3 }
   0x4   : > { %p128_p2 = pnand %p7997_p0, %p127_p1 }
   0x6   : > { %131 = sbr.rel (%p128_p2) target bundleno = 1598 (0x63e), region = 32 }
   0xb   : > { %s146_s14 = smul.u32 49, %s8613_s13  ;;  %v8584_v0 = vmov 0.0   ;;  %p7999_p4 = scmp.ne.s32.totalorder %s8613_s13, 0 }
   0xc   : > { %152 = vst [vmem:[#allocation2] sm:$0xff] %v8584_v0 }
   0xd   : > { %p147_p3 = scmp.lt.s32.totalorder %s146_s14, 97  ;;  %153 = vst [vmem:[#allocation2 + $0x8] sm:$0xff] %v8584_v0 }
   0xe   : > { %154 = vst [vmem:[#allocation2 + $0x10] sm:$0xff] %v8584_v0 }
   0xf   : > { %s13825_s14 = smov (!%p147_p3, %s146_s14), 97  ;;  %155 = vst [vmem:[#allocation2 + $0x18] sm:$0xff] %v8584_v0 }
  0x10   : > { %156 = vst [vmem:[#allocation2 + $0x20] sm:$0xff] %v8584_v0  ;;  %s7998_s15 = sshll.u32 %s13825_s14, 3 }
  0x11   : > { %157 = vst [vmem:[#allocation2 + $0x1b0] sm:$0xff] %v8584_v0  ;;  %s8621_s18 = scalar_lea.vmem %s13144_s3, %s7998_s15  ;;  %165 = sbr.rel (%p7999_p4) target bundleno = 76 (0x4c), region = 36 }
  0x12   : > { %158 = vst [vmem:[#allocation2 + $0x1b8] sm:$0xff] %v8584_v0 }
  0x13   : > { %159 = vst [vmem:[#allocation2 + $0x1c0] sm:$0xff] %v8584_v0 }
  0x14   : > { %160 = vst [vmem:[#allocation2 + $0x1c8] sm:$0xff] %v8584_v0 }
  0x15   : > { %161 = vst [vmem:[#allocation2 + $0x1d0] sm:$0xff] %v8584_v0 }
  0x16   : > { %v166_v1 = vld [vmem:[%s13141_s0] sm:$0xff]  ;;  %v167_v2 = vld [vmem:[%s13141_s0 + $0x8] sm:$0xff]  ;;  %v168_v3 = vld [vmem:[%s13141_s0 + $0x10] sm:$0xff] }
  0x17   : > { %219 = vst [vmem:[#allocation2 + $0x28] sm:$0xff] %v166_v1  ;;  %v169_v4 = vld [vmem:[%s13141_s0 + $0x18] sm:$0xff]  ;;  %v170_v5 = vld [vmem:[%s13141_s0 + $0x20] sm:$0xff]  ;;  %v171_v6 = vld [vmem:[%s13141_s0 + $0x28] sm:$0xff] }
  0x18   : > { %220 = vst [vmem:[#allocation2 + $0x30] sm:$0xff] %v167_v2  ;;  %v172_v7 = vld [vmem:[%s13141_s0 + $0x30] sm:$0xff]  ;;  %v173_v8 = vld [vmem:[%s13141_s0 + $0x38] sm:$0xff]  ;;  %v174_v9 = vld [vmem:[%s13141_s0 + $0x40] sm:$0xff] }
  0x19   : > { %221 = vst [vmem:[#allocation2 + $0x38] sm:$0xff] %v168_v3  ;;  %v175_v10 = vld [vmem:[%s13141_s0 + $0x48] sm:$0xff]  ;;  %v176_v11 = vld [vmem:[%s13141_s0 + $0x50] sm:$0xff]  ;;  %v177_v12 = vld [vmem:[%s13141_s0 + $0x58] sm:$0xff] }
  0x1a   : > { %222 = vst [vmem:[#allocation2 + $0x40] sm:$0xff] %v169_v4  ;;  %v178_v13 = vld [vmem:[%s13141_s0 + $0x60] sm:$0xff]  ;;  %v179_v14 = vld [vmem:[%s13141_s0 + $0x68] sm:$0xff]  ;;  %v180_v15 = vld [vmem:[%s13141_s0 + $0x70] sm:$0xff] }
  0x1b   : > { %223 = vst [vmem:[#allocation2 + $0x48] sm:$0xff] %v170_v5  ;;  %v181_v16 = vld [vmem:[%s13141_s0 + $0x78] sm:$0xff]  ;;  %v182_v17 = vld [vmem:[%s13141_s0 + $0x80] sm:$0xff]  ;;  %v183_v18 = vld [vmem:[%s13141_s0 + $0x88] sm:$0xff] }
  0x1c   : > { %224 = vst [vmem:[#allocation2 + $0x50] sm:$0xff] %v171_v6  ;;  %v184_v19 = vld [vmem:[%s13141_s0 + $0x90] sm:$0xff]  ;;  %v185_v20 = vld [vmem:[%s13141_s0 + $0x98] sm:$0xff]  ;;  %v186_v21 = vld [vmem:[%s13141_s0 + $0xa0] sm:$0xff] }
  0x1d   : > { %225 = vst [vmem:[#allocation2 + $0x58] sm:$0xff] %v172_v7  ;;  %v187_v22 = vld [vmem:[%s13141_s0 + $0xa8] sm:$0xff]  ;;  %v188_v23 = vld [vmem:[%s13141_s0 + $0xb0] sm:$0xff]  ;;  %v189_v24 = vld [vmem:[%s13141_s0 + $0xb8] sm:$0xff] }
  0x1e   : > { %226 = vst [vmem:[#allocation2 + $0x60] sm:$0xff] %v173_v8  ;;  %v190_v25 = vld [vmem:[%s13141_s0 + $0xc0] sm:$0xff]  ;;  %v191_v26 = vld [vmem:[%s13141_s0 + $0xc8] sm:$0xff]  ;;  %v192_v27 = vld [vmem:[%s13141_s0 + $0xd0] sm:$0xff] }
  0x1f   : > { %227 = vst [vmem:[#allocation2 + $0x68] sm:$0xff] %v174_v9  ;;  %v193_v28 = vld [vmem:[%s13141_s0 + $0xd8] sm:$0xff]  ;;  %v194_v29 = vld [vmem:[%s13141_s0 + $0xe0] sm:$0xff]  ;;  %v195_v30 = vld [vmem:[%s13141_s0 + $0xe8] sm:$0xff] }
  0x20   : > { %228 = vst [vmem:[#allocation2 + $0x70] sm:$0xff] %v175_v10  ;;  %v196_v31 = vld [vmem:[%s13141_s0 + $0xf0] sm:$0xff]  ;;  %v197_v32 = vld [vmem:[%s13141_s0 + $0xf8] sm:$0xff]  ;;  %v198_v33 = vld [vmem:[%s13141_s0 + $0x100] sm:$0xff] }
  0x21   : > { %229 = vst [vmem:[#allocation2 + $0x78] sm:$0xff] %v176_v11  ;;  %v199_v34 = vld [vmem:[%s13141_s0 + $0x108] sm:$0xff]  ;;  %v200_v35 = vld [vmem:[%s13141_s0 + $0x110] sm:$0xff]  ;;  %v201_v36 = vld [vmem:[%s13141_s0 + $0x118] sm:$0xff] }
  0x22   : > { %230 = vst [vmem:[#allocation2 + $0x80] sm:$0xff] %v177_v12  ;;  %v202_v37 = vld [vmem:[%s13141_s0 + $0x120] sm:$0xff]  ;;  %v203_v38 = vld [vmem:[%s13141_s0 + $0x128] sm:$0xff]  ;;  %v204_v39 = vld [vmem:[%s13141_s0 + $0x130] sm:$0xff] }
  0x23   : > { %231 = vst [vmem:[#allocation2 + $0x88] sm:$0xff] %v178_v13  ;;  %v205_v40 = vld [vmem:[%s13141_s0 + $0x138] sm:$0xff]  ;;  %v206_v41 = vld [vmem:[%s13141_s0 + $0x140] sm:$0xff]  ;;  %v207_v42 = vld [vmem:[%s13141_s0 + $0x148] sm:$0xff] }
  0x24   : > { %232 = vst [vmem:[#allocation2 + $0x90] sm:$0xff] %v179_v14  ;;  %v208_v43 = vld [vmem:[%s13141_s0 + $0x150] sm:$0xff]  ;;  %v209_v44 = vld [vmem:[%s13141_s0 + $0x158] sm:$0xff]  ;;  %v210_v45 = vld [vmem:[%s13141_s0 + $0x160] sm:$0xff] }
  0x25   : > { %233 = vst [vmem:[#allocation2 + $0x98] sm:$0xff] %v180_v15  ;;  %v211_v46 = vld [vmem:[%s13141_s0 + $0x168] sm:$0xff]  ;;  %v212_v47 = vld [vmem:[%s13141_s0 + $0x170] sm:$0xff]  ;;  %v213_v48 = vld [vmem:[%s13141_s0 + $0x178] sm:$0xff] }
  0x26   : > { %234 = vst [vmem:[#allocation2 + $0xa0] sm:$0xff] %v181_v16  ;;  %v214_v49 = vld [vmem:[%s13141_s0 + $0x180] sm:$0xff]  ;;  %v215_v50 = vld [vmem:[%s13141_s0 + $0x188] sm:$0xff]  ;;  %v216_v51 = vld [vmem:[%s13141_s0 + $0x190] sm:$0xff] }
  0x27   : > { %235 = vst [vmem:[#allocation2 + $0xa8] sm:$0xff] %v182_v17  ;;  %v217_v52 = vld [vmem:[%s13141_s0 + $0x198] sm:$0xff]  ;;  %v218_v53 = vld [vmem:[%s13141_s0 + $0x1a0] sm:$0xff] }
  0x28   : > { %236 = vst [vmem:[#allocation2 + $0xb0] sm:$0xff] %v183_v18 }
  0x29   : > { %237 = vst [vmem:[#allocation2 + $0xb8] sm:$0xff] %v184_v19 }
  0x2a   : > { %238 = vst [vmem:[#allocation2 + $0xc0] sm:$0xff] %v185_v20 }
  0x2b   : > { %239 = vst [vmem:[#allocation2 + $0xc8] sm:$0xff] %v186_v21 }
  0x2c   : > { %240 = vst [vmem:[#allocation2 + $0xd0] sm:$0xff] %v187_v22 }
  0x2d   : > { %241 = vst [vmem:[#allocation2 + $0xd8] sm:$0xff] %v188_v23 }
  0x2e   : > { %242 = vst [vmem:[#allocation2 + $0xe0] sm:$0xff] %v189_v24 }
  0x2f   : > { %243 = vst [vmem:[#allocation2 + $0xe8] sm:$0xff] %v190_v25 }
  0x30   : > { %244 = vst [vmem:[#allocation2 + $0xf0] sm:$0xff] %v191_v26 }
  0x31   : > { %245 = vst [vmem:[#allocation2 + $0xf8] sm:$0xff] %v192_v27 }
  0x32   : > { %246 = vst [vmem:[#allocation2 + $0x100] sm:$0xff] %v193_v28 }
  0x33   : > { %247 = vst [vmem:[#allocation2 + $0x108] sm:$0xff] %v194_v29 }
  0x34   : > { %248 = vst [vmem:[#allocation2 + $0x110] sm:$0xff] %v195_v30 }
  0x35   : > { %249 = vst [vmem:[#allocation2 + $0x118] sm:$0xff] %v196_v31 }
  0x36   : > { %250 = vst [vmem:[#allocation2 + $0x120] sm:$0xff] %v197_v32 }
  0x37   : > { %251 = vst [vmem:[#allocation2 + $0x128] sm:$0xff] %v198_v33 }
  0x38   : > { %252 = vst [vmem:[#allocation2 + $0x130] sm:$0xff] %v199_v34 }
  0x39   : > { %253 = vst [vmem:[#allocation2 + $0x138] sm:$0xff] %v200_v35 }
  0x3a   : > { %254 = vst [vmem:[#allocation2 + $0x140] sm:$0xff] %v201_v36 }
  0x3b   : > { %255 = vst [vmem:[#allocation2 + $0x148] sm:$0xff] %v202_v37 }
  0x3c   : > { %256 = vst [vmem:[#allocation2 + $0x150] sm:$0xff] %v203_v38 }
  0x3d   : > { %257 = vst [vmem:[#allocation2 + $0x158] sm:$0xff] %v204_v39 }
  0x3e   : > { %258 = vst [vmem:[#allocation2 + $0x160] sm:$0xff] %v205_v40 }
  0x3f   : > { %259 = vst [vmem:[#allocation2 + $0x168] sm:$0xff] %v206_v41 }
  0x40   : > { %260 = vst [vmem:[#allocation2 + $0x170] sm:$0xff] %v207_v42 }
  0x41   : > { %261 = vst [vmem:[#allocation2 + $0x178] sm:$0xff] %v208_v43 }
  0x42   : > { %262 = vst [vmem:[#allocation2 + $0x180] sm:$0xff] %v209_v44 }
  0x43   : > { %263 = vst [vmem:[#allocation2 + $0x188] sm:$0xff] %v210_v45 }
  0x44   : > { %264 = vst [vmem:[#allocation2 + $0x190] sm:$0xff] %v211_v46 }
  0x45   : > { %265 = vst [vmem:[#allocation2 + $0x198] sm:$0xff] %v212_v47 }
  0x46   : > { %266 = vst [vmem:[#allocation2 + $0x1a0] sm:$0xff] %v213_v48 }
  0x47   : > { %267 = vst [vmem:[#allocation2 + $0x1a8] sm:$0xff] %v214_v49 }
  0x48   : > { %268 = vst [vmem:[#allocation2 + $0x1b0] sm:$0xff] %v215_v50 }
  0x49   : > { %269 = vst [vmem:[#allocation2 + $0x1b8] sm:$0xff] %v216_v51 }
  0x4a   : > { %270 = vst [vmem:[#allocation2 + $0x1c0] sm:$0xff] %v217_v52 }
  0x4b   : > { %271 = vst [vmem:[#allocation2 + $0x1c8] sm:$0xff] %v218_v53 }
  0x4c PF: > { %p8000_p5 = scmp.ne.s32.totalorder %s8613_s13, 1 }
  0x4e   : > { %275 = sbr.rel (%p8000_p5) target bundleno = 137 (0x89), region = 40 }
  0x53   : > { %v276_v54 = vld [vmem:[%s13141_s0 + $0x168] sm:$0xff]  ;;  %v277_v55 = vld [vmem:[%s13141_s0 + $0x170] sm:$0xff]  ;;  %v278_v56 = vld [vmem:[%s13141_s0 + $0x178] sm:$0xff] }
  0x54   : > { %329 = vst [vmem:[#allocation2 + $0x8] sm:$0xff] %v276_v54  ;;  %v279_v57 = vld [vmem:[%s13141_s0 + $0x180] sm:$0xff]  ;;  %v280_v58 = vld [vmem:[%s13141_s0 + $0x188] sm:$0xff]  ;;  %v281_v59 = vld [vmem:[%s13141_s0 + $0x190] sm:$0xff] }
  0x55   : > { %330 = vst [vmem:[#allocation2 + $0x10] sm:$0xff] %v277_v55  ;;  %v282_v60 = vld [vmem:[%s13141_s0 + $0x198] sm:$0xff]  ;;  %v283_v61 = vld [vmem:[%s13141_s0 + $0x1a0] sm:$0xff]  ;;  %v284_v62 = vld [vmem:[%s13141_s0 + $0x1a8] sm:$0xff] }
  0x56   : > { %331 = vst [vmem:[#allocation2 + $0x18] sm:$0xff] %v278_v56  ;;  %v285_v63 = vld [vmem:[%s13141_s0 + $0x1b0] sm:$0xff]  ;;  %v286_v0 = vld [vmem:[%s13141_s0 + $0x1b8] sm:$0xff]  ;;  %v287_v1 = vld [vmem:[%s13141_s0 + $0x1c0] sm:$0xff] }
  0x57   : > { %332 = vst [vmem:[#allocation2 + $0x20] sm:$0xff] %v279_v57  ;;  %v288_v2 = vld [vmem:[%s13141_s0 + $0x1c8] sm:$0xff]  ;;  %v289_v3 = vld [vmem:[%s13141_s0 + $0x1d0] sm:$0xff]  ;;  %v290_v4 = vld [vmem:[%s13141_s0 + $0x1d8] sm:$0xff] }
  0x58   : > { %333 = vst [vmem:[#allocation2 + $0x28] sm:$0xff] %v280_v58  ;;  %v291_v5 = vld [vmem:[%s13141_s0 + $0x1e0] sm:$0xff]  ;;  %v292_v6 = vld [vmem:[%s13141_s0 + $0x1e8] sm:$0xff]  ;;  %v293_v7 = vld [vmem:[%s13141_s0 + $0x1f0] sm:$0xff] }
  0x59   : > { %334 = vst [vmem:[#allocation2 + $0x30] sm:$0xff] %v281_v59  ;;  %v294_v8 = vld [vmem:[%s13141_s0 + $0x1f8] sm:$0xff]  ;;  %v295_v9 = vld [vmem:[%s13141_s0 + $0x200] sm:$0xff]  ;;  %v296_v10 = vld [vmem:[%s13141_s0 + $0x208] sm:$0xff] }
  0x5a   : > { %335 = vst [vmem:[#allocation2 + $0x38] sm:$0xff] %v282_v60  ;;  %v297_v11 = vld [vmem:[%s13141_s0 + $0x210] sm:$0xff]  ;;  %v298_v12 = vld [vmem:[%s13141_s0 + $0x218] sm:$0xff]  ;;  %v299_v13 = vld [vmem:[%s13141_s0 + $0x220] sm:$0xff] }
  0x5b   : > { %336 = vst [vmem:[#allocation2 + $0x40] sm:$0xff] %v283_v61  ;;  %v300_v14 = vld [vmem:[%s13141_s0 + $0x228] sm:$0xff]  ;;  %v301_v15 = vld [vmem:[%s13141_s0 + $0x230] sm:$0xff]  ;;  %v302_v16 = vld [vmem:[%s13141_s0 + $0x238] sm:$0xff] }
  0x5c   : > { %337 = vst [vmem:[#allocation2 + $0x48] sm:$0xff] %v284_v62  ;;  %v303_v17 = vld [vmem:[%s13141_s0 + $0x240] sm:$0xff]  ;;  %v304_v18 = vld [vmem:[%s13141_s0 + $0x248] sm:$0xff]  ;;  %v305_v19 = vld [vmem:[%s13141_s0 + $0x250] sm:$0xff] }
  0x5d   : > { %338 = vst [vmem:[#allocation2 + $0x50] sm:$0xff] %v285_v63  ;;  %v306_v20 = vld [vmem:[%s13141_s0 + $0x258] sm:$0xff]  ;;  %v307_v21 = vld [vmem:[%s13141_s0 + $0x260] sm:$0xff]  ;;  %v308_v22 = vld [vmem:[%s13141_s0 + $0x268] sm:$0xff] }
  0x5e   : > { %339 = vst [vmem:[#allocation2 + $0x58] sm:$0xff] %v286_v0  ;;  %v309_v23 = vld [vmem:[%s13141_s0 + $0x270] sm:$0xff]  ;;  %v310_v24 = vld [vmem:[%s13141_s0 + $0x278] sm:$0xff]  ;;  %v311_v25 = vld [vmem:[%s13141_s0 + $0x280] sm:$0xff] }
  0x5f   : > { %340 = vst [vmem:[#allocation2 + $0x60] sm:$0xff] %v287_v1  ;;  %v312_v26 = vld [vmem:[%s13141_s0 + $0x288] sm:$0xff]  ;;  %v313_v27 = vld [vmem:[%s13141_s0 + $0x290] sm:$0xff]  ;;  %v314_v28 = vld [vmem:[%s13141_s0 + $0x298] sm:$0xff] }
  0x60   : > { %341 = vst [vmem:[#allocation2 + $0x68] sm:$0xff] %v288_v2  ;;  %v315_v29 = vld [vmem:[%s13141_s0 + $0x2a0] sm:$0xff]  ;;  %v316_v30 = vld [vmem:[%s13141_s0 + $0x2a8] sm:$0xff]  ;;  %v317_v31 = vld [vmem:[%s13141_s0 + $0x2b0] sm:$0xff] }
  0x61   : > { %342 = vst [vmem:[#allocation2 + $0x70] sm:$0xff] %v289_v3  ;;  %v318_v32 = vld [vmem:[%s13141_s0 + $0x2b8] sm:$0xff]  ;;  %v319_v33 = vld [vmem:[%s13141_s0 + $0x2c0] sm:$0xff]  ;;  %v320_v34 = vld [vmem:[%s13141_s0 + $0x2c8] sm:$0xff] }
  0x62   : > { %343 = vst [vmem:[#allocation2 + $0x78] sm:$0xff] %v290_v4  ;;  %v321_v35 = vld [vmem:[%s13141_s0 + $0x2d0] sm:$0xff]  ;;  %v322_v36 = vld [vmem:[%s13141_s0 + $0x2d8] sm:$0xff]  ;;  %v323_v37 = vld [vmem:[%s13141_s0 + $0x2e0] sm:$0xff] }
  0x63   : > { %344 = vst [vmem:[#allocation2 + $0x80] sm:$0xff] %v291_v5  ;;  %v324_v38 = vld [vmem:[%s13141_s0 + $0x2e8] sm:$0xff]  ;;  %v325_v39 = vld [vmem:[%s13141_s0 + $0x2f0] sm:$0xff]  ;;  %v326_v40 = vld [vmem:[%s13141_s0 + $0x2f8] sm:$0xff] }
  0x64   : > { %345 = vst [vmem:[#allocation2 + $0x88] sm:$0xff] %v292_v6  ;;  %v327_v41 = vld [vmem:[%s13141_s0 + $0x300] sm:$0xff]  ;;  %v328_v42 = vld [vmem:[%s13141_s0 + $0x308] sm:$0xff] }
  0x65   : > { %346 = vst [vmem:[#allocation2 + $0x90] sm:$0xff] %v293_v7 }
  0x66   : > { %347 = vst [vmem:[#allocation2 + $0x98] sm:$0xff] %v294_v8 }
  0x67   : > { %348 = vst [vmem:[#allocation2 + $0xa0] sm:$0xff] %v295_v9 }
  0x68   : > { %349 = vst [vmem:[#allocation2 + $0xa8] sm:$0xff] %v296_v10 }
  0x69   : > { %350 = vst [vmem:[#allocation2 + $0xb0] sm:$0xff] %v297_v11 }
  0x6a   : > { %351 = vst [vmem:[#allocation2 + $0xb8] sm:$0xff] %v298_v12 }
  0x6b   : > { %352 = vst [vmem:[#allocation2 + $0xc0] sm:$0xff] %v299_v13 }
  0x6c   : > { %353 = vst [vmem:[#allocation2 + $0xc8] sm:$0xff] %v300_v14 }
  0x6d   : > { %354 = vst [vmem:[#allocation2 + $0xd0] sm:$0xff] %v301_v15 }
  0x6e   : > { %355 = vst [vmem:[#allocation2 + $0xd8] sm:$0xff] %v302_v16 }
  0x6f   : > { %356 = vst [vmem:[#allocation2 + $0xe0] sm:$0xff] %v303_v17 }
  0x70   : > { %357 = vst [vmem:[#allocation2 + $0xe8] sm:$0xff] %v304_v18 }
  0x71   : > { %358 = vst [vmem:[#allocation2 + $0xf0] sm:$0xff] %v305_v19 }
  0x72   : > { %359 = vst [vmem:[#allocation2 + $0xf8] sm:$0xff] %v306_v20 }
  0x73   : > { %360 = vst [vmem:[#allocation2 + $0x100] sm:$0xff] %v307_v21 }
  0x74   : > { %361 = vst [vmem:[#allocation2 + $0x108] sm:$0xff] %v308_v22 }
  0x75   : > { %362 = vst [vmem:[#allocation2 + $0x110] sm:$0xff] %v309_v23 }
  0x76   : > { %363 = vst [vmem:[#allocation2 + $0x118] sm:$0xff] %v310_v24 }
  0x77   : > { %364 = vst [vmem:[#allocation2 + $0x120] sm:$0xff] %v311_v25 }
  0x78   : > { %365 = vst [vmem:[#allocation2 + $0x128] sm:$0xff] %v312_v26 }
  0x79   : > { %366 = vst [vmem:[#allocation2 + $0x130] sm:$0xff] %v313_v27 }
  0x7a   : > { %367 = vst [vmem:[#allocation2 + $0x138] sm:$0xff] %v314_v28 }
  0x7b   : > { %368 = vst [vmem:[#allocation2 + $0x140] sm:$0xff] %v315_v29 }
  0x7c   : > { %369 = vst [vmem:[#allocation2 + $0x148] sm:$0xff] %v316_v30 }
  0x7d   : > { %370 = vst [vmem:[#allocation2 + $0x150] sm:$0xff] %v317_v31 }
  0x7e   : > { %371 = vst [vmem:[#allocation2 + $0x158] sm:$0xff] %v318_v32 }
  0x7f   : > { %372 = vst [vmem:[#allocation2 + $0x160] sm:$0xff] %v319_v33 }
  0x80   : > { %373 = vst [vmem:[#allocation2 + $0x168] sm:$0xff] %v320_v34 }
  0x81   : > { %374 = vst [vmem:[#allocation2 + $0x170] sm:$0xff] %v321_v35 }
  0x82   : > { %375 = vst [vmem:[#allocation2 + $0x178] sm:$0xff] %v322_v36 }
  0x83   : > { %376 = vst [vmem:[#allocation2 + $0x180] sm:$0xff] %v323_v37 }
  0x84   : > { %377 = vst [vmem:[#allocation2 + $0x188] sm:$0xff] %v324_v38 }
  0x85   : > { %378 = vst [vmem:[#allocation2 + $0x190] sm:$0xff] %v325_v39 }
  0x86   : > { %379 = vst [vmem:[#allocation2 + $0x198] sm:$0xff] %v326_v40 }
  0x87   : > { %380 = vst [vmem:[#allocation2 + $0x1a0] sm:$0xff] %v327_v41 }
  0x88   : > { %381 = vst [vmem:[#allocation2 + $0x1a8] sm:$0xff] %v328_v42 }
  0x89 PF: > { %v2978_v43 = vld [vmem:[%s13142_s1 + $0xf8] sm:$0xff]  ;;  %v2977_v45 = vld [vmem:[%s13142_s1 + $0xf0] sm:$0xff]  ;;  %v382_v46 = vlaneseq  ;;  %v2976_v49 = vld [vmem:[%s13142_s1 + $0xe8] sm:$0xff]  ;;  %v13149_v28 = vmov 0   ;;  %s8586_s4 = smov 64  }
  0x8a   : > { %v2994_v44 = vld [vmem:[%s13142_s1 + $0x178] sm:$0xff]  ;;  %3183 = vmatpush.msra.mxu1 %v2978_v43  ;;  %v2993_v47 = vld [vmem:[%s13142_s1 + $0x170] sm:$0xff]  ;;  %v2992_v50 = vld [vmem:[%s13142_s1 + $0x168] sm:$0xff] }
  0x8b   : > { %3371 = vmatpush.msra.mxu2 %v2994_v44  ;;  %v2962_v48 = vld [vmem:[%s13142_s1 + $0x78] sm:$0xff]  ;;  %v2961_v51 = vld [vmem:[%s13142_s1 + $0x70] sm:$0xff]  ;;  %v8967_v52 = vshrl.u32 %v382_v46, 7  ;;  %v2960_v53 = vld [vmem:[%s13142_s1 + $0x68] sm:$0xff] }
  0x8c   : > { %2995 = vmatpush.msra.mxu0 %v2962_v48  ;;  %3184 = vmatpush.msra.mxu1 %v2977_v45  ;;  %v2975_v54 = vld [vmem:[%s13142_s1 + $0xe0] sm:$0xff]  ;;  %v2974_v59 = vld [vmem:[%s13142_s1 + $0xd8] sm:$0xff]  ;;  %v2973_v2 = vld [vmem:[%s13142_s1 + $0xd0] sm:$0xff] }
  0x8d   : > { %3372 = vmatpush.msra.mxu2 %v2993_v47  ;;  %v2991_v55 = vld [vmem:[%s13142_s1 + $0x160] sm:$0xff]  ;;  %v8979_v56 = vadd.s32 24, %v8967_v52  ;;  %v8982_v57 = vadd.s32 8, %v8967_v52  ;;  %v2990_v60 = vld [vmem:[%s13142_s1 + $0x158] sm:$0xff]  ;;  %v9002_v1 = vadd.s32 16, %v8967_v52  ;;  %v2989_v3 = vld [vmem:[%s13142_s1 + $0x150] sm:$0xff] }
  0x8e   : > { %2996 = vmatpush.msra.mxu0 %v2961_v51  ;;  %3185 = vmatpush.msra.mxu1 %v2976_v49  ;;  %v2959_v58 = vld [vmem:[%s13142_s1 + $0x60] sm:$0xff]  ;;  %v2958_v0 = vld [vmem:[%s13142_s1 + $0x58] sm:$0xff]  ;;  %v2957_v7 = vld [vmem:[%s13142_s1 + $0x50] sm:$0xff]  ;;  %v9028_v15 = vadd.s32 32, %v8967_v52 }
  0x8f   : > { %3373 = vmatpush.msra.mxu2 %v2992_v50  ;;  %v499_v61 = vand.u32 65535, %v8979_v56  ;;  %v500_v62 = vshrl.u32 %v8979_v56, 16  ;;  %v8996_v63 = vadd.s32 24, %v8982_v57  ;;  %v2972_v10 = vld [vmem:[%s13142_s1 + $0xc8] sm:$0xff]  ;;  %v9036_v19 = vadd.s32 24, %v9002_v1  ;;  %v2971_v21 = vld [vmem:[%s13142_s1 + $0xc0] sm:$0xff] }
  0x90   : > { %2997 = vmatpush.msra.mxu0 %v2960_v53  ;;  %3186 = vmatpush.msra.mxu1 %v2975_v54  ;;  %v2988_v11 = vld [vmem:[%s13142_s1 + $0x148] sm:$0xff]  ;;  %v9039_v20 = vadd.s32 24, %v8979_v56  ;;  %v2987_v22 = vld [vmem:[%s13142_s1 + $0x140] sm:$0xff]  ;;  %v2970_v32 = vld [vmem:[%s13142_s1 + $0xb8] sm:$0xff] }
  0x91   : > { %3374 = vmatpush.msra.mxu2 %v2991_v55  ;;  %v502_v4 = vmul.u32 9362, %v499_v61  ;;  %v9010_v5 = vmul.u32 37449, %v499_v61  ;;  %v9012_v6 = vmul.u32 9362, %v500_v62  ;;  %v531_v8 = vand.u32 65535, %v8996_v63  ;;  %v2956_v16 = vld [vmem:[%s13142_s1 + $0x48] sm:$0xff]  ;;  %v2955_v26 = vld [vmem:[%s13142_s1 + $0x40] sm:$0xff] }
  0x92   : > { %2998 = vmatpush.msra.mxu0 %v2959_v58  ;;  %3187 = vmatpush.msra.mxu1 %v2974_v59  ;;  %v532_v9 = vshrl.u32 %v8996_v63, 16  ;;  %v505_v12 = vmul.u32 37449, %v500_v62  ;;  %v2986_v33 = vld [vmem:[%s13142_s1 + $0x138] sm:$0xff]  ;;  %v2969_v41 = vld [vmem:[%s13142_s1 + $0xb0] sm:$0xff]  ;;  %v2968_v50 = vld [vmem:[%s13142_s1 + $0xa8] sm:$0xff]  ;;  %v563_v55 = vand.u32 65535, %v9036_v19 }
  0x93   : > { %3375 = vmatpush.msra.mxu2 %v2990_v60  ;;  %v506_v13 = vshll.u32 %v9010_v5, 16  ;;  %v508_v14 = vshll.u32 %v9012_v6, 16  ;;  %v534_v17 = vmul.u32 9362, %v531_v8  ;;  %v9033_v18 = vmul.u32 37449, %v531_v8  ;;  %v2954_v37 = vld [vmem:[%s13142_s1 + $0x38] sm:$0xff]  ;;  %v2985_v42 = vld [vmem:[%s13142_s1 + $0x130] sm:$0xff] }
  0x94   : > { %2999 = vmatpush.msra.mxu0 %v2958_v0  ;;  %3188 = vmatpush.msra.mxu1 %v2973_v2  ;;  %v507_v23 = vshrl.u32 %v9010_v5, 16  ;;  %v9048_v25 = vmul.u32 9362, %v532_v9  ;;  %v509_v27 = vshrl.u32 %v9012_v6, 16  ;;  %v537_v30 = vmul.u32 37449, %v532_v9  ;;  %v2953_v46 = vld [vmem:[%s13142_s1 + $0x30] sm:$0xff]  ;;  %v2984_v51 = vld [vmem:[%s13142_s1 + $0x128] sm:$0xff] }
  0x95   : > { %3376 = vmatpush.msra.mxu2 %v2989_v3  ;;  %vm510_vm0 = vc.u32 %v502_v4, %v506_v13  ;;  %v512_v24 = vadd.s32 %v506_v13, %v502_v4  ;;  %v538_v31 = vshll.u32 %v9033_v18, 16  ;;  %v539_v39 = vshrl.u32 %v9033_v18, 16  ;;  %v2952_v59 = vld [vmem:[%s13142_s1 + $0x28] sm:$0xff]  ;;  %v2967_v0 = vld [vmem:[%s13142_s1 + $0xa0] sm:$0xff]  ;;  %v2982_v13 = vld [vmem:[%s13142_s1 + $0x118] sm:$0xff] }
  0x96   : > { %3000 = vmatpush.msra.mxu0 %v2957_v7  ;;  %3189 = vmatpush.msra.mxu1 %v2972_v10  ;;  %v511_v29 = vsel %vm510_vm0, 1, %v13149_v28  ;;  %v540_v36 = vshll.u32 %v9048_v25, 16  ;;  %v541_v44 = vshrl.u32 %v9048_v25, 16  ;;  %v564_v58 = vshrl.u32 %v9036_v19, 16  ;;  %v2983_v2 = vld [vmem:[%s13142_s1 + $0x120] sm:$0xff] }
  0x97   : > { %3377 = vmatpush.msra.mxu2 %v2988_v11  ;;  %v513_v34 = vadd.s32 %v511_v29, %v505_v12  ;;  %vm514_vm1 = vc.u32 %v512_v24, %v508_v14  ;;  %v516_v35 = vadd.s32 %v512_v24, %v508_v14  ;;  %vm542_vm2 = vc.u32 %v534_v17, %v538_v31  ;;  %v2951_v7 = vld [vmem:[%s13142_s1 + $0x20] sm:$0xff]  ;;  %v2966_v12 = vld [vmem:[%s13142_s1 + $0x98] sm:$0xff] }
  0x98   : > { %3001 = vmatpush.msra.mxu0 %v2956_v16  ;;  %3190 = vmatpush.msra.mxu1 %v2971_v21  ;;  %v515_v38 = vsel %vm514_vm1, 1, %v13149_v28  ;;  %v544_v40 = vadd.s32 %v538_v31, %v534_v17  ;;  %v543_v45 = vsel %vm542_vm2, 1, %v13149_v28  ;;  %v595_v61 = vand.u32 65535, %v9039_v20  ;;  %v2950_v21 = vld [vmem:[%s13142_s1 + $0x18] sm:$0xff] }
  0x99   : > { %3378 = vmatpush.msra.mxu2 %v2987_v22  ;;  %v517_v43 = vadd.s32 %v515_v38, %v513_v34  ;;  %vm520_vm3 = vc.u32 %v516_v35, 2454267026  ;;  %v545_v48 = vadd.s32 %v543_v45, %v537_v30  ;;  %v596_v62 = vshrl.u32 %v9039_v20, 16  ;;  %v2980_v38 = vld [vmem:[%s13142_s1 + $0x108] sm:$0xff] }
  0x9a   : > { %3002 = vmatpush.msra.mxu0 %v2955_v26  ;;  %3191 = vmatpush.msra.mxu1 %v2970_v32  ;;  %v521_v47 = vsel %vm520_vm3, 1, %v13149_v28  ;;  %vm546_vm4 = vc.u32 %v544_v40, %v540_v36  ;;  %v548_v49 = vadd.s32 %v544_v40, %v540_v36  ;;  %v566_v4 = vmul.u32 9362, %v563_v55  ;;  %v2965_v26 = vld [vmem:[%s13142_s1 + $0x90] sm:$0xff] }
  0x9b   : > { %3379 = vmatpush.msra.mxu2 %v2986_v33  ;;  %v518_v53 = vadd.s32 %v517_v43, %v507_v23  ;;  %v547_v54 = vsel %vm546_vm4, 1, %v13149_v28  ;;  %v9100_v5 = vmul.u32 37449, %v563_v55  ;;  %v9103_v6 = vadd.s32 24, %v9028_v15  ;;  %v2949_v32 = vld [vmem:[%s13142_s1 + $0x10] sm:$0xff] }
  0x9c   : > { %3003 = vmatpush.msra.mxu0 %v2954_v37  ;;  %3192 = vmatpush.msra.mxu1 %v2969_v41  ;;  %v549_v60 = vadd.s32 %v547_v54, %v545_v48  ;;  %vm552_vm5 = vc.u32 %v548_v49, 2454267026  ;;  %v9109_v10 = vmul.u32 9362, %v564_v58  ;;  %v569_v11 = vmul.u32 37449, %v564_v58  ;;  %v2964_v37 = vld [vmem:[%s13142_s1 + $0x88] sm:$0xff]  ;;  %v2979_v48 = vld [vmem:[%s13142_s1 + $0x100] sm:$0xff] }
  0x9d   : > { %3380 = vmatpush.msra.mxu2 %v2985_v42  ;;  %v519_v3 = vadd.s32 %v518_v53, %v509_v27  ;;  %v553_v9 = vsel %vm552_vm5, 1, %v13149_v28  ;;  %v570_v16 = vshll.u32 %v9100_v5, 16  ;;  %v598_v17 = vmul.u32 9362, %v595_v61  ;;  %v2981_v27 = vld [vmem:[%s13142_s1 + $0x110] sm:$0xff]  ;;  %v2948_v42 = vld [vmem:[%s13142_s1 + $0x8] sm:$0xff] }
  0x9e   : > { %3004 = vmatpush.msra.mxu0 %v2953_v46  ;;  %3193 = vmatpush.msra.mxu1 %v2968_v50  ;;  %v550_v8 = vadd.s32 %v549_v60, %v539_v39  ;;  %v9118_v18 = vmul.u32 37449, %v595_v61  ;;  %v571_v23 = vshrl.u32 %v9100_v5, 16  ;;  %v572_v24 = vshll.u32 %v9109_v10, 16  ;;  %v2719_v53 = vld [vmem:[#allocation2 + $0x9] sm:$0xff] }
  0x9f   : > { %3381 = vmatpush.msra.mxu2 %v2984_v51  ;;  %v522_v14 = vadd.s32 %v521_v47, %v519_v3  ;;  %v9125_v25 = vmul.u32 9362, %v596_v62  ;;  %v573_v30 = vshrl.u32 %v9109_v10, 16  ;;  %vm574_vm6 = vc.u32 %v566_v4, %v570_v16  ;;  %v2963_v47 = vld [vmem:[%s13142_s1 + $0x80] sm:$0xff]  ;;  %v2605_v51 = vld [vmem:[#allocation2 + $0x8] sm:$0xff] }
  0xa0   : > { %3005 = vmatpush.msra.mxu0 %v2952_v59  ;;  %3194 = vmatpush.msra.mxu1 %v2967_v0  ;;  %v551_v22 = vadd.s32 %v550_v8, %v541_v44  ;;  %v576_v31 = vadd.s32 %v570_v16, %v566_v4  ;;  %v575_v34 = vsel %vm574_vm6, 1, %v13149_v28  ;;  %v601_v35 = vmul.u32 37449, %v596_v62  ;;  %v2377_v62 = vld [vmem:[#allocation2 + $0x7] sm:$0xff] }
  0xa1   : > { %3382 = vmatpush.msra.mxu2 %v2983_v2  ;;  %v523_v29 = vshrl.u32 %v522_v14, 4  ;;  %v602_v36 = vshll.u32 %v9118_v18, 16  ;;  %v577_v40 = vadd.s32 %v575_v34, %v569_v11  ;;  %v603_v45 = vshrl.u32 %v9118_v18, 16 }
  0xa2   : > { %3006 = vmatpush.msra.mxu0 %v2951_v7  ;;  %3195 = vmatpush.msra.mxu1 %v2966_v12  ;;  %v554_v33 = vadd.s32 %v553_v9, %v551_v22  ;;  %vm578_vm7 = vc.u32 %v576_v31, %v572_v24  ;;  %v580_v41 = vadd.s32 %v576_v31, %v572_v24  ;;  %v604_v46 = vshll.u32 %v9125_v25, 16  ;;  %v2720_v24 = vld [vmem:[#allocation2 + $0x11] sm:$0xff] }
  0xa3   : > { %3383 = vmatpush.msra.mxu2 %v2982_v13  ;;  %v524_v39 = vmul.u32 28, %v523_v29  ;;  %v579_v44 = vsel %vm578_vm7, 1, %v13149_v28  ;;  %vm606_vm9 = vc.u32 %v598_v17, %v602_v36  ;;  %v608_v59 = vadd.s32 %v602_v36, %v598_v17 }
  0xa4   : > { %3007 = vmatpush.msra.mxu0 %v2950_v21  ;;  %3196 = vmatpush.msra.mxu1 %v2965_v26  ;;  %v555_v43 = vshrl.u32 %v554_v33, 4  ;;  %v581_v50 = vadd.s32 %v579_v44, %v577_v40  ;;  %vm584_vm8 = vc.u32 %v580_v41, 2454267026  ;;  %v607_v58 = vsel %vm606_vm9, 1, %v13149_v28  ;;  %v2378_v33 = vld [vmem:[#allocation2 + $0xf] sm:$0xff] }
  0xa5   : > { %3384 = vmatpush.msra.mxu2 %v2981_v27  ;;  %v9158_v49 = vsub.s32 %v8979_v56, %v524_v39  ;;  %v585_v55 = vsel %vm584_vm8, 1, %v13149_v28  ;;  %v2947_v56 = vld [vmem:[%s13142_s1] sm:$0xff]  ;;  %v609_v61 = vadd.s32 %v607_v58, %v601_v35  ;;  %vm610_vm12 = vc.u32 %v608_v59, %v604_v46 }
  0xa6   : > { %3008 = vmatpush.msra.mxu0 %v2949_v32  ;;  %3197 = vmatpush.msra.mxu1 %v2964_v37  ;;  %v556_v54 = vmul.u32 28, %v555_v43  ;;  %v582_v60 = vadd.s32 %v581_v50, %v571_v23  ;;  %v612_v2 = vadd.s32 %v608_v59, %v604_v46  ;;  %v627_v3 = vand.u32 65535, %v9103_v6  ;;  %v2606_v23 = vld [vmem:[#allocation2 + $0x10] sm:$0xff] }
  0xa7   : > { %13362 = vst [vmem:[#allocation4_spill] sm:$0xff] %v9158_v49  ;;  %3385 = vmatpush.msra.mxu2 %v2980_v38  ;;  %vm13246_vm10 = vcmp.ne.s32.totalorder %v9158_v49, 27  ;;  %vm2320_vm11 = vcmp.ne.s32.totalorder %v9158_v49, 0  ;;  %v611_v5 = vsel %vm610_vm12, 1, %v13149_v28  ;;  %v628_v7 = vshrl.u32 %v9103_v6, 16 }
  0xa8   : > { %3009 = vmatpush.msra.mxu0 %v2948_v42  ;;  %3198 = vmatpush.msra.mxu1 %v2963_v47  ;;  %v557_v0 = vsub.s32 %v8996_v63, %v556_v54  ;;  %v583_v4 = vadd.s32 %v582_v60, %v573_v30  ;;  %v9174_v8 = vadd.s32 40, %v8967_v52  ;;  %v605_v9 = vshrl.u32 %v9125_v25, 16  ;;  %v2721_v54 = vld [vmem:[#allocation2 + $0x19] sm:$0xff] }
  0xa9   : > { %3386 = vmatpush.msra.mxu2 %v2979_v48  ;;  %3199 = vmatmul.f32.vlgmr.msra.gmra.mxu1 %v2605_v51  ;;  %v613_v63 = vadd.s32 %v611_v5, %v609_v61  ;;  %vm616_vm13 = vc.u32 %v612_v2, 2454267026  ;;  %v630_v11 = vmul.u32 9362, %v627_v3  ;;  %v631_v12 = vmul.u32 37449, %v627_v3  ;;  %v2379_v2 = vld [vmem:[#allocation2 + $0x17] sm:$0xff] }
  0xaa   : > { %8058 = vmatmul.msk.f32.vlgmr.msra.gmra.mxu2 %vm13246_vm10, %v2719_v53  ;;  %3010 = vmatpush.msra.mxu0 %v2947_v56  ;;  %vm2663_vm14 = vcmp.ne.s32.totalorder %v557_v0, 27  ;;  %v586_v10 = vadd.s32 %v585_v55, %v583_v4  ;;  %vm2321_vm15 = vcmp.ne.s32.totalorder %v557_v0, 0  ;;  %v632_v14 = vmul.u32 9362, %v628_v7  ;;  %v2607_v53 = vld [vmem:[#allocation2 + $0x18] sm:$0xff] }
  0xab   : > { %8001 = vmatmul.msk.f32.vlgmr.msra.gmra.mxu0 %vm2320_vm11, %v2377_v62  ;;  %v614_v13 = vadd.s32 %v613_v63, %v603_v45  ;;  %v9180_v16 = vadd.s32 24, %v9174_v8  ;;  %v617_v18 = vsel %vm616_vm13, 1, %v13149_v28  ;;  %v633_v21 = vmul.u32 37449, %v628_v7 }
  0xac   : > { %v587_v17 = vshrl.u32 %v586_v10, 4  ;;  %v634_v22 = vshll.u32 %v631_v12, 16  ;;  %v635_v26 = vshrl.u32 %v631_v12, 16  ;;  %v636_v27 = vshll.u32 %v632_v14, 16 }
  0xad   : > { %v615_v25 = vadd.s32 %v614_v13, %v605_v9  ;;  %v659_v29 = vand.u32 65535, %v9180_v16  ;;  %v660_v32 = vshrl.u32 %v9180_v16, 16  ;;  %v9190_v44 = vadd.s32 48, %v8967_v52 }
  0xae   : > { %v588_v30 = vmul.u32 28, %v587_v17  ;;  %vm638_vm0 = vc.u32 %v630_v11, %v634_v22  ;;  %v640_v31 = vadd.s32 %v634_v22, %v630_v11  ;;  %v637_v45 = vshrl.u32 %v632_v14, 16 }
  0xaf   : > { %v618_v34 = vadd.s32 %v617_v18, %v615_v25  ;;  %v639_v35 = vsel %vm638_vm0, 1, %v13149_v28  ;;  %v662_v36 = vmul.u32 9362, %v659_v29  ;;  %v663_v37 = vmul.u32 37449, %v659_v29  ;;  %v2608_v29 = vld [vmem:[#allocation2 + $0x20] sm:$0xff] }
  0xb0   : > { %v589_v38 = vsub.s32 %v9036_v19, %v588_v30  ;;  %v641_v39 = vadd.s32 %v639_v35, %v633_v21  ;;  %vm642_vm1 = vc.u32 %v640_v31, %v636_v27  ;;  %v664_v40 = vmul.u32 9362, %v660_v32  ;;  %v2722_v30 = vld [vmem:[#allocation2 + $0x21] sm:$0xff] }
  0xb1   : > { %3202 = vmatmul.f32.gmra.mxu1 %v2606_v23  ;;  %v619_v41 = vshrl.u32 %v618_v34, 4  ;;  %v643_v42 = vsel %vm642_vm1, 1, %v13149_v28  ;;  %v644_v43 = vadd.s32 %v640_v31, %v636_v27  ;;  %v665_v47 = vmul.u32 37449, %v660_v32 }
  0xb2   : > { %8059 = vmatmul.msk.f32.gmra.mxu2 %vm2663_vm14, %v2720_v24  ;;  %v645_v46 = vadd.s32 %v643_v42, %v641_v39  ;;  %v666_v48 = vshll.u32 %v663_v37, 16  ;;  %v668_v51 = vshll.u32 %v664_v40, 16  ;;  %vm2664_vm3 = vcmp.ne.s32.totalorder %v589_v38, 27 }
  0xb3   : > { %8002 = vmatmul.msk.f32.gmra.mxu0 %vm2321_vm15, %v2378_v33  ;;  %v620_v50 = vmul.u32 28, %v619_v41  ;;  %vm648_vm2 = vc.u32 %v644_v43, 2454267026  ;;  %vm2322_vm4 = vcmp.ne.s32.totalorder %v589_v38, 0  ;;  %v9196_v56 = vadd.s32 24, %v9190_v44 }
  0xb4   : > { %v646_v19 = vadd.s32 %v645_v46, %v635_v26  ;;  %vm670_vm5 = vc.u32 %v662_v36, %v666_v48  ;;  %v649_v55 = vsel %vm648_vm2, 1, %v13149_v28  ;;  %v672_v59 = vadd.s32 %v666_v48, %v662_v36 }
  0xb5   : > { %v671_v58 = vsel %vm670_vm5, 1, %v13149_v28  ;;  %v621_v60 = vsub.s32 %v9039_v20, %v620_v50  ;;  %v9200_v0 = vadd.s32 56, %v8967_v52  ;;  %v667_v3 = vshrl.u32 %v663_v37, 16  ;;  %v2380_v37 = vld [vmem:[#allocation2 + $0x1f] sm:$0xff] }
  0xb6   : > { %v647_v61 = vadd.s32 %v646_v19, %v637_v45  ;;  %v673_v62 = vadd.s32 %v671_v58, %v665_v47  ;;  %v669_v4 = vshrl.u32 %v664_v40, 16  ;;  %vm674_vm6 = vc.u32 %v672_v59, %v668_v51 }
  0xb7   : > { %v676_v5 = vadd.s32 %v672_v59, %v668_v51  ;;  %v675_v9 = vsel %vm674_vm6, 1, %v13149_v28  ;;  %v691_v63 = vand.u32 65535, %v9196_v56  ;;  %v692_v20 = vshrl.u32 %v9196_v56, 16 }
  0xb8   : > { %v650_v7 = vadd.s32 %v649_v55, %v647_v61  ;;  %v677_v10 = vadd.s32 %v675_v9, %v673_v62  ;;  %v9207_v11 = vadd.s32 24, %v9200_v0  ;;  %v9210_v12 = vadd.s32 64, %v8967_v52  ;;  %v2609_v62 = vld [vmem:[#allocation2 + $0x28] sm:$0xff] }
  0xb9   : > { %3205 = vmatmul.f32.gmra.mxu1 %v2607_v53  ;;  %vm680_vm7 = vc.u32 %v676_v5, 2454267026  ;;  %vm2665_vm8 = vcmp.ne.s32.totalorder %v621_v60, 27  ;;  %v694_v14 = vmul.u32 9362, %v691_v63  ;;  %v695_v17 = vmul.u32 37449, %v691_v63  ;;  %v2381_v63 = vld [vmem:[#allocation2 + $0x27] sm:$0xff] }
  0xba   : > { %8060 = vmatmul.msk.f32.gmra.mxu2 %vm2664_vm3, %v2721_v54  ;;  %v651_v13 = vshrl.u32 %v650_v7, 4  ;;  %v678_v18 = vadd.s32 %v677_v10, %v667_v3  ;;  %v681_v21 = vsel %vm680_vm7, 1, %v13149_v28  ;;  %v696_v22 = vmul.u32 9362, %v692_v20 }
  0xbb   : > { %8003 = vmatmul.msk.f32.gmra.mxu0 %vm2322_vm4, %v2379_v2  ;;  %v723_v23 = vand.u32 65535, %v9207_v11  ;;  %v697_v25 = vmul.u32 37449, %v692_v20  ;;  %v698_v26 = vshll.u32 %v695_v17, 16  ;;  %v724_v27 = vshrl.u32 %v9207_v11, 16  ;;  %v2723_v2 = vld [vmem:[#allocation2 + $0x29] sm:$0xff] }
  0xbc   : > { %v652_v24 = vmul.u32 28, %v651_v13  ;;  %vm2323_vm9 = vcmp.ne.s32.totalorder %v621_v60, 0  ;;  %v679_v31 = vadd.s32 %v678_v18, %v669_v4  ;;  %v700_v32 = vshll.u32 %v696_v22, 16 }
  0xbd   : > { %v9217_v33 = vadd.s32 24, %v9210_v12  ;;  %vm702_vm12 = vc.u32 %v694_v14, %v698_v26  ;;  %v704_v35 = vadd.s32 %v698_v26, %v694_v14  ;;  %v727_v36 = vmul.u32 37449, %v723_v23 }
  0xbe   : > { %v653_v34 = vsub.s32 %v9103_v6, %v652_v24  ;;  %v682_v38 = vadd.s32 %v681_v21, %v679_v31  ;;  %v703_v39 = vsel %vm702_vm12, 1, %v13149_v28  ;;  %v726_v40 = vmul.u32 9362, %v723_v23 }
  0xbf   : > { %v728_v41 = vmul.u32 9362, %v724_v27  ;;  %v699_v42 = vshrl.u32 %v695_v17, 16  ;;  %v705_v43 = vadd.s32 %v703_v39, %v697_v25  ;;  %vm706_vm13 = vc.u32 %v704_v35, %v700_v32  ;;  %v2724_v39 = vld [vmem:[#allocation2 + $0x31] sm:$0xff] }
  0xc0   : > { %v729_v45 = vmul.u32 37449, %v724_v27  ;;  %v683_v46 = vshrl.u32 %v682_v38, 4  ;;  %v707_v47 = vsel %vm706_vm13, 1, %v13149_v28  ;;  %v708_v6 = vadd.s32 %v704_v35, %v700_v32  ;;  %v2610_v38 = vld [vmem:[#allocation2 + $0x30] sm:$0xff] }
  0xc1   : > { %3208 = vmatmul.f32.gmra.mxu1 %v2608_v29  ;;  %v730_v48 = vshll.u32 %v727_v36, 16  ;;  %vm2666_vm14 = vcmp.ne.s32.totalorder %v653_v34, 27  ;;  %v701_v50 = vshrl.u32 %v696_v22, 16  ;;  %v709_v51 = vadd.s32 %v707_v47, %v705_v43  ;;  %v2382_v47 = vld [vmem:[#allocation2 + $0x2f] sm:$0xff] }
  0xc2   : > { %8061 = vmatmul.msk.f32.gmra.mxu2 %vm2665_vm8, %v2722_v30  ;;  %v732_v19 = vshll.u32 %v728_v41, 16  ;;  %v684_v53 = vmul.u32 28, %v683_v46  ;;  %vm712_vm15 = vc.u32 %v708_v6, 2454267026  ;;  %v731_v58 = vshrl.u32 %v727_v36, 16 }
  0xc3   : > { %8004 = vmatmul.msk.f32.gmra.mxu0 %vm2323_vm9, %v2380_v37  ;;  %vm734_vm0 = vc.u32 %v726_v40, %v730_v48  ;;  %v736_v54 = vadd.s32 %v730_v48, %v726_v40  ;;  %v710_v55 = vadd.s32 %v709_v51, %v699_v42  ;;  %v755_v61 = vand.u32 65535, %v9217_v33 }
  0xc4   : > { %v735_v59 = vsel %vm734_vm0, 1, %v13149_v28  ;;  %v713_v3 = vsel %vm712_vm15, 1, %v13149_v28  ;;  %vm2324_vm2 = vcmp.ne.s32.totalorder %v653_v34, 0  ;;  %v756_v9 = vshrl.u32 %v9217_v33, 16 }
  0xc5   : > { %v737_v60 = vadd.s32 %v735_v59, %v729_v45  ;;  %vm738_vm1 = vc.u32 %v736_v54, %v732_v19  ;;  %v740_v4 = vadd.s32 %v736_v54, %v732_v19  ;;  %v711_v5 = vadd.s32 %v710_v55, %v701_v50 }
  0xc6   : > { %v739_v7 = vsel %vm738_vm1, 1, %v13149_v28  ;;  %v685_v20 = vsub.s32 %v9180_v16, %v684_v53  ;;  %v733_v10 = vshrl.u32 %v728_v41, 16  ;;  %v758_v17 = vmul.u32 9362, %v755_v61 }
  0xc7   : > { %v741_v13 = vadd.s32 %v739_v7, %v737_v60  ;;  %vm744_vm3 = vc.u32 %v740_v4, 2454267026  ;;  %v714_v14 = vadd.s32 %v713_v3, %v711_v5  ;;  %v759_v18 = vmul.u32 37449, %v755_v61 }
  0xc8   : > { %v760_v21 = vmul.u32 9362, %v756_v9  ;;  %v745_v23 = vsel %vm744_vm3, 1, %v13149_v28  ;;  %v9233_v24 = vadd.s32 72, %v8967_v52  ;;  %v9236_v25 = vadd.s32 80, %v8967_v52 }
  0xc9   : > { %3211 = vmatmul.f32.gmra.mxu1 %v2609_v62  ;;  %v742_v22 = vadd.s32 %v741_v13, %v731_v58  ;;  %v715_v16 = vshrl.u32 %v714_v14, 4  ;;  %v761_v26 = vmul.u32 37449, %v756_v9  ;;  %v762_v27 = vshll.u32 %v759_v18, 16  ;;  %v2611_v9 = vld [vmem:[#allocation2 + $0x38] sm:$0xff] }
  0xca   : > { %8062 = vmatmul.msk.f32.gmra.mxu2 %vm2666_vm14, %v2723_v2  ;;  %v764_v29 = vshll.u32 %v760_v21, 16  ;;  %vm2667_vm4 = vcmp.ne.s32.totalorder %v685_v20, 27  ;;  %v763_v31 = vshrl.u32 %v759_v18, 16  ;;  %v9240_v32 = vadd.s32 24, %v9233_v24 }
  0xcb   : > { %8005 = vmatmul.msk.f32.gmra.mxu0 %vm2324_vm2, %v2381_v63  ;;  %v743_v30 = vadd.s32 %v742_v22, %v733_v10  ;;  %v716_v35 = vmul.u32 28, %v715_v16  ;;  %vm766_vm5 = vc.u32 %v758_v17, %v762_v27  ;;  %v768_v36 = vadd.s32 %v762_v27, %v758_v17  ;;  %v2725_v63 = vld [vmem:[#allocation2 + $0x39] sm:$0xff] }
  0xcc   : > { %v9243_v37 = vadd.s32 24, %v9236_v25  ;;  %v767_v40 = vsel %vm766_vm5, 1, %v13149_v28  ;;  %v787_v41 = vand.u32 65535, %v9240_v32  ;;  %v788_v42 = vshrl.u32 %v9240_v32, 16  ;;  %v2383_v22 = vld [vmem:[#allocation2 + $0x37] sm:$0xff] }
  0xcd   : > { %v746_v34 = vadd.s32 %v745_v23, %v743_v30  ;;  %v717_v43 = vsub.s32 %v9196_v56, %v716_v35  ;;  %v769_v45 = vadd.s32 %v767_v40, %v761_v26  ;;  %vm770_vm6 = vc.u32 %v768_v36, %v764_v29 }
  0xce   : > { %v772_v46 = vadd.s32 %v768_v36, %v764_v29  ;;  %vm2325_vm7 = vcmp.ne.s32.totalorder %v685_v20, 0  ;;  %v771_v48 = vsel %vm770_vm6, 1, %v13149_v28  ;;  %v791_v50 = vmul.u32 37449, %v787_v41 }
  0xcf   : > { %v747_v6 = vshrl.u32 %v746_v34, 4  ;;  %v765_v51 = vshrl.u32 %v760_v21, 16  ;;  %v773_v19 = vadd.s32 %v771_v48, %v769_v45  ;;  %v790_v53 = vmul.u32 9362, %v787_v41  ;;  %v2726_v48 = vld [vmem:[#allocation2 + $0x41] sm:$0xff] }
  0xd0   : > { %vm776_vm8 = vc.u32 %v772_v46, 2454267026  ;;  %vm2668_vm9 = vcmp.ne.s32.totalorder %v717_v43, 27  ;;  %v792_v55 = vmul.u32 9362, %v788_v42  ;;  %v9252_v56 = vadd.s32 88, %v8967_v52 }
  0xd1   : > { %3214 = vmatmul.f32.gmra.mxu1 %v2610_v38  ;;  %v748_v54 = vmul.u32 28, %v747_v6  ;;  %v774_v58 = vadd.s32 %v773_v19, %v763_v31  ;;  %v793_v59 = vmul.u32 37449, %v788_v42  ;;  %v794_v61 = vshll.u32 %v791_v50, 16  ;;  %v2612_v6 = vld [vmem:[#allocation2 + $0x40] sm:$0xff] }
  0xd2   : > { %8063 = vmatmul.msk.f32.gmra.mxu2 %vm2667_vm4, %v2724_v39  ;;  %v819_v62 = vand.u32 65535, %v9243_v37  ;;  %vm2326_vm12 = vcmp.ne.s32.totalorder %v717_v43, 0  ;;  %v777_v2 = vsel %vm776_vm8, 1, %v13149_v28  ;;  %v796_v3 = vshll.u32 %v792_v55, 16 }
  0xd3   : > { %8006 = vmatmul.msk.f32.gmra.mxu0 %vm2325_vm7, %v2382_v47  ;;  %v820_v60 = vshrl.u32 %v9243_v37, 16  ;;  %v775_v4 = vadd.s32 %v774_v58, %v765_v51  ;;  %v795_v5 = vshrl.u32 %v791_v50, 16  ;;  %vm798_vm13 = vc.u32 %v790_v53, %v794_v61 }
  0xd4   : > { %v800_v7 = vadd.s32 %v794_v61, %v790_v53  ;;  %v749_v20 = vsub.s32 %v9207_v11, %v748_v54  ;;  %v799_v10 = vsel %vm798_vm13, 1, %v13149_v28  ;;  %v822_v13 = vmul.u32 9362, %v819_v62 }
  0xd5   : > { %v823_v14 = vmul.u32 37449, %v819_v62  ;;  %v778_v17 = vadd.s32 %v777_v2, %v775_v4  ;;  %v801_v18 = vadd.s32 %v799_v10, %v793_v59  ;;  %v824_v16 = vmul.u32 9362, %v820_v60 }
  0xd6   : > { %vm802_vm14 = vc.u32 %v800_v7, %v796_v3  ;;  %v804_v21 = vadd.s32 %v800_v7, %v796_v3  ;;  %v825_v26 = vmul.u32 37449, %v820_v60  ;;  %v797_v30 = vshrl.u32 %v792_v55, 16 }
  0xd7   : > { %v803_v23 = vsel %vm802_vm14, 1, %v13149_v28  ;;  %v826_v27 = vshll.u32 %v823_v14, 16  ;;  %v779_v29 = vshrl.u32 %v778_v17, 4  ;;  %vm2669_vm0 = vcmp.ne.s32.totalorder %v749_v20, 27 }
  0xd8   : > { %v805_v11 = vadd.s32 %v803_v23, %v801_v18  ;;  %vm808_vm15 = vc.u32 %v804_v21, 2454267026  ;;  %v827_v31 = vshrl.u32 %v823_v14, 16  ;;  %v828_v35 = vshll.u32 %v824_v16, 16 }
  0xd9   : > { %3217 = vmatmul.f32.gmra.mxu1 %v2611_v9  ;;  %vm830_vm1 = vc.u32 %v822_v13, %v826_v27  ;;  %v780_v36 = vmul.u32 28, %v779_v29  ;;  %v832_v34 = vadd.s32 %v826_v27, %v822_v13  ;;  %v809_v40 = vsel %vm808_vm15, 1, %v13149_v28 }
  0xda   : > { %8064 = vmatmul.msk.f32.gmra.mxu2 %vm2668_vm9, %v2725_v63  ;;  %v806_v38 = vadd.s32 %v805_v11, %v795_v5  ;;  %v831_v39 = vsel %vm830_vm1, 1, %v13149_v28  ;;  %v9265_v42 = vadd.s32 24, %v9252_v56  ;;  %v9268_v45 = vadd.s32 96, %v8967_v52 }
  0xdb   : > { %8007 = vmatmul.msk.f32.gmra.mxu0 %vm2326_vm12, %v2383_v22  ;;  %v833_v41 = vadd.s32 %v831_v39, %v825_v26  ;;  %v9271_v46 = vsub.s32 %v9217_v33, %v780_v36  ;;  %vm834_vm2 = vc.u32 %v832_v34, %v828_v35  ;;  %v836_v43 = vadd.s32 %v832_v34, %v828_v35  ;;  %v2384_v33 = vld [vmem:[#allocation2 + $0x3f] sm:$0xff]  ;;  %v2727_v26 = vld [vmem:[#allocation2 + $0x49] sm:$0xff] }
  0xdc   : > { %v807_v47 = vadd.s32 %v806_v38, %v797_v30  ;;  %vm2327_vm3 = vcmp.ne.s32.totalorder %v749_v20, 0  ;;  %v835_v50 = vsel %vm834_vm2, 1, %v13149_v28  ;;  %v851_v51 = vand.u32 65535, %v9265_v42  ;;  %v2385_v38 = vld [vmem:[#allocation2 + $0x47] sm:$0xff] }
  0xdd   : > { %v852_v19 = vshrl.u32 %v9265_v42, 16  ;;  %v829_v54 = vshrl.u32 %v824_v16, 16  ;;  %v837_v55 = vadd.s32 %v835_v50, %v833_v41  ;;  %v9277_v58 = vadd.s32 24, %v9268_v45  ;;  %v2613_v16 = vld [vmem:[#allocation2 + $0x48] sm:$0xff] }
  0xde   : > { %v810_v53 = vadd.s32 %v809_v40, %v807_v47  ;;  %vm840_vm4 = vc.u32 %v836_v43, 2454267026  ;;  %v854_v59 = vmul.u32 9362, %v851_v51  ;;  %v855_v61 = vmul.u32 37449, %v851_v51 }
  0xdf   : > { %v856_v62 = vmul.u32 9362, %v852_v19  ;;  %vm2670_vm5 = vcmp.ne.s32.totalorder %v9271_v46, 27  ;;  %v838_v3 = vadd.s32 %v837_v55, %v827_v31  ;;  %v9282_v60 = vadd.s32 104, %v8967_v52 }
  0xe0   : > { %v811_v2 = vshrl.u32 %v810_v53, 4  ;;  %v841_v4 = vsel %vm840_vm4, 1, %v13149_v28  ;;  %v857_v5 = vmul.u32 37449, %v852_v19  ;;  %v858_v7 = vshll.u32 %v855_v61, 16 }
  0xe1   : > { %3220 = vmatmul.f32.gmra.mxu1 %v2612_v6  ;;  %v860_v9 = vshll.u32 %v856_v62, 16  ;;  %vm2328_vm6 = vcmp.ne.s32.totalorder %v9271_v46, 0  ;;  %v839_v10 = vadd.s32 %v838_v3, %v829_v54  ;;  %v883_v13 = vand.u32 65535, %v9277_v58  ;;  %v2728_v3 = vld [vmem:[#allocation2 + $0x51] sm:$0xff] }
  0xe2   : > { %8065 = vmatmul.msk.f32.gmra.mxu2 %vm2669_vm0, %v2726_v48  ;;  %v812_v63 = vmul.u32 28, %v811_v2  ;;  %v859_v14 = vshrl.u32 %v855_v61, 16  ;;  %vm862_vm7 = vc.u32 %v854_v59, %v858_v7  ;;  %v864_v17 = vadd.s32 %v858_v7, %v854_v59  ;;  %v2614_v2 = vld [vmem:[#allocation2 + $0x50] sm:$0xff] }
  0xe3   : > { %8008 = vmatmul.msk.f32.gmra.mxu0 %vm2327_vm3, %v2384_v33  ;;  %v884_v18 = vshrl.u32 %v9277_v58, 16  ;;  %v842_v22 = vadd.s32 %v841_v4, %v839_v10  ;;  %v863_v23 = vsel %vm862_vm7, 1, %v13149_v28  ;;  %v9294_v20 = vadd.s32 24, %v9282_v60 }
  0xe4   : > { %v9290_v21 = vsub.s32 %v9240_v32, %v812_v63  ;;  %v865_v27 = vadd.s32 %v863_v23, %v857_v5  ;;  %vm866_vm8 = vc.u32 %v864_v17, %v860_v9  ;;  %v868_v29 = vadd.s32 %v864_v17, %v860_v9 }
  0xe5   : > { %v887_v30 = vmul.u32 37449, %v883_v13  ;;  %v843_v11 = vshrl.u32 %v842_v22, 4  ;;  %v861_v31 = vshrl.u32 %v856_v62, 16  ;;  %v867_v35 = vsel %vm866_vm8, 1, %v13149_v28 }
  0xe6   : > { %v886_v36 = vmul.u32 9362, %v883_v13  ;;  %v869_v32 = vadd.s32 %v867_v35, %v865_v27  ;;  %vm872_vm9 = vc.u32 %v868_v29, 2454267026  ;;  %v888_v39 = vmul.u32 9362, %v884_v18 }
  0xe7   : > { %v9298_v34 = vadd.s32 112, %v8967_v52  ;;  %vm2671_vm12 = vcmp.ne.s32.totalorder %v9290_v21, 27  ;;  %vm2329_vm13 = vcmp.ne.s32.totalorder %v9290_v21, 0  ;;  %v889_v40 = vmul.u32 37449, %v884_v18  ;;  %v2729_v21 = vld [vmem:[#allocation2 + $0x59] sm:$0xff] }
  0xe8   : > { %v890_v41 = vshll.u32 %v887_v30, 16  ;;  %v844_v47 = vmul.u32 28, %v843_v11  ;;  %v870_v43 = vadd.s32 %v869_v32, %v859_v14  ;;  %v892_v6 = vshll.u32 %v888_v39, 16  ;;  %v2386_v14 = vld [vmem:[#allocation2 + $0x4f] sm:$0xff] }
  0xe9   : > { %3223 = vmatmul.f32.gmra.mxu1 %v2613_v16  ;;  %v915_v48 = vand.u32 65535, %v9294_v20  ;;  %v873_v50 = vsel %vm872_vm9, 1, %v13149_v28  ;;  %v916_v19 = vshrl.u32 %v9294_v20, 16  ;;  %v891_v54 = vshrl.u32 %v887_v30, 16 }
  0xea   : > { %8066 = vmatmul.msk.f32.gmra.mxu2 %vm2670_vm5, %v2727_v26  ;;  %vm894_vm14 = vc.u32 %v886_v36, %v890_v41  ;;  %v896_v51 = vadd.s32 %v890_v41, %v886_v36  ;;  %v871_v53 = vadd.s32 %v870_v43, %v861_v31  ;;  %v893_v59 = vshrl.u32 %v888_v39, 16  ;;  %v2615_v43 = vld [vmem:[#allocation2 + $0x58] sm:$0xff] }
  0xeb   : > { %8009 = vmatmul.msk.f32.gmra.mxu0 %vm2328_vm6, %v2385_v38  ;;  %v895_v55 = vsel %vm894_vm14, 1, %v13149_v28  ;;  %v919_v33 = vmul.u32 37449, %v915_v48  ;;  %v918_v62 = vmul.u32 9362, %v915_v48  ;;  %v920_v7 = vmul.u32 9362, %v916_v19 }
  0xec   : > { %v897_v61 = vadd.s32 %v895_v55, %v889_v40  ;;  %vm898_vm15 = vc.u32 %v896_v51, %v892_v6  ;;  %v874_v4 = vadd.s32 %v873_v50, %v871_v53  ;;  %v900_v5 = vadd.s32 %v896_v51, %v892_v6 }
  0xed   : > { %v899_v46 = vsel %vm898_vm15, 1, %v13149_v28  ;;  %v845_v9 = vsub.s32 %v9243_v37, %v844_v47  ;;  %v921_v10 = vmul.u32 37449, %v916_v19  ;;  %v922_v13 = vshll.u32 %v919_v33, 16 }
  0xee   : > { %v901_v63 = vadd.s32 %v899_v46, %v897_v61  ;;  %v875_v17 = vshrl.u32 %v874_v4, 4  ;;  %vm904_vm0 = vc.u32 %v900_v5, 2454267026  ;;  %v923_v18 = vshrl.u32 %v919_v33, 16 }
  0xef   : > { %v924_v22 = vshll.u32 %v920_v7, 16  ;;  %v905_v16 = vsel %vm904_vm0, 1, %v13149_v28  ;;  %vm926_vm1 = vc.u32 %v918_v62, %v922_v13  ;;  %v928_v26 = vadd.s32 %v922_v13, %v918_v62 }
  0xf0   : > { %v902_v23 = vadd.s32 %v901_v63, %v891_v54  ;;  %v876_v27 = vmul.u32 28, %v875_v17  ;;  %v927_v37 = vsel %vm926_vm1, 1, %v13149_v28  ;;  %v9317_v29 = vadd.s32 24, %v9298_v34  ;;  %v2387_v54 = vld [vmem:[#allocation2 + $0x57] sm:$0xff] }
  0xf1   : > { %3226 = vmatmul.f32.gmra.mxu1 %v2614_v2  ;;  %v9320_v30 = vadd.s32 120, %v8967_v52  ;;  %v929_v31 = vadd.s32 %v927_v37, %v921_v10  ;;  %vm930_vm2 = vc.u32 %v928_v26, %v924_v22  ;;  %v932_v35 = vadd.s32 %v928_v26, %v924_v22 }
  0xf2   : > { %8067 = vmatmul.msk.f32.gmra.mxu2 %vm2671_vm12, %v2728_v3  ;;  %v903_v11 = vadd.s32 %v902_v23, %v893_v59  ;;  %v925_v36 = vshrl.u32 %v920_v7, 16  ;;  %v931_v38 = vsel %vm930_vm2, 1, %v13149_v28  ;;  %v947_v32 = vand.u32 65535, %v9317_v29  ;;  %v2616_v23 = vld [vmem:[#allocation2 + $0x60] sm:$0xff] }
  0xf3   : > { %8010 = vmatmul.msk.f32.gmra.mxu0 %vm2329_vm13, %v2386_v14  ;;  %v948_v39 = vshrl.u32 %v9317_v29, 16  ;;  %v933_v41 = vadd.s32 %v931_v38, %v929_v31  ;;  %vm936_vm3 = vc.u32 %v932_v35, 2454267026  ;;  %v9328_v47 = vadd.s32 24, %v9320_v30  ;;  %v2388_v31 = vld [vmem:[#allocation2 + $0x5f] sm:$0xff] }
  0xf4   : > { %v906_v40 = vadd.s32 %v905_v16, %v903_v11  ;;  %vm2672_vm4 = vcmp.ne.s32.totalorder %v845_v9, 27  ;;  %v877_v6 = vsub.s32 %v9265_v42, %v876_v27  ;;  %v950_v48 = vmul.u32 9362, %v947_v32  ;;  %v2730_v16 = vld [vmem:[#allocation2 + $0x61] sm:$0xff] }
  0xf5   : > { %v934_v51 = vadd.s32 %v933_v41, %v923_v18  ;;  %v951_v19 = vmul.u32 37449, %v947_v32  ;;  %v952_v53 = vmul.u32 9362, %v948_v39  ;;  %vm2330_vm5 = vcmp.ne.s32.totalorder %v845_v9, 0 }
  0xf6   : > { %v907_v50 = vshrl.u32 %v906_v40, 4  ;;  %v937_v55 = vsel %vm936_vm3, 1, %v13149_v28  ;;  %v979_v33 = vand.u32 65535, %v9328_v47  ;;  %v980_v59 = vshrl.u32 %v9328_v47, 16 }
  0xf7   : > { %v935_v62 = vadd.s32 %v934_v51, %v925_v36  ;;  %v953_v2 = vmul.u32 37449, %v948_v39  ;;  %v954_v3 = vshll.u32 %v951_v19, 16  ;;  %vm2673_vm6 = vcmp.ne.s32.totalorder %v877_v6, 27 }
  0xf8   : > { %v908_v61 = vmul.u32 28, %v907_v50  ;;  %v956_v42 = vshll.u32 %v952_v53, 16  ;;  %v982_v4 = vmul.u32 9362, %v979_v33  ;;  %v983_v46 = vmul.u32 37449, %v979_v33 }
  0xf9   : > { %3229 = vmatmul.f32.gmra.mxu1 %v2615_v43  ;;  %v938_v7 = vadd.s32 %v937_v55, %v935_v62  ;;  %vm958_vm7 = vc.u32 %v950_v48, %v954_v3  ;;  %v960_v9 = vadd.s32 %v954_v3, %v950_v48  ;;  %vm2331_vm8 = vcmp.ne.s32.totalorder %v877_v6, 0  ;;  %v2617_v6 = vld [vmem:[#allocation2 + $0x68] sm:$0xff] }
  0xfa   : > { %8068 = vmatmul.msk.f32.gmra.mxu2 %vm2672_vm4, %v2729_v21  ;;  %v9335_v5 = vsub.s32 %v9277_v58, %v908_v61  ;;  %v959_v63 = vsel %vm958_vm7, 1, %v13149_v28  ;;  %v984_v10 = vmul.u32 9362, %v980_v59  ;;  %v986_v13 = vshll.u32 %v983_v46, 16 }
  0xfb   : > { %8011 = vmatmul.msk.f32.gmra.mxu0 %vm2330_vm5, %v2387_v54  ;;  %v939_v14 = vshrl.u32 %v938_v7, 4  ;;  %v961_v17 = vadd.s32 %v959_v63, %v953_v2  ;;  %v985_v18 = vmul.u32 37449, %v980_v59  ;;  %v9339_v22 = vadd.s32 128, %v8967_v52  ;;  %v2731_v2 = vld [vmem:[#allocation2 + $0x69] sm:$0xff] }
  0xfc   : > { %v955_v26 = vshrl.u32 %v951_v19, 16  ;;  %vm962_vm9 = vc.u32 %v960_v9, %v956_v42  ;;  %v964_v58 = vadd.s32 %v960_v9, %v956_v42  ;;  %v988_v27 = vshll.u32 %v984_v10, 16 }
  0xfd   : > { %vm2674_vm12 = vcmp.ne.s32.totalorder %v9335_v5, 27  ;;  %v957_v37 = vshrl.u32 %v952_v53, 16  ;;  %v963_v11 = vsel %vm962_vm9, 1, %v13149_v28  ;;  %vm990_vm13 = vc.u32 %v982_v4, %v986_v13 }
  0xfe   : > { %v965_v35 = vadd.s32 %v963_v11, %v961_v17  ;;  %vm968_vm14 = vc.u32 %v964_v58, 2454267026  ;;  %v991_v36 = vsel %vm990_vm13, 1, %v13149_v28  ;;  %v992_v38 = vadd.s32 %v986_v13, %v982_v4  ;;  %v2389_v13 = vld [vmem:[#allocation2 + $0x67] sm:$0xff] }
  0xff   : > { %v940_v32 = vmul.u32 28, %v939_v14  ;;  %v987_v39 = vshrl.u32 %v983_v46, 16  ;;  %v993_v40 = vadd.s32 %v991_v36, %v985_v18  ;;  %v9346_v41 = vadd.s32 24, %v9339_v22 }
 0x100   : > { %v966_v43 = vadd.s32 %v965_v35, %v955_v26  ;;  %vm994_vm15 = vc.u32 %v992_v38, %v988_v27  ;;  %v996_v21 = vadd.s32 %v992_v38, %v988_v27  ;;  %v9349_v48 = vadd.s32 136, %v8967_v52 }
 0x101   : > { %3232 = vmatmul.f32.gmra.mxu1 %v2616_v23  ;;  %v969_v50 = vsel %vm968_vm14, 1, %v13149_v28  ;;  %v989_v51 = vshrl.u32 %v984_v10, 16  ;;  %v995_v19 = vsel %vm994_vm15, 1, %v13149_v28  ;;  %v1011_v53 = vand.u32 65535, %v9346_v41 }
 0x102   : > { %8069 = vmatmul.msk.f32.gmra.mxu2 %vm2673_vm6, %v2730_v16  ;;  %v967_v54 = vadd.s32 %v966_v43, %v957_v37  ;;  %v997_v55 = vadd.s32 %v995_v19, %v993_v40  ;;  %vm1000_vm0 = vc.u32 %v996_v21, 2454267026  ;;  %v1012_v33 = vshrl.u32 %v9346_v41, 16 }
 0x103   : > { %8012 = vmatmul.msk.f32.gmra.mxu0 %vm2331_vm8, %v2388_v31  ;;  %vm2332_vm1 = vcmp.ne.s32.totalorder %v9335_v5, 0  ;;  %v1014_v59 = vmul.u32 9362, %v1011_v53  ;;  %v1015_v61 = vmul.u32 37449, %v1011_v53  ;;  %v9358_v62 = vadd.s32 24, %v9349_v48 }
 0x104   : > { %v970_v3 = vadd.s32 %v969_v50, %v967_v54  ;;  %v998_v42 = vadd.s32 %v997_v55, %v987_v39  ;;  %v1001_v4 = vsel %vm1000_vm0, 1, %v13149_v28  ;;  %v1016_v46 = vmul.u32 9362, %v1012_v33  ;;  %v2618_v50 = vld [vmem:[#allocation2 + $0x70] sm:$0xff] }
 0x105   : > { %v1017_v7 = vmul.u32 37449, %v1012_v33  ;;  %v1018_v9 = vshll.u32 %v1015_v61, 16  ;;  %v1043_v63 = vand.u32 65535, %v9358_v62  ;;  %v1044_v10 = vshrl.u32 %v9358_v62, 16  ;;  %v2390_v33 = vld [vmem:[#allocation2 + $0x6f] sm:$0xff] }
 0x106   : > { %v941_v14 = vsub.s32 %v9294_v20, %v940_v32  ;;  %v971_v17 = vshrl.u32 %v970_v3, 4  ;;  %v999_v18 = vadd.s32 %v998_v42, %v989_v51  ;;  %v1020_v23 = vshll.u32 %v1016_v46, 16  ;;  %v2732_v51 = vld [vmem:[#allocation2 + $0x71] sm:$0xff] }
 0x107   : > { %v1019_v16 = vshrl.u32 %v1015_v61, 16  ;;  %vm1022_vm2 = vc.u32 %v1014_v59, %v1018_v9  ;;  %v1024_v26 = vadd.s32 %v1018_v9, %v1014_v59  ;;  %v1047_v58 = vmul.u32 37449, %v1043_v63 }
 0x108   : > { %v972_v27 = vmul.u32 28, %v971_v17  ;;  %v1002_v37 = vadd.s32 %v1001_v4, %v999_v18  ;;  %v1023_v11 = vsel %vm1022_vm2, 1, %v13149_v28  ;;  %v1046_v31 = vmul.u32 9362, %v1043_v63 }
 0x109   : > { %3235 = vmatmul.f32.gmra.mxu1 %v2617_v6  ;;  %v1025_v20 = vadd.s32 %v1023_v11, %v1017_v7  ;;  %vm1026_vm3 = vc.u32 %v1024_v26, %v1020_v23  ;;  %v1028_v35 = vadd.s32 %v1024_v26, %v1020_v23  ;;  %v1048_v36 = vmul.u32 9362, %v1044_v10 }
 0x10a   : > { %8070 = vmatmul.msk.f32.gmra.mxu2 %vm2674_vm12, %v2731_v2  ;;  %v1003_v38 = vshrl.u32 %v1002_v37, 4  ;;  %v1027_v32 = vsel %vm1026_vm3, 1, %v13149_v28  ;;  %v1050_v39 = vshll.u32 %v1047_v58, 16  ;;  %v1021_v40 = vshrl.u32 %v1016_v46, 16 }
 0x10b   : > { %8013 = vmatmul.msk.f32.gmra.mxu0 %vm2332_vm1, %v2389_v13  ;;  %v1029_v43 = vadd.s32 %v1027_v32, %v1025_v20  ;;  %vm1032_vm4 = vc.u32 %v1028_v35, 2454267026  ;;  %v1049_v21 = vmul.u32 37449, %v1044_v10  ;;  %vm2675_vm5 = vcmp.ne.s32.totalorder %v941_v14, 27  ;;  %v2391_v32 = vld [vmem:[#allocation2 + $0x77] sm:$0xff] }
 0x10c   : > { %vm2333_vm6 = vcmp.ne.s32.totalorder %v941_v14, 0  ;;  %v973_v19 = vsub.s32 %v9317_v29, %v972_v27  ;;  %v1051_v5 = vshrl.u32 %v1047_v58, 16  ;;  %v1004_v53 = vmul.u32 28, %v1003_v38  ;;  %v2619_v58 = vld [vmem:[#allocation2 + $0x78] sm:$0xff] }
 0x10d   : > { %v1030_v54 = vadd.s32 %v1029_v43, %v1019_v16  ;;  %v1052_v55 = vshll.u32 %v1048_v36, 16  ;;  %vm1054_vm7 = vc.u32 %v1046_v31, %v1050_v39  ;;  %v1033_v59 = vsel %vm1032_vm4, 1, %v13149_v28  ;;  %v2733_v27 = vld [vmem:[#allocation2 + $0x79] sm:$0xff] }
 0x10e   : > { %v1055_v61 = vsel %vm1054_vm7, 1, %v13149_v28  ;;  %v1056_v6 = vadd.s32 %v1050_v39, %v1046_v31  ;;  %v9374_v2 = vadd.s32 144, %v8967_v52  ;;  %v9377_v29 = vadd.s32 152, %v8967_v52 }
 0x10f   : > { %v1031_v3 = vadd.s32 %v1030_v54, %v1021_v40  ;;  %v1057_v42 = vadd.s32 %v1055_v61, %v1049_v21  ;;  %v9380_v4 = vadd.s32 160, %v8967_v52  ;;  %vm2676_vm8 = vcmp.ne.s32.totalorder %v973_v19, 27 }
 0x110   : > { %vm2334_vm9 = vcmp.ne.s32.totalorder %v973_v19, 0  ;;  %vm1058_vm12 = vc.u32 %v1056_v6, %v1052_v55  ;;  %v1060_v46 = vadd.s32 %v1056_v6, %v1052_v55  ;;  %v9385_v63 = vadd.s32 24, %v9374_v2 }
 0x111   : > { %3238 = vmatmul.f32.gmra.mxu1 %v2618_v50  ;;  %v1034_v7 = vadd.s32 %v1033_v59, %v1031_v3  ;;  %v1059_v9 = vsel %vm1058_vm12, 1, %v13149_v28  ;;  %v9388_v10 = vadd.s32 24, %v9377_v29  ;;  %v9391_v13 = vsub.s32 %v9328_v47, %v1004_v53 }
 0x112   : > { %8071 = vmatmul.msk.f32.gmra.mxu2 %vm2675_vm5, %v2732_v51  ;;  %v1053_v17 = vshrl.u32 %v1048_v36, 16  ;;  %v1061_v18 = vadd.s32 %v1059_v9, %v1057_v42  ;;  %vm1064_vm13 = vc.u32 %v1060_v46, 2454267026  ;;  %v1075_v16 = vand.u32 65535, %v9385_v63 }
 0x113   : > { %8014 = vmatmul.msk.f32.gmra.mxu0 %vm2333_vm6, %v2390_v33  ;;  %v1035_v23 = vshrl.u32 %v1034_v7, 4  ;;  %v1076_v14 = vshrl.u32 %v9385_v63, 16  ;;  %v9396_v26 = vadd.s32 24, %v9380_v4  ;;  %v1065_v11 = vsel %vm1064_vm13, 1, %v13149_v28 }
 0x114   : > { %v1062_v37 = vadd.s32 %v1061_v18, %v1051_v5  ;;  %v1107_v31 = vand.u32 65535, %v9388_v10  ;;  %v1108_v47 = vshrl.u32 %v9388_v10, 16  ;;  %v1078_v35 = vmul.u32 9362, %v1075_v16  ;;  %v2734_v18 = vld [vmem:[#allocation2 + $0x81] sm:$0xff] }
 0x115   : > { %v1036_v20 = vmul.u32 28, %v1035_v23  ;;  %v1079_v36 = vmul.u32 37449, %v1075_v16  ;;  %v1080_v38 = vmul.u32 9362, %v1076_v14  ;;  %vm2677_vm14 = vcmp.ne.s32.totalorder %v9391_v13, 27 }
 0x116   : > { %vm2335_vm15 = vcmp.ne.s32.totalorder %v9391_v13, 0  ;;  %v1063_v39 = vadd.s32 %v1062_v37, %v1053_v17  ;;  %v1111_v40 = vmul.u32 37449, %v1107_v31  ;;  %v1081_v43 = vmul.u32 37449, %v1076_v14  ;;  %v2620_v17 = vld [vmem:[#allocation2 + $0x80] sm:$0xff]  ;;  %v2621_v13 = vld [vmem:[#allocation2 + $0x88] sm:$0xff] }
 0x117   : > { %v1082_v21 = vshll.u32 %v1079_v36, 16  ;;  %v1084_v50 = vshll.u32 %v1080_v38, 16  ;;  %v9405_v51 = vadd.s32 168, %v8967_v52  ;;  %v9408_v5 = vsub.s32 %v9346_v41, %v1036_v20 }
 0x118   : > { %v1066_v53 = vadd.s32 %v1065_v11, %v1063_v39  ;;  %v1110_v54 = vmul.u32 9362, %v1107_v31  ;;  %v1112_v55 = vmul.u32 9362, %v1108_v47  ;;  %v1083_v33 = vshrl.u32 %v1079_v36, 16 }
 0x119   : > { %3241 = vmatmul.f32.gmra.mxu1 %v2619_v58  ;;  %vm1086_vm0 = vc.u32 %v1078_v35, %v1082_v21  ;;  %v1088_v59 = vadd.s32 %v1082_v21, %v1078_v35  ;;  %v1139_v61 = vand.u32 65535, %v9396_v26  ;;  %v1113_v42 = vmul.u32 37449, %v1108_v47 }
 0x11a   : > { %8072 = vmatmul.msk.f32.gmra.mxu2 %vm2676_vm8, %v2733_v27  ;;  %v1067_v6 = vshrl.u32 %v1066_v53, 4  ;;  %v1087_v3 = vsel %vm1086_vm0, 1, %v13149_v28  ;;  %v1114_v46 = vshll.u32 %v1111_v40, 16  ;;  %v1116_v41 = vshll.u32 %v1112_v55, 16  ;;  %v2392_v27 = vld [vmem:[#allocation2 + $0x7f] sm:$0xff] }
 0x11b   : > { %8015 = vmatmul.msk.f32.gmra.mxu0 %vm2334_vm9, %v2391_v32  ;;  %v1089_v7 = vadd.s32 %v1087_v3, %v1081_v43  ;;  %vm1090_vm1 = vc.u32 %v1088_v59, %v1084_v50  ;;  %v1092_v9 = vadd.s32 %v1088_v59, %v1084_v50  ;;  %vm2678_vm2 = vcmp.ne.s32.totalorder %v9408_v5, 27 }
 0x11c   : > { %v1085_v19 = vshrl.u32 %v1080_v38, 16  ;;  %v1091_v23 = vsel %vm1090_vm1, 1, %v13149_v28  ;;  %vm1118_vm3 = vc.u32 %v1110_v54, %v1114_v46  ;;  %v1120_v58 = vadd.s32 %v1114_v46, %v1110_v54 }
 0x11d   : > { %v1093_v16 = vadd.s32 %v1091_v23, %v1089_v7  ;;  %vm1096_vm4 = vc.u32 %v1092_v9, 2454267026  ;;  %v1119_v14 = vsel %vm1118_vm3, 1, %v13149_v28  ;;  %v1068_v37 = vmul.u32 28, %v1067_v6  ;;  %v2393_v23 = vld [vmem:[#allocation2 + $0x87] sm:$0xff] }
 0x11e   : > { %v1115_v11 = vshrl.u32 %v1111_v40, 16  ;;  %v1121_v31 = vadd.s32 %v1119_v14, %v1113_v42  ;;  %v1140_v47 = vshrl.u32 %v9396_v26, 16  ;;  %v1117_v35 = vshrl.u32 %v1112_v55, 16  ;;  %v2735_v42 = vld [vmem:[#allocation2 + $0x89] sm:$0xff] }
 0x11f   : > { %v1094_v20 = vadd.s32 %v1093_v16, %v1083_v33  ;;  %vm1122_vm5 = vc.u32 %v1120_v58, %v1116_v41  ;;  %v1124_v36 = vadd.s32 %v1120_v58, %v1116_v41  ;;  %v1097_v38 = vsel %vm1096_vm4, 1, %v13149_v28 }
 0x120   : > { %v1123_v32 = vsel %vm1122_vm5, 1, %v13149_v28  ;;  %v1142_v39 = vmul.u32 9362, %v1139_v61  ;;  %v1143_v43 = vmul.u32 37449, %v1139_v61  ;;  %v1144_v50 = vmul.u32 9362, %v1140_v47 }
 0x121   : > { %3244 = vmatmul.f32.gmra.mxu1 %v2620_v17  ;;  %v1095_v40 = vadd.s32 %v1094_v20, %v1085_v19  ;;  %v1125_v21 = vadd.s32 %v1123_v32, %v1121_v31  ;;  %vm1128_vm6 = vc.u32 %v1124_v36, 2454267026  ;;  %vm3559_vm7 = vcmask 523264  }
 0x122   : > { %8073 = vmatmul.msk.f32.gmra.mxu2 %vm2677_vm14, %v2734_v18  ;;  %vm2336_vm8 = vcmp.ne.s32.totalorder %v9408_v5, 0  ;;  %v9425_v53 = vsub.s32 %v9358_v62, %v1068_v37  ;;  %v1145_v54 = vmul.u32 37449, %v1140_v47  ;;  %v1146_v55 = vshll.u32 %v1143_v43, 16 }
 0x123   : > { %8016 = vmatmul.msk.f32.gmra.mxu0 %vm2335_vm15, %v2392_v27  ;;  %v1098_v33 = vadd.s32 %v1097_v38, %v1095_v40  ;;  %v1126_v59 = vadd.s32 %v1125_v21, %v1115_v11  ;;  %v1129_v6 = vsel %vm1128_vm6, 1, %v13149_v28  ;;  %v1148_v61 = vshll.u32 %v1144_v50, 16 }
 0x124   : > { %v1147_v46 = vshrl.u32 %v1143_v43, 16  ;;  %vm1150_vm9 = vc.u32 %v1142_v39, %v1146_v55  ;;  %v1152_v7 = vadd.s32 %v1146_v55, %v1142_v39  ;;  %v9429_v9 = vadd.s32 24, %v9405_v51 }
 0x125   : > { %v1099_v41 = vshrl.u32 %v1098_v33, 4  ;;  %v1127_v17 = vadd.s32 %v1126_v59, %v1117_v35  ;;  %v1151_v62 = vsel %vm1150_vm9, 1, %v13149_v28  ;;  %v9433_v18 = vadd.s32 176, %v8967_v52 }
 0x126   : > { %v3200_v3 = vpop.f32.mrf.mxu1  ;;  %v1153_v16 = vadd.s32 %v1151_v62, %v1145_v54  ;;  %vm1154_vm12 = vc.u32 %v1152_v7, %v1148_v61  ;;  %v1156_v14 = vadd.s32 %v1152_v7, %v1148_v61  ;;  %v1171_v58 = vand.u32 65535, %v9429_v9  ;;  %v2736_v61 = vld [vmem:[#allocation2 + $0x91] sm:$0xff] }
 0x127   : > { %v1100_v37 = vmul.u32 28, %v1099_v41  ;;  %v1130_v11 = vadd.s32 %v1129_v6, %v1127_v17  ;;  %v1155_v31 = vsel %vm1154_vm12, 1, %v13149_v28  ;;  %v1149_v47 = vshrl.u32 %v1144_v50, 16  ;;  %v2622_v6 = vld [vmem:[#allocation2 + $0x90] sm:$0xff] }
 0x128   : > { %v3012_v19 = vpop.f32.mrf.mxu0  ;;  %v1157_v20 = vadd.s32 %v1155_v31, %v1153_v16  ;;  %vm1160_vm13 = vc.u32 %v1156_v14, 2454267026  ;;  %v1172_v35 = vshrl.u32 %v9429_v9, 16  ;;  %vm2679_vm14 = vcmp.ne.s32.totalorder %v9425_v53, 27  ;;  %v2394_v17 = vld [vmem:[#allocation2 + $0x8f] sm:$0xff] }
 0x129   : > { %3247 = vmatmul.f32.gmra.mxu1 %v2621_v13  ;;  %v3201_v27 = vadd.f32 %v3200_v3, %v3012_v19  ;;  %v1131_v36 = vshrl.u32 %v1130_v11, 4  ;;  %v1174_v38 = vmul.u32 9362, %v1171_v58  ;;  %v1175_v32 = vmul.u32 37449, %v1171_v58 }
 0x12a   : > { %8074 = vmatmul.msk.f32.gmra.mxu2 %vm2678_vm2, %v2735_v42  ;;  %v9444_v43 = vsub.s32 %v9385_v63, %v1100_v37  ;;  %v1158_v40 = vadd.s32 %v1157_v20, %v1147_v46  ;;  %v9446_v21 = vmul.u32 9362, %v1172_v35  ;;  %v9449_v50 = vadd.s32 24, %v9433_v18 }
 0x12b   : > { %8017 = vmatmul.msk.f32.gmra.mxu0 %vm2336_vm8, %v2393_v23  ;;  %v1132_v55 = vmul.u32 28, %v1131_v36  ;;  %v1161_v5 = vsel %vm1160_vm13, 1, %v13149_v28  ;;  %v9453_v33 = vadd.s32 184, %v8967_v52  ;;  %v1177_v13 = vmul.u32 37449, %v1172_v35 }
 0x12c   : > { %v1159_v3 = vadd.s32 %v1158_v40, %v1149_v47  ;;  %v1178_v63 = vshll.u32 %v1175_v32, 16  ;;  %v1180_v42 = vshll.u32 %v9446_v21, 16  ;;  %vm2337_vm15 = vcmp.ne.s32.totalorder %v9425_v53, 0  ;;  %v2623_v53 = vld [vmem:[#allocation2 + $0x98] sm:$0xff] }
 0x12d   : > { %v3388_v39 = vpop.f32.mrf.mxu2  ;;  %v1203_v46 = vand.u32 65535, %v9449_v50  ;;  %v1204_v7 = vshrl.u32 %v9449_v50, 16  ;;  %vm2680_vm0 = vcmp.ne.s32.totalorder %v9444_v43, 27  ;;  %v9464_v16 = vsub.s32 %v9388_v10, %v1132_v55 }
 0x12e   : > { %v3389_v54 = vadd.f32 %v3388_v39, %v3201_v27  ;;  %v3203_v59 = vpop.f32.mrf.mxu1  ;;  %v1162_v62 = vadd.s32 %v1161_v5, %v1159_v3  ;;  %vm1182_vm1 = vc.u32 %v1174_v38, %v1178_v63  ;;  %v1184_v19 = vadd.s32 %v1178_v63, %v1174_v38  ;;  %v2737_v5 = vld [vmem:[#allocation2 + $0x99] sm:$0xff] }
 0x12f   : > { %v1179_v14 = vshrl.u32 %v1175_v32, 16  ;;  %v1183_v58 = vsel %vm1182_vm1, 1, %v13149_v28  ;;  %v9468_v11 = vadd.s32 24, %v9453_v33  ;;  %v1206_v47 = vmul.u32 9362, %v1203_v46 }
 0x130   : > { %3560 = vst.msk [vmem:[#allocation3] sm:$0xff] %vm3559_vm7, %v3389_v54  ;;  %v3015_v41 = vpop.f32.mrf.mxu0  ;;  %v1185_v27 = vadd.s32 %v1183_v58, %v1177_v13  ;;  %vm1186_vm2 = vc.u32 %v1184_v19, %v1180_v42  ;;  %v1188_v37 = vadd.s32 %v1184_v19, %v1180_v42  ;;  %v1207_v20 = vmul.u32 37449, %v1203_v46  ;;  %v2395_v42 = vld [vmem:[#allocation2 + $0x97] sm:$0xff] }
 0x131   : > { %3250 = vmatmul.f32.gmra.mxu1 %v2622_v6  ;;  %v3204_v23 = vadd.f32 %v3203_v59, %v3015_v41  ;;  %v1187_v31 = vsel %vm1186_vm2, 1, %v13149_v28  ;;  %v9473_v35 = vmul.u32 9362, %v1204_v7  ;;  %v1163_v36 = vshrl.u32 %v1162_v62, 4 }
 0x132   : > { %8075 = vmatmul.msk.f32.gmra.mxu2 %vm2679_vm14, %v2736_v61  ;;  %v1181_v38 = vshrl.u32 %v9446_v21, 16  ;;  %v1189_v32 = vadd.s32 %v1187_v31, %v1185_v27  ;;  %vm1192_vm3 = vc.u32 %v1188_v37, 2454267026  ;;  %vm2338_vm4 = vcmp.ne.s32.totalorder %v9444_v43, 0 }
 0x133   : > { %8018 = vmatmul.msk.f32.gmra.mxu0 %vm2337_vm15, %v2394_v17  ;;  %v1209_v40 = vmul.u32 37449, %v1204_v7  ;;  %v1210_v54 = vshll.u32 %v1207_v20, 16  ;;  %vm2681_vm5 = vcmp.ne.s32.totalorder %v9464_v16, 27  ;;  %v1193_v6 = vsel %vm1192_vm3, 1, %v13149_v28 }
 0x134   : > { %v1190_v59 = vadd.s32 %v1189_v32, %v1179_v14  ;;  %v1212_v61 = vshll.u32 %v9473_v35, 16  ;;  %v1235_v3 = vand.u32 65535, %v9468_v11  ;;  %v1236_v13 = vshrl.u32 %v9468_v11, 16 }
 0x135   : > { %v3391_v10 = vpop.f32.mrf.mxu2  ;;  %vm1214_vm6 = vc.u32 %v1206_v47, %v1210_v54  ;;  %v1216_v21 = vadd.s32 %v1210_v54, %v1206_v47  ;;  %vm2339_vm8 = vcmp.ne.s32.totalorder %v9464_v16, 0  ;;  %v1164_v46 = vmul.u32 28, %v1163_v36 }
 0x136   : > { %v3392_v39 = vadd.f32 %v3391_v10, %v3204_v23  ;;  %v3206_v55 = vpop.f32.mrf.mxu1  ;;  %v1191_v7 = vadd.s32 %v1190_v59, %v1181_v38  ;;  %v1211_v41 = vshrl.u32 %v1207_v20, 16  ;;  %v1215_v17 = vsel %vm1214_vm6, 1, %v13149_v28  ;;  %v2624_v59 = vld [vmem:[#allocation2 + $0xa0] sm:$0xff] }
 0x137   : > { %v1217_v19 = vadd.s32 %v1215_v17, %v1209_v40  ;;  %vm1218_vm9 = vc.u32 %v1216_v21, %v1212_v61  ;;  %v1238_v23 = vmul.u32 9362, %v1235_v3  ;;  %v1220_v27 = vadd.s32 %v1216_v21, %v1212_v61 }
 0x138   : > { %3561 = vst.msk [vmem:[#allocation3 + $0x8] sm:$0xff] %vm3559_vm7, %v3392_v39  ;;  %v3018_v63 = vpop.f32.mrf.mxu0  ;;  %v1194_v14 = vadd.s32 %v1193_v6, %v1191_v7  ;;  %v1219_v58 = vsel %vm1218_vm9, 1, %v13149_v28  ;;  %v1239_v37 = vmul.u32 37449, %v1235_v3  ;;  %v1213_v31 = vshrl.u32 %v9473_v35, 16  ;;  %v2738_v35 = vld [vmem:[#allocation2 + $0xa1] sm:$0xff] }
 0x139   : > { %3253 = vmatmul.f32.gmra.mxu1 %v2623_v53  ;;  %v3207_v62 = vadd.f32 %v3206_v55, %v3018_v63  ;;  %v1221_v47 = vadd.s32 %v1219_v58, %v1217_v19  ;;  %v1240_v20 = vmul.u32 9362, %v1236_v13  ;;  %v9492_v10 = vadd.s32 192, %v8967_v52 }
 0x13a   : > { %8076 = vmatmul.msk.f32.gmra.mxu2 %vm2680_vm0, %v2737_v5  ;;  %v1195_v38 = vshrl.u32 %v1194_v14, 4  ;;  %vm1224_vm12 = vc.u32 %v1220_v27, 2454267026  ;;  %v1241_v32 = vmul.u32 37449, %v1236_v13  ;;  %v1242_v39 = vshll.u32 %v1239_v37, 16 }
 0x13b   : > { %8019 = vmatmul.msk.f32.gmra.mxu0 %vm2338_vm4, %v2395_v42  ;;  %v9495_v54 = vsub.s32 %v9396_v26, %v1164_v46  ;;  %v1222_v55 = vadd.s32 %v1221_v47, %v1211_v41  ;;  %v1244_v53 = vshll.u32 %v1240_v20, 16  ;;  %v1225_v6 = vsel %vm1224_vm12, 1, %v13149_v28  ;;  %v2396_v46 = vld [vmem:[#allocation2 + $0x9f] sm:$0xff] }
 0x13c   : > { %v1243_v61 = vshrl.u32 %v1239_v37, 16  ;;  %vm1246_vm13 = vc.u32 %v1238_v23, %v1242_v39  ;;  %v1248_v21 = vadd.s32 %v1242_v39, %v1238_v23  ;;  %v1196_v3 = vmul.u32 28, %v1195_v38 }
 0x13d   : > { %v3394_v36 = vpop.f32.mrf.mxu2  ;;  %v1223_v13 = vadd.s32 %v1222_v55, %v1213_v31  ;;  %v1247_v26 = vsel %vm1246_vm13, 1, %v13149_v28  ;;  %v9502_v63 = vadd.s32 24, %v9492_v10  ;;  %v9505_v17 = vadd.s32 200, %v8967_v52 }
 0x13e   : > { %v3395_v40 = vadd.f32 %v3394_v36, %v3207_v62  ;;  %v3209_v43 = vpop.f32.mrf.mxu1  ;;  %v1249_v7 = vadd.s32 %v1247_v26, %v1241_v32  ;;  %vm1250_vm14 = vc.u32 %v1248_v21, %v1244_v53  ;;  %v1252_v41 = vadd.s32 %v1248_v21, %v1244_v53 }
 0x13f   : > { %v5443_v5 = vld [vmem:[#allocation3 + $0x4] sm:$0xff]  ;;  %v1226_v19 = vadd.s32 %v1225_v6, %v1223_v13  ;;  %v1251_v23 = vsel %vm1250_vm14, 1, %v13149_v28  ;;  %v1267_v14 = vand.u32 65535, %v9502_v63  ;;  %v1245_v58 = vshrl.u32 %v1240_v20, 16 }
 0x140   : > { %3562 = vst.msk [vmem:[#allocation3 + $0x10] sm:$0xff] %vm3559_vm7, %v3395_v40  ;;  %6099 = vrot.lane.b32.xlu0 %v5443_v5, %s8586_s4  ;;  %v3021_v42 = vpop.f32.mrf.mxu0  ;;  %v1253_v27 = vadd.s32 %v1251_v23, %v1249_v7  ;;  %vm1256_vm15 = vc.u32 %v1252_v41, 2454267026  ;;  %vm2682_vm0 = vcmp.ne.s32.totalorder %v9495_v54, 27  ;;  %v9515_v37 = vsub.s32 %v9429_v9, %v1196_v3  ;;  %v2625_v9 = vld [vmem:[#allocation2 + $0xa8] sm:$0xff] }
 0x141   : > { %3256 = vmatmul.f32.gmra.mxu1 %v2624_v59  ;;  %v3210_v62 = vadd.f32 %v3209_v43, %v3021_v42  ;;  %v1227_v31 = vshrl.u32 %v1226_v19, 4  ;;  %v1268_v47 = vshrl.u32 %v9502_v63, 16  ;;  %v1270_v32 = vmul.u32 9362, %v1267_v14  ;;  %v2739_v59 = vld [vmem:[#allocation2 + $0xa9] sm:$0xff] }
 0x142   : > { %8077 = vmatmul.msk.f32.gmra.mxu2 %vm2681_vm5, %v2738_v35  ;;  %v1254_v38 = vadd.s32 %v1253_v27, %v1243_v61  ;;  %v1271_v39 = vmul.u32 37449, %v1267_v14  ;;  %v9519_v40 = vadd.s32 24, %v9505_v17  ;;  %v1257_v16 = vsel %vm1256_vm15, 1, %v13149_v28  ;;  %v2397_v42 = vld [vmem:[#allocation2 + $0xa7] sm:$0xff] }
 0x143   : > { %8020 = vmatmul.msk.f32.gmra.mxu0 %vm2339_vm8, %v2396_v46  ;;  %v1228_v55 = vmul.u32 28, %v1227_v31  ;;  %v9522_v53 = vmul.u32 9362, %v1268_v47  ;;  %vm2340_vm1 = vcmp.ne.s32.totalorder %v9495_v54, 0  ;;  %v1273_v6 = vmul.u32 37449, %v1268_v47 }
 0x144   : > { %v1255_v35 = vadd.s32 %v1254_v38, %v1245_v58  ;;  %v1274_v61 = vshll.u32 %v1271_v39, 16  ;;  %vm2683_vm2 = vcmp.ne.s32.totalorder %v9515_v37, 27  ;;  %v1299_v3 = vand.u32 65535, %v9519_v40 }
 0x145   : > { %v3397_v36 = vpop.f32.mrf.mxu2  ;;  %v1276_v21 = vshll.u32 %v9522_v53, 16  ;;  %v1300_v13 = vshrl.u32 %v9519_v40, 16  ;;  %v9532_v41 = vadd.s32 208, %v8967_v52  ;;  %v9537_v19 = vsub.s32 %v9449_v50, %v1228_v55 }
 0x146   : > { %v3398_v20 = vadd.f32 %v3397_v36, %v3210_v62  ;;  %v3212_v43 = vpop.f32.mrf.mxu1  ;;  %v1258_v46 = vadd.s32 %v1257_v16, %v1255_v35  ;;  %vm1278_vm3 = vc.u32 %v1270_v32, %v1274_v61  ;;  %v1280_v7 = vadd.s32 %v1274_v61, %v1270_v32 }
 0x147   : > { %v5444_v5 = vld [vmem:[#allocation3 + $0xc] sm:$0xff]  ;;  %v1275_v23 = vshrl.u32 %v1271_v39, 16  ;;  %v1279_v14 = vsel %vm1278_vm3, 1, %v13149_v28  ;;  %v1277_v58 = vshrl.u32 %v9522_v53, 16  ;;  %v1302_v36 = vmul.u32 9362, %v1299_v3 }
 0x148   : > { %3563 = vst.msk [vmem:[#allocation3 + $0x18] sm:$0xff] %vm3559_vm7, %v3398_v20  ;;  %6101 = vrot.lane.b32.xlu0 %v5444_v5, %s8586_s4  ;;  %v3024_v26 = vpop.f32.mrf.mxu0  ;;  %v1281_v27 = vadd.s32 %v1279_v14, %v1273_v6  ;;  %vm1282_vm4 = vc.u32 %v1280_v7, %v1276_v21  ;;  %v1284_v31 = vadd.s32 %v1280_v7, %v1276_v21  ;;  %v1303_v38 = vmul.u32 37449, %v1299_v3 }
 0x149   : > { %3259 = vmatmul.f32.gmra.mxu1 %v2625_v9  ;;  %v3213_v62 = vadd.f32 %v3212_v43, %v3024_v26  ;;  %v1283_v47 = vsel %vm1282_vm4, 1, %v13149_v28  ;;  %v9544_v32 = vmul.u32 9362, %v1300_v13  ;;  %v1259_v50 = vshrl.u32 %v1258_v46, 4  ;;  %v2626_v9 = vld [vmem:[#allocation2 + $0xb0] sm:$0xff] }
 0x14a   : > { %8078 = vmatmul.msk.f32.gmra.mxu2 %vm2682_vm0, %v2739_v59  ;;  %v1285_v55 = vadd.s32 %v1283_v47, %v1281_v27  ;;  %vm1288_vm5 = vc.u32 %v1284_v31, 2454267026  ;;  %v9547_v39 = vadd.s32 24, %v9532_v41  ;;  %vm2341_vm6 = vcmp.ne.s32.totalorder %v9515_v37, 0  ;;  %v2740_v59 = vld [vmem:[#allocation2 + $0xb1] sm:$0xff] }
 0x14b   : > { %8021 = vmatmul.msk.f32.gmra.mxu0 %vm2340_vm1, %v2397_v42  ;;  %v1305_v53 = vmul.u32 37449, %v1300_v13  ;;  %v1306_v43 = vshll.u32 %v1303_v38, 16  ;;  %vm2684_vm8 = vcmp.ne.s32.totalorder %v9537_v19, 27  ;;  %v1289_v6 = vsel %vm1288_vm5, 1, %v13149_v28  ;;  %v2398_v42 = vld [vmem:[#allocation2 + $0xaf] sm:$0xff] }
 0x14c   : > { %v1286_v35 = vadd.s32 %v1285_v55, %v1275_v23  ;;  %v1308_v61 = vshll.u32 %v9544_v32, 16  ;;  %v1331_v3 = vand.u32 65535, %v9547_v39  ;;  %v1332_v13 = vshrl.u32 %v9547_v39, 16 }
 0x14d   : > { %v3400_v20 = vpop.f32.mrf.mxu2  ;;  %vm1310_vm9 = vc.u32 %v1302_v36, %v1306_v43  ;;  %v1312_v21 = vadd.s32 %v1306_v43, %v1302_v36  ;;  %vm2342_vm12 = vcmp.ne.s32.totalorder %v9537_v19, 0  ;;  %v1260_v46 = vmul.u32 28, %v1259_v50 }
 0x14e   : > { %v3401_v16 = vadd.f32 %v3400_v20, %v3213_v62  ;;  %v3215_v54 = vpop.f32.mrf.mxu1  ;;  %v1287_v7 = vadd.s32 %v1286_v35, %v1277_v58  ;;  %v1307_v62 = vshrl.u32 %v1303_v38, 16  ;;  %v1311_v23 = vsel %vm1310_vm9, 1, %v13149_v28 }
 0x14f   : > { %v5445_v5 = vld [vmem:[#allocation3 + $0x14] sm:$0xff]  ;;  %v1313_v27 = vadd.s32 %v1311_v23, %v1305_v53  ;;  %vm1314_vm13 = vc.u32 %v1312_v21, %v1308_v61  ;;  %v1334_v31 = vmul.u32 9362, %v1331_v3  ;;  %v1316_v20 = vadd.s32 %v1312_v21, %v1308_v61  ;;  %v2627_v21 = vld [vmem:[#allocation2 + $0xb8] sm:$0xff] }
 0x150   : > { %3564 = vst.msk [vmem:[#allocation3 + $0x20] sm:$0xff] %vm3559_vm7, %v3401_v16  ;;  %6103 = vrot.lane.b32.xlu1 %v5445_v5, %s8586_s4  ;;  %v3027_v26 = vpop.f32.mrf.mxu0  ;;  %v1290_v47 = vadd.s32 %v1289_v6, %v1287_v7  ;;  %v1315_v36 = vsel %vm1314_vm13, 1, %v13149_v28  ;;  %v1335_v55 = vmul.u32 37449, %v1331_v3  ;;  %v1309_v58 = vshrl.u32 %v9544_v32, 16  ;;  %v2741_v32 = vld [vmem:[#allocation2 + $0xb9] sm:$0xff] }
 0x151   : > { %3262 = vmatmul.f32.gmra.mxu1 %v2626_v9  ;;  %v3216_v14 = vadd.f32 %v3215_v54, %v3027_v26  ;;  %v1317_v38 = vadd.s32 %v1315_v36, %v1313_v27  ;;  %v1336_v50 = vmul.u32 9362, %v1332_v13  ;;  %v9566_v16 = vadd.s32 216, %v8967_v52  ;;  %v2399_v23 = vld [vmem:[#allocation2 + $0xb7] sm:$0xff] }
 0x152   : > { %8079 = vmatmul.msk.f32.gmra.mxu2 %vm2683_vm2, %v2740_v59  ;;  %v1291_v54 = vshrl.u32 %v1290_v47, 4  ;;  %vm1320_vm14 = vc.u32 %v1316_v20, 2454267026  ;;  %v1337_v53 = vmul.u32 37449, %v1332_v13  ;;  %v1338_v5 = vshll.u32 %v1335_v55, 16 }
 0x153   : > { %8022 = vmatmul.msk.f32.gmra.mxu0 %vm2341_vm6, %v2398_v42  ;;  %v9569_v59 = vsub.s32 %v9468_v11, %v1260_v46  ;;  %v1318_v35 = vadd.s32 %v1317_v38, %v1307_v62  ;;  %v1340_v6 = vshll.u32 %v1336_v50, 16  ;;  %v1321_v3 = vsel %vm1320_vm14, 1, %v13149_v28 }
 0x154   : > { %v1339_v26 = vshrl.u32 %v1335_v55, 16  ;;  %vm1342_vm15 = vc.u32 %v1334_v31, %v1338_v5  ;;  %v1344_v42 = vadd.s32 %v1338_v5, %v1334_v31  ;;  %v1292_v13 = vmul.u32 28, %v1291_v54 }
 0x155   : > { %v3403_v43 = vpop.f32.mrf.mxu2  ;;  %v1319_v7 = vadd.s32 %v1318_v35, %v1309_v58  ;;  %v1343_v11 = vsel %vm1342_vm15, 1, %v13149_v28  ;;  %v9576_v46 = vadd.s32 24, %v9566_v16  ;;  %v9579_v47 = vadd.s32 224, %v8967_v52 }
 0x156   : > { %v3404_v9 = vadd.f32 %v3403_v43, %v3216_v14  ;;  %v3218_v37 = vpop.f32.mrf.mxu1  ;;  %v1345_v14 = vadd.s32 %v1343_v11, %v1337_v53  ;;  %vm1346_vm0 = vc.u32 %v1344_v42, %v1340_v6  ;;  %v1348_v27 = vadd.s32 %v1344_v42, %v1340_v6  ;;  %v2742_v42 = vld [vmem:[#allocation2 + $0xc1] sm:$0xff] }
 0x157   : > { %v5446_v61 = vld [vmem:[#allocation3 + $0x1c] sm:$0xff]  ;;  %v1322_v36 = vadd.s32 %v1321_v3, %v1319_v7  ;;  %v1347_v20 = vsel %vm1346_vm0, 1, %v13149_v28  ;;  %v1363_v55 = vand.u32 65535, %v9576_v46  ;;  %v1341_v58 = vshrl.u32 %v1336_v50, 16 }
 0x158   : > { %3565 = vst.msk [vmem:[#allocation3 + $0x28] sm:$0xff] %vm3559_vm7, %v3404_v9  ;;  %6105 = vrot.lane.b32.xlu1 %v5446_v61, %s8586_s4  ;;  %v3030_v62 = vpop.f32.mrf.mxu0  ;;  %v1349_v38 = vadd.s32 %v1347_v20, %v1345_v14  ;;  %vm1352_vm1 = vc.u32 %v1348_v27, 2454267026  ;;  %vm2685_vm2 = vcmp.ne.s32.totalorder %v9569_v59, 27  ;;  %v9589_v43 = vsub.s32 %v9502_v63, %v1292_v13  ;;  %v2628_v63 = vld [vmem:[#allocation2 + $0xc0] sm:$0xff] }
 0x159   : > { %3265 = vmatmul.f32.gmra.mxu1 %v2627_v21  ;;  %v3219_v31 = vadd.f32 %v3218_v37, %v3030_v62  ;;  %v1323_v54 = vshrl.u32 %v1322_v36, 4  ;;  %v1364_v53 = vshrl.u32 %v9576_v46, 16  ;;  %v1366_v35 = vmul.u32 9362, %v1363_v55  ;;  %v2400_v27 = vld [vmem:[#allocation2 + $0xbf] sm:$0xff] }
 0x15a   : > { %8080 = vmatmul.msk.f32.gmra.mxu2 %vm2684_vm8, %v2741_v32  ;;  %v1350_v9 = vadd.s32 %v1349_v38, %v1339_v26  ;;  %v1367_v6 = vmul.u32 37449, %v1363_v55  ;;  %v9593_v37 = vadd.s32 24, %v9579_v47  ;;  %v1353_v19 = vsel %vm1352_vm1, 1, %v13149_v28 }
 0x15b   : > { %8023 = vmatmul.msk.f32.gmra.mxu0 %vm2342_vm12, %v2399_v23  ;;  %v1324_v61 = vmul.u32 28, %v1323_v54  ;;  %v9596_v21 = vmul.u32 9362, %v1364_v53  ;;  %vm2343_vm3 = vcmp.ne.s32.totalorder %v9569_v59, 0  ;;  %v1369_v7 = vmul.u32 37449, %v1364_v53 }
 0x15c   : > { %v1351_v13 = vadd.s32 %v1350_v9, %v1341_v58  ;;  %v1370_v26 = vshll.u32 %v1367_v6, 16  ;;  %vm2686_vm4 = vcmp.ne.s32.totalorder %v9589_v43, 27  ;;  %v1395_v62 = vand.u32 65535, %v9593_v37 }
 0x15d   : > { %v3406_v5 = vpop.f32.mrf.mxu2  ;;  %v1372_v11 = vshll.u32 %v9596_v21, 16  ;;  %v1396_v23 = vshrl.u32 %v9593_v37, 16  ;;  %v9606_v20 = vadd.s32 232, %v8967_v52  ;;  %v9611_v58 = vsub.s32 %v9519_v40, %v1324_v61 }
 0x15e   : > { %v3407_v50 = vadd.f32 %v3406_v5, %v3219_v31  ;;  %v3221_v32 = vpop.f32.mrf.mxu1  ;;  %v1354_v31 = vadd.s32 %v1353_v19, %v1351_v13  ;;  %vm1374_vm5 = vc.u32 %v1366_v35, %v1370_v26  ;;  %v1376_v36 = vadd.s32 %v1370_v26, %v1366_v35  ;;  %v2743_v26 = vld [vmem:[#allocation2 + $0xc9] sm:$0xff] }
 0x15f   : > { %v5447_v3 = vld [vmem:[#allocation3 + $0x24] sm:$0xff]  ;;  %13363 = vst [vmem:[#allocation5_spill] sm:$0xff] %v9606_v20  ;;  %v1371_v38 = vshrl.u32 %v1367_v6, 16  ;;  %v1375_v54 = vsel %vm1374_vm5, 1, %v13149_v28  ;;  %v1373_v53 = vshrl.u32 %v9596_v21, 16  ;;  %v1399_v19 = vmul.u32 37449, %v1395_v62 }
 0x160   : > { %3566 = vst.msk [vmem:[#allocation3 + $0x30] sm:$0xff] %vm3559_vm7, %v3407_v50  ;;  %6107 = vrot.lane.b32.xlu2 %v5447_v3, %s8586_s4  ;;  %v3033_v14 = vpop.f32.mrf.mxu0  ;;  %v1377_v5 = vadd.s32 %v1375_v54, %v1369_v7  ;;  %vm1378_vm6 = vc.u32 %v1376_v36, %v1372_v11  ;;  %v1380_v9 = vadd.s32 %v1376_v36, %v1372_v11  ;;  %v1398_v50 = vmul.u32 9362, %v1395_v62  ;;  %v2629_v7 = vld [vmem:[#allocation2 + $0xc8] sm:$0xff] }
 0x161   : > { %3268 = vmatmul.f32.gmra.mxu1 %v2628_v63  ;;  %v3222_v55 = vadd.f32 %v3221_v32, %v3033_v14  ;;  %v1379_v35 = vsel %vm1378_vm6, 1, %v13149_v28  ;;  %v9618_v3 = vmul.u32 9362, %v1396_v23  ;;  %v1355_v40 = vshrl.u32 %v1354_v31, 4 }
 0x162   : > { %8081 = vmatmul.msk.f32.gmra.mxu2 %vm2685_vm2, %v2742_v42  ;;  %v1381_v61 = vadd.s32 %v1379_v35, %v1377_v5  ;;  %vm1384_vm8 = vc.u32 %v1380_v9, 2454267026  ;;  %v9621_v6 = vadd.s32 24, %v9606_v20  ;;  %vm2344_vm9 = vcmp.ne.s32.totalorder %v9589_v43, 0  ;;  %v5250_v20 = vld [vmem:[#allocation3 + $0xb] sm:$0xff] }
 0x163   : > { %8024 = vmatmul.msk.f32.gmra.mxu0 %vm2343_vm3, %v2400_v27  ;;  %v1401_v63 = vmul.u32 37449, %v1396_v23  ;;  %v1402_v42 = vshll.u32 %v1399_v19, 16  ;;  %vm2687_vm12 = vcmp.ne.s32.totalorder %v9611_v58, 27  ;;  %v1385_v62 = vsel %vm1384_vm8, 1, %v13149_v28 }
 0x164   : > { %v1382_v11 = vadd.s32 %v1381_v61, %v1371_v38  ;;  %v1404_v14 = vshll.u32 %v9618_v3, 16  ;;  %v1427_v23 = vand.u32 65535, %v9621_v6  ;;  %v1428_v31 = vshrl.u32 %v9621_v6, 16 }
 0x165   : > { %v3409_v32 = vpop.f32.mrf.mxu2  ;;  %vm1406_vm13 = vc.u32 %v1398_v50, %v1402_v42  ;;  %v1408_v27 = vadd.s32 %v1402_v42, %v1398_v50  ;;  %vm2345_vm14 = vcmp.ne.s32.totalorder %v9611_v58, 0  ;;  %v1356_v54 = vmul.u32 28, %v1355_v40 }
 0x166   : > { %v3410_v21 = vadd.f32 %v3409_v32, %v3222_v55  ;;  %v3224_v59 = vpop.f32.mrf.mxu1  ;;  %v2401_v55 = vld [vmem:[#allocation2 + $0xc7] sm:$0xff]  ;;  %v1383_v38 = vadd.s32 %v1382_v11, %v1373_v53  ;;  %v1403_v5 = vshrl.u32 %v1399_v19, 16  ;;  %v1407_v9 = vsel %vm1406_vm13, 1, %v13149_v28 }
 0x167   : > { %v5448_v13 = vld [vmem:[#allocation3 + $0x2c] sm:$0xff]  ;;  %v1409_v32 = vadd.s32 %v1407_v9, %v1401_v63  ;;  %vm1410_vm15 = vc.u32 %v1408_v27, %v1404_v14  ;;  %v1430_v50 = vmul.u32 9362, %v1427_v23  ;;  %v1412_v42 = vadd.s32 %v1408_v27, %v1404_v14 }
 0x168   : > { %3567 = vst.msk [vmem:[#allocation3 + $0x38] sm:$0xff] %vm3559_vm7, %v3410_v21  ;;  %6109 = vrot.lane.b32.xlu2 %v5448_v13, %s8586_s4  ;;  %v3036_v36 = vpop.f32.mrf.mxu0  ;;  %v1386_v61 = vadd.s32 %v1385_v62, %v1383_v38  ;;  %v1411_v21 = vsel %vm1410_vm15, 1, %v13149_v28  ;;  %v1431_v13 = vmul.u32 37449, %v1427_v23  ;;  %v1405_v53 = vshrl.u32 %v9618_v3, 16  ;;  %v2744_v3 = vld [vmem:[#allocation2 + $0xd1] sm:$0xff] }
 0x169   : > { %3271 = vmatmul.f32.gmra.mxu1 %v2629_v7  ;;  %v3225_v35 = vadd.f32 %v3224_v59, %v3036_v36  ;;  %v1413_v19 = vadd.s32 %v1411_v21, %v1409_v32  ;;  %v1432_v40 = vmul.u32 9362, %v1428_v31  ;;  %v9640_v7 = vadd.s32 240, %v8967_v52 }
 0x16a   : > { %8082 = vmatmul.msk.f32.gmra.mxu2 %vm2686_vm4, %v2743_v26  ;;  %v1387_v59 = vshrl.u32 %v1386_v61, 4  ;;  %vm1416_vm0 = vc.u32 %v1412_v42, 2454267026  ;;  %v1433_v63 = vmul.u32 37449, %v1428_v31  ;;  %v1434_v11 = vshll.u32 %v1431_v13, 16  ;;  %v2402_v61 = vld [vmem:[#allocation2 + $0xcf] sm:$0xff] }
 0x16b   : > { %8025 = vmatmul.msk.f32.gmra.mxu0 %vm2344_vm9, %v2401_v55  ;;  %13364 = vst [vmem:[#allocation6_spill] sm:$0xff] %v9640_v7  ;;  %v9643_v36 = vsub.s32 %v9547_v39, %v1356_v54  ;;  %v1414_v14 = vadd.s32 %v1413_v19, %v1403_v5  ;;  %v1436_v27 = vshll.u32 %v1432_v40, 16  ;;  %v2630_v55 = vld [vmem:[#allocation2 + $0xd0] sm:$0xff]  ;;  %v1417_v38 = vsel %vm1416_vm0, 1, %v13149_v28 }
 0x16c   : > { %v1435_v9 = vshrl.u32 %v1431_v13, 16  ;;  %vm1438_vm1 = vc.u32 %v1430_v50, %v1434_v11  ;;  %v1440_v32 = vadd.s32 %v1434_v11, %v1430_v50  ;;  %v1388_v31 = vmul.u32 28, %v1387_v59 }
 0x16d   : > { %v3412_v26 = vpop.f32.mrf.mxu2  ;;  %v1439_v39 = vsel %vm1438_vm1, 1, %v13149_v28  ;;  %v9650_v54 = vadd.s32 24, %v9640_v7  ;;  %v9653_v13 = vadd.s32 248, %v8967_v52  ;;  %v1437_v59 = vshrl.u32 %v1432_v40, 16 }
 0x16e   : > { %v3413_v62 = vadd.f32 %v3412_v26, %v3225_v35  ;;  %v3227_v43 = vpop.f32.mrf.mxu1  ;;  %v1415_v35 = vadd.s32 %v1414_v14, %v1405_v53  ;;  %v1441_v21 = vadd.s32 %v1439_v39, %v1433_v63  ;;  %vm1442_vm2 = vc.u32 %v1440_v32, %v1436_v27  ;;  %v2745_v39 = vld [vmem:[#allocation2 + $0xd9] sm:$0xff] }
 0x16f   : > { %v5449_v23 = vld [vmem:[#allocation3 + $0x34] sm:$0xff]  ;;  %v1444_v42 = vadd.s32 %v1440_v32, %v1436_v27  ;;  %13365 = vst [vmem:[#allocation7_spill] sm:$0xff] %v9653_v13  ;;  %v1443_v53 = vsel %vm1442_vm2, 1, %v13149_v28  ;;  %v1459_v26 = vand.u32 65535, %v9650_v54  ;;  %vm2688_vm4 = vcmp.ne.s32.totalorder %v9643_v36, 27 }
 0x170   : > { %3568 = vst.msk [vmem:[#allocation3 + $0x40] sm:$0xff] %vm3559_vm7, %v3413_v62  ;;  %6111 = vrot.lane.b32.xlu0 %v5449_v23, %s8586_s4  ;;  %v3039_v5 = vpop.f32.mrf.mxu0  ;;  %v1418_v19 = vadd.s32 %v1417_v38, %v1415_v35  ;;  %v1445_v11 = vadd.s32 %v1443_v53, %v1441_v21  ;;  %v9663_v63 = vsub.s32 %v9576_v46, %v1388_v31  ;;  %v6877_v62 = vld [vmem:[%s13143_s2 + $0x78] sm:$0xff]  ;;  %v1460_v14 = vshrl.u32 %v9650_v54, 16  ;;  %v6876_v38 = vld [vmem:[%s13143_s2 + $0x70] sm:$0xff] }
 0x171   : > { %3274 = vmatmul.f32.gmra.mxu1 %v2630_v55  ;;  %v3228_v50 = vadd.f32 %v3227_v43, %v3039_v5  ;;  %vm1448_vm3 = vc.u32 %v1444_v42, 2454267026  ;;  %7081 = vmatpush.msra.mxu3 %v6877_v62  ;;  %v1462_v40 = vmul.u32 9362, %v1459_v26  ;;  %v9669_v23 = vmul.u32 37449, %v1459_v26  ;;  %v6875_v42 = vld [vmem:[%s13143_s2 + $0x68] sm:$0xff] }
 0x172   : > { %8083 = vmatmul.msk.f32.gmra.mxu2 %vm2687_vm12, %v2744_v3  ;;  %v1446_v43 = vadd.s32 %v1445_v11, %v1435_v9  ;;  %v9672_v58 = vadd.s32 24, %v9653_v13  ;;  %v1419_v3 = vshrl.u32 %v1418_v19, 4  ;;  %v1449_v46 = vsel %vm1448_vm3, 1, %v13149_v28  ;;  %v2631_v9 = vld [vmem:[#allocation2 + $0xd8] sm:$0xff] }
 0x173   : > { %8026 = vmatmul.msk.f32.gmra.mxu0 %vm2345_vm14, %v2402_v61  ;;  %v9678_v32 = vmul.u32 9362, %v1460_v14  ;;  %vm2346_vm5 = vcmp.ne.s32.totalorder %v9643_v36, 0  ;;  %7082 = vmatpush.msra.mxu3 %v6876_v38  ;;  %v1465_v61 = vmul.u32 37449, %v1460_v14  ;;  %v1466_v21 = vshll.u32 %v9669_v23, 16 }
 0x174   : > { %v1447_v5 = vadd.s32 %v1446_v43, %v1437_v59  ;;  %vm2689_vm6 = vcmp.ne.s32.totalorder %v9663_v63, 27  ;;  %v1491_v19 = vand.u32 65535, %v9672_v58  ;;  %v1492_v53 = vshrl.u32 %v9672_v58, 16  ;;  %v2403_v59 = vld [vmem:[#allocation2 + $0xd7] sm:$0xff] }
 0x175   : > { %v3415_v27 = vpop.f32.mrf.mxu2  ;;  %7083 = vmatpush.msra.mxu3 %v6875_v42  ;;  %vm1470_vm8 = vc.u32 %v1462_v40, %v1466_v21  ;;  %v1472_v62 = vadd.s32 %v1466_v21, %v1462_v40  ;;  %v9692_v14 = vadd.s32 256, %v8967_v52  ;;  %v1420_v43 = vmul.u32 28, %v1419_v3  ;;  %v6933_v40 = vld [vmem:[%s13143_s2 + $0x238] sm:$0xff] }
 0x176   : > { %v3416_v55 = vadd.f32 %v3415_v27, %v3228_v50  ;;  %v3230_v31 = vpop.f32.mrf.mxu1  ;;  %v1468_v50 = vshll.u32 %v9678_v32, 16  ;;  %v1450_v11 = vadd.s32 %v1449_v46, %v1447_v5  ;;  %v1471_v38 = vsel %vm1470_vm8, 1, %v13149_v28  ;;  %v6874_v46 = vld [vmem:[%s13143_s2 + $0x60] sm:$0xff]  ;;  %7745 = vmatpush.msrb.mxu2 %v6933_v40  ;;  %v6873_v3 = vld [vmem:[%s13143_s2 + $0x58] sm:$0xff] }
 0x177   : > { %v5450_v35 = vld [vmem:[#allocation3 + $0x3c] sm:$0xff]  ;;  %13366 = vst [vmem:[#allocation8_spill] sm:$0xff] %v9692_v14  ;;  %7084 = vmatpush.msra.mxu3 %v6874_v46  ;;  %v9713_v21 = vmul.u32 9362, %v1492_v53  ;;  %vm2347_vm13 = vcmp.ne.s32.totalorder %v9663_v63, 0  ;;  %v2632_v46 = vld [vmem:[#allocation2 + $0xe0] sm:$0xff]  ;;  %v9724_v40 = vsub.s32 %v9593_v37, %v1420_v43 }
 0x178   : > { %3569 = vst.msk [vmem:[#allocation3 + $0x48] sm:$0xff] %vm3559_vm7, %v3416_v55  ;;  %6113 = vrot.lane.b32.xlu1 %v5450_v35, %s8586_s4  ;;  %v3042_v26 = vpop.f32.mrf.mxu0  ;;  %v1467_v55 = vshrl.u32 %v9669_v23, 16  ;;  %v1469_v35 = vshrl.u32 %v9678_v32, 16  ;;  %vm1474_vm9 = vc.u32 %v1472_v62, %v1468_v50  ;;  %v1476_v5 = vadd.s32 %v1472_v62, %v1468_v50 }
 0x179   : > { %3277 = vmatmul.f32.gmra.mxu1 %v2631_v9  ;;  %v3231_v27 = vadd.f32 %v3230_v31, %v3042_v26  ;;  %v1473_v9 = vadd.s32 %v1471_v38, %v1465_v61  ;;  %v1475_v23 = vsel %vm1474_vm9, 1, %v13149_v28  ;;  %v1494_v31 = vmul.u32 9362, %v1491_v19  ;;  %7085 = vmatpush.msra.mxu3 %v6873_v3  ;;  %v6872_v26 = vld [vmem:[%s13143_s2 + $0x50] sm:$0xff] }
 0x17a   : > { %8084 = vmatmul.msk.f32.gmra.mxu2 %vm2688_vm4, %v2745_v39  ;;  %v9711_v39 = vmul.u32 37449, %v1491_v19  ;;  %v1451_v61 = vshrl.u32 %v1450_v11, 4  ;;  %vm1480_vm12 = vc.u32 %v1476_v5, 2454267026  ;;  %v9716_v50 = vadd.s32 24, %v9692_v14  ;;  %v2746_v11 = vld [vmem:[#allocation2 + $0xe1] sm:$0xff] }
 0x17b   : > { %8027 = vmatmul.msk.f32.gmra.mxu0 %vm2346_vm5, %v2403_v59  ;;  %v1477_v42 = vadd.s32 %v1475_v23, %v1473_v9  ;;  %v1497_v59 = vmul.u32 37449, %v1492_v53  ;;  %v1481_v5 = vsel %vm1480_vm12, 1, %v13149_v28  ;;  %7086 = vmatpush.msra.mxu3 %v6872_v26  ;;  %v6925_v53 = vld [vmem:[%s13143_s2 + $0x1f8] sm:$0xff]  ;;  %v6871_v23 = vld [vmem:[%s13143_s2 + $0x48] sm:$0xff]  ;;  %vm2690_vm1 = vcmp.ne.s32.totalorder %v9724_v40, 27 }
 0x17c   : > { %v1498_v19 = vshll.u32 %v9711_v39, 16  ;;  %v1523_v43 = vand.u32 65535, %v9716_v50  ;;  %7573 = vmatpush.msrb.mxu1 %v6925_v53  ;;  %v1499_v26 = vshrl.u32 %v9711_v39, 16  ;;  %vm2348_vm3 = vcmp.ne.s32.totalorder %v9724_v40, 0 }
 0x17d   : > { %v3418_v32 = vpop.f32.mrf.mxu2  ;;  %v1478_v9 = vadd.s32 %v1477_v42, %v1467_v55  ;;  %v1524_v55 = vshrl.u32 %v9716_v50, 16  ;;  %v1452_v42 = vmul.u32 28, %v1451_v61  ;;  %7087 = vmatpush.msra.mxu3 %v6871_v23 }
 0x17e   : > { %v3419_v36 = vadd.f32 %v3418_v32, %v3231_v27  ;;  %v3233_v62 = vpop.f32.mrf.mxu1  ;;  %v1500_v27 = vshll.u32 %v9713_v21, 16  ;;  %vm1502_vm14 = vc.u32 %v1494_v31, %v1498_v19  ;;  %v1504_v37 = vadd.s32 %v1498_v19, %v1494_v31  ;;  %v2404_v32 = vld [vmem:[#allocation2 + $0xdf] sm:$0xff] }
 0x17f   : > { %v5451_v38 = vld [vmem:[#allocation3 + $0x44] sm:$0xff]  ;;  %v1526_v13 = vmul.u32 9362, %v1523_v43  ;;  %v9746_v39 = vmul.u32 37449, %v1523_v43  ;;  %v1529_v63 = vmul.u32 37449, %v1524_v55  ;;  %v6868_v43 = vld [vmem:[%s13143_s2 + $0x30] sm:$0xff] }
 0x180   : > { %3570 = vst.msk [vmem:[#allocation3 + $0x50] sm:$0xff] %vm3559_vm7, %v3419_v36  ;;  %6115 = vrot.lane.b32.xlu2 %v5451_v38, %s8586_s4  ;;  %v3045_v3 = vpop.f32.mrf.mxu0  ;;  %v1479_v36 = vadd.s32 %v1478_v9, %v1469_v35  ;;  %v1503_v38 = vsel %vm1502_vm14, 1, %v13149_v28  ;;  %vm1506_vm15 = vc.u32 %v1504_v37, %v1500_v27  ;;  %v6870_v19 = vld [vmem:[%s13143_s2 + $0x40] sm:$0xff]  ;;  %v1508_v9 = vadd.s32 %v1504_v37, %v1500_v27 }
 0x181   : > { %3280 = vmatmul.f32.gmra.mxu1 %v2632_v46  ;;  %v3234_v14 = vadd.f32 %v3233_v62, %v3045_v3  ;;  %v1505_v31 = vadd.s32 %v1503_v38, %v1497_v59  ;;  %v1507_v35 = vsel %vm1506_vm15, 1, %v13149_v28  ;;  %7088 = vmatpush.msra.mxu3 %v6870_v19  ;;  %v1501_v46 = vshrl.u32 %v9713_v21, 16  ;;  %v6869_v59 = vld [vmem:[%s13143_s2 + $0x38] sm:$0xff]  ;;  %v2633_v38 = vld [vmem:[#allocation2 + $0xe8] sm:$0xff] }
 0x182   : > { %8085 = vmatmul.msk.f32.gmra.mxu2 %vm2689_vm6, %v2746_v11  ;;  %v1482_v61 = vadd.s32 %v1481_v5, %v1479_v36  ;;  %v9754_v11 = vmul.u32 9362, %v1524_v55  ;;  %v9757_v5 = vadd.s32 264, %v8967_v52  ;;  %v9760_v27 = vsub.s32 %v9621_v6, %v1452_v42  ;;  %v2747_v6 = vld [vmem:[#allocation2 + $0xe9] sm:$0xff] }
 0x183   : > { %8028 = vmatmul.msk.f32.gmra.mxu0 %vm2347_vm13, %v2404_v32  ;;  %v1509_v62 = vadd.s32 %v1507_v35, %v1505_v31  ;;  %vm1512_vm0 = vc.u32 %v1508_v9, 2454267026  ;;  %7089 = vmatpush.msra.mxu3 %v6869_v59  ;;  %v1530_v23 = vshll.u32 %v9746_v39, 16  ;;  %v6867_v19 = vld [vmem:[%s13143_s2 + $0x28] sm:$0xff] }
 0x184   : > { %13367 = vst [vmem:[#allocation9_spill] sm:$0xff] %v9757_v5  ;;  %v1532_v3 = vshll.u32 %v9754_v11, 16  ;;  %v1483_v42 = vshrl.u32 %v1482_v61, 4  ;;  %v1513_v31 = vsel %vm1512_vm0, 1, %v13149_v28  ;;  %v9780_v35 = vadd.s32 24, %v9757_v5  ;;  %v2405_v9 = vld [vmem:[#allocation2 + $0xe7] sm:$0xff] }
 0x185   : > { %v3421_v53 = vpop.f32.mrf.mxu2  ;;  %v1510_v37 = vadd.s32 %v1509_v62, %v1499_v26  ;;  %7090 = vmatpush.msra.mxu3 %v6868_v43  ;;  %vm1534_vm2 = vc.u32 %v1526_v13, %v1530_v23  ;;  %v1536_v55 = vadd.s32 %v1530_v23, %v1526_v13  ;;  %v6909_v26 = vld [vmem:[%s13143_s2 + $0x178] sm:$0xff]  ;;  %vm2691_vm4 = vcmp.ne.s32.totalorder %v9760_v27, 27 }
 0x186   : > { %v3422_v21 = vadd.f32 %v3421_v53, %v3234_v14  ;;  %v3236_v32 = vpop.f32.mrf.mxu1  ;;  %v1535_v61 = vsel %vm1534_vm2, 1, %v13149_v28  ;;  %7409 = vmatpush.msrb.mxu0 %v6909_v26  ;;  %v1484_v43 = vmul.u32 28, %v1483_v42  ;;  %vm2349_vm8 = vcmp.ne.s32.totalorder %v9760_v27, 0 }
 0x187   : > { %v5452_v36 = vld [vmem:[#allocation3 + $0x4c] sm:$0xff]  ;;  %v1511_v14 = vadd.s32 %v1510_v37, %v1501_v46  ;;  %7091 = vmatpush.msra.mxu3 %v6867_v19  ;;  %v1531_v46 = vshrl.u32 %v9746_v39, 16  ;;  %v1537_v62 = vadd.s32 %v1535_v61, %v1529_v63  ;;  %vm1538_vm5 = vc.u32 %v1536_v55, %v1532_v3  ;;  %v6864_v61 = vld [vmem:[%s13143_s2 + $0x10] sm:$0xff] }
 0x188   : > { %3571 = vst.msk [vmem:[#allocation3 + $0x58] sm:$0xff] %vm3559_vm7, %v3422_v21  ;;  %6117 = vrot.lane.b32.xlu0 %v5452_v36, %s8586_s4  ;;  %v3048_v13 = vpop.f32.mrf.mxu0  ;;  %v1539_v23 = vsel %vm1538_vm5, 1, %v13149_v28  ;;  %v1540_v21 = vadd.s32 %v1536_v55, %v1532_v3  ;;  %v6866_v37 = vld [vmem:[%s13143_s2 + $0x20] sm:$0xff]  ;;  %v1533_v36 = vshrl.u32 %v9754_v11, 16  ;;  %v1555_v39 = vand.u32 65535, %v9780_v35  ;;  %v6865_v3 = vld [vmem:[%s13143_s2 + $0x18] sm:$0xff] }
 0x189   : > { %3283 = vmatmul.f32.gmra.mxu1 %v2633_v38  ;;  %v3237_v59 = vadd.f32 %v3236_v32, %v3048_v13  ;;  %v1514_v53 = vadd.s32 %v1513_v31, %v1511_v14  ;;  %v1541_v26 = vadd.s32 %v1539_v23, %v1537_v62  ;;  %7092 = vmatpush.msra.mxu3 %v6866_v37  ;;  %v1556_v32 = vshrl.u32 %v9780_v35, 16 }
 0x18a   : > { %8086 = vmatmul.msk.f32.gmra.mxu2 %vm2690_vm1, %v2747_v6  ;;  %vm1544_vm6 = vc.u32 %v1540_v21, 2454267026  ;;  %v3620_v38 = vand.u32 65535, %v8967_v52  ;;  %v1558_v11 = vmul.u32 9362, %v1555_v39  ;;  %v9799_v31 = vmul.u32 37449, %v1555_v39 }
 0x18b   : > { %8029 = vmatmul.msk.f32.gmra.mxu0 %vm2348_vm3, %v2405_v9  ;;  %v1515_v63 = vshrl.u32 %v1514_v53, 4  ;;  %v1542_v42 = vadd.s32 %v1541_v26, %v1531_v46  ;;  %7093 = vmatpush.msra.mxu3 %v6865_v3  ;;  %v3621_v55 = vshrl.u32 %v8967_v52, 16  ;;  %v1545_v19 = vsel %vm1544_vm6, 1, %v13149_v28  ;;  %v2634_v53 = vld [vmem:[#allocation2 + $0xf0] sm:$0xff]  ;;  %v6863_v26 = vld [vmem:[%s13143_s2 + $0x8] sm:$0xff] }
 0x18c   : > { %v9806_v13 = vmul.u32 9362, %v1556_v32  ;;  %v2748_v46 = vld [vmem:[#allocation2 + $0xf1] sm:$0xff]  ;;  %v1561_v21 = vmul.u32 37449, %v1556_v32  ;;  %v9813_v37 = vsub.s32 %v9650_v54, %v1484_v43  ;;  %v1563_v39 = vshrl.u32 %v9799_v31, 16 }
 0x18d   : > { %v3424_v6 = vpop.f32.mrf.mxu2  ;;  %v1516_v14 = vmul.u32 28, %v1515_v63  ;;  %v1543_v23 = vadd.s32 %v1542_v42, %v1533_v36  ;;  %7094 = vmatpush.msra.mxu3 %v6864_v61  ;;  %v9820_v36 = vmul.u32 37449, %v3620_v38  ;;  %v2406_v32 = vld [vmem:[#allocation2 + $0xef] sm:$0xff]  ;;  %v6862_v61 = vld [vmem:[%s13143_s2] sm:$0xff] }
 0x18e   : > { %v3425_v40 = vadd.f32 %v3424_v6, %v3237_v59  ;;  %v3239_v9 = vpop.f32.mrf.mxu1  ;;  %v1562_v59 = vshll.u32 %v9799_v31, 16  ;;  %v1564_v63 = vshll.u32 %v9806_v13, 16  ;;  %vm2692_vm14 = vcmp.ne.s32.totalorder %v9813_v37, 27 }
 0x18f   : > { %v5453_v62 = vld [vmem:[#allocation3 + $0x54] sm:$0xff]  ;;  %v1546_v6 = vadd.s32 %v1545_v19, %v1543_v23  ;;  %7095 = vmatpush.msra.mxu3 %v6863_v26  ;;  %v9827_v43 = vsub.s32 %v9672_v58, %v1516_v14  ;;  %v3623_v19 = vmul.u32 9362, %v3620_v38  ;;  %v3627_v58 = vshll.u32 %v9820_v36, 16  ;;  %v6893_v14 = vld [vmem:[%s13143_s2 + $0xf8] sm:$0xff] }
 0x190   : > { %3572 = vst.msk [vmem:[#allocation3 + $0x60] sm:$0xff] %vm3559_vm7, %v3425_v40  ;;  %6119 = vrot.lane.b32.xlu1 %v5453_v62, %s8586_s4  ;;  %v3051_v3 = vpop.f32.mrf.mxu0  ;;  %vm1566_vm9 = vc.u32 %v1558_v11, %v1562_v59  ;;  %v1568_v42 = vadd.s32 %v1562_v59, %v1558_v11  ;;  %v9822_v40 = vmul.u32 9362, %v3621_v55  ;;  %v1565_v38 = vshrl.u32 %v9806_v13, 16 }
 0x191   : > { %3286 = vmatmul.f32.gmra.mxu1 %v2634_v53  ;;  %v3240_v54 = vadd.f32 %v3239_v9, %v3051_v3  ;;  %v1567_v31 = vsel %vm1566_vm9, 1, %v13149_v28  ;;  %v1547_v62 = vshrl.u32 %v1546_v6, 4  ;;  %7096 = vmatpush.msra.mxu3 %v6862_v61  ;;  %v3626_v53 = vmul.u32 37449, %v3621_v55  ;;  %v2749_v3 = vld [vmem:[#allocation2 + $0xf9] sm:$0xff] }
 0x192   : > { %8087 = vmatmul.msk.f32.gmra.mxu2 %vm2691_vm4, %v2748_v46  ;;  %v1569_v23 = vadd.s32 %v1567_v31, %v1561_v21  ;;  %vm1570_vm12 = vc.u32 %v1568_v42, %v1564_v63  ;;  %v1572_v11 = vadd.s32 %v1568_v42, %v1564_v63  ;;  %v3629_v21 = vshll.u32 %v9822_v40, 16  ;;  %v2635_v63 = vld [vmem:[#allocation2 + $0xf8] sm:$0xff] }
 0x193   : > { %8030 = vmatmul.msk.f32.gmra.mxu0 %vm2349_vm8, %v2406_v32  ;;  %v1571_v9 = vsel %vm1570_vm12, 1, %v13149_v28  ;;  %7245 = vmatpush.msrb.mxu3 %v6893_v14  ;;  %vm2350_vm15 = vcmp.ne.s32.totalorder %v9813_v37, 0  ;;  %vm3631_vm0 = vc.u32 %v3623_v19, %v3627_v58  ;;  %vm2693_vm1 = vcmp.ne.s32.totalorder %v9827_v43, 27  ;;  %v2407_v14 = vld [vmem:[#allocation2 + $0xf7] sm:$0xff] }
 0x194   : > { %v1573_v59 = vadd.s32 %v1571_v9, %v1569_v23  ;;  %vm1576_vm13 = vc.u32 %v1572_v11, 2454267026  ;;  %v1548_v32 = vmul.u32 28, %v1547_v62  ;;  %v3632_v13 = vsel %vm3631_vm0, 1, %v13149_v28 }
 0x195   : > { %v3427_v46 = vpop.f32.mrf.mxu2  ;;  %v3633_v42 = vadd.s32 %v3627_v58, %v3623_v19  ;;  %v3634_v31 = vadd.s32 %v3632_v13, %v3626_v53  ;;  %v3652_v61 = vand.u32 65535, %v8982_v57  ;;  %v3653_v23 = vshrl.u32 %v8982_v57, 16 }
 0x196   : > { %v3428_v26 = vadd.f32 %v3427_v46, %v3240_v54  ;;  %v3242_v27 = vpop.f32.mrf.mxu1  ;;  %v1574_v6 = vadd.s32 %v1573_v59, %v1563_v39  ;;  %v1577_v54 = vsel %vm1576_vm13, 1, %v13149_v28  ;;  %vm2351_vm2 = vcmp.ne.s32.totalorder %v9827_v43, 0 }
 0x197   : > { %v5454_v55 = vld [vmem:[#allocation3 + $0x5c] sm:$0xff]  ;;  %v3628_v62 = vshrl.u32 %v9820_v36, 16  ;;  %v3630_v19 = vshrl.u32 %v9822_v40, 16  ;;  %vm3635_vm3 = vc.u32 %v3633_v42, %v3629_v21  ;;  %v3637_v58 = vadd.s32 %v3633_v42, %v3629_v21 }
 0x198   : > { %3573 = vst.msk [vmem:[#allocation3 + $0x68] sm:$0xff] %vm3559_vm7, %v3428_v26  ;;  %6121 = vrot.lane.b32.xlu2 %v5454_v55, %s8586_s4  ;;  %v3054_v9 = vpop.f32.mrf.mxu0  ;;  %v1575_v39 = vadd.s32 %v1574_v6, %v1565_v38  ;;  %v3636_v53 = vsel %vm3635_vm3, 1, %v13149_v28  ;;  %v9859_v46 = vadd.s32 272, %v8967_v52  ;;  %v9862_v59 = vsub.s32 %v9716_v50, %v1548_v32 }
 0x199   : > { %3289 = vmatmul.f32.gmra.mxu1 %v2635_v63  ;;  %v3243_v11 = vadd.f32 %v3242_v27, %v3054_v9  ;;  %v3638_v26 = vadd.s32 %v3636_v53, %v3634_v31  ;;  %v9864_v36 = vmul.u32 37449, %v3652_v61  ;;  %vm3641_vm4 = vc.u32 %v3637_v58, 2454267026  ;;  %v2636_v9 = vld [vmem:[#allocation2 + $0x100] sm:$0xff] }
 0x19a   : > { %8088 = vmatmul.msk.f32.gmra.mxu2 %vm2692_vm14, %v2749_v3  ;;  %13368 = vst [vmem:[#allocation10_spill] sm:$0xff] %v9859_v46  ;;  %v1578_v38 = vadd.s32 %v1577_v54, %v1575_v39  ;;  %v9869_v40 = vadd.s32 24, %v9859_v46  ;;  %v9871_v27 = vmul.u32 9362, %v3653_v23  ;;  %v3655_v50 = vmul.u32 9362, %v3652_v61 }
 0x19b   : > { %8031 = vmatmul.msk.f32.gmra.mxu0 %vm2350_vm15, %v2407_v14  ;;  %v3639_v3 = vadd.s32 %v3638_v26, %v3628_v62  ;;  %v3659_v32 = vshll.u32 %v9864_v36, 16  ;;  %v3642_v13 = vsel %vm3641_vm4, 1, %v13149_v28  ;;  %v2750_v14 = vld [vmem:[#allocation2 + $0x101] sm:$0xff]  ;;  %vm2694_vm5 = vcmp.ne.s32.totalorder %v9862_v59, 27 }
 0x19c   : > { %v1579_v63 = vshrl.u32 %v1578_v38, 4  ;;  %v1587_v37 = vand.u32 65535, %v9869_v40  ;;  %v1588_v42 = vshrl.u32 %v9869_v40, 16  ;;  %v3658_v58 = vmul.u32 37449, %v3653_v23 }
 0x19d   : > { %v3430_v55 = vpop.f32.mrf.mxu2  ;;  %v3640_v53 = vadd.s32 %v3639_v3, %v3630_v19  ;;  %v3661_v26 = vshll.u32 %v9871_v27, 16  ;;  %v2408_v19 = vld [vmem:[#allocation2 + $0xff] sm:$0xff]  ;;  %vm2352_vm6 = vcmp.ne.s32.totalorder %v9862_v59, 0  ;;  %v3662_v3 = vshrl.u32 %v9871_v27, 16 }
 0x19e   : > { %v3431_v6 = vadd.f32 %v3430_v55, %v3243_v11  ;;  %v3245_v54 = vpop.f32.mrf.mxu1  ;;  %v1580_v39 = vmul.u32 28, %v1579_v63  ;;  %v1590_v62 = vmul.u32 9362, %v1587_v37  ;;  %v9882_v11 = vmul.u32 37449, %v1587_v37  ;;  %v6924_v55 = vld [vmem:[%s13143_s2 + $0x1f0] sm:$0xff] }
 0x19f   : > { %v5455_v31 = vld [vmem:[#allocation3 + $0x64] sm:$0xff]  ;;  %v9884_v38 = vmul.u32 9362, %v1588_v42  ;;  %v3643_v23 = vadd.s32 %v3642_v13, %v3640_v53  ;;  %vm9892_vm8 = vc.u32 %v3655_v50, %v3659_v32  ;;  %v3665_v37 = vadd.s32 %v3659_v32, %v3655_v50  ;;  %7574 = vmatpush.msrb.mxu1 %v6924_v55  ;;  %v2637_v55 = vld [vmem:[#allocation2 + $0x108] sm:$0xff] }
 0x1a0   : > { %3574 = vst.msk [vmem:[#allocation3 + $0x70] sm:$0xff] %vm3559_vm7, %v3431_v6  ;;  %6123 = vrot.lane.b32.xlu0 %v5455_v31, %s8586_s4  ;;  %v3057_v63 = vpop.f32.mrf.mxu0  ;;  %v1593_v21 = vmul.u32 37449, %v1588_v42  ;;  %v1594_v61 = vshll.u32 %v9882_v11, 16  ;;  %v9901_v13 = vsub.s32 %v9780_v35, %v1580_v39  ;;  %v1595_v53 = vshrl.u32 %v9882_v11, 16 }
 0x1a1   : > { %3292 = vmatmul.f32.gmra.mxu1 %v2636_v9  ;;  %v3246_v31 = vadd.f32 %v3245_v54, %v3057_v63  ;;  %v1596_v28 = vshll.u32 %v9884_v38, 16  ;;  %v3644_v27 = vshrl.u32 %v3643_v23, 4  ;;  %v1597_v46 = vshrl.u32 %v9884_v38, 16  ;;  %v2751_v38 = vld [vmem:[#allocation2 + $0x109] sm:$0xff]  ;;  %v5249_v23 = vld [vmem:[#allocation3 + $0x3] sm:$0xff] }
 0x1a2   : > { %8089 = vmatmul.msk.f32.gmra.mxu2 %vm2693_vm1, %v2750_v14  ;;  %vm1598_vm9 = vc.u32 %v1590_v62, %v1594_v61  ;;  %v1600_v50 = vadd.s32 %v1594_v61, %v1590_v62  ;;  %v13371_v32 = vmov 0   ;;  %vm3667_vm12 = vc.u32 %v3665_v37, %v3661_v26 }
 0x1a3   : > { %8032 = vmatmul.msk.f32.gmra.mxu0 %vm2351_vm2, %v2408_v19  ;;  %v3664_v42 = vsel %vm9892_vm8, 1, %v13371_v32  ;;  %v3645_v9 = vmul.u32 28, %v3644_v27  ;;  %v1599_v35 = vsel %vm1598_vm9, 1, %v13371_v32  ;;  %v3668_v39 = vsel %vm3667_vm12, 1, %v13371_v32 }
 0x1a4   : > { %v3666_v14 = vadd.s32 %v3664_v42, %v3658_v58  ;;  %v1601_v63 = vadd.s32 %v1599_v35, %v1593_v21  ;;  %vm1602_vm13 = vc.u32 %v1600_v50, %v1596_v28  ;;  %v1604_v43 = vadd.s32 %v1600_v50, %v1596_v28 }
 0x1a5   : > { %v3433_v54 = vpop.f32.mrf.mxu2  ;;  %vm2695_vm14 = vcmp.ne.s32.totalorder %v9901_v13, 27  ;;  %v9914_v62 = vsub.s32 %v8967_v52, %v3645_v9  ;;  %v1603_v6 = vsel %vm1602_vm13, 1, %v13371_v32  ;;  %v3669_v27 = vadd.s32 %v3665_v37, %v3661_v26 }
 0x1a6   : > { %v3434_v11 = vadd.f32 %v3433_v54, %v3246_v31  ;;  %v3248_v19 = vpop.f32.mrf.mxu1  ;;  %v3670_v58 = vadd.s32 %v3668_v39, %v3666_v14  ;;  %v6908_v31 = vld [vmem:[%s13143_s2 + $0x170] sm:$0xff]  ;;  %v1605_v28 = vadd.s32 %v1603_v6, %v1601_v63  ;;  %vm1608_vm15 = vc.u32 %v1604_v43, 2454267026  ;;  %v2409_v54 = vld [vmem:[#allocation2 + $0x107] sm:$0xff] }
 0x1a7   : > { %v5456_v61 = vld [vmem:[#allocation3 + $0x6c] sm:$0xff]  ;;  %13372 = vst [vmem:[#allocation11_spill] sm:$0xff] %v9914_v62  ;;  %v9923_v21 = vadd.s32 280, %v8967_v52  ;;  %7410 = vmatpush.msrb.mxu0 %v6908_v31  ;;  %v3685_v50 = vshrl.u32 %v9002_v1, 16  ;;  %vm13171_vm0 = vcmp.ne.s32.totalorder %v9914_v62, 0  ;;  %vm2353_vm1 = vcmp.ne.s32.totalorder %v9901_v13, 0 }
 0x1a8   : > { %3575 = vst.msk [vmem:[#allocation3 + $0x78] sm:$0xff] %vm3559_vm7, %v3434_v11  ;;  %6125 = vrot.lane.b32.xlu1 %v5456_v61, %s8586_s4  ;;  %v3060_v42 = vpop.f32.mrf.mxu0  ;;  %v1609_v26 = vsel %vm1608_vm15, 1, %v13371_v32  ;;  %v13374_v37 = vshrl.u32 %v9864_v36, 16  ;;  %vm3673_vm2 = vc.u32 %v3669_v27, 2454267026  ;;  %v5394_v14 = vsel %vm13171_vm0, %v5249_v23, 0.0 }
 0x1a9   : > { %13373 = vst [vmem:[#allocation12_spill] sm:$0xff] %v9923_v21  ;;  %3295 = vmatmul.f32.gmra.mxu1 %v2637_v55  ;;  %v3249_v35 = vadd.f32 %v3248_v19, %v3060_v42  ;;  %v1606_v39 = vadd.s32 %v1605_v28, %v1595_v53  ;;  %v3674_v11 = vsel %vm3673_vm2, 1, %v13371_v32  ;;  %v9937_v43 = vadd.s32 24, %v9923_v21  ;;  %v5252_v13 = vld [vmem:[#allocation3 + $0x1b] sm:$0xff] }
 0x1aa   : > { %v3671_v9 = vadd.s32 %v3670_v58, %v13374_v37  ;;  %8090 = vmatmul.msk.f32.gmra.mxu2 %vm2694_vm5, %v2751_v38  ;;  %v13375_v61 = vand.u32 65535, %v9002_v1  ;;  %v9947_v19 = vmul.u32 9362, %v3685_v50  ;;  %v3690_v53 = vmul.u32 37449, %v3685_v50  ;;  %v2638_v37 = vld [vmem:[#allocation2 + $0x110] sm:$0xff] }
 0x1ab   : > { %8033 = vmatmul.msk.f32.gmra.mxu0 %vm2352_vm6, %v2409_v54  ;;  %v1607_v38 = vadd.s32 %v1606_v39, %v1597_v46  ;;  %v9950_v23 = vadd.s32 288, %v8967_v52  ;;  %v1619_v58 = vand.u32 65535, %v9937_v43  ;;  %v1620_v31 = vshrl.u32 %v9937_v43, 16  ;;  %v2752_v39 = vld [vmem:[#allocation2 + $0x111] sm:$0xff] }
 0x1ac   : > { %v3672_v63 = vadd.s32 %v3671_v9, %v3662_v3  ;;  %v3687_v36 = vmul.u32 9362, %v13375_v61  ;;  %v13376_v6 = vmov %v13375_v61  ;;  %v3693_v46 = vshll.u32 %v9947_v19, 16 }
 0x1ad   : > { %v9943_v55 = vmul.u32 37449, %v13376_v6  ;;  %13377 = vst [vmem:[#allocation13_spill] sm:$0xff] %v9950_v23  ;;  %v3436_v3 = vpop.f32.mrf.mxu2  ;;  %v1610_v9 = vadd.s32 %v1609_v26, %v1607_v38  ;;  %v1622_v6 = vmul.u32 9362, %v1619_v58  ;;  %v9957_v21 = vmul.u32 37449, %v1619_v58 }
 0x1ae   : > { %v3675_v27 = vadd.s32 %v3674_v11, %v3672_v63  ;;  %v3437_v42 = vadd.f32 %v3436_v3, %v3249_v35  ;;  %v3251_v54 = vpop.f32.mrf.mxu1  ;;  %v9959_v11 = vmul.u32 9362, %v1620_v31  ;;  %v1625_v63 = vmul.u32 37449, %v1620_v31  ;;  %v2410_v3 = vld [vmem:[#allocation2 + $0x10f] sm:$0xff] }
 0x1af   : > { %v3691_v28 = vshll.u32 %v9943_v55, 16  ;;  %v5457_v50 = vld [vmem:[#allocation3 + $0x74] sm:$0xff]  ;;  %v1611_v35 = vshrl.u32 %v1610_v9, 4  ;;  %v1626_v5 = vshll.u32 %v9957_v21, 16 }
 0x1b0   : > { %v3676_v61 = vshrl.u32 %v3675_v27, 4  ;;  %3576 = vst.msk [vmem:[#allocation3 + $0x80] sm:$0xff] %vm3559_vm7, %v3437_v42  ;;  %6127 = vrot.lane.b32.xlu2 %v5457_v50, %s8586_s4  ;;  %v3063_v38 = vpop.f32.mrf.mxu0  ;;  %v1627_v27 = vshrl.u32 %v9957_v21, 16  ;;  %v1628_v58 = vshll.u32 %v9959_v11, 16  ;;  %v1629_v31 = vshrl.u32 %v9959_v11, 16  ;;  %v5697_v49 = vld [vmem:[#allocation3 + $0x77] sm:$0xff] }
 0x1b1   : > { %vm3695_vm3 = vc.u32 %v3687_v36, %v3691_v28  ;;  %3298 = vmatmul.f32.gmra.mxu1 %v2638_v37  ;;  %v3252_v50 = vadd.f32 %v3251_v54, %v3063_v38  ;;  %v1612_v9 = vmul.u32 28, %v1611_v35  ;;  %vm1630_vm4 = vc.u32 %v1622_v6, %v1626_v5  ;;  %v6892_v37 = vld [vmem:[%s13143_s2 + $0xf0] sm:$0xff]  ;;  %v2639_v38 = vld [vmem:[#allocation2 + $0x118] sm:$0xff] }
 0x1b2   : > { %v3677_v59 = vmul.u32 28, %v3676_v61  ;;  %8091 = vmatmul.msk.f32.gmra.mxu2 %vm2695_vm14, %v2752_v39  ;;  %v6100_v42 = vpop.permute.xlu0 %6099  ;;  %v3696_v26 = vsel %vm3695_vm3, 1, %v13371_v32  ;;  %v1632_v21 = vadd.s32 %v1626_v5, %v1622_v6  ;;  %v1631_v39 = vsel %vm1630_vm4, 1, %v13371_v32  ;;  %7246 = vmatpush.msrb.mxu3 %v6892_v37 }
 0x1b3   : > { %v6666_v7 = vsel %vm3559_vm7, %v5394_v14, %v6100_v42  ;;  %8034 = vmatmul.msk.f32.gmra.mxu0 %vm2353_vm1, %v2410_v3  ;;  %v1613_v54 = vsub.s32 %v9869_v40, %v1612_v9  ;;  %v3697_v11 = vadd.s32 %v3691_v28, %v3687_v36  ;;  %v3698_v14 = vadd.s32 %v3696_v26, %v3690_v53  ;;  %v2753_v3 = vld [vmem:[#allocation2 + $0x119] sm:$0xff] }
 0x1b4   : > { %v9973_v61 = vsub.s32 %v8982_v57, %v3677_v59  ;;  %7097 = vmatmul.f32.vlgmr.msra.gmra.mxu3 %v6666_v7  ;;  %v1633_v57 = vadd.s32 %v1631_v39, %v1625_v63  ;;  %vm1634_vm6 = vc.u32 %v1632_v21, %v1628_v58  ;;  %v1636_v5 = vadd.s32 %v1632_v21, %v1628_v58  ;;  %v2411_v42 = vld [vmem:[#allocation2 + $0x117] sm:$0xff] }
 0x1b5   : > { %v3439_v35 = vpop.f32.mrf.mxu2  ;;  %vm2696_vm8 = vcmp.ne.s32.totalorder %v1613_v54, 27  ;;  %vm2354_vm9 = vcmp.ne.s32.totalorder %v1613_v54, 0  ;;  %v1635_v36 = vsel %vm1634_vm6, 1, %v13371_v32  ;;  %vm3699_vm13 = vc.u32 %v3697_v11, %v3693_v46 }
 0x1b6   : > { %13378 = vst [vmem:[#allocation14_spill] sm:$0xff] %v9973_v61  ;;  %vm5154_vm5 = vcmp.ne.s32.totalorder %v9973_v61, 0  ;;  %v3440_v59 = vadd.f32 %v3439_v35, %v3252_v50  ;;  %v3254_v6 = vpop.f32.mrf.mxu1  ;;  %vm1640_vm12 = vc.u32 %v1636_v5, 2454267026  ;;  %v3701_v53 = vadd.s32 %v3697_v11, %v3693_v46 }
 0x1b7   : > { %v5395_v7 = vsel %vm5154_vm5, %v5250_v20, 0.0  ;;  %v5458_v40 = vld [vmem:[#allocation3 + $0x7c] sm:$0xff]  ;;  %v1637_v28 = vadd.s32 %v1635_v36, %v1633_v57  ;;  %v1641_v63 = vsel %vm1640_vm12, 1, %v13371_v32  ;;  %v3700_v20 = vsel %vm3699_vm13, 1, %v13371_v32 }
 0x1b8   : > { %3577 = vst.msk [vmem:[#allocation3 + $0x88] sm:$0xff] %vm3559_vm7, %v3440_v59  ;;  %6129 = vrot.lane.b32.xlu0 %v5458_v40, %s8586_s4  ;;  %v9991_v26 = vadd.s32 24, %v9950_v23  ;;  %v3066_v58 = vpop.f32.mrf.mxu0  ;;  %v3702_v50 = vadd.s32 %v3700_v20, %v3698_v14  ;;  %vm3705_vm14 = vc.u32 %v3701_v53, 2454267026  ;;  %v9995_v9 = vsel %vm2320_vm11, %v5252_v13, 0.0 }
 0x1b9   : > { %v9998_v46 = vadd.s32 296, %v8967_v52  ;;  %3301 = vmatmul.f32.gmra.mxu1 %v2639_v38  ;;  %v3255_v37 = vadd.f32 %v3254_v6, %v3066_v58  ;;  %v1638_v39 = vadd.s32 %v1637_v28, %v1627_v27  ;;  %v3706_v11 = vsel %vm3705_vm14, 1, %v13371_v32  ;;  %v2412_v38 = vld [vmem:[#allocation2 + $0x11f] sm:$0xff] }
 0x1ba   : > { %8092 = vmatmul.msk.f32.gmra.mxu2 %vm2696_vm8, %v2753_v3  ;;  %v6102_v21 = vpop.permute.xlu0 %6101  ;;  %v1651_v35 = vand.u32 65535, %v9991_v26  ;;  %v13380_v57 = vshrl.u32 %v9943_v55, 16  ;;  %v1652_v59 = vshrl.u32 %v9991_v26, 16  ;;  %v13381_v36 = vshrl.u32 %v9947_v19, 16 }
 0x1bb   : > { %13379 = vst [vmem:[#allocation15_spill] sm:$0xff] %v9998_v46  ;;  %v6667_v14 = vsel %vm3559_vm7, %v5395_v7, %v6102_v21  ;;  %v10008_v13 = vadd.s32 24, %v9998_v46  ;;  %8035 = vmatmul.msk.f32.gmra.mxu0 %vm2354_vm9, %v2411_v42  ;;  %v1639_v40 = vadd.s32 %v1638_v39, %v1629_v31  ;;  %v2640_v31 = vld [vmem:[#allocation2 + $0x120] sm:$0xff] }
 0x1bc   : > { %v3703_v5 = vadd.s32 %v3702_v50, %v13380_v57  ;;  %7100 = vmatmul.f32.gmra.mxu3 %v6667_v14  ;;  %v1654_v6 = vmul.u32 9362, %v1651_v35  ;;  %v1655_v27 = vmul.u32 37449, %v1651_v35  ;;  %v10014_v53 = vmul.u32 9362, %v1652_v59 }
 0x1bd   : > { %v3442_v3 = vpop.f32.mrf.mxu2  ;;  %v1657_v55 = vmul.u32 37449, %v1652_v59  ;;  %v1683_v28 = vand.u32 65535, %v10008_v13  ;;  %v1642_v58 = vadd.s32 %v1641_v63, %v1639_v40  ;;  %v1684_v19 = vshrl.u32 %v10008_v13, 16 }
 0x1be   : > { %v3704_v7 = vadd.s32 %v3703_v5, %v13381_v36  ;;  %v3443_v20 = vadd.f32 %v3442_v3, %v3255_v37  ;;  %v1658_v50 = vshll.u32 %v1655_v27, 16  ;;  %v1659_v21 = vshrl.u32 %v1655_v27, 16  ;;  %v3257_v54 = vpop.f32.mrf.mxu1 }
 0x1bf   : > { %v5459_v42 = vld [vmem:[#allocation3 + $0x84] sm:$0xff]  ;;  %v1660_v35 = vshll.u32 %v10014_v53, 16  ;;  %v1661_v14 = vshrl.u32 %v10014_v53, 16  ;;  %v1643_v57 = vshrl.u32 %v1642_v58, 4  ;;  %v1686_v63 = vmul.u32 9362, %v1683_v28 }
 0x1c0   : > { %v3707_v39 = vadd.s32 %v3706_v11, %v3704_v7  ;;  %3578 = vst.msk [vmem:[#allocation3 + $0x90] sm:$0xff] %vm3559_vm7, %v3443_v20  ;;  %6131 = vrot.lane.b32.xlu1 %v5459_v42, %s8586_s4  ;;  %vm1662_vm15 = vc.u32 %v1654_v6, %v1658_v50  ;;  %v1664_v37 = vadd.s32 %v1658_v50, %v1654_v6  ;;  %v3069_v5 = vpop.f32.mrf.mxu0  ;;  %v10023_v27 = vmul.u32 37449, %v1683_v28  ;;  %v2754_v20 = vld [vmem:[#allocation2 + $0x121] sm:$0xff] }
 0x1c1   : > { %v1663_v40 = vsel %vm1662_vm15, 1, %v13371_v32  ;;  %v10025_v11 = vmul.u32 9362, %v1684_v19  ;;  %3304 = vmatmul.f32.gmra.mxu1 %v2640_v31  ;;  %v1644_v3 = vmul.u32 28, %v1643_v57  ;;  %v3258_v7 = vadd.f32 %v3257_v54, %v3069_v5  ;;  %v6932_v54 = vld [vmem:[%s13143_s2 + $0x230] sm:$0xff] }
 0x1c2   : > { %v3708_v59 = vshrl.u32 %v3707_v39, 4  ;;  %v6104_v36 = vpop.permute.xlu1 %6103  ;;  %v1665_v53 = vadd.s32 %v1663_v40, %v1657_v55  ;;  %vm1666_vm1 = vc.u32 %v1664_v37, %v1660_v35  ;;  %v1668_v6 = vadd.s32 %v1664_v37, %v1660_v35  ;;  %v6923_v55 = vld [vmem:[%s13143_s2 + $0x1e8] sm:$0xff]  ;;  %7746 = vmatpush.msrb.mxu2 %v6932_v54 }
 0x1c3   : > { %v1667_v58 = vsel %vm1666_vm1, 1, %v13371_v32  ;;  %v1689_v50 = vmul.u32 37449, %v1684_v19  ;;  %v1645_v39 = vsub.s32 %v9937_v43, %v1644_v3  ;;  %v1690_v28 = vshll.u32 %v10023_v27, 16  ;;  %v5251_v35 = vld [vmem:[#allocation3 + $0x13] sm:$0xff]  ;;  %7575 = vmatpush.msrb.mxu1 %v6923_v55 }
 0x1c4   : > { %v3709_v42 = vmul.u32 28, %v3708_v59  ;;  %v1669_v46 = vadd.s32 %v1667_v58, %v1665_v53  ;;  %v1691_v23 = vshrl.u32 %v10023_v27, 16  ;;  %vm1672_vm2 = vc.u32 %v1668_v6, 2454267026  ;;  %v2641_v40 = vld [vmem:[#allocation2 + $0x128] sm:$0xff] }
 0x1c5   : > { %v3445_v19 = vpop.f32.mrf.mxu2  ;;  %v1692_v43 = vshll.u32 %v10025_v11, 16  ;;  %v1693_v57 = vshrl.u32 %v10025_v11, 16  ;;  %vm2697_vm3 = vcmp.ne.s32.totalorder %v1645_v39, 27  ;;  %vm2355_vm4 = vcmp.ne.s32.totalorder %v1645_v39, 0 }
 0x1c6   : > { %v10038_v31 = vsub.s32 %v9002_v1, %v3709_v42  ;;  %v3446_v37 = vadd.f32 %v3445_v19, %v3258_v7  ;;  %v1670_v5 = vadd.s32 %v1669_v46, %v1659_v21  ;;  %8093 = vmatmul.msk.f32.gmra.mxu2 %vm2697_vm3, %v2754_v20  ;;  %8036 = vmatmul.msk.f32.gmra.mxu0 %vm2355_vm4, %v2412_v38  ;;  %v3260_v59 = vpop.f32.mrf.mxu1  ;;  %v1673_v27 = vsel %vm1672_vm2, 1, %v13371_v32 }
 0x1c7   : > { %v5460_v1 = vld [vmem:[#allocation3 + $0x8c] sm:$0xff]  ;;  %vm1694_vm8 = vc.u32 %v1686_v63, %v1690_v28  ;;  %v1696_v3 = vadd.s32 %v1690_v28, %v1686_v63  ;;  %v3717_v21 = vshrl.u32 %v9028_v15, 16  ;;  %v13383_v28 = vand.u32 65535, %v9028_v15 }
 0x1c8   : > { %13382 = vst [vmem:[#allocation16_spill] sm:$0xff] %v10038_v31  ;;  %vm5155_vm6 = vcmp.ne.s32.totalorder %v10038_v31, 0  ;;  %6133 = vrot.lane.b32.xlu2 %v5460_v1, %s8586_s4  ;;  %v1671_v7 = vadd.s32 %v1670_v5, %v1661_v14  ;;  %v1695_v46 = vsel %vm1694_vm8, 1, %v13371_v32  ;;  %v3072_v53 = vpop.f32.mrf.mxu0 }
 0x1c9   : > { %v5396_v11 = vsel %vm5155_vm6, %v5251_v35, 0.0  ;;  %3579 = vst.msk [vmem:[#allocation3 + $0x98] sm:$0xff] %vm3559_vm7, %v3446_v37  ;;  %v1697_v20 = vadd.s32 %v1695_v46, %v1689_v50  ;;  %vm1698_vm9 = vc.u32 %v1696_v3, %v1692_v43  ;;  %v1700_v42 = vadd.s32 %v1696_v3, %v1692_v43  ;;  %3307 = vmatmul.f32.gmra.mxu1 %v2641_v40 }
 0x1ca   : > { %v6668_v38 = vsel %vm3559_vm7, %v5396_v11, %v6104_v36  ;;  %v1674_v63 = vadd.s32 %v1673_v27, %v1671_v7  ;;  %v6106_v58 = vpop.permute.xlu1 %6105  ;;  %v3261_v6 = vadd.f32 %v3260_v59, %v3072_v53  ;;  %v1699_v39 = vsel %vm1698_vm9, 1, %v13371_v32  ;;  %v2642_v53 = vld [vmem:[#allocation2 + $0x130] sm:$0xff] }
 0x1cb   : > { %7103 = vmatmul.f32.gmra.mxu3 %v6668_v38  ;;  %v3719_v14 = vmul.u32 9362, %v13383_v28  ;;  %v6669_v54 = vsel %vm3559_vm7, %v9995_v9, %v6106_v58  ;;  %v1701_v55 = vadd.s32 %v1699_v39, %v1697_v20  ;;  %vm1704_vm12 = vc.u32 %v1700_v42, 2454267026  ;;  %v2413_v58 = vld [vmem:[#allocation2 + $0x127] sm:$0xff] }
 0x1cc   : > { %v13384_v36 = vmov %v13383_v28  ;;  %v1675_v35 = vshrl.u32 %v1674_v63, 4  ;;  %v1705_v19 = vsel %vm1704_vm12, 1, %v13371_v32  ;;  %v3721_v43 = vmul.u32 9362, %v3717_v21 }
 0x1cd   : > { %v3720_v50 = vmul.u32 37449, %v13384_v36  ;;  %v3722_v37 = vmul.u32 37449, %v3717_v21  ;;  %v3448_v5 = vpop.f32.mrf.mxu2  ;;  %v1702_v59 = vadd.s32 %v1701_v55, %v1691_v23  ;;  %v10060_v27 = vadd.s32 304, %v8967_v52  ;;  %v2755_v21 = vld [vmem:[#allocation2 + $0x129] sm:$0xff] }
 0x1ce   : > { %v1676_v3 = vmul.u32 28, %v1675_v35  ;;  %v3449_v11 = vadd.f32 %v3448_v5, %v3261_v6  ;;  %v3725_v9 = vshll.u32 %v3721_v43, 16  ;;  %v3726_v7 = vshrl.u32 %v3721_v43, 16  ;;  %v3263_v46 = vpop.f32.mrf.mxu1 }
 0x1cf   : > { %v3723_v1 = vshll.u32 %v3720_v50, 16  ;;  %v3724_v40 = vshrl.u32 %v3720_v50, 16  ;;  %13385 = vst [vmem:[#allocation17_spill] sm:$0xff] %v10060_v27  ;;  %v1703_v20 = vadd.s32 %v1702_v59, %v1693_v57  ;;  %v10063_v63 = vadd.s32 24, %v10060_v27 }
 0x1d0   : > { %v5461_v38 = vld [vmem:[#allocation3 + $0x94] sm:$0xff]  ;;  %v1677_v23 = vsub.s32 %v9991_v26, %v1676_v3  ;;  %3580 = vst.msk [vmem:[#allocation3 + $0xa0] sm:$0xff] %vm3559_vm7, %v3449_v11  ;;  %v3748_v39 = vand.u32 65535, %v9174_v8  ;;  %v3749_v28 = vshrl.u32 %v9174_v8, 16  ;;  %v3075_v55 = vpop.f32.mrf.mxu0 }
 0x1d1   : > { %vm3727_vm13 = vc.u32 %v3719_v14, %v3723_v1  ;;  %v3729_v42 = vadd.s32 %v3723_v1, %v3719_v14  ;;  %6135 = vrot.lane.b32.xlu0 %v5461_v38, %s8586_s4  ;;  %v1706_v57 = vadd.s32 %v1705_v19, %v1703_v20  ;;  %v6907_v26 = vld [vmem:[%s13143_s2 + $0x168] sm:$0xff]  ;;  %3310 = vmatmul.f32.gmra.mxu1 %v2642_v53  ;;  %v1715_v19 = vand.u32 65535, %v10063_v63 }
 0x1d2   : > { %v3728_v6 = vsel %vm3727_vm13, 1, %v13371_v32  ;;  %vm2698_vm15 = vcmp.ne.s32.totalorder %v1677_v23, 27  ;;  %vm2356_vm1 = vcmp.ne.s32.totalorder %v1677_v23, 0  ;;  %v3264_v50 = vadd.f32 %v3263_v46, %v3075_v55  ;;  %7411 = vmatpush.msrb.mxu0 %v6907_v26  ;;  %v2643_v55 = vld [vmem:[#allocation2 + $0x138] sm:$0xff] }
 0x1d3   : > { %v3730_v14 = vadd.s32 %v3728_v6, %v3722_v37  ;;  %vm3731_vm14 = vc.u32 %v3729_v42, %v3725_v9  ;;  %v3733_v36 = vadd.s32 %v3729_v42, %v3725_v9  ;;  %7106 = vmatmul.f32.gmra.mxu3 %v6669_v54  ;;  %8094 = vmatmul.msk.f32.gmra.mxu2 %vm2698_vm15, %v2755_v21  ;;  %v1707_v43 = vshrl.u32 %v1706_v57, 4 }
 0x1d4   : > { %v3732_v35 = vsel %vm3731_vm14, 1, %v13371_v32  ;;  %8037 = vmatmul.msk.f32.gmra.mxu0 %vm2356_vm1, %v2413_v58  ;;  %v1716_v59 = vshrl.u32 %v10063_v63, 16  ;;  %v3751_v1 = vmul.u32 9362, %v3748_v39  ;;  %v10078_v3 = vmul.u32 37449, %v3748_v39  ;;  %v2756_v58 = vld [vmem:[#allocation2 + $0x131] sm:$0xff] }
 0x1d5   : > { %v3734_v5 = vadd.s32 %v3732_v35, %v3730_v14  ;;  %vm3737_vm2 = vc.u32 %v3733_v36, 2454267026  ;;  %v1708_v54 = vmul.u32 28, %v1707_v43  ;;  %v3451_v9 = vpop.f32.mrf.mxu2  ;;  %v1718_v46 = vmul.u32 9362, %v1715_v19 }
 0x1d6   : > { %v3738_v37 = vsel %vm3737_vm2, 1, %v13371_v32  ;;  %v1719_v38 = vmul.u32 37449, %v1715_v19  ;;  %v3452_v53 = vadd.f32 %v3451_v9, %v3264_v50  ;;  %v10080_v20 = vmul.u32 9362, %v1716_v59  ;;  %v3266_v36 = vpop.f32.mrf.mxu1 }
 0x1d7   : > { %v3735_v11 = vadd.s32 %v3734_v5, %v3724_v40  ;;  %v1721_v42 = vmul.u32 37449, %v1716_v59  ;;  %v10082_v23 = vmul.u32 9362, %v3749_v28  ;;  %v1709_v21 = vsub.s32 %v10008_v13, %v1708_v54  ;;  %v5462_v57 = vld [vmem:[#allocation3 + $0x9c] sm:$0xff] }
 0x1d8   : > { %v1722_v39 = vshll.u32 %v1719_v38, 16  ;;  %v1723_v14 = vshrl.u32 %v1719_v38, 16  ;;  %3581 = vst.msk [vmem:[#allocation3 + $0xa8] sm:$0xff] %vm3559_vm7, %v3452_v53  ;;  %v2414_v40 = vld [vmem:[#allocation2 + $0x12f] sm:$0xff]  ;;  %6137 = vrot.lane.b32.xlu1 %v5462_v57, %s8586_s4  ;;  %v1724_v26 = vshll.u32 %v10080_v20, 16  ;;  %v1725_v50 = vshrl.u32 %v10080_v20, 16 }
 0x1d9   : > { %v3736_v6 = vadd.s32 %v3735_v11, %v3726_v7  ;;  %v3754_v35 = vmul.u32 37449, %v3749_v28  ;;  %v3755_v43 = vshll.u32 %v10078_v3, 16  ;;  %vm2699_vm3 = vcmp.ne.s32.totalorder %v1709_v21, 27  ;;  %v3078_v7 = vpop.f32.mrf.mxu0  ;;  %3313 = vmatmul.f32.gmra.mxu1 %v2643_v55 }
 0x1da   : > { %vm2357_vm4 = vcmp.ne.s32.totalorder %v1709_v21, 0  ;;  %vm1726_vm8 = vc.u32 %v1718_v46, %v1722_v39  ;;  %v1728_v19 = vadd.s32 %v1722_v39, %v1718_v46  ;;  %v3267_v59 = vadd.f32 %v3266_v36, %v3078_v7  ;;  %v2644_v36 = vld [vmem:[#allocation2 + $0x140] sm:$0xff] }
 0x1db   : > { %v3739_v13 = vadd.s32 %v3738_v37, %v3736_v6  ;;  %v1727_v5 = vsel %vm1726_vm8, 1, %v13371_v32  ;;  %v3756_v54 = vshrl.u32 %v10078_v3, 16  ;;  %8095 = vmatmul.msk.f32.gmra.mxu2 %vm2699_vm3, %v2756_v58  ;;  %v3757_v28 = vshll.u32 %v10082_v23, 16 }
 0x1dc   : > { %8038 = vmatmul.msk.f32.gmra.mxu0 %vm2357_vm4, %v2414_v40  ;;  %v1729_v9 = vadd.s32 %v1727_v5, %v1721_v42  ;;  %v3758_v38 = vshrl.u32 %v10082_v23, 16  ;;  %vm1730_vm9 = vc.u32 %v1728_v19, %v1724_v26  ;;  %v1732_v37 = vadd.s32 %v1728_v19, %v1724_v26  ;;  %v5253_v23 = vld [vmem:[#allocation3 + $0x23] sm:$0xff]  ;;  %v6108_v26 = vpop.permute.xlu2 %6107 }
 0x1dd   : > { %v3740_v11 = vshrl.u32 %v3739_v13, 4  ;;  %vm3759_vm12 = vc.u32 %v3751_v1, %v3755_v43  ;;  %v3761_v53 = vadd.s32 %v3755_v43, %v3751_v1  ;;  %v1731_v21 = vsel %vm1730_vm9, 1, %v13371_v32  ;;  %v3454_v6 = vpop.f32.mrf.mxu2 }
 0x1de   : > { %v3760_v46 = vsel %vm3759_vm12, 1, %v13371_v32  ;;  %v10097_v3 = vadd.s32 312, %v8967_v52  ;;  %v1733_v58 = vadd.s32 %v1731_v21, %v1729_v9  ;;  %vm1736_vm13 = vc.u32 %v1732_v37, 2454267026  ;;  %v6891_v37 = vld [vmem:[%s13143_s2 + $0xe8] sm:$0xff] }
 0x1df   : > { %v3741_v20 = vmul.u32 28, %v3740_v11  ;;  %v3762_v42 = vadd.s32 %v3760_v46, %v3754_v35  ;;  %vm3763_vm14 = vc.u32 %v3761_v53, %v3757_v28  ;;  %v1737_v55 = vsel %vm1736_vm13, 1, %v13371_v32  ;;  %v5463_v40 = vld [vmem:[#allocation3 + $0xa4] sm:$0xff]  ;;  %7247 = vmatpush.msrb.mxu3 %v6891_v37 }
 0x1e0   : > { %13386 = vst [vmem:[#allocation18_spill] sm:$0xff] %v10097_v3  ;;  %v3764_v1 = vsel %vm3763_vm14, 1, %v13371_v32  ;;  %v3765_v39 = vadd.s32 %v3761_v53, %v3757_v28  ;;  %v1734_v43 = vadd.s32 %v1733_v58, %v1723_v14  ;;  %v3455_v7 = vadd.f32 %v3454_v6, %v3267_v59  ;;  %6139 = vrot.lane.b32.xlu2 %v5463_v40, %s8586_s4  ;;  %v3269_v28 = vpop.f32.mrf.mxu1 }
 0x1e1   : > { %v10100_v57 = vsub.s32 %v9028_v15, %v3741_v20  ;;  %v3766_v13 = vadd.s32 %v3764_v1, %v3762_v42  ;;  %v10106_v35 = vadd.s32 24, %v10097_v3  ;;  %v3081_v15 = vpop.f32.mrf.mxu0  ;;  %v3780_v5 = vand.u32 65535, %v9190_v44  ;;  %3316 = vmatmul.f32.gmra.mxu1 %v2644_v36 }
 0x1e2   : > { %vm3769_vm1 = vc.u32 %v3765_v39, 2454267026  ;;  %v3781_v19 = vshrl.u32 %v9190_v44, 16  ;;  %v1735_v9 = vadd.s32 %v1734_v43, %v1725_v50  ;;  %3582 = vst.msk [vmem:[#allocation3 + $0xb0] sm:$0xff] %vm3559_vm7, %v3455_v7  ;;  %v3270_v46 = vadd.f32 %v3269_v28, %v3081_v15 }
 0x1e3   : > { %13387 = vst [vmem:[#allocation19_spill] sm:$0xff] %v10100_v57  ;;  %vm5156_vm15 = vcmp.ne.s32.totalorder %v10100_v57, 0  ;;  %v3767_v14 = vadd.s32 %v3766_v13, %v3756_v54  ;;  %v3770_v59 = vsel %vm3769_vm1, 1, %v13371_v32  ;;  %v1747_v20 = vand.u32 65535, %v10106_v35 }
 0x1e4   : > { %v5398_v11 = vsel %vm5156_vm15, %v5253_v23, 0.0  ;;  %v1748_v21 = vshrl.u32 %v10106_v35, 16  ;;  %v1738_v50 = vadd.s32 %v1737_v55, %v1735_v9  ;;  %v3783_v6 = vmul.u32 9362, %v3780_v5 }
 0x1e5   : > { %v6670_v53 = vsel %vm3559_vm7, %v5398_v11, %v6108_v26  ;;  %v3768_v54 = vadd.s32 %v3767_v14, %v3758_v38  ;;  %v10121_v58 = vmul.u32 37449, %v3780_v5  ;;  %v1750_v42 = vmul.u32 9362, %v1747_v20  ;;  %v2645_v38 = vld [vmem:[#allocation2 + $0x148] sm:$0xff] }
 0x1e6   : > { %7109 = vmatmul.f32.gmra.mxu3 %v6670_v53  ;;  %v1751_v23 = vmul.u32 37449, %v1747_v20  ;;  %v10123_v1 = vmul.u32 9362, %v1748_v21  ;;  %v1753_v39 = vmul.u32 37449, %v1748_v21  ;;  %v1739_v40 = vshrl.u32 %v1738_v50, 4  ;;  %v2757_v20 = vld [vmem:[#allocation2 + $0x139] sm:$0xff] }
 0x1e7   : > { %v3771_v36 = vadd.s32 %v3770_v59, %v3768_v54  ;;  %v10125_v26 = vmul.u32 9362, %v3781_v19  ;;  %v3786_v43 = vmul.u32 37449, %v3781_v19  ;;  %v3787_v9 = vshll.u32 %v10121_v58, 16  ;;  %v2415_v50 = vld [vmem:[#allocation2 + $0x137] sm:$0xff] }
 0x1e8   : > { %v1754_v13 = vshll.u32 %v1751_v23, 16  ;;  %v1755_v7 = vshrl.u32 %v1751_v23, 16  ;;  %v1756_v15 = vshll.u32 %v10123_v1, 16  ;;  %v1757_v55 = vshrl.u32 %v10123_v1, 16  ;;  %v3457_v1 = vpop.f32.mrf.mxu2 }
 0x1e9   : > { %v1740_v11 = vmul.u32 28, %v1739_v40  ;;  %v3772_v5 = vshrl.u32 %v3771_v36, 4  ;;  %v3788_v14 = vshrl.u32 %v10121_v58, 16  ;;  %v3789_v59 = vshll.u32 %v10125_v26, 16  ;;  %v5464_v19 = vld [vmem:[#allocation3 + $0xac] sm:$0xff]  ;;  %3319 = vmatmul.f32.gmra.mxu1 %v2645_v38 }
 0x1ea   : > { %vm1758_vm2 = vc.u32 %v1750_v42, %v1754_v13  ;;  %v1760_v28 = vadd.s32 %v1754_v13, %v1750_v42  ;;  %v3790_v37 = vshrl.u32 %v10125_v26, 16  ;;  %vm3791_vm3 = vc.u32 %v3783_v6, %v3787_v9  ;;  %6141 = vrot.lane.b32.xlu0 %v5464_v19, %s8586_s4  ;;  %v6110_v13 = vpop.permute.xlu2 %6109  ;;  %v10148_v19 = vpop.permute.xlu1 %6113 }
 0x1eb   : > { %v1741_v53 = vsub.s32 %v10063_v63, %v1740_v11  ;;  %v3773_v21 = vmul.u32 28, %v3772_v5  ;;  %v1759_v54 = vsel %vm1758_vm2, 1, %v13371_v32  ;;  %v3792_v42 = vsel %vm3791_vm3, 1, %v13371_v32  ;;  %v5254_v63 = vld [vmem:[#allocation3 + $0x2b] sm:$0xff]  ;;  %v10141_v5 = vld [vmem:[#allocation3 + $0x3b] sm:$0xff] }
 0x1ec   : > { %v1761_v23 = vadd.s32 %v1759_v54, %v1753_v39  ;;  %vm1762_vm4 = vc.u32 %v1760_v28, %v1756_v15  ;;  %v1764_v58 = vadd.s32 %v1760_v28, %v1756_v15  ;;  %v3793_v38 = vadd.s32 %v3787_v9, %v3783_v6  ;;  %v3084_v6 = vpop.f32.mrf.mxu0 }
 0x1ed   : > { %vm2700_vm8 = vcmp.ne.s32.totalorder %v1741_v53, 27  ;;  %v10138_v40 = vsub.s32 %v9174_v8, %v3773_v21  ;;  %vm2358_vm9 = vcmp.ne.s32.totalorder %v1741_v53, 0  ;;  %v1763_v36 = vsel %vm1762_vm4, 1, %v13371_v32 }
 0x1ee   : > { %8096 = vmatmul.msk.f32.gmra.mxu2 %vm2700_vm8, %v2757_v20  ;;  %8039 = vmatmul.msk.f32.gmra.mxu0 %vm2358_vm9, %v2415_v50  ;;  %v1765_v11 = vadd.s32 %v1763_v36, %v1761_v23  ;;  %vm1768_vm12 = vc.u32 %v1764_v58, 2454267026  ;;  %v3794_v39 = vadd.s32 %v3792_v42, %v3786_v43  ;;  %v3458_v28 = vadd.f32 %v3457_v1, %v3270_v46  ;;  %v2646_v58 = vld [vmem:[#allocation2 + $0x150] sm:$0xff] }
 0x1ef   : > { %13388 = vst [vmem:[#allocation20_spill] sm:$0xff] %v10138_v40  ;;  %vm5157_vm13 = vcmp.ne.s32.totalorder %v10138_v40, 0  ;;  %v1769_v15 = vsel %vm1768_vm12, 1, %v13371_v32  ;;  %v10146_v8 = vadd.s32 320, %v8967_v52  ;;  %vm3795_vm14 = vc.u32 %v3793_v38, %v3789_v59 }
 0x1f0   : > { %v5399_v53 = vsel %vm5157_vm13, %v5254_v63, 0.0  ;;  %v1766_v20 = vadd.s32 %v1765_v11, %v1755_v7  ;;  %v3797_v21 = vadd.s32 %v3793_v38, %v3789_v59  ;;  %v3796_v9 = vsel %vm3795_vm14, 1, %v13371_v32  ;;  %3583 = vst.msk [vmem:[#allocation3 + $0xb8] sm:$0xff] %vm3559_vm7, %v3458_v28  ;;  %v3272_v7 = vpop.f32.mrf.mxu1 }
 0x1f1   : > { %13389 = vst [vmem:[#allocation21_spill] sm:$0xff] %v10146_v8  ;;  %v6671_v43 = vsel %vm3559_vm7, %v5399_v53, %v6110_v13  ;;  %v10156_v46 = vadd.s32 24, %v10146_v8  ;;  %v5938_v50 = vsel %vm13171_vm0, %v10141_v5, 0.0  ;;  %v3798_v23 = vadd.s32 %v3796_v9, %v3794_v39  ;;  %3322 = vmatmul.f32.gmra.mxu1 %v2646_v58  ;;  %v3460_v8 = vpop.f32.mrf.mxu2 }
 0x1f2   : > { %7112 = vmatmul.f32.gmra.mxu3 %v6671_v43  ;;  %v1767_v54 = vadd.s32 %v1766_v20, %v1757_v55  ;;  %vm3801_vm1 = vc.u32 %v3797_v21, 2454267026  ;;  %v10163_v59 = vsel %vm3559_vm7, %v5938_v50, %v10148_v19  ;;  %v3273_v36 = vadd.f32 %v3272_v7, %v3084_v6 }
 0x1f3   : > { %v3802_v42 = vsel %vm3801_vm1, 1, %v13371_v32  ;;  %v1779_v1 = vand.u32 65535, %v10156_v46  ;;  %v1780_v63 = vshrl.u32 %v10156_v46, 16  ;;  %v3799_v11 = vadd.s32 %v3798_v23, %v3788_v14 }
 0x1f4   : > { %v1770_v13 = vadd.s32 %v1769_v15, %v1767_v54  ;;  %v3812_v55 = vand.u32 65535, %v9200_v0  ;;  %v3813_v38 = vshrl.u32 %v9200_v0, 16 }
 0x1f5   : > { %v1782_v39 = vmul.u32 9362, %v1779_v1  ;;  %v1783_v28 = vmul.u32 37449, %v1779_v1  ;;  %v1784_v53 = vmul.u32 9362, %v1780_v63  ;;  %v1785_v20 = vmul.u32 37449, %v1780_v63 }
 0x1f6   : > { %v1771_v21 = vshrl.u32 %v1770_v13, 4  ;;  %v3800_v43 = vadd.s32 %v3799_v11, %v3790_v37  ;;  %v3815_v9 = vmul.u32 9362, %v3812_v55  ;;  %v10172_v50 = vmul.u32 37449, %v3812_v55  ;;  %v2758_v11 = vld [vmem:[#allocation2 + $0x141] sm:$0xff] }
 0x1f7   : > { %v1786_v6 = vshll.u32 %v1783_v28, 16  ;;  %v1787_v7 = vshrl.u32 %v1783_v28, 16  ;;  %v1788_v15 = vshll.u32 %v1784_v53, 16  ;;  %v1789_v14 = vshrl.u32 %v1784_v53, 16  ;;  %v5465_v1 = vld [vmem:[#allocation3 + $0xb4] sm:$0xff]  ;;  %v2416_v28 = vld [vmem:[#allocation2 + $0x13f] sm:$0xff] }
 0x1f8   : > { %v1772_v54 = vmul.u32 28, %v1771_v21  ;;  %v3803_v23 = vadd.s32 %v3802_v42, %v3800_v43  ;;  %v10174_v58 = vmul.u32 9362, %v3813_v38  ;;  %v3818_v3 = vmul.u32 37449, %v3813_v38  ;;  %6143 = vrot.lane.b32.xlu1 %v5465_v1, %s8586_s4 }
 0x1f9   : > { %vm1790_vm2 = vc.u32 %v1782_v39, %v1786_v6  ;;  %v1792_v63 = vadd.s32 %v1786_v6, %v1782_v39  ;;  %v3819_v13 = vshll.u32 %v10172_v50, 16  ;;  %v3820_v26 = vshrl.u32 %v10172_v50, 16 }
 0x1fa   : > { %v1773_v37 = vsub.s32 %v10106_v35, %v1772_v54  ;;  %v3804_v55 = vshrl.u32 %v3803_v23, 4  ;;  %v1791_v53 = vsel %vm1790_vm2, 1, %v13371_v32  ;;  %v3821_v42 = vshll.u32 %v10174_v58, 16  ;;  %v3087_v54 = vpop.f32.mrf.mxu0 }
 0x1fb   : > { %v1793_v21 = vadd.s32 %v1791_v53, %v1785_v20  ;;  %vm1794_vm3 = vc.u32 %v1792_v63, %v1788_v15  ;;  %v1796_v38 = vadd.s32 %v1792_v63, %v1788_v15  ;;  %v3822_v39 = vshrl.u32 %v10174_v58, 16  ;;  %v5255_v20 = vld [vmem:[#allocation3 + $0x33] sm:$0xff]  ;;  %v6112_v63 = vpop.permute.xlu0 %6111  ;;  %v3463_v53 = vpop.f32.mrf.mxu2 }
 0x1fc   : > { %vm2701_vm4 = vcmp.ne.s32.totalorder %v1773_v37, 27  ;;  %v3805_v43 = vmul.u32 28, %v3804_v55  ;;  %vm2359_vm8 = vcmp.ne.s32.totalorder %v1773_v37, 0  ;;  %v1795_v50 = vsel %vm1794_vm3, 1, %v13371_v32 }
 0x1fd   : > { %8097 = vmatmul.msk.f32.gmra.mxu2 %vm2701_vm4, %v2758_v11  ;;  %8040 = vmatmul.msk.f32.gmra.mxu0 %vm2359_vm8, %v2416_v28  ;;  %v1797_v35 = vadd.s32 %v1795_v50, %v1793_v21  ;;  %vm1800_vm9 = vc.u32 %v1796_v38, 2454267026  ;;  %vm3823_vm12 = vc.u32 %v3815_v9, %v3819_v13  ;;  %v3825_v6 = vadd.s32 %v3819_v13, %v3815_v9  ;;  %v3275_v28 = vpop.f32.mrf.mxu1 }
 0x1fe   : > { %v10185_v23 = vsub.s32 %v9190_v44, %v3805_v43  ;;  %v1801_v15 = vsel %vm1800_vm9, 1, %v13371_v32  ;;  %v3824_v58 = vsel %vm3823_vm12, 1, %v13371_v32  ;;  %v3461_v1 = vadd.f32 %v3460_v8, %v3273_v36  ;;  %v6922_v8 = vld [vmem:[%s13143_s2 + $0x1e0] sm:$0xff] }
 0x1ff   : > { %v1798_v37 = vadd.s32 %v1797_v35, %v1787_v7  ;;  %v3826_v55 = vadd.s32 %v3824_v58, %v3818_v3  ;;  %vm3827_vm14 = vc.u32 %v3825_v6, %v3821_v42  ;;  %v3829_v11 = vadd.s32 %v3825_v6, %v3821_v42  ;;  %7576 = vmatpush.msrb.mxu1 %v6922_v8  ;;  %v2647_v42 = vld [vmem:[#allocation2 + $0x158] sm:$0xff] }
 0x200   : > { %13390 = vst [vmem:[#allocation22_spill] sm:$0xff] %v10185_v23  ;;  %vm5158_vm1 = vcmp.ne.s32.totalorder %v10185_v23, 0  ;;  %v3828_v9 = vsel %vm3827_vm14, 1, %v13371_v32  ;;  %v10193_v44 = vadd.s32 328, %v8967_v52  ;;  %v3276_v13 = vadd.f32 %v3275_v28, %v3087_v54  ;;  %3325 = vmatmul.f32.gmra.mxu1 %v2647_v42 }
 0x201   : > { %3584 = vst.msk [vmem:[#allocation3 + $0xc0] sm:$0xff] %vm3559_vm7, %v3461_v1  ;;  %v5400_v3 = vsel %vm5158_vm1, %v5255_v20, 0.0  ;;  %v1799_v36 = vadd.s32 %v1798_v37, %v1789_v14  ;;  %v3830_v7 = vadd.s32 %v3828_v9, %v3826_v55  ;;  %vm3833_vm2 = vc.u32 %v3829_v11, 2454267026 }
 0x202   : > { %13391 = vst [vmem:[#allocation23_spill] sm:$0xff] %v10193_v44  ;;  %v6672_v21 = vsel %vm3559_vm7, %v5400_v3, %v6112_v63  ;;  %v3834_v38 = vsel %vm3833_vm2, 1, %v13371_v32  ;;  %v10203_v43 = vadd.s32 24, %v10193_v44  ;;  %v3844_v50 = vand.u32 65535, %v9210_v12 }
 0x203   : > { %7115 = vmatmul.f32.gmra.mxu3 %v6672_v21  ;;  %v1802_v35 = vadd.s32 %v1801_v15, %v1799_v36  ;;  %v3831_v6 = vadd.s32 %v3830_v7, %v3820_v26  ;;  %v3845_v54 = vshrl.u32 %v9210_v12, 16  ;;  %v3464_v14 = vadd.f32 %v3463_v53, %v3276_v13 }
 0x204   : > { %v1811_v20 = vand.u32 65535, %v10203_v43  ;;  %v1812_v58 = vshrl.u32 %v10203_v43, 16  ;;  %v3847_v1 = vmul.u32 9362, %v3844_v50  ;;  %v3848_v63 = vmul.u32 37449, %v3844_v50 }
 0x205   : > { %v1803_v37 = vshrl.u32 %v1802_v35, 4  ;;  %v3832_v55 = vadd.s32 %v3831_v6, %v3822_v39  ;;  %v10209_v11 = vmul.u32 9362, %v3845_v54  ;;  %v3850_v28 = vmul.u32 37449, %v3845_v54  ;;  %3585 = vst.msk [vmem:[#allocation3 + $0xc8] sm:$0xff] %vm3559_vm7, %v3464_v14  ;;  %v2759_v35 = vld [vmem:[#allocation2 + $0x149] sm:$0xff] }
 0x206   : > { %v1814_v9 = vmul.u32 9362, %v1811_v20  ;;  %v1815_v8 = vmul.u32 37449, %v1811_v20  ;;  %v1816_v15 = vmul.u32 9362, %v1812_v58  ;;  %v1817_v26 = vmul.u32 37449, %v1812_v58  ;;  %v2417_v54 = vld [vmem:[#allocation2 + $0x147] sm:$0xff] }
 0x207   : > { %v1804_v3 = vmul.u32 28, %v1803_v37  ;;  %v3835_v36 = vadd.s32 %v3834_v38, %v3832_v55  ;;  %v3851_v13 = vshll.u32 %v3848_v63, 16  ;;  %v3852_v53 = vshrl.u32 %v3848_v63, 16 }
 0x208   : > { %v5466_v7 = vld [vmem:[#allocation3 + $0xbc] sm:$0xff]  ;;  %v1818_v42 = vshll.u32 %v1815_v8, 16  ;;  %v1819_v21 = vshrl.u32 %v1815_v8, 16  ;;  %v1820_v44 = vshll.u32 %v1816_v15, 16  ;;  %v1821_v50 = vshrl.u32 %v1816_v15, 16 }
 0x209   : > { %6145 = vrot.lane.b32.xlu2 %v5466_v7, %s8586_s4  ;;  %v1805_v39 = vsub.s32 %v10156_v46, %v1804_v3  ;;  %v3836_v6 = vshrl.u32 %v3835_v36, 4  ;;  %v3853_v14 = vshll.u32 %v10209_v11, 16  ;;  %v3854_v20 = vshrl.u32 %v10209_v11, 16  ;;  %v3278_v7 = vpop.f32.mrf.mxu1 }
 0x20a   : > { %vm1822_vm3 = vc.u32 %v1814_v9, %v1818_v42  ;;  %v1824_v38 = vadd.s32 %v1818_v42, %v1814_v9  ;;  %vm3855_vm4 = vc.u32 %v3847_v1, %v3851_v13  ;;  %v3857_v58 = vadd.s32 %v3851_v13, %v3847_v1  ;;  %v3090_v1 = vpop.f32.mrf.mxu0 }
 0x20b   : > { %vm2702_vm8 = vcmp.ne.s32.totalorder %v1805_v39, 27  ;;  %v3837_v63 = vmul.u32 28, %v3836_v6  ;;  %vm2360_vm9 = vcmp.ne.s32.totalorder %v1805_v39, 0  ;;  %v1823_v37 = vsel %vm1822_vm3, 1, %v13371_v32 }
 0x20c   : > { %8098 = vmatmul.msk.f32.gmra.mxu2 %vm2702_vm8, %v2759_v35  ;;  %8041 = vmatmul.msk.f32.gmra.mxu0 %vm2360_vm9, %v2417_v54  ;;  %v1825_v55 = vadd.s32 %v1823_v37, %v1817_v26  ;;  %vm1826_vm12 = vc.u32 %v1824_v38, %v1820_v44  ;;  %v1828_v46 = vadd.s32 %v1824_v38, %v1820_v44  ;;  %v3856_v8 = vsel %vm3855_vm4, 1, %v13371_v32  ;;  %v6906_v38 = vld [vmem:[%s13143_s2 + $0x160] sm:$0xff] }
 0x20d   : > { %v10219_v15 = vsub.s32 %v9200_v0, %v3837_v63  ;;  %v1827_v11 = vsel %vm1826_vm12, 1, %v13371_v32  ;;  %v3858_v9 = vadd.s32 %v3856_v8, %v3850_v28  ;;  %vm3859_vm14 = vc.u32 %v3857_v58, %v3853_v14  ;;  %7412 = vmatpush.msrb.mxu0 %v6906_v38  ;;  %v5467_v37 = vld [vmem:[#allocation3 + $0xc4] sm:$0xff] }
 0x20e   : > { %v1829_v3 = vadd.s32 %v1827_v11, %v1825_v55  ;;  %vm1832_vm2 = vc.u32 %v1828_v46, 2454267026  ;;  %v3860_v36 = vsel %vm3859_vm14, 1, %v13371_v32  ;;  %v3861_v13 = vadd.s32 %v3857_v58, %v3853_v14  ;;  %v3466_v58 = vpop.f32.mrf.mxu2  ;;  %v2648_v55 = vld [vmem:[#allocation2 + $0x160] sm:$0xff]  ;;  %6147 = vrot.lane.b32.xlu0 %v5467_v37, %s8586_s4 }
 0x20f   : > { %13392 = vst [vmem:[#allocation24_spill] sm:$0xff] %v10219_v15  ;;  %vm5159_vm3 = vcmp.ne.s32.totalorder %v10219_v15, 0  ;;  %v1833_v26 = vsel %vm1832_vm2, 1, %v13371_v32  ;;  %v3862_v44 = vadd.s32 %v3860_v36, %v3858_v9  ;;  %v10226_v42 = vadd.s32 336, %v8967_v52  ;;  %3328 = vmatmul.f32.gmra.mxu1 %v2648_v55 }
 0x210   : > { %v5401_v0 = vsel %vm5159_vm3, %v10141_v5, 0.0  ;;  %v1830_v28 = vadd.s32 %v1829_v3, %v1819_v21  ;;  %vm3865_vm4 = vc.u32 %v3861_v13, 2454267026  ;;  %v3279_v39 = vadd.f32 %v3278_v7, %v3090_v1  ;;  %v6890_v5 = vld [vmem:[%s13143_s2 + $0xe0] sm:$0xff] }
 0x211   : > { %13393 = vst [vmem:[#allocation25_spill] sm:$0xff] %v10226_v42  ;;  %v6673_v35 = vsel %vm3559_vm7, %v5401_v0, %v10148_v19  ;;  %v3863_v6 = vadd.s32 %v3862_v44, %v3852_v53  ;;  %v3866_v54 = vsel %vm3865_vm4, 1, %v13371_v32  ;;  %v10235_v14 = vadd.s32 24, %v10226_v42  ;;  %7248 = vmatpush.msrb.mxu3 %v6890_v5 }
 0x212   : > { %7118 = vmatmul.f32.gmra.mxu3 %v6673_v35  ;;  %v1831_v21 = vadd.s32 %v1830_v28, %v1821_v50  ;;  %v3876_v63 = vand.u32 65535, %v9233_v24  ;;  %v3877_v19 = vshrl.u32 %v9233_v24, 16  ;;  %v3467_v53 = vadd.f32 %v3466_v58, %v3279_v39 }
 0x213   : > { %v3864_v46 = vadd.s32 %v3863_v6, %v3854_v20  ;;  %v1843_v8 = vand.u32 65535, %v10235_v14  ;;  %v1844_v11 = vshrl.u32 %v10235_v14, 16  ;;  %v10249_v9 = vadd.s32 344, %v8967_v52 }
 0x214   : > { %v1834_v50 = vadd.s32 %v1833_v26, %v1831_v21  ;;  %v3879_v1 = vmul.u32 9362, %v3876_v63  ;;  %v10251_v3 = vmul.u32 37449, %v3876_v63  ;;  %v10253_v36 = vmul.u32 9362, %v3877_v19  ;;  %3586 = vst.msk [vmem:[#allocation3 + $0xd0] sm:$0xff] %vm3559_vm7, %v3467_v53 }
 0x215   : > { %13394 = vst [vmem:[#allocation26_spill] sm:$0xff] %v10249_v9  ;;  %v3867_v20 = vadd.s32 %v3866_v54, %v3864_v46  ;;  %v1846_v13 = vmul.u32 9362, %v1843_v8  ;;  %v1847_v44 = vmul.u32 37449, %v1843_v8  ;;  %v1848_v7 = vmul.u32 9362, %v1844_v11  ;;  %v2418_v8 = vld [vmem:[#allocation2 + $0x14f] sm:$0xff] }
 0x216   : > { %v1835_v0 = vshrl.u32 %v1834_v50, 4  ;;  %v1849_v28 = vmul.u32 37449, %v1844_v11  ;;  %v3882_v39 = vmul.u32 37449, %v3877_v19  ;;  %v3883_v35 = vshll.u32 %v10251_v3, 16  ;;  %v2760_v19 = vld [vmem:[#allocation2 + $0x151] sm:$0xff] }
 0x217   : > { %v3868_v6 = vshrl.u32 %v3867_v20, 4  ;;  %v1850_v38 = vshll.u32 %v1847_v44, 16  ;;  %v1851_v26 = vshrl.u32 %v1847_v44, 16  ;;  %v1852_v58 = vshll.u32 %v1848_v7, 16  ;;  %v5257_v44 = vld [vmem:[#allocation3 + $0x43] sm:$0xff] }
 0x218   : > { %v1836_v5 = vmul.u32 28, %v1835_v0  ;;  %v1853_v21 = vshrl.u32 %v1848_v7, 16  ;;  %v3884_v63 = vshrl.u32 %v10251_v3, 16  ;;  %v3885_v53 = vshll.u32 %v10253_v36, 16  ;;  %v10265_v0 = vpop.permute.xlu2 %6115 }
 0x219   : > { %v3869_v37 = vmul.u32 28, %v3868_v6  ;;  %vm1854_vm8 = vc.u32 %v1846_v13, %v1850_v38  ;;  %v1856_v54 = vadd.s32 %v1850_v38, %v1846_v13  ;;  %v3886_v55 = vshrl.u32 %v10253_v36, 16  ;;  %v3093_v13 = vpop.f32.mrf.mxu0 }
 0x21a   : > { %v1837_v46 = vsub.s32 %v10203_v43, %v1836_v5  ;;  %v1855_v11 = vsel %vm1854_vm8, 1, %v13371_v32  ;;  %vm3887_vm9 = vc.u32 %v3879_v1, %v3883_v35  ;;  %v3889_v50 = vadd.s32 %v3883_v35, %v3879_v1 }
 0x21b   : > { %v10263_v20 = vsub.s32 %v9210_v12, %v3869_v37  ;;  %v1857_v3 = vadd.s32 %v1855_v11, %v1849_v28  ;;  %vm1858_vm12 = vc.u32 %v1856_v54, %v1852_v58  ;;  %v1860_v7 = vadd.s32 %v1856_v54, %v1852_v58  ;;  %v3281_v37 = vpop.f32.mrf.mxu1 }
 0x21c   : > { %vm2703_vm14 = vcmp.ne.s32.totalorder %v1837_v46, 27  ;;  %vm2361_vm2 = vcmp.ne.s32.totalorder %v1837_v46, 0  ;;  %v1859_v36 = vsel %vm1858_vm12, 1, %v13371_v32  ;;  %v3888_v43 = vsel %vm3887_vm9, 1, %v13371_v32  ;;  %v5468_v46 = vld [vmem:[#allocation3 + $0xcc] sm:$0xff] }
 0x21d   : > { %13395 = vst [vmem:[#allocation27_spill] sm:$0xff] %v10263_v20  ;;  %8099 = vmatmul.msk.f32.gmra.mxu2 %vm2703_vm14, %v2760_v19  ;;  %vm13214_vm4 = vcmp.ne.s32.totalorder %v10263_v20, 0  ;;  %8042 = vmatmul.msk.f32.gmra.mxu0 %vm2361_vm2, %v2418_v8  ;;  %v1861_v1 = vadd.s32 %v1859_v36, %v1857_v3  ;;  %vm1864_vm8 = vc.u32 %v1860_v7, 2454267026  ;;  %v3890_v12 = vadd.s32 %v3888_v43, %v3882_v39  ;;  %v2649_v39 = vld [vmem:[#allocation2 + $0x168] sm:$0xff] }
 0x21e   : > { %v5402_v28 = vsel %vm13214_vm4, %v5257_v44, 0.0  ;;  %v1865_v35 = vsel %vm1864_vm8, 1, %v13371_v32  ;;  %vm3891_vm0 = vc.u32 %v3889_v50, %v3885_v53  ;;  %v3893_v6 = vadd.s32 %v3889_v50, %v3885_v53  ;;  %6149 = vrot.lane.b32.xlu1 %v5468_v46, %s8586_s4  ;;  %3331 = vmatmul.f32.gmra.mxu1 %v2649_v39  ;;  %v3469_v39 = vpop.f32.mrf.mxu2 }
 0x21f   : > { %v6674_v38 = vsel %vm3559_vm7, %v5402_v28, %v10265_v0  ;;  %v1862_v58 = vadd.s32 %v1861_v1, %v1851_v26  ;;  %v3892_v5 = vsel %vm3891_vm0, 1, %v13371_v32  ;;  %v10277_v54 = vadd.s32 24, %v10249_v9 }
 0x220   : > { %7121 = vmatmul.f32.gmra.mxu3 %v6674_v38  ;;  %v3894_v19 = vadd.s32 %v3892_v5, %v3890_v12  ;;  %vm3897_vm9 = vc.u32 %v3893_v6, 2454267026  ;;  %v10279_v8 = vadd.f32 %v3281_v37, %v3093_v13  ;;  %v3908_v11 = vand.u32 65535, %v9236_v25 }
 0x221   : > { %v1863_v53 = vadd.s32 %v1862_v58, %v1853_v21  ;;  %v3898_v26 = vsel %vm3897_vm9, 1, %v13371_v32  ;;  %v1875_v50 = vand.u32 65535, %v10277_v54  ;;  %v1876_v44 = vshrl.u32 %v10277_v54, 16 }
 0x222   : > { %v3895_v3 = vadd.s32 %v3894_v19, %v3884_v63  ;;  %v3909_v7 = vshrl.u32 %v9236_v25, 16  ;;  %v3911_v36 = vmul.u32 9362, %v3908_v11  ;;  %v10287_v43 = vmul.u32 37449, %v3908_v11 }
 0x223   : > { %v1866_v1 = vadd.s32 %v1865_v35, %v1863_v53  ;;  %v1878_v12 = vmul.u32 9362, %v1875_v50  ;;  %v1879_v13 = vmul.u32 37449, %v1875_v50  ;;  %v1880_v28 = vmul.u32 9362, %v1876_v44 }
 0x224   : > { %v3896_v6 = vadd.s32 %v3895_v3, %v3886_v55  ;;  %v1881_v38 = vmul.u32 37449, %v1876_v44  ;;  %v10289_v21 = vmul.u32 9362, %v3909_v7  ;;  %v3914_v58 = vmul.u32 37449, %v3909_v7 }
 0x225   : > { %v1867_v5 = vshrl.u32 %v1866_v1, 4  ;;  %v1882_v37 = vshll.u32 %v1879_v13, 16  ;;  %v1883_v46 = vshrl.u32 %v1879_v13, 16  ;;  %v1884_v9 = vshll.u32 %v1880_v28, 16  ;;  %v2761_v1 = vld [vmem:[#allocation2 + $0x159] sm:$0xff] }
 0x226   : > { %v3899_v63 = vadd.s32 %v3898_v26, %v3896_v6  ;;  %v1885_v19 = vshrl.u32 %v1880_v28, 16  ;;  %v3915_v42 = vshll.u32 %v10287_v43, 16  ;;  %v3916_v11 = vshrl.u32 %v10287_v43, 16  ;;  %v2419_v26 = vld [vmem:[#allocation2 + $0x157] sm:$0xff] }
 0x227   : > { %v1868_v35 = vmul.u32 28, %v1867_v5  ;;  %vm1886_vm0 = vc.u32 %v1878_v12, %v1882_v37  ;;  %v1888_v53 = vadd.s32 %v1882_v37, %v1878_v12  ;;  %v3917_v55 = vshll.u32 %v10289_v21, 16 }
 0x228   : > { %v3900_v50 = vshrl.u32 %v3899_v63, 4  ;;  %v1887_v44 = vsel %vm1886_vm0, 1, %v13371_v32  ;;  %v3918_v3 = vshrl.u32 %v10289_v21, 16  ;;  %vm3919_vm12 = vc.u32 %v3911_v36, %v3915_v42  ;;  %v3096_v63 = vpop.f32.mrf.mxu0 }
 0x229   : > { %v1869_v7 = vsub.s32 %v10235_v14, %v1868_v35  ;;  %v1889_v13 = vadd.s32 %v1887_v44, %v1881_v38  ;;  %vm1890_vm14 = vc.u32 %v1888_v53, %v1884_v9  ;;  %v1892_v28 = vadd.s32 %v1888_v53, %v1884_v9  ;;  %v5258_v14 = vld [vmem:[#allocation3 + $0x4b] sm:$0xff]  ;;  %v10303_v35 = vpop.permute.xlu0 %6117  ;;  %v3284_v44 = vpop.f32.mrf.mxu1 }
 0x22a   : > { %v3901_v6 = vmul.u32 28, %v3900_v50  ;;  %v1891_v43 = vsel %vm1890_vm14, 1, %v13371_v32  ;;  %v3920_v12 = vsel %vm3919_vm12, 1, %v13371_v32  ;;  %v3921_v5 = vadd.s32 %v3915_v42, %v3911_v36 }
 0x22b   : > { %vm2704_vm2 = vcmp.ne.s32.totalorder %v1869_v7, 27  ;;  %vm2362_vm8 = vcmp.ne.s32.totalorder %v1869_v7, 0  ;;  %v1893_v37 = vadd.s32 %v1891_v43, %v1889_v13  ;;  %vm1896_vm9 = vc.u32 %v1892_v28, 2454267026 }
 0x22c   : > { %8100 = vmatmul.msk.f32.gmra.mxu2 %vm2704_vm2, %v2761_v1  ;;  %v10300_v21 = vsub.s32 %v9233_v24, %v3901_v6  ;;  %8043 = vmatmul.msk.f32.gmra.mxu0 %vm2362_vm8, %v2419_v26  ;;  %v1897_v38 = vsel %vm1896_vm9, 1, %v13371_v32  ;;  %v3922_v9 = vadd.s32 %v3920_v12, %v3914_v58  ;;  %vm3923_vm0 = vc.u32 %v3921_v5, %v3917_v55  ;;  %v6931_v58 = vld [vmem:[%s13143_s2 + $0x228] sm:$0xff]  ;;  %v2650_v26 = vld [vmem:[#allocation2 + $0x170] sm:$0xff] }
 0x22d   : > { %v1894_v53 = vadd.s32 %v1893_v37, %v1883_v46  ;;  %v3924_v42 = vsel %vm3923_vm0, 1, %v13371_v32  ;;  %v3925_v36 = vadd.s32 %v3921_v5, %v3917_v55  ;;  %v3470_v50 = vadd.f32 %v3469_v39, %v10279_v8  ;;  %v3472_v39 = vpop.f32.mrf.mxu2  ;;  %7747 = vmatpush.msrb.mxu2 %v6931_v58  ;;  %3334 = vmatmul.f32.gmra.mxu1 %v2650_v26 }
 0x22e   : > { %13396 = vst [vmem:[#allocation28_spill] sm:$0xff] %v10300_v21  ;;  %vm13185_vm12 = vcmp.ne.s32.totalorder %v10300_v21, 0  ;;  %v3926_v7 = vadd.s32 %v3924_v42, %v3922_v9  ;;  %v10309_v24 = vadd.s32 352, %v8967_v52  ;;  %v3285_v1 = vadd.f32 %v3284_v44, %v3096_v63  ;;  %v2424_v21 = vld [vmem:[#allocation2 + $0x17f] sm:$0xff] }
 0x22f   : > { %v5403_v46 = vsel %vm13185_vm12, %v5258_v14, 0.0  ;;  %v1895_v13 = vadd.s32 %v1894_v53, %v1885_v19  ;;  %vm3929_vm14 = vc.u32 %v3925_v36, 2454267026  ;;  %3587 = vst.msk [vmem:[#allocation3 + $0xd8] sm:$0xff] %vm3559_vm7, %v3470_v50  ;;  %v3940_v8 = vand.u32 65535, %v9252_v56 }
 0x230   : > { %13397 = vst [vmem:[#allocation29_spill] sm:$0xff] %v10309_v24  ;;  %v6675_v55 = vsel %vm3559_vm7, %v5403_v46, %v10303_v35  ;;  %v3927_v28 = vadd.s32 %v3926_v7, %v3916_v11  ;;  %v3930_v6 = vsel %vm3929_vm14, 1, %v13371_v32  ;;  %v10322_v43 = vadd.s32 24, %v10309_v24 }
 0x231   : > { %7124 = vmatmul.f32.gmra.mxu3 %v6675_v55  ;;  %v1898_v12 = vadd.s32 %v1897_v38, %v1895_v13  ;;  %v3941_v19 = vshrl.u32 %v9252_v56, 16  ;;  %v3943_v5 = vmul.u32 9362, %v3940_v8  ;;  %v10325_v37 = vmul.u32 37449, %v3940_v8 }
 0x232   : > { %v3928_v63 = vadd.s32 %v3927_v28, %v3918_v3  ;;  %v1907_v14 = vand.u32 65535, %v10322_v43  ;;  %v1908_v9 = vshrl.u32 %v10322_v43, 16  ;;  %v3473_v53 = vadd.f32 %v3472_v39, %v3285_v1 }
 0x233   : > { %v1899_v42 = vshrl.u32 %v1898_v12, 4  ;;  %v10329_v11 = vmul.u32 9362, %v3941_v19  ;;  %v3946_v36 = vmul.u32 37449, %v3941_v19  ;;  %v3947_v50 = vshll.u32 %v10325_v37, 16  ;;  %v2762_v19 = vld [vmem:[#allocation2 + $0x161] sm:$0xff] }
 0x234   : > { %v3931_v44 = vadd.s32 %v3930_v6, %v3928_v63  ;;  %v1910_v7 = vmul.u32 9362, %v1907_v14  ;;  %v1911_v38 = vmul.u32 37449, %v1907_v14  ;;  %v1912_v58 = vmul.u32 9362, %v1908_v9  ;;  %3588 = vst.msk [vmem:[#allocation3 + $0xe0] sm:$0xff] %vm3559_vm7, %v3473_v53  ;;  %v2420_v6 = vld [vmem:[#allocation2 + $0x15f] sm:$0xff] }
 0x235   : > { %v1900_v26 = vmul.u32 28, %v1899_v42  ;;  %v1913_v46 = vmul.u32 37449, %v1908_v9  ;;  %v3948_v3 = vshrl.u32 %v10325_v37, 16  ;;  %v3949_v13 = vshll.u32 %v10329_v11, 16  ;;  %v6921_v42 = vld [vmem:[%s13143_s2 + $0x1d8] sm:$0xff] }
 0x236   : > { %v3932_v8 = vshrl.u32 %v3931_v44, 4  ;;  %v1914_v1 = vshll.u32 %v1911_v38, 16  ;;  %v1915_v39 = vshrl.u32 %v1911_v38, 16  ;;  %v1916_v55 = vshll.u32 %v1912_v58, 16  ;;  %v5469_v28 = vld [vmem:[#allocation3 + $0xd4] sm:$0xff]  ;;  %7577 = vmatpush.msrb.mxu1 %v6921_v42 }
 0x237   : > { %v1901_v12 = vsub.s32 %v10277_v54, %v1900_v26  ;;  %v1917_v63 = vshrl.u32 %v1912_v58, 16  ;;  %v3950_v14 = vshrl.u32 %v10329_v11, 16  ;;  %vm3951_vm2 = vc.u32 %v3943_v5, %v3947_v50  ;;  %6151 = vrot.lane.b32.xlu2 %v5469_v28, %s8586_s4  ;;  %v5259_v38 = vld [vmem:[#allocation3 + $0x53] sm:$0xff]  ;;  %v10349_v26 = vpop.permute.xlu1 %6119 }
 0x238   : > { %v3933_v9 = vmul.u32 28, %v3932_v8  ;;  %vm1918_vm8 = vc.u32 %v1910_v7, %v1914_v1  ;;  %v1920_v37 = vadd.s32 %v1914_v1, %v1910_v7  ;;  %v3952_v53 = vsel %vm3951_vm2, 1, %v13371_v32 }
 0x239   : > { %vm2705_vm9 = vcmp.ne.s32.totalorder %v1901_v12, 27  ;;  %vm2363_vm0 = vcmp.ne.s32.totalorder %v1901_v12, 0  ;;  %v1919_v54 = vsel %vm1918_vm8, 1, %v13371_v32  ;;  %v3953_v44 = vadd.s32 %v3947_v50, %v3943_v5 }
 0x23a   : > { %8101 = vmatmul.msk.f32.gmra.mxu2 %vm2705_vm9, %v2762_v19  ;;  %v10344_v11 = vsub.s32 %v9236_v25, %v3933_v9  ;;  %8044 = vmatmul.msk.f32.gmra.mxu0 %vm2363_vm0, %v2420_v6  ;;  %v1921_v58 = vadd.s32 %v1919_v54, %v1913_v46  ;;  %vm1922_vm14 = vc.u32 %v1920_v37, %v1916_v55  ;;  %v10347_v7 = vadd.s32 360, %v8967_v52  ;;  %v3099_v6 = vpop.f32.mrf.mxu0 }
 0x23b   : > { %v1923_v8 = vsel %vm1922_vm14, 1, %v13371_v32  ;;  %v1924_v1 = vadd.s32 %v1920_v37, %v1916_v55  ;;  %v3954_v28 = vadd.s32 %v3952_v53, %v3946_v36  ;;  %vm3955_vm2 = vc.u32 %v3953_v44, %v3949_v13  ;;  %v3287_v53 = vpop.f32.mrf.mxu1 }
 0x23c   : > { %13398 = vst [vmem:[#allocation30_spill] sm:$0xff] %v10344_v11  ;;  %vm13184_vm8 = vcmp.ne.s32.totalorder %v10344_v11, 0  ;;  %v1925_v5 = vadd.s32 %v1923_v8, %v1921_v58  ;;  %v3956_v25 = vsel %vm3955_vm2, 1, %v13371_v32  ;;  %v3957_v50 = vadd.s32 %v3953_v44, %v3949_v13  ;;  %v6889_v44 = vld [vmem:[%s13143_s2 + $0xd8] sm:$0xff] }
 0x23d   : > { %13399 = vst [vmem:[#allocation31_spill] sm:$0xff] %v10347_v7  ;;  %v5404_v46 = vsel %vm13184_vm8, %v5259_v38, 0.0  ;;  %vm1928_vm9 = vc.u32 %v1924_v1, 2454267026  ;;  %v3958_v12 = vadd.s32 %v3956_v25, %v3954_v28  ;;  %v10357_v19 = vadd.s32 24, %v10347_v7  ;;  %7249 = vmatpush.msrb.mxu3 %v6889_v44  ;;  %v5470_v1 = vld [vmem:[#allocation3 + $0xdc] sm:$0xff] }
 0x23e   : > { %v6676_v55 = vsel %vm3559_vm7, %v5404_v46, %v10349_v26  ;;  %v1926_v36 = vadd.s32 %v1925_v5, %v1915_v39  ;;  %v1929_v9 = vsel %vm1928_vm9, 1, %v13371_v32  ;;  %vm3961_vm0 = vc.u32 %v3957_v50, 2454267026  ;;  %v6905_v39 = vld [vmem:[%s13143_s2 + $0x158] sm:$0xff]  ;;  %6153 = vrot.lane.b32.xlu0 %v5470_v1, %s8586_s4 }
 0x23f   : > { %7127 = vmatmul.f32.gmra.mxu3 %v6676_v55  ;;  %v3959_v37 = vadd.s32 %v3958_v12, %v3948_v3  ;;  %v3962_v13 = vsel %vm3961_vm0, 1, %v13371_v32  ;;  %v1939_v42 = vand.u32 65535, %v10357_v19  ;;  %v1940_v54 = vshrl.u32 %v10357_v19, 16  ;;  %7413 = vmatpush.msrb.mxu0 %v6905_v39  ;;  %v2651_v28 = vld [vmem:[#allocation2 + $0x178] sm:$0xff] }
 0x240   : > { %v1927_v38 = vadd.s32 %v1926_v36, %v1917_v63  ;;  %v3288_v58 = vadd.f32 %v3287_v53, %v3099_v6  ;;  %v3972_v8 = vand.u32 65535, %v9268_v45  ;;  %v3973_v3 = vshrl.u32 %v9268_v45, 16  ;;  %3337 = vmatmul.f32.gmra.mxu1 %v2651_v28 }
 0x241   : > { %v3960_v5 = vadd.s32 %v3959_v37, %v3950_v14  ;;  %v1942_v25 = vmul.u32 9362, %v1939_v42  ;;  %v1943_v50 = vmul.u32 37449, %v1939_v42  ;;  %v1944_v46 = vmul.u32 9362, %v1940_v54  ;;  %v3475_v37 = vpop.f32.mrf.mxu2 }
 0x242   : > { %v1930_v12 = vadd.s32 %v1929_v9, %v1927_v38  ;;  %v1945_v55 = vmul.u32 37449, %v1940_v54  ;;  %v3975_v7 = vmul.u32 9362, %v3972_v8  ;;  %v10374_v63 = vmul.u32 37449, %v3972_v8 }
 0x243   : > { %v3963_v6 = vadd.s32 %v3962_v13, %v3960_v5  ;;  %v1946_v36 = vshll.u32 %v1943_v50, 16  ;;  %v1947_v53 = vshrl.u32 %v1943_v50, 16  ;;  %v1948_v24 = vshll.u32 %v1944_v46, 16 }
 0x244   : > { %v1931_v44 = vshrl.u32 %v1930_v12, 4  ;;  %v1949_v39 = vshrl.u32 %v1944_v46, 16  ;;  %v10376_v27 = vmul.u32 9362, %v3973_v3  ;;  %v3978_v14 = vmul.u32 37449, %v3973_v3  ;;  %v2763_v3 = vld [vmem:[#allocation2 + $0x169] sm:$0xff] }
 0x245   : > { %v3964_v42 = vshrl.u32 %v3963_v6, 4  ;;  %vm1950_vm14 = vc.u32 %v1942_v25, %v1946_v36  ;;  %v1952_v11 = vadd.s32 %v1946_v36, %v1942_v25  ;;  %v3979_v1 = vshll.u32 %v10374_v63, 16  ;;  %v2421_v46 = vld [vmem:[#allocation2 + $0x167] sm:$0xff]  ;;  %v5260_v36 = vld [vmem:[#allocation3 + $0x5b] sm:$0xff] }
 0x246   : > { %v1932_v9 = vmul.u32 28, %v1931_v44  ;;  %v1951_v54 = vsel %vm1950_vm14, 1, %v13371_v32  ;;  %v3980_v38 = vshrl.u32 %v10374_v63, 16  ;;  %v3981_v13 = vshll.u32 %v10376_v27, 16 }
 0x247   : > { %v3965_v8 = vmul.u32 28, %v3964_v42  ;;  %v1953_v28 = vadd.s32 %v1951_v54, %v1945_v55  ;;  %vm1954_vm2 = vc.u32 %v1952_v11, %v1948_v24  ;;  %v1956_v5 = vadd.s32 %v1952_v11, %v1948_v24  ;;  %v10389_v55 = vpop.permute.xlu2 %6121  ;;  %v3102_v11 = vpop.f32.mrf.mxu0 }
 0x248   : > { %v1933_v50 = vsub.s32 %v10322_v43, %v1932_v9  ;;  %v1955_v12 = vsel %vm1954_vm2, 1, %v13371_v32  ;;  %v3982_v25 = vshrl.u32 %v10376_v27, 16  ;;  %vm3983_vm9 = vc.u32 %v3975_v7, %v3979_v1 }
 0x249   : > { %v10386_v6 = vsub.s32 %v9252_v56, %v3965_v8  ;;  %v1957_v63 = vadd.s32 %v1955_v12, %v1953_v28  ;;  %vm1960_vm0 = vc.u32 %v1956_v5, 2454267026  ;;  %v3984_v44 = vsel %vm3983_vm9, 1, %v13371_v32  ;;  %v3290_v8 = vpop.f32.mrf.mxu1 }
 0x24a   : > { %vm2706_vm14 = vcmp.ne.s32.totalorder %v1933_v50, 27  ;;  %vm2364_vm8 = vcmp.ne.s32.totalorder %v1933_v50, 0  ;;  %v1961_v24 = vsel %vm1960_vm0, 1, %v13371_v32  ;;  %v3985_v43 = vadd.s32 %v3979_v1, %v3975_v7  ;;  %v2652_v50 = vld [vmem:[#allocation2 + $0x180] sm:$0xff] }
 0x24b   : > { %13400 = vst [vmem:[#allocation32_spill] sm:$0xff] %v10386_v6  ;;  %8102 = vmatmul.msk.f32.gmra.mxu2 %vm2706_vm14, %v2763_v3  ;;  %vm13202_vm2 = vcmp.ne.s32.totalorder %v10386_v6, 0  ;;  %8045 = vmatmul.msk.f32.gmra.mxu0 %vm2364_vm8, %v2421_v46  ;;  %v1958_v27 = vadd.s32 %v1957_v63, %v1947_v53  ;;  %v3986_v56 = vadd.s32 %v3984_v44, %v3978_v14  ;;  %v10396_v28 = vadd.s32 368, %v8967_v52 }
 0x24c   : > { %v3476_v42 = vadd.f32 %v3475_v37, %v3288_v58  ;;  %v5405_v9 = vsel %vm13202_vm2, %v5260_v36, 0.0  ;;  %vm3987_vm12 = vc.u32 %v3985_v43, %v3981_v13  ;;  %v3989_v54 = vadd.s32 %v3985_v43, %v3981_v13  ;;  %v3478_v13 = vpop.f32.mrf.mxu2  ;;  %3340 = vmatmul.f32.gmra.mxu1 %v2652_v50 }
 0x24d   : > { %13401 = vst [vmem:[#allocation33_spill] sm:$0xff] %v10396_v28  ;;  %v6677_v7 = vsel %vm3559_vm7, %v5405_v9, %v10389_v55  ;;  %v1959_v1 = vadd.s32 %v1958_v27, %v1949_v39  ;;  %v3988_v5 = vsel %vm3987_vm12, 1, %v13371_v32  ;;  %v3291_v53 = vadd.f32 %v3290_v8, %v3102_v11 }
 0x24e   : > { %3589 = vst.msk [vmem:[#allocation3 + $0xe8] sm:$0xff] %vm3559_vm7, %v3476_v42  ;;  %7130 = vmatmul.f32.gmra.mxu3 %v6677_v7  ;;  %v3990_v58 = vadd.s32 %v3988_v5, %v3986_v56  ;;  %vm3993_vm8 = vc.u32 %v3989_v54, 2454267026  ;;  %v10403_v14 = vadd.s32 24, %v10396_v28  ;;  %v4004_v37 = vand.u32 65535, %v9282_v60  ;;  %v2422_v28 = vld [vmem:[#allocation2 + $0x16f] sm:$0xff] }
 0x24f   : > { %v1962_v3 = vadd.s32 %v1961_v24, %v1959_v1  ;;  %v3994_v46 = vsel %vm3993_vm8, 1, %v13371_v32  ;;  %v4005_v39 = vshrl.u32 %v9282_v60, 16  ;;  %v3479_v12 = vadd.f32 %v3478_v13, %v3291_v53 }
 0x250   : > { %v3991_v36 = vadd.s32 %v3990_v58, %v3980_v38  ;;  %v1971_v63 = vand.u32 65535, %v10403_v14  ;;  %v1972_v44 = vshrl.u32 %v10403_v14, 16  ;;  %v4007_v43 = vmul.u32 9362, %v4004_v37 }
 0x251   : > { %v1963_v11 = vshrl.u32 %v1962_v3, 4  ;;  %v10410_v27 = vmul.u32 37449, %v4004_v37  ;;  %v10412_v56 = vmul.u32 9362, %v4005_v39  ;;  %v4010_v42 = vmul.u32 37449, %v4005_v39  ;;  %3590 = vst.msk [vmem:[#allocation3 + $0xf0] sm:$0xff] %vm3559_vm7, %v3479_v12  ;;  %v2764_v39 = vld [vmem:[#allocation2 + $0x171] sm:$0xff] }
 0x252   : > { %v3992_v24 = vadd.s32 %v3991_v36, %v3982_v25  ;;  %v1974_v9 = vmul.u32 9362, %v1971_v63  ;;  %v1975_v54 = vmul.u32 37449, %v1971_v63  ;;  %v1976_v8 = vmul.u32 9362, %v1972_v44 }
 0x253   : > { %v1964_v7 = vmul.u32 28, %v1963_v11  ;;  %v1977_v1 = vmul.u32 37449, %v1972_v44  ;;  %v4011_v38 = vshll.u32 %v10410_v27, 16  ;;  %v4012_v5 = vshrl.u32 %v10410_v27, 16 }
 0x254   : > { %v3995_v53 = vadd.s32 %v3994_v46, %v3992_v24  ;;  %v1978_v58 = vshll.u32 %v1975_v54, 16  ;;  %v1979_v13 = vshrl.u32 %v1975_v54, 16  ;;  %v1980_v37 = vshll.u32 %v1976_v8, 16 }
 0x255   : > { %v5471_v50 = vld [vmem:[#allocation3 + $0xe4] sm:$0xff]  ;;  %v1965_v3 = vsub.s32 %v10357_v19, %v1964_v7  ;;  %v1981_v12 = vshrl.u32 %v1976_v8, 16  ;;  %v4013_v25 = vshll.u32 %v10412_v56, 16  ;;  %v4014_v36 = vshrl.u32 %v10412_v56, 16  ;;  %v3105_v19 = vpop.f32.mrf.mxu0 }
 0x256   : > { %6155 = vrot.lane.b32.xlu1 %v5471_v50, %s8586_s4  ;;  %v3996_v63 = vshrl.u32 %v3995_v53, 4  ;;  %vm1982_vm12 = vc.u32 %v1974_v9, %v1978_v58  ;;  %v1984_v44 = vadd.s32 %v1978_v58, %v1974_v9  ;;  %vm4015_vm9 = vc.u32 %v4007_v43, %v4011_v38  ;;  %v3293_v53 = vpop.f32.mrf.mxu1  ;;  %v5261_v50 = vld [vmem:[#allocation3 + $0x63] sm:$0xff] }
 0x257   : > { %vm2707_vm0 = vcmp.ne.s32.totalorder %v1965_v3, 27  ;;  %vm2365_vm14 = vcmp.ne.s32.totalorder %v1965_v3, 0  ;;  %v1983_v46 = vsel %vm1982_vm12, 1, %v13371_v32  ;;  %v4016_v11 = vsel %vm4015_vm9, 1, %v13371_v32 }
 0x258   : > { %8103 = vmatmul.msk.f32.gmra.mxu2 %vm2707_vm0, %v2764_v39  ;;  %v3997_v27 = vmul.u32 28, %v3996_v63  ;;  %8046 = vmatmul.msk.f32.gmra.mxu0 %vm2365_vm14, %v2422_v28  ;;  %v1985_v24 = vadd.s32 %v1983_v46, %v1977_v1  ;;  %vm1986_vm8 = vc.u32 %v1984_v44, %v1980_v37  ;;  %v1988_v54 = vadd.s32 %v1984_v44, %v1980_v37  ;;  %v10432_v28 = vpop.permute.xlu0 %6123 }
 0x259   : > { %v1987_v56 = vsel %vm1986_vm8, 1, %v13371_v32  ;;  %v4017_v8 = vadd.s32 %v4011_v38, %v4007_v43  ;;  %v4018_v7 = vadd.s32 %v4016_v11, %v4010_v42  ;;  %v10425_v9 = vadd.s32 376, %v8967_v52 }
 0x25a   : > { %v10428_v58 = vsub.s32 %v9268_v45, %v3997_v27  ;;  %v1989_v3 = vadd.s32 %v1987_v56, %v1985_v24  ;;  %vm1992_vm12 = vc.u32 %v1988_v54, 2454267026  ;;  %v10430_v39 = vadd.f32 %v3293_v53, %v3105_v19  ;;  %v2653_v24 = vld [vmem:[#allocation2 + $0x188] sm:$0xff] }
 0x25b   : > { %13402 = vst [vmem:[#allocation34_spill] sm:$0xff] %v10425_v9  ;;  %v1993_v1 = vsel %vm1992_vm12, 1, %v13371_v32  ;;  %vm4019_vm9 = vc.u32 %v4017_v8, %v4013_v25  ;;  %v4021_v37 = vadd.s32 %v4017_v8, %v4013_v25  ;;  %v10436_v43 = vadd.s32 24, %v10425_v9  ;;  %3343 = vmatmul.f32.gmra.mxu1 %v2653_v24 }
 0x25c   : > { %13403 = vst [vmem:[#allocation35_spill] sm:$0xff] %v10428_v58  ;;  %vm13194_vm0 = vcmp.ne.s32.totalorder %v10428_v58, 0  ;;  %v1990_v42 = vadd.s32 %v1989_v3, %v1979_v13  ;;  %v4020_v45 = vsel %vm4019_vm9, 1, %v13371_v32  ;;  %v4036_v38 = vand.u32 65535, %v9298_v34  ;;  %v5472_v13 = vld [vmem:[#allocation3 + $0xec] sm:$0xff] }
 0x25d   : > { %v5406_v63 = vsel %vm13194_vm0, %v5261_v50, 0.0  ;;  %v4022_v44 = vadd.s32 %v4020_v45, %v4018_v7  ;;  %vm4025_vm14 = vc.u32 %v4021_v37, 2454267026  ;;  %v2003_v46 = vand.u32 65535, %v10436_v43  ;;  %6157 = vrot.lane.b32.xlu2 %v5472_v13, %s8586_s4 }
 0x25e   : > { %v6678_v25 = vsel %vm3559_vm7, %v5406_v63, %v10432_v28  ;;  %v1991_v11 = vadd.s32 %v1990_v42, %v1981_v12  ;;  %v4026_v19 = vsel %vm4025_vm14, 1, %v13371_v32  ;;  %v2004_v27 = vshrl.u32 %v10436_v43, 16 }
 0x25f   : > { %7133 = vmatmul.f32.gmra.mxu3 %v6678_v25  ;;  %v4023_v54 = vadd.s32 %v4022_v44, %v4012_v5  ;;  %v2006_v56 = vmul.u32 9362, %v2003_v46  ;;  %v2007_v8 = vmul.u32 37449, %v2003_v46  ;;  %v4037_v53 = vshrl.u32 %v9298_v34, 16 }
 0x260   : > { %v1994_v7 = vadd.s32 %v1993_v1, %v1991_v11  ;;  %v2008_v50 = vmul.u32 9362, %v2004_v27  ;;  %v2009_v3 = vmul.u32 37449, %v2004_v27  ;;  %v4039_v37 = vmul.u32 9362, %v4036_v38 }
 0x261   : > { %v4024_v12 = vadd.s32 %v4023_v54, %v4014_v36  ;;  %v2010_v42 = vshll.u32 %v2007_v8, 16  ;;  %v2011_v45 = vshrl.u32 %v2007_v8, 16  ;;  %v10450_v63 = vmul.u32 37449, %v4036_v38  ;;  %v2765_v8 = vld [vmem:[#allocation2 + $0x179] sm:$0xff] }
 0x262   : > { %v1995_v9 = vshrl.u32 %v1994_v7, 4  ;;  %v2012_v58 = vshll.u32 %v2008_v50, 16  ;;  %v2013_v25 = vshrl.u32 %v2008_v50, 16  ;;  %v10452_v5 = vmul.u32 9362, %v4037_v53  ;;  %v2423_v7 = vld [vmem:[#allocation2 + $0x177] sm:$0xff] }
 0x263   : > { %v4027_v44 = vadd.s32 %v4026_v19, %v4024_v12  ;;  %vm2014_vm8 = vc.u32 %v2006_v56, %v2010_v42  ;;  %v2016_v46 = vadd.s32 %v2010_v42, %v2006_v56  ;;  %v4042_v6 = vmul.u32 37449, %v4037_v53  ;;  %v3481_v12 = vpop.f32.mrf.mxu2  ;;  %v3108_v42 = vpop.f32.mrf.mxu0 }
 0x264   : > { %v1996_v13 = vmul.u32 28, %v1995_v9  ;;  %v2015_v1 = vsel %vm2014_vm8, 1, %v13371_v32  ;;  %v4043_v11 = vshll.u32 %v10450_v63, 16  ;;  %v4044_v36 = vshrl.u32 %v10450_v63, 16  ;;  %v5262_v63 = vld [vmem:[#allocation3 + $0x6b] sm:$0xff] }
 0x265   : > { %v4028_v27 = vshrl.u32 %v4027_v44, 4  ;;  %v2017_v24 = vadd.s32 %v2015_v1, %v2009_v3  ;;  %vm2018_vm12 = vc.u32 %v2016_v46, %v2012_v58  ;;  %v2020_v38 = vadd.s32 %v2016_v46, %v2012_v58  ;;  %v3296_v46 = vpop.f32.mrf.mxu1  ;;  %v10469_v1 = vpop.permute.xlu1 %6125 }
 0x266   : > { %v1997_v54 = vsub.s32 %v10403_v14, %v1996_v13  ;;  %v2019_v19 = vsel %vm2018_vm12, 1, %v13371_v32  ;;  %v4045_v56 = vshll.u32 %v10452_v5, 16  ;;  %v4046_v9 = vshrl.u32 %v10452_v5, 16 }
 0x267   : > { %v4029_v53 = vmul.u32 28, %v4028_v27  ;;  %v2021_v50 = vadd.s32 %v2019_v19, %v2017_v24  ;;  %vm2024_vm9 = vc.u32 %v2020_v38, 2454267026  ;;  %vm4047_vm14 = vc.u32 %v4039_v37, %v4043_v11 }
 0x268   : > { %vm2708_vm8 = vcmp.ne.s32.totalorder %v1997_v54, 27  ;;  %vm2366_vm0 = vcmp.ne.s32.totalorder %v1997_v54, 0  ;;  %v2025_v58 = vsel %vm2024_vm9, 1, %v13371_v32  ;;  %v4048_v14 = vsel %vm4047_vm14, 1, %v13371_v32 }
 0x269   : > { %8104 = vmatmul.msk.f32.gmra.mxu2 %vm2708_vm8, %v2765_v8  ;;  %v10464_v3 = vsub.s32 %v9282_v60, %v4029_v53  ;;  %8047 = vmatmul.msk.f32.gmra.mxu0 %vm2366_vm0, %v2423_v7  ;;  %v2022_v44 = vadd.s32 %v2021_v50, %v2011_v45  ;;  %v4049_v5 = vadd.s32 %v4043_v11, %v4039_v37  ;;  %v10467_v13 = vadd.s32 384, %v8967_v52  ;;  %v2654_v53 = vld [vmem:[#allocation2 + $0x190] sm:$0xff] }
 0x26a   : > { %v4050_v27 = vadd.s32 %v4048_v14, %v4042_v6  ;;  %v3482_v24 = vadd.f32 %v3481_v12, %v10430_v39  ;;  %v10472_v38 = vadd.f32 %v3296_v46, %v3108_v42  ;;  %v4068_v54 = vand.u32 65535, %v9320_v30  ;;  %3346 = vmatmul.f32.gmra.mxu1 %v2654_v53 }
 0x26b   : > { %13404 = vst [vmem:[#allocation36_spill] sm:$0xff] %v10464_v3  ;;  %vm13201_vm12 = vcmp.ne.s32.totalorder %v10464_v3, 0  ;;  %v2023_v60 = vadd.s32 %v2022_v44, %v2013_v25  ;;  %vm4051_vm9 = vc.u32 %v4049_v5, %v4045_v56  ;;  %v4053_v8 = vadd.s32 %v4049_v5, %v4045_v56  ;;  %v6888_v25 = vld [vmem:[%s13143_s2 + $0xd0] sm:$0xff] }
 0x26c   : > { %13405 = vst [vmem:[#allocation37_spill] sm:$0xff] %v10467_v13  ;;  %v5407_v37 = vsel %vm13201_vm12, %v5262_v63, 0.0  ;;  %v4052_v45 = vsel %vm4051_vm9, 1, %v13371_v32  ;;  %v10481_v6 = vadd.s32 24, %v10467_v13  ;;  %v4069_v39 = vshrl.u32 %v9320_v30, 16  ;;  %v6920_v56 = vld [vmem:[%s13143_s2 + $0x1d0] sm:$0xff]  ;;  %7250 = vmatpush.msrb.mxu3 %v6888_v25 }
 0x26d   : > { %3591 = vst.msk [vmem:[#allocation3 + $0xf8] sm:$0xff] %vm3559_vm7, %v3482_v24  ;;  %v6679_v11 = vsel %vm3559_vm7, %v5407_v37, %v10469_v1  ;;  %v2026_v7 = vadd.s32 %v2025_v58, %v2023_v60  ;;  %v4054_v19 = vadd.s32 %v4052_v45, %v4050_v27  ;;  %vm4057_vm0 = vc.u32 %v4053_v8, 2454267026  ;;  %7578 = vmatpush.msrb.mxu1 %v6920_v56 }
 0x26e   : > { %7136 = vmatmul.f32.gmra.mxu3 %v6679_v11  ;;  %v4058_v50 = vsel %vm4057_vm0, 1, %v13371_v32  ;;  %v2035_v12 = vand.u32 65535, %v10481_v6  ;;  %v2036_v42 = vshrl.u32 %v10481_v6, 16  ;;  %v4071_v14 = vmul.u32 9362, %v4068_v54 }
 0x26f   : > { %v2027_v58 = vshrl.u32 %v2026_v7, 4  ;;  %v4055_v63 = vadd.s32 %v4054_v19, %v4044_v36  ;;  %v10495_v44 = vmul.u32 37449, %v4068_v54  ;;  %v10497_v5 = vmul.u32 9362, %v4069_v39  ;;  %v2766_v54 = vld [vmem:[#allocation2 + $0x181] sm:$0xff] }
 0x270   : > { %v2038_v46 = vmul.u32 9362, %v2035_v12  ;;  %v2039_v27 = vmul.u32 37449, %v2035_v12  ;;  %v2040_v24 = vmul.u32 9362, %v2036_v42  ;;  %v2041_v60 = vmul.u32 37449, %v2036_v42 }
 0x271   : > { %v2028_v8 = vmul.u32 28, %v2027_v58  ;;  %v4056_v37 = vadd.s32 %v4055_v63, %v4046_v9  ;;  %v4074_v45 = vmul.u32 37449, %v4069_v39  ;;  %v4075_v11 = vshll.u32 %v10495_v44, 16  ;;  %v3484_v58 = vpop.f32.mrf.mxu2 }
 0x272   : > { %v2042_v13 = vshll.u32 %v2039_v27, 16  ;;  %v2043_v3 = vshrl.u32 %v2039_v27, 16  ;;  %v2044_v56 = vshll.u32 %v2040_v24, 16  ;;  %v2045_v7 = vshrl.u32 %v2040_v24, 16  ;;  %v3111_v24 = vpop.f32.mrf.mxu0 }
 0x273   : > { %v2029_v36 = vsub.s32 %v10436_v43, %v2028_v8  ;;  %v4059_v19 = vadd.s32 %v4058_v50, %v4056_v37  ;;  %v4076_v25 = vshrl.u32 %v10495_v44, 16  ;;  %v4077_v53 = vshll.u32 %v10497_v5, 16 }
 0x274   : > { %v5473_v12 = vld [vmem:[#allocation3 + $0xf4] sm:$0xff]  ;;  %vm2046_vm14 = vc.u32 %v2038_v46, %v2042_v13  ;;  %v2048_v42 = vadd.s32 %v2042_v13, %v2038_v46  ;;  %v4078_v9 = vshrl.u32 %v10497_v5, 16  ;;  %vm4079_vm8 = vc.u32 %v4071_v14, %v4075_v11 }
 0x275   : > { %6159 = vrot.lane.b32.xlu0 %v5473_v12, %s8586_s4  ;;  %vm2709_vm9 = vcmp.ne.s32.totalorder %v2029_v36, 27  ;;  %v4060_v39 = vshrl.u32 %v4059_v19, 4  ;;  %vm2367_vm0 = vcmp.ne.s32.totalorder %v2029_v36, 0  ;;  %v2047_v43 = vsel %vm2046_vm14, 1, %v13371_v32  ;;  %v3299_v19 = vpop.f32.mrf.mxu1  ;;  %v10514_v12 = vpop.permute.xlu2 %6127 }
 0x276   : > { %8105 = vmatmul.msk.f32.gmra.mxu2 %vm2709_vm9, %v2766_v54  ;;  %8048 = vmatmul.msk.f32.gmra.mxu0 %vm2367_vm0, %v2424_v21  ;;  %v2049_v50 = vadd.s32 %v2047_v43, %v2041_v60  ;;  %vm2050_vm12 = vc.u32 %v2048_v42, %v2044_v56  ;;  %v2052_v63 = vadd.s32 %v2048_v42, %v2044_v56  ;;  %v4080_v44 = vsel %vm4079_vm8, 1, %v13371_v32  ;;  %v5263_v21 = vld [vmem:[#allocation3 + $0x73] sm:$0xff] }
 0x277   : > { %v4061_v27 = vmul.u32 28, %v4060_v39  ;;  %v2051_v13 = vsel %vm2050_vm12, 1, %v13371_v32  ;;  %v4081_v5 = vadd.s32 %v4075_v11, %v4071_v14  ;;  %v4082_v46 = vadd.s32 %v4080_v44, %v4074_v45 }
 0x278   : > { %v2053_v8 = vadd.s32 %v2051_v13, %v2049_v50  ;;  %vm2056_vm2 = vc.u32 %v2052_v63, 2454267026  ;;  %v3485_v37 = vadd.f32 %v3484_v58, %v10472_v38  ;;  %v432_v36 = vadd.s32 392, %v8967_v52  ;;  %v6904_v58 = vld [vmem:[%s13143_s2 + $0x150] sm:$0xff]  ;;  %v2655_v50 = vld [vmem:[#allocation2 + $0x198] sm:$0xff] }
 0x279   : > { %v10511_v54 = vsub.s32 %v9298_v34, %v4061_v27  ;;  %v2057_v60 = vsel %vm2056_vm2, 1, %v13371_v32  ;;  %vm4083_vm14 = vc.u32 %v4081_v5, %v4077_v53  ;;  %v4085_v56 = vadd.s32 %v4081_v5, %v4077_v53  ;;  %7414 = vmatpush.msrb.mxu0 %v6904_v58  ;;  %3349 = vmatmul.f32.gmra.mxu1 %v2655_v50 }
 0x27a   : > { %v2054_v14 = vadd.s32 %v2053_v8, %v2043_v3  ;;  %v4084_v45 = vsel %vm4083_vm14, 1, %v13371_v32  ;;  %3592 = vst.msk [vmem:[#allocation3 + $0x100] sm:$0xff] %vm3559_vm7, %v3485_v37  ;;  %v10518_v11 = vadd.s32 24, %v432_v36  ;;  %v10520_v38 = vadd.f32 %v3299_v19, %v3111_v24 }
 0x27b   : > { %13406 = vst [vmem:[#allocation38_spill] sm:$0xff] %v10511_v54  ;;  %vm13205_vm12 = vcmp.ne.s32.totalorder %v10511_v54, 0  ;;  %v4086_v34 = vadd.s32 %v4084_v45, %v4082_v46  ;;  %vm4089_vm8 = vc.u32 %v4085_v56, 2454267026  ;;  %v4100_v42 = vand.u32 65535, %v9339_v22  ;;  %v2426_v54 = vld [vmem:[#allocation2 + $0x18f] sm:$0xff] }
 0x27c   : > { %v5408_v53 = vsel %vm13205_vm12, %v5263_v21, 0.0  ;;  %v2055_v39 = vadd.s32 %v2054_v14, %v2045_v7  ;;  %v4090_v3 = vsel %vm4089_vm8, 1, %v13371_v32  ;;  %v2067_v43 = vand.u32 65535, %v10518_v11 }
 0x27d   : > { %v6680_v63 = vsel %vm3559_vm7, %v5408_v53, %v10514_v12  ;;  %v4087_v44 = vadd.s32 %v4086_v34, %v4076_v25  ;;  %v2068_v27 = vshrl.u32 %v10518_v11, 16  ;;  %v4101_v13 = vshrl.u32 %v9339_v22, 16 }
 0x27e   : > { %7139 = vmatmul.f32.gmra.mxu3 %v6680_v63  ;;  %v2058_v7 = vadd.s32 %v2057_v60, %v2055_v39  ;;  %v2070_v5 = vmul.u32 9362, %v2067_v43  ;;  %v2071_v46 = vmul.u32 37449, %v2067_v43  ;;  %v4103_v24 = vmul.u32 9362, %v4100_v42 }
 0x27f   : > { %v4088_v8 = vadd.s32 %v4087_v44, %v4078_v9  ;;  %v2072_v37 = vmul.u32 9362, %v2068_v27  ;;  %v2073_v36 = vmul.u32 37449, %v2068_v27  ;;  %v10535_v21 = vmul.u32 37449, %v4100_v42  ;;  %v2767_v27 = vld [vmem:[#allocation2 + $0x189] sm:$0xff] }
 0x280   : > { %v2059_v56 = vshrl.u32 %v2058_v7, 4  ;;  %v2074_v19 = vshll.u32 %v2071_v46, 16  ;;  %v2075_v14 = vshrl.u32 %v2071_v46, 16  ;;  %v10537_v25 = vmul.u32 9362, %v4101_v13  ;;  %v2425_v7 = vld [vmem:[#allocation2 + $0x187] sm:$0xff] }
 0x281   : > { %v4091_v45 = vadd.s32 %v4090_v3, %v4088_v8  ;;  %v2076_v34 = vshll.u32 %v2072_v37, 16  ;;  %v2077_v53 = vshrl.u32 %v2072_v37, 16  ;;  %v4106_v58 = vmul.u32 37449, %v4101_v13  ;;  %v5474_v50 = vld [vmem:[#allocation3 + $0xfc] sm:$0xff] }
 0x282   : > { %v2060_v63 = vmul.u32 28, %v2059_v56  ;;  %vm2078_vm2 = vc.u32 %v2070_v5, %v2074_v19  ;;  %v2080_v60 = vadd.s32 %v2074_v19, %v2070_v5  ;;  %v4107_v39 = vshll.u32 %v10535_v21, 16  ;;  %6161 = vrot.lane.b32.xlu1 %v5474_v50, %s8586_s4  ;;  %v3487_v56 = vpop.f32.mrf.mxu2 }
 0x283   : > { %v4092_v9 = vshrl.u32 %v4091_v45, 4  ;;  %v2079_v42 = vsel %vm2078_vm2, 1, %v13371_v32  ;;  %v4108_v43 = vshrl.u32 %v10535_v21, 16  ;;  %v4109_v44 = vshll.u32 %v10537_v25, 16  ;;  %v3114_v21 = vpop.f32.mrf.mxu0  ;;  %v5264_v45 = vld [vmem:[#allocation3 + $0x7b] sm:$0xff] }
 0x284   : > { %v2061_v3 = vsub.s32 %v10481_v6, %v2060_v63  ;;  %v2081_v13 = vadd.s32 %v2079_v42, %v2073_v36  ;;  %vm2082_vm9 = vc.u32 %v2080_v60, %v2076_v34  ;;  %v2084_v46 = vadd.s32 %v2080_v60, %v2076_v34  ;;  %v10552_v63 = vpop.permute.xlu0 %6129  ;;  %v3302_v42 = vpop.f32.mrf.mxu1 }
 0x285   : > { %v4093_v8 = vmul.u32 28, %v4092_v9  ;;  %v2083_v5 = vsel %vm2082_vm9, 1, %v13371_v32  ;;  %v4110_v37 = vshrl.u32 %v10537_v25, 16  ;;  %vm4111_vm0 = vc.u32 %v4103_v24, %v4107_v39 }
 0x286   : > { %vm2710_vm14 = vcmp.ne.s32.totalorder %v2061_v3, 27  ;;  %vm2368_vm8 = vcmp.ne.s32.totalorder %v2061_v3, 0  ;;  %v2085_v19 = vadd.s32 %v2083_v5, %v2081_v13  ;;  %vm2088_vm2 = vc.u32 %v2084_v46, 2454267026 }
 0x287   : > { %8106 = vmatmul.msk.f32.gmra.mxu2 %vm2710_vm14, %v2767_v27  ;;  %v10548_v6 = vsub.s32 %v9320_v30, %v4093_v8  ;;  %8049 = vmatmul.msk.f32.gmra.mxu0 %vm2368_vm8, %v2425_v7  ;;  %v2089_v36 = vsel %vm2088_vm2, 1, %v13371_v32  ;;  %v4112_v34 = vsel %vm4111_vm0, 1, %v13371_v32  ;;  %v4113_v50 = vadd.s32 %v4107_v39, %v4103_v24 }
 0x288   : > { %v2086_v25 = vadd.s32 %v2085_v19, %v2075_v14  ;;  %v4114_v60 = vadd.s32 %v4112_v34, %v4106_v58  ;;  %v3488_v9 = vadd.f32 %v3487_v56, %v10520_v38  ;;  %v433_v3 = vadd.s32 400, %v8967_v52 }
 0x289   : > { %13407 = vst [vmem:[#allocation39_spill] sm:$0xff] %v10548_v6  ;;  %vm13209_vm9 = vcmp.ne.s32.totalorder %v10548_v6, 0  ;;  %vm4115_vm14 = vc.u32 %v4113_v50, %v4109_v44  ;;  %v4117_v30 = vadd.s32 %v4113_v50, %v4109_v44  ;;  %v10557_v27 = vadd.f32 %v3302_v42, %v3114_v21  ;;  %v2656_v44 = vld [vmem:[#allocation2 + $0x1a0] sm:$0xff] }
 0x28a   : > { %v5409_v7 = vsel %vm13209_vm9, %v5264_v45, 0.0  ;;  %v2087_v13 = vadd.s32 %v2086_v25, %v2077_v53  ;;  %v4116_v24 = vsel %vm4115_vm14, 1, %v13371_v32  ;;  %3593 = vst.msk [vmem:[#allocation3 + $0x108] sm:$0xff] %vm3559_vm7, %v3488_v9  ;;  %v10563_v14 = vadd.s32 24, %v433_v3  ;;  %3352 = vmatmul.f32.gmra.mxu1 %v2656_v44 }
 0x28b   : > { %v6681_v38 = vsel %vm3559_vm7, %v5409_v7, %v10552_v63  ;;  %v4118_v58 = vadd.s32 %v4116_v24, %v4114_v60  ;;  %vm4121_vm0 = vc.u32 %v4117_v30, 2454267026  ;;  %v4132_v39 = vand.u32 65535, %v9349_v48 }
 0x28c   : > { %7142 = vmatmul.f32.gmra.mxu3 %v6681_v38  ;;  %v2090_v46 = vadd.s32 %v2089_v36, %v2087_v13  ;;  %v4122_v8 = vsel %vm4121_vm0, 1, %v13371_v32  ;;  %v2099_v53 = vand.u32 65535, %v10563_v14  ;;  %v2100_v5 = vshrl.u32 %v10563_v14, 16 }
 0x28d   : > { %v4119_v56 = vadd.s32 %v4118_v58, %v4108_v43  ;;  %v4133_v19 = vshrl.u32 %v9349_v48, 16  ;;  %v4135_v21 = vmul.u32 9362, %v4132_v39  ;;  %v10572_v45 = vmul.u32 37449, %v4132_v39 }
 0x28e   : > { %v2091_v34 = vshrl.u32 %v2090_v46, 4  ;;  %v2102_v50 = vmul.u32 9362, %v2099_v53  ;;  %v2103_v25 = vmul.u32 37449, %v2099_v53  ;;  %v2104_v60 = vmul.u32 9362, %v2100_v5  ;;  %v2768_v53 = vld [vmem:[#allocation2 + $0x191] sm:$0xff] }
 0x28f   : > { %v4120_v9 = vadd.s32 %v4119_v56, %v4110_v37  ;;  %v2105_v42 = vmul.u32 37449, %v2100_v5  ;;  %v10574_v36 = vmul.u32 9362, %v4133_v19  ;;  %v4138_v3 = vmul.u32 37449, %v4133_v19 }
 0x290   : > { %v2092_v30 = vmul.u32 28, %v2091_v34  ;;  %v2106_v7 = vshll.u32 %v2103_v25, 16  ;;  %v2107_v13 = vshrl.u32 %v2103_v25, 16  ;;  %v2108_v24 = vshll.u32 %v2104_v60, 16  ;;  %v3490_v34 = vpop.f32.mrf.mxu2 }
 0x291   : > { %v4123_v38 = vadd.s32 %v4122_v8, %v4120_v9  ;;  %v2109_v43 = vshrl.u32 %v2104_v60, 16  ;;  %v4139_v58 = vshll.u32 %v10572_v45, 16  ;;  %v4140_v39 = vshrl.u32 %v10572_v45, 16  ;;  %v5475_v44 = vld [vmem:[#allocation3 + $0x104] sm:$0xff] }
 0x292   : > { %v2093_v46 = vsub.s32 %v10518_v11, %v2092_v30  ;;  %vm2110_vm8 = vc.u32 %v2102_v50, %v2106_v7  ;;  %v2112_v37 = vadd.s32 %v2106_v7, %v2102_v50  ;;  %v4141_v5 = vshll.u32 %v10574_v36, 16  ;;  %6163 = vrot.lane.b32.xlu2 %v5475_v44, %s8586_s4  ;;  %v3117_v11 = vpop.f32.mrf.mxu0  ;;  %v3305_v44 = vpop.f32.mrf.mxu1 }
 0x293   : > { %v4124_v56 = vshrl.u32 %v4123_v38, 4  ;;  %v2111_v19 = vsel %vm2110_vm8, 1, %v13371_v32  ;;  %v4142_v8 = vshrl.u32 %v10574_v36, 16  ;;  %vm4143_vm2 = vc.u32 %v4135_v21, %v4139_v58 }
 0x294   : > { %vm2711_vm14 = vcmp.ne.s32.totalorder %v2093_v46, 27  ;;  %vm2369_vm0 = vcmp.ne.s32.totalorder %v2093_v46, 0  ;;  %v2113_v45 = vadd.s32 %v2111_v19, %v2105_v42  ;;  %vm2114_vm12 = vc.u32 %v2112_v37, %v2108_v24  ;;  %v5265_v42 = vld [vmem:[#allocation3 + $0x83] sm:$0xff] }
 0x295   : > { %8107 = vmatmul.msk.f32.gmra.mxu2 %vm2711_vm14, %v2768_v53  ;;  %v4125_v25 = vmul.u32 28, %v4124_v56  ;;  %8050 = vmatmul.msk.f32.gmra.mxu0 %vm2369_vm0, %v2426_v54  ;;  %v2115_v50 = vsel %vm2114_vm12, 1, %v13371_v32  ;;  %v2116_v60 = vadd.s32 %v2112_v37, %v2108_v24  ;;  %v4144_v9 = vsel %vm4143_vm2, 1, %v13371_v32  ;;  %v10592_v54 = vpop.permute.xlu1 %6131 }
 0x296   : > { %v2117_v30 = vadd.s32 %v2115_v50, %v2113_v45  ;;  %v4145_v7 = vadd.s32 %v4139_v58, %v4135_v21  ;;  %v4146_v38 = vadd.s32 %v4144_v9, %v4138_v3  ;;  %v3491_v36 = vadd.f32 %v3490_v34, %v10557_v27 }
 0x297   : > { %v10587_v6 = vsub.s32 %v9339_v22, %v4125_v25  ;;  %vm2120_vm8 = vc.u32 %v2116_v60, 2454267026  ;;  %v434_v46 = vadd.s32 408, %v8967_v52  ;;  %v10590_v53 = vadd.f32 %v3305_v44, %v3117_v11 }
 0x298   : > { %v2118_v24 = vadd.s32 %v2117_v30, %v2107_v13  ;;  %v2121_v37 = vsel %vm2120_vm8, 1, %v13371_v32  ;;  %vm4147_vm12 = vc.u32 %v4145_v7, %v4141_v5  ;;  %v4149_v21 = vadd.s32 %v4145_v7, %v4141_v5  ;;  %3594 = vst.msk [vmem:[#allocation3 + $0x110] sm:$0xff] %vm3559_vm7, %v3491_v36  ;;  %v6887_v13 = vld [vmem:[%s13143_s2 + $0xc8] sm:$0xff]  ;;  %v6930_v5 = vld [vmem:[%s13143_s2 + $0x220] sm:$0xff] }
 0x299   : > { %13408 = vst [vmem:[#allocation40_spill] sm:$0xff] %v10587_v6  ;;  %vm13208_vm2 = vcmp.ne.s32.totalorder %v10587_v6, 0  ;;  %v4148_v22 = vsel %vm4147_vm12, 1, %v13371_v32  ;;  %v10598_v27 = vadd.s32 24, %v434_v46  ;;  %v4164_v3 = vand.u32 65535, %v9374_v2  ;;  %7251 = vmatpush.msrb.mxu3 %v6887_v13  ;;  %7748 = vmatpush.msrb.mxu2 %v6930_v5 }
 0x29a   : > { %v5410_v58 = vsel %vm13208_vm2, %v5265_v42, 0.0  ;;  %v2119_v56 = vadd.s32 %v2118_v24, %v2109_v43  ;;  %v4150_v19 = vadd.s32 %v4148_v22, %v4146_v38  ;;  %vm4153_vm14 = vc.u32 %v4149_v21, 2454267026  ;;  %v2657_v43 = vld [vmem:[#allocation2 + $0x1a8] sm:$0xff] }
 0x29b   : > { %v6682_v34 = vsel %vm3559_vm7, %v5410_v58, %v10592_v54  ;;  %v4154_v45 = vsel %vm4153_vm14, 1, %v13371_v32  ;;  %v2131_v11 = vand.u32 65535, %v10598_v27  ;;  %v2132_v25 = vshrl.u32 %v10598_v27, 16  ;;  %3355 = vmatmul.f32.gmra.mxu1 %v2657_v43  ;;  %v2769_v43 = vld [vmem:[#allocation2 + $0x199] sm:$0xff] }
 0x29c   : > { %7145 = vmatmul.f32.gmra.mxu3 %v6682_v34  ;;  %v2122_v50 = vadd.s32 %v2121_v37, %v2119_v56  ;;  %v4151_v60 = vadd.s32 %v4150_v19, %v4140_v39  ;;  %v4165_v9 = vshrl.u32 %v9374_v2, 16  ;;  %v4167_v30 = vmul.u32 9362, %v4164_v3 }
 0x29d   : > { %v2134_v7 = vmul.u32 9362, %v2131_v11  ;;  %v2135_v38 = vmul.u32 37449, %v2131_v11  ;;  %v10615_v36 = vmul.u32 9362, %v2132_v25  ;;  %v2137_v44 = vmul.u32 37449, %v2132_v25 }
 0x29e   : > { %v2123_v42 = vshrl.u32 %v2122_v50, 4  ;;  %v4152_v46 = vadd.s32 %v4151_v60, %v4142_v8  ;;  %v10617_v24 = vmul.u32 37449, %v4164_v3  ;;  %v10619_v21 = vmul.u32 9362, %v4165_v9  ;;  %v2427_v60 = vld [vmem:[#allocation2 + $0x197] sm:$0xff] }
 0x29f   : > { %v2138_v22 = vshll.u32 %v2135_v38, 16  ;;  %v2139_v58 = vshrl.u32 %v2135_v38, 16  ;;  %v2140_v37 = vshll.u32 %v10615_v36, 16  ;;  %v2141_v39 = vshrl.u32 %v10615_v36, 16  ;;  %v5476_v56 = vld [vmem:[#allocation3 + $0x10c] sm:$0xff] }
 0x2a0   : > { %v2124_v19 = vmul.u32 28, %v2123_v42  ;;  %v4155_v13 = vadd.s32 %v4154_v45, %v4152_v46  ;;  %v4170_v5 = vmul.u32 37449, %v4165_v9  ;;  %v4171_v34 = vshll.u32 %v10617_v24, 16  ;;  %6165 = vrot.lane.b32.xlu0 %v5476_v56, %s8586_s4  ;;  %v3493_v42 = vpop.f32.mrf.mxu2  ;;  %v3120_v56 = vpop.f32.mrf.mxu0 }
 0x2a1   : > { %vm2142_vm0 = vc.u32 %v2134_v7, %v2138_v22  ;;  %v2144_v8 = vadd.s32 %v2138_v22, %v2134_v7  ;;  %v4172_v3 = vshrl.u32 %v10617_v24, 16  ;;  %v4173_v11 = vshll.u32 %v10619_v21, 16 }
 0x2a2   : > { %v2125_v25 = vsub.s32 %v10563_v14, %v2124_v19  ;;  %v4156_v50 = vshrl.u32 %v4155_v13, 4  ;;  %v2143_v38 = vsel %vm2142_vm0, 1, %v13371_v32  ;;  %v4174_v45 = vshrl.u32 %v10619_v21, 16  ;;  %v10635_v21 = vpop.permute.xlu2 %6133  ;;  %v5266_v19 = vld [vmem:[#allocation3 + $0x8b] sm:$0xff] }
 0x2a3   : > { %v2145_v9 = vadd.s32 %v2143_v38, %v2137_v44  ;;  %vm2146_vm8 = vc.u32 %v2144_v8, %v2140_v37  ;;  %v2148_v36 = vadd.s32 %v2144_v8, %v2140_v37  ;;  %vm4175_vm12 = vc.u32 %v4167_v30, %v4171_v34  ;;  %v6919_v44 = vld [vmem:[%s13143_s2 + $0x1c8] sm:$0xff] }
 0x2a4   : > { %vm2712_vm14 = vcmp.ne.s32.totalorder %v2125_v25, 27  ;;  %v4157_v7 = vmul.u32 28, %v4156_v50  ;;  %vm2370_vm2 = vcmp.ne.s32.totalorder %v2125_v25, 0  ;;  %v2147_v46 = vsel %vm2146_vm8, 1, %v13371_v32  ;;  %7579 = vmatpush.msrb.mxu1 %v6919_v44  ;;  %v3308_v50 = vpop.f32.mrf.mxu1 }
 0x2a5   : > { %8108 = vmatmul.msk.f32.gmra.mxu2 %vm2712_vm14, %v2769_v43  ;;  %8051 = vmatmul.msk.f32.gmra.mxu0 %vm2370_vm2, %v2427_v60  ;;  %v2149_v14 = vadd.s32 %v2147_v46, %v2145_v9  ;;  %vm2152_vm9 = vc.u32 %v2148_v36, 2454267026  ;;  %v4176_v24 = vsel %vm4175_vm12, 1, %v13371_v32  ;;  %v4177_v22 = vadd.s32 %v4171_v34, %v4167_v30  ;;  %v10642_v43 = vpop.f32.mrf.mxu3  ;;  %v2658_v36 = vld [vmem:[#allocation2 + $0x1b0] sm:$0xff] }
 0x2a6   : > { %v10638_v37 = vsub.s32 %v9349_v48, %v4157_v7  ;;  %v2153_v13 = vsel %vm2152_vm9, 1, %v13371_v32  ;;  %v4178_v8 = vadd.s32 %v4176_v24, %v4170_v5  ;;  %v3494_v25 = vadd.f32 %v3493_v42, %v10590_v53  ;;  %13410 = vst [vmem:[#allocation42_spill] sm:$0xff] %v10642_v43  ;;  %v6903_v53 = vld [vmem:[%s13143_s2 + $0x148] sm:$0xff]  ;;  %3358 = vmatmul.f32.gmra.mxu1 %v2658_v36 }
 0x2a7   : > { %v2150_v30 = vadd.s32 %v2149_v14, %v2139_v58  ;;  %vm4179_vm2 = vc.u32 %v4177_v22, %v4173_v11  ;;  %v4181_v34 = vadd.s32 %v4177_v22, %v4173_v11  ;;  %v435_v60 = vadd.s32 416, %v8967_v52  ;;  %7415 = vmatpush.msrb.mxu0 %v6903_v53 }
 0x2a8   : > { %13409 = vst [vmem:[#allocation41_spill] sm:$0xff] %v10638_v37  ;;  %vm13212_vm0 = vcmp.ne.s32.totalorder %v10638_v37, 0  ;;  %v4180_v48 = vsel %vm4179_vm2, 1, %v13371_v32  ;;  %v3309_v38 = vadd.f32 %v3308_v50, %v3120_v56  ;;  %v4196_v5 = vand.u32 65535, %v9377_v29  ;;  %v3496_v36 = vpop.f32.mrf.mxu2 }
 0x2a9   : > { %3595 = vst.msk [vmem:[#allocation3 + $0x118] sm:$0xff] %vm3559_vm7, %v3494_v25  ;;  %v5411_v58 = vsel %vm13212_vm0, %v5266_v19, 0.0  ;;  %v2151_v11 = vadd.s32 %v2150_v30, %v2141_v39  ;;  %v4182_v9 = vadd.s32 %v4180_v48, %v4178_v8  ;;  %vm4185_vm9 = vc.u32 %v4181_v34, 2454267026 }
 0x2aa   : > { %v6683_v42 = vsel %vm3559_vm7, %v5411_v58, %v10635_v21  ;;  %v4186_v7 = vsel %vm4185_vm9, 1, %v13371_v32  ;;  %v10657_v46 = vadd.s32 24, %v435_v60  ;;  %v4197_v14 = vshrl.u32 %v9377_v29, 16 }
 0x2ab   : > { %7148 = vmatmul.f32.gmra.mxu3 %v6683_v42  ;;  %v2154_v24 = vadd.s32 %v2153_v13, %v2151_v11  ;;  %v4183_v22 = vadd.s32 %v4182_v9, %v4172_v3  ;;  %v4199_v56 = vmul.u32 9362, %v4196_v5  ;;  %v10660_v44 = vmul.u32 37449, %v4196_v5 }
 0x2ac   : > { %v2163_v39 = vand.u32 65535, %v10657_v46  ;;  %v2164_v19 = vshrl.u32 %v10657_v46, 16  ;;  %v10664_v8 = vmul.u32 9362, %v4197_v14  ;;  %v4202_v25 = vmul.u32 37449, %v4197_v14 }
 0x2ad   : > { %v2155_v30 = vshrl.u32 %v2154_v24, 4  ;;  %v4184_v34 = vadd.s32 %v4183_v22, %v4174_v45  ;;  %v4203_v50 = vshll.u32 %v10660_v44, 16  ;;  %v4204_v60 = vshrl.u32 %v10660_v44, 16  ;;  %v10671_v22 = vpop.f32.mrf.mxu3 }
 0x2ae   : > { %v2166_v48 = vmul.u32 9362, %v2163_v39  ;;  %v2167_v53 = vmul.u32 37449, %v2163_v39  ;;  %v2168_v13 = vmul.u32 9362, %v2164_v19  ;;  %v2169_v3 = vmul.u32 37449, %v2164_v19  ;;  %13411 = vst [vmem:[#allocation43_spill] sm:$0xff] %v10671_v22  ;;  %v2770_v39 = vld [vmem:[#allocation2 + $0x1a1] sm:$0xff] }
 0x2af   : > { %v2156_v58 = vmul.u32 28, %v2155_v30  ;;  %v4187_v5 = vadd.s32 %v4186_v7, %v4184_v34  ;;  %v4205_v11 = vshll.u32 %v10664_v8, 16  ;;  %v4206_v9 = vshrl.u32 %v10664_v8, 16  ;;  %v2428_v30 = vld [vmem:[#allocation2 + $0x19f] sm:$0xff] }
 0x2b0   : > { %v5477_v42 = vld [vmem:[#allocation3 + $0x114] sm:$0xff]  ;;  %v2170_v43 = vshll.u32 %v2167_v53, 16  ;;  %v2171_v14 = vshrl.u32 %v2167_v53, 16  ;;  %v2172_v24 = vshll.u32 %v2168_v13, 16  ;;  %v2173_v45 = vshrl.u32 %v2168_v13, 16 }
 0x2b1   : > { %6167 = vrot.lane.b32.xlu1 %v5477_v42, %s8586_s4  ;;  %v2157_v44 = vsub.s32 %v10598_v27, %v2156_v58  ;;  %v4188_v19 = vshrl.u32 %v4187_v5, 4  ;;  %vm4207_vm8 = vc.u32 %v4199_v56, %v4203_v50  ;;  %v4209_v7 = vadd.s32 %v4203_v50, %v4199_v56  ;;  %v5267_v56 = vld [vmem:[#allocation3 + $0x93] sm:$0xff] }
 0x2b2   : > { %vm2174_vm12 = vc.u32 %v2166_v48, %v2170_v43  ;;  %v2176_v34 = vadd.s32 %v2170_v43, %v2166_v48  ;;  %v4208_v8 = vsel %vm4207_vm8, 1, %v13371_v32  ;;  %v3497_v37 = vadd.f32 %v3496_v36, %v3309_v38  ;;  %v3123_v38 = vpop.f32.mrf.mxu0  ;;  %v10681_v48 = vpop.permute.xlu0 %6135 }
 0x2b3   : > { %vm2713_vm14 = vcmp.ne.s32.totalorder %v2157_v44, 27  ;;  %v4189_v53 = vmul.u32 28, %v4188_v19  ;;  %vm2371_vm2 = vcmp.ne.s32.totalorder %v2157_v44, 0  ;;  %v2175_v13 = vsel %vm2174_vm12, 1, %v13371_v32 }
 0x2b4   : > { %8109 = vmatmul.msk.f32.gmra.mxu2 %vm2713_vm14, %v2770_v39  ;;  %8052 = vmatmul.msk.f32.gmra.mxu0 %vm2371_vm2, %v2428_v30  ;;  %v2177_v42 = vadd.s32 %v2175_v13, %v2169_v3  ;;  %vm2178_vm9 = vc.u32 %v2176_v34, %v2172_v24  ;;  %v2180_v27 = vadd.s32 %v2176_v34, %v2172_v24  ;;  %v436_v44 = vadd.s32 424, %v8967_v52 }
 0x2b5   : > { %3596 = vst.msk [vmem:[#allocation3 + $0x120] sm:$0xff] %vm3559_vm7, %v3497_v37  ;;  %v10678_v58 = vsub.s32 %v9374_v2, %v4189_v53  ;;  %v2179_v43 = vsel %vm2178_vm9, 1, %v13371_v32  ;;  %v4210_v50 = vadd.s32 %v4208_v8, %v4202_v25  ;;  %vm4211_vm8 = vc.u32 %v4209_v7, %v4205_v11  ;;  %v3311_v2 = vpop.f32.mrf.mxu1  ;;  %v3499_v8 = vpop.f32.mrf.mxu2  ;;  %v2659_v53 = vld [vmem:[#allocation2 + $0x1b8] sm:$0xff] }
 0x2b6   : > { %v2181_v5 = vadd.s32 %v2179_v43, %v2177_v42  ;;  %vm2184_vm12 = vc.u32 %v2180_v27, 2454267026  ;;  %v4212_v36 = vsel %vm4211_vm8, 1, %v13371_v32  ;;  %v4213_v3 = vadd.s32 %v4209_v7, %v4205_v11  ;;  %3361 = vmatmul.f32.gmra.mxu1 %v2659_v53 }
 0x2b7   : > { %13412 = vst [vmem:[#allocation44_spill] sm:$0xff] %v10678_v58  ;;  %vm13213_vm14 = vcmp.ne.s32.totalorder %v10678_v58, 0  ;;  %v2185_v37 = vsel %vm2184_vm12, 1, %v13371_v32  ;;  %v4214_v24 = vadd.s32 %v4212_v36, %v4210_v50  ;;  %v3312_v19 = vadd.f32 %v3311_v2, %v3123_v38 }
 0x2b8   : > { %v5412_v25 = vsel %vm13213_vm14, %v5267_v56, 0.0  ;;  %v2182_v39 = vadd.s32 %v2181_v5, %v2171_v14  ;;  %vm4217_vm2 = vc.u32 %v4213_v3, 2454267026  ;;  %v10692_v7 = vadd.s32 24, %v436_v44  ;;  %v10696_v14 = vpop.f32.mrf.mxu3 }
 0x2b9   : > { %v6684_v30 = vsel %vm3559_vm7, %v5412_v25, %v10681_v48  ;;  %v4215_v34 = vadd.s32 %v4214_v24, %v4204_v60  ;;  %v4218_v11 = vsel %vm4217_vm2, 1, %v13371_v32  ;;  %v4228_v42 = vand.u32 65535, %v9380_v4  ;;  %13413 = vst [vmem:[#allocation45_spill] sm:$0xff] %v10696_v14 }
 0x2ba   : > { %7151 = vmatmul.f32.gmra.mxu3 %v6684_v30  ;;  %v2183_v13 = vadd.s32 %v2182_v39, %v2173_v45  ;;  %v4229_v27 = vshrl.u32 %v9380_v4, 16  ;;  %v3500_v56 = vadd.f32 %v3499_v8, %v3312_v19  ;;  %v2195_v50 = vand.u32 65535, %v10692_v7 }
 0x2bb   : > { %v4216_v43 = vadd.s32 %v4215_v34, %v4206_v9  ;;  %v2196_v60 = vshrl.u32 %v10692_v7, 16  ;;  %v437_v5 = vadd.s32 432, %v8967_v52  ;;  %v4231_v3 = vmul.u32 9362, %v4228_v42 }
 0x2bc   : > { %v5478_v38 = vld [vmem:[#allocation3 + $0x11c] sm:$0xff]  ;;  %v2186_v36 = vadd.s32 %v2185_v37, %v2183_v13  ;;  %v10701_v24 = vmul.u32 37449, %v4228_v42  ;;  %v10703_v45 = vmul.u32 9362, %v4229_v27  ;;  %3597 = vst.msk [vmem:[#allocation3 + $0x128] sm:$0xff] %vm3559_vm7, %v3500_v56  ;;  %v2198_v44 = vmul.u32 9362, %v2195_v50 }
 0x2bd   : > { %6169 = vrot.lane.b32.xlu2 %v5478_v38, %s8586_s4  ;;  %v4219_v2 = vadd.s32 %v4218_v11, %v4216_v43  ;;  %v2199_v9 = vmul.u32 37449, %v2195_v50  ;;  %v2200_v25 = vmul.u32 9362, %v2196_v60  ;;  %v2201_v19 = vmul.u32 37449, %v2196_v60  ;;  %v2429_v60 = vld [vmem:[#allocation2 + $0x1a7] sm:$0xff] }
 0x2be   : > { %v2187_v39 = vshrl.u32 %v2186_v36, 4  ;;  %v4234_v30 = vmul.u32 37449, %v4229_v27  ;;  %v4235_v34 = vshll.u32 %v10701_v24, 16  ;;  %v4236_v22 = vshrl.u32 %v10701_v24, 16  ;;  %v2771_v27 = vld [vmem:[#allocation2 + $0x1a9] sm:$0xff] }
 0x2bf   : > { %v4220_v8 = vshrl.u32 %v4219_v2, 4  ;;  %v2202_v37 = vshll.u32 %v2199_v9, 16  ;;  %v2203_v53 = vshrl.u32 %v2199_v9, 16  ;;  %v2204_v13 = vshll.u32 %v2200_v25, 16 }
 0x2c0   : > { %v2188_v42 = vmul.u32 28, %v2187_v39  ;;  %v2205_v14 = vshrl.u32 %v2200_v25, 16  ;;  %v4237_v56 = vshll.u32 %v10703_v45, 16  ;;  %v4238_v43 = vshrl.u32 %v10703_v45, 16  ;;  %v5268_v25 = vld [vmem:[#allocation3 + $0x9b] sm:$0xff] }
 0x2c1   : > { %v4221_v38 = vmul.u32 28, %v4220_v8  ;;  %vm2206_vm9 = vc.u32 %v2198_v44, %v2202_v37  ;;  %v2208_v11 = vadd.s32 %v2202_v37, %v2198_v44  ;;  %vm4239_vm8 = vc.u32 %v4231_v3, %v4235_v34  ;;  %v10716_v8 = vpop.permute.xlu1 %6137 }
 0x2c2   : > { %v2189_v50 = vsub.s32 %v10657_v46, %v2188_v42  ;;  %v2207_v36 = vsel %vm2206_vm9, 1, %v13371_v32  ;;  %v4241_v2 = vadd.s32 %v4235_v34, %v4231_v3  ;;  %v4240_v46 = vsel %vm4239_vm8, 1, %v13371_v32  ;;  %v10721_v3 = vpop.f32.mrf.mxu3 }
 0x2c3   : > { %v10714_v9 = vsub.s32 %v9377_v29, %v4221_v38  ;;  %v2209_v24 = vadd.s32 %v2207_v36, %v2201_v19  ;;  %vm2210_vm12 = vc.u32 %v2208_v11, %v2204_v13  ;;  %v2212_v39 = vadd.s32 %v2208_v11, %v2204_v13  ;;  %13415 = vst [vmem:[#allocation47_spill] sm:$0xff] %v10721_v3  ;;  %v3126_v19 = vpop.f32.mrf.mxu0 }
 0x2c4   : > { %vm2714_vm2 = vcmp.ne.s32.totalorder %v2189_v50, 27  ;;  %vm2372_vm0 = vcmp.ne.s32.totalorder %v2189_v50, 0  ;;  %v2211_v45 = vsel %vm2210_vm12, 1, %v13371_v32  ;;  %v4242_v44 = vadd.s32 %v4240_v46, %v4234_v30  ;;  %v3314_v50 = vpop.f32.mrf.mxu1  ;;  %v6886_v30 = vld [vmem:[%s13143_s2 + $0xc0] sm:$0xff] }
 0x2c5   : > { %13414 = vst [vmem:[#allocation46_spill] sm:$0xff] %v10714_v9  ;;  %8110 = vmatmul.msk.f32.gmra.mxu2 %vm2714_vm2, %v2771_v27  ;;  %vm13227_vm9 = vcmp.ne.s32.totalorder %v10714_v9, 0  ;;  %8053 = vmatmul.msk.f32.gmra.mxu0 %vm2372_vm0, %v2429_v60  ;;  %v2213_v29 = vadd.s32 %v2211_v45, %v2209_v24  ;;  %vm2216_vm14 = vc.u32 %v2212_v39, 2454267026  ;;  %vm4243_vm4 = vc.u32 %v4241_v2, %v4237_v56  ;;  %v5479_v60 = vld [vmem:[#allocation3 + $0x124] sm:$0xff] }
 0x2c6   : > { %v5413_v34 = vsel %vm13227_vm9, %v5268_v25, 0.0  ;;  %v2217_v37 = vsel %vm2216_vm14, 1, %v13371_v32  ;;  %v4245_v13 = vadd.s32 %v4241_v2, %v4237_v56  ;;  %v4244_v11 = vsel %vm4243_vm4, 1, %v13371_v32  ;;  %6171 = vrot.lane.b32.xlu0 %v5479_v60, %s8586_s4  ;;  %7252 = vmatpush.msrb.mxu3 %v6886_v30 }
 0x2c7   : > { %v6685_v42 = vsel %vm3559_vm7, %v5413_v34, %v10716_v8  ;;  %v2214_v38 = vadd.s32 %v2213_v29, %v2203_v53  ;;  %v10729_v27 = vadd.s32 24, %v437_v5  ;;  %v4246_v36 = vadd.s32 %v4244_v11, %v4242_v44  ;;  %v6918_v53 = vld [vmem:[%s13143_s2 + $0x1c0] sm:$0xff] }
 0x2c8   : > { %7154 = vmatmul.f32.gmra.mxu3 %v6685_v42  ;;  %vm4249_vm0 = vc.u32 %v4245_v13, 2454267026  ;;  %v10734_v25 = vadd.f32 %v3314_v50, %v3126_v19  ;;  %v4260_v56 = vand.u32 65535, %v9405_v51  ;;  %v2660_v5 = vld [vmem:[#allocation2 + $0x1c0] sm:$0xff]  ;;  %7580 = vmatpush.msrb.mxu1 %v6918_v53  ;;  %v4261_v29 = vshrl.u32 %v9405_v51, 16 }
 0x2c9   : > { %v2215_v2 = vadd.s32 %v2214_v38, %v2205_v14  ;;  %v4250_v24 = vsel %vm4249_vm0, 1, %v13371_v32  ;;  %v2227_v39 = vand.u32 65535, %v10729_v27  ;;  %v2228_v45 = vshrl.u32 %v10729_v27, 16  ;;  %3364 = vmatmul.f32.gmra.mxu1 %v2660_v5 }
 0x2ca   : > { %v4247_v46 = vadd.s32 %v4246_v36, %v4236_v22  ;;  %v4263_v44 = vmul.u32 9362, %v4260_v56  ;;  %v10745_v19 = vmul.u32 37449, %v4260_v56  ;;  %v10747_v50 = vmul.u32 9362, %v4261_v29  ;;  %v3502_v22 = vpop.f32.mrf.mxu2 }
 0x2cb   : > { %v2218_v34 = vadd.s32 %v2217_v37, %v2215_v2  ;;  %v2230_v13 = vmul.u32 9362, %v2227_v39  ;;  %v2231_v42 = vmul.u32 37449, %v2227_v39  ;;  %v2232_v11 = vmul.u32 9362, %v2228_v45  ;;  %v10751_v2 = vpop.f32.mrf.mxu3 }
 0x2cc   : > { %v4248_v14 = vadd.s32 %v4247_v46, %v4238_v43  ;;  %v2233_v38 = vmul.u32 37449, %v2228_v45  ;;  %v4266_v60 = vmul.u32 37449, %v4261_v29  ;;  %v4267_v56 = vshll.u32 %v10745_v19, 16  ;;  %13416 = vst [vmem:[#allocation48_spill] sm:$0xff] %v10751_v2  ;;  %v3317_v2 = vpop.f32.mrf.mxu1 }
 0x2cd   : > { %v2219_v3 = vshrl.u32 %v2218_v34, 4  ;;  %v2234_v9 = vshll.u32 %v2231_v42, 16  ;;  %v2235_v30 = vshrl.u32 %v2231_v42, 16  ;;  %v2236_v53 = vshll.u32 %v2232_v11, 16  ;;  %v2772_v34 = vld [vmem:[#allocation2 + $0x1b1] sm:$0xff] }
 0x2ce   : > { %v4251_v36 = vadd.s32 %v4250_v24, %v4248_v14  ;;  %v2237_v6 = vshrl.u32 %v2232_v11, 16  ;;  %v4268_v5 = vshrl.u32 %v10745_v19, 16  ;;  %v4269_v39 = vshll.u32 %v10747_v50, 16  ;;  %v2430_v42 = vld [vmem:[#allocation2 + $0x1af] sm:$0xff] }
 0x2cf   : > { %v2220_v37 = vmul.u32 28, %v2219_v3  ;;  %vm2238_vm4 = vc.u32 %v2230_v13, %v2234_v9  ;;  %v2240_v43 = vadd.s32 %v2234_v9, %v2230_v13  ;;  %v4270_v29 = vshrl.u32 %v10747_v50, 16  ;;  %v3129_v50 = vpop.f32.mrf.mxu0 }
 0x2d0   : > { %v4252_v45 = vshrl.u32 %v4251_v36, 4  ;;  %v2239_v46 = vsel %vm2238_vm4, 1, %v13371_v32  ;;  %vm4271_vm14 = vc.u32 %v4263_v44, %v4267_v56  ;;  %v4273_v13 = vadd.s32 %v4267_v56, %v4263_v44  ;;  %v10766_v44 = vpop.permute.xlu2 %6139 }
 0x2d1   : > { %v2221_v24 = vsub.s32 %v10692_v7, %v2220_v37  ;;  %v2241_v11 = vadd.s32 %v2239_v46, %v2233_v38  ;;  %vm2242_vm8 = vc.u32 %v2240_v43, %v2236_v53  ;;  %v2244_v19 = vadd.s32 %v2240_v43, %v2236_v53  ;;  %v6917_v7 = vld [vmem:[%s13143_s2 + $0x1b8] sm:$0xff] }
 0x2d2   : > { %v4253_v3 = vmul.u32 28, %v4252_v45  ;;  %v2243_v14 = vsel %vm2242_vm8, 1, %v13371_v32  ;;  %v4272_v9 = vsel %vm4271_vm14, 1, %v13371_v32  ;;  %v5269_v53 = vld [vmem:[#allocation3 + $0xa3] sm:$0xff]  ;;  %vm4275_vm4 = vc.u32 %v4273_v13, %v4269_v39  ;;  %7581 = vmatpush.msrb.mxu1 %v6917_v7 }
 0x2d3   : > { %vm2715_vm12 = vcmp.ne.s32.totalorder %v2221_v24, 27  ;;  %vm2373_vm2 = vcmp.ne.s32.totalorder %v2221_v24, 0  ;;  %v2245_v36 = vadd.s32 %v2243_v14, %v2241_v11  ;;  %vm2248_vm0 = vc.u32 %v2244_v19, 2454267026 }
 0x2d4   : > { %8111 = vmatmul.msk.f32.gmra.mxu2 %vm2715_vm12, %v2772_v34  ;;  %v10763_v38 = vsub.s32 %v9380_v4, %v4253_v3  ;;  %8054 = vmatmul.msk.f32.gmra.mxu0 %vm2373_vm2, %v2430_v42  ;;  %v2249_v37 = vsel %vm2248_vm0, 1, %v13371_v32  ;;  %v4274_v43 = vadd.s32 %v4272_v9, %v4266_v60  ;;  %v4276_v45 = vsel %vm4275_vm4, 1, %v13371_v32  ;;  %v6916_v60 = vld [vmem:[%s13143_s2 + $0x1b0] sm:$0xff]  ;;  %v6914_v9 = vld [vmem:[%s13143_s2 + $0x1a0] sm:$0xff] }
 0x2d5   : > { %v2246_v56 = vadd.s32 %v2245_v36, %v2235_v30  ;;  %v4277_v46 = vadd.s32 %v4273_v13, %v4269_v39  ;;  %v3503_v24 = vadd.f32 %v3502_v22, %v10734_v25  ;;  %v438_v4 = vadd.s32 440, %v8967_v52  ;;  %v6915_v30 = vld [vmem:[%s13143_s2 + $0x1a8] sm:$0xff]  ;;  %v3505_v22 = vpop.f32.mrf.mxu2  ;;  %7582 = vmatpush.msrb.mxu1 %v6916_v60  ;;  %v10790_v36 = vpop.f32.mrf.mxu3 }
 0x2d6   : > { %13417 = vst [vmem:[#allocation49_spill] sm:$0xff] %v10763_v38  ;;  %vm13225_vm14 = vcmp.ne.s32.totalorder %v10763_v38, 0  ;;  %v4278_v34 = vadd.s32 %v4276_v45, %v4274_v43  ;;  %v3318_v11 = vadd.f32 %v3317_v2, %v3129_v50  ;;  %v4292_v25 = vand.u32 65535, %v9433_v18 }
 0x2d7   : > { %v5414_v39 = vsel %vm13225_vm14, %v5269_v53, 0.0  ;;  %v2247_v42 = vadd.s32 %v2246_v56, %v2237_v6  ;;  %vm4281_vm8 = vc.u32 %v4277_v46, 2454267026  ;;  %3598 = vst.msk [vmem:[#allocation3 + $0x130] sm:$0xff] %vm3559_vm7, %v3503_v24  ;;  %v10785_v14 = vadd.s32 24, %v438_v4  ;;  %v2661_v6 = vld [vmem:[#allocation2 + $0x1c8] sm:$0xff]  ;;  %7583 = vmatpush.msrb.mxu1 %v6915_v30 }
 0x2d8   : > { %v6686_v2 = vsel %vm3559_vm7, %v5414_v39, %v10766_v44  ;;  %v4279_v19 = vadd.s32 %v4278_v34, %v4268_v5  ;;  %v4282_v3 = vsel %vm4281_vm8, 1, %v13371_v32  ;;  %13418 = vst [vmem:[#allocation50_spill] sm:$0xff] %v10790_v36  ;;  %v4293_v50 = vshrl.u32 %v9433_v18, 16  ;;  %3367 = vmatmul.f32.gmra.mxu1 %v2661_v6 }
 0x2d9   : > { %7157 = vmatmul.f32.gmra.mxu3 %v6686_v2  ;;  %v2250_v13 = vadd.s32 %v2249_v37, %v2247_v42  ;;  %v4295_v7 = vmul.u32 9362, %v4292_v25  ;;  %v10793_v53 = vmul.u32 37449, %v4292_v25  ;;  %v2259_v43 = vand.u32 65535, %v10785_v14  ;;  %7584 = vmatpush.msrb.mxu1 %v6914_v9 }
 0x2da   : > { %v4280_v5 = vadd.s32 %v4279_v19, %v4270_v29  ;;  %v2260_v56 = vshrl.u32 %v10785_v14, 16  ;;  %v3506_v45 = vadd.f32 %v3505_v22, %v3318_v11  ;;  %v10797_v24 = vmul.u32 9362, %v4293_v50  ;;  %v3320_v22 = vpop.f32.mrf.mxu1 }
 0x2db   : > { %v2251_v46 = vshrl.u32 %v2250_v13, 4  ;;  %v4298_v34 = vmul.u32 37449, %v4293_v50  ;;  %v4299_v37 = vshll.u32 %v10793_v53, 16  ;;  %v2262_v60 = vmul.u32 9362, %v2259_v43  ;;  %v2773_v50 = vld [vmem:[#allocation2 + $0x1b9] sm:$0xff] }
 0x2dc   : > { %v4283_v4 = vadd.s32 %v4282_v3, %v4280_v5  ;;  %v2263_v39 = vmul.u32 37449, %v2259_v43  ;;  %v10800_v42 = vmul.u32 9362, %v2260_v56  ;;  %3599 = vst.msk [vmem:[#allocation3 + $0x138] sm:$0xff] %vm3559_vm7, %v3506_v45  ;;  %v2265_v30 = vmul.u32 37449, %v2260_v56  ;;  %v2431_v5 = vld [vmem:[#allocation2 + $0x1b7] sm:$0xff] }
 0x2dd   : > { %v2252_v29 = vmul.u32 28, %v2251_v46  ;;  %v4300_v25 = vshrl.u32 %v10793_v53, 16  ;;  %v4301_v11 = vshll.u32 %v10797_v24, 16  ;;  %v4302_v45 = vshrl.u32 %v10797_v24, 16 }
 0x2de   : > { %v4284_v2 = vshrl.u32 %v4283_v4, 4  ;;  %v2266_v19 = vshll.u32 %v2263_v39, 16  ;;  %v2267_v6 = vshrl.u32 %v2263_v39, 16  ;;  %v2268_v13 = vshll.u32 %v10800_v42, 16  ;;  %v5480_v9 = vld [vmem:[#allocation3 + $0x12c] sm:$0xff]  ;;  %v3132_v4 = vpop.f32.mrf.mxu0  ;;  %v6913_v39 = vld [vmem:[%s13143_s2 + $0x198] sm:$0xff] }
 0x2df   : > { %v2253_v3 = vsub.s32 %v10729_v27, %v2252_v29  ;;  %v2269_v43 = vshrl.u32 %v10800_v42, 16  ;;  %vm4303_vm12 = vc.u32 %v4295_v7, %v4299_v37  ;;  %6173 = vrot.lane.b32.xlu1 %v5480_v9, %s8586_s4  ;;  %v6929_v27 = vld [vmem:[%s13143_s2 + $0x218] sm:$0xff]  ;;  %v4305_v42 = vadd.s32 %v4299_v37, %v4295_v7  ;;  %7585 = vmatpush.msrb.mxu1 %v6913_v39  ;;  %v5270_v29 = vld [vmem:[#allocation3 + $0xab] sm:$0xff]  ;;  %v10822_v9 = vpop.permute.xlu0 %6141  ;;  %v10825_v7 = vpop.f32.mrf.mxu3 }
 0x2e0   : > { %v4285_v53 = vmul.u32 28, %v4284_v2  ;;  %vm2270_vm2 = vc.u32 %v2262_v60, %v2266_v19  ;;  %v2272_v56 = vadd.s32 %v2266_v19, %v2262_v60  ;;  %v4304_v46 = vsel %vm4303_vm12, 1, %v13371_v32  ;;  %7749 = vmatpush.msrb.mxu2 %v6929_v27  ;;  %13420 = vst [vmem:[#allocation52_spill] sm:$0xff] %v10825_v7  ;;  %v10839_v39 = vpop.f32.mrf.mxu2 }
 0x2e1   : > { %vm2716_vm0 = vcmp.ne.s32.totalorder %v2253_v3, 27  ;;  %vm2374_vm4 = vcmp.ne.s32.totalorder %v2253_v3, 0  ;;  %v2271_v24 = vsel %vm2270_vm2, 1, %v13371_v32  ;;  %v439_v19 = vadd.s32 448, %v8967_v52 }
 0x2e2   : > { %8112 = vmatmul.msk.f32.gmra.mxu2 %vm2716_vm0, %v2773_v50  ;;  %v10819_v60 = vsub.s32 %v9405_v51, %v4285_v53  ;;  %8055 = vmatmul.msk.f32.gmra.mxu0 %vm2374_vm4, %v2431_v5  ;;  %v2273_v2 = vadd.s32 %v2271_v24, %v2265_v30  ;;  %vm2274_vm8 = vc.u32 %v2272_v56, %v2268_v13  ;;  %v10847_v27 = vpop.f32.mrf.mxu1 }
 0x2e3   : > { %v2275_v36 = vsel %vm2274_vm8, 1, %v13371_v32  ;;  %v2276_v3 = vadd.s32 %v2272_v56, %v2268_v13  ;;  %v4306_v38 = vadd.s32 %v4304_v46, %v4298_v34  ;;  %vm4307_vm12 = vc.u32 %v4305_v42, %v4301_v11 }
 0x2e4   : > { %13419 = vst [vmem:[#allocation51_spill] sm:$0xff] %v10819_v60  ;;  %vm13230_vm2 = vcmp.ne.s32.totalorder %v10819_v60, 0  ;;  %v2277_v37 = vadd.s32 %v2275_v36, %v2273_v2  ;;  %v4308_v51 = vsel %vm4307_vm12, 1, %v13371_v32  ;;  %v4309_v50 = vadd.s32 %v4305_v42, %v4301_v11  ;;  %v6902_v2 = vld [vmem:[%s13143_s2 + $0x140] sm:$0xff] }
 0x2e5   : > { %v5415_v30 = vsel %vm13230_vm2, %v5270_v29, 0.0  ;;  %vm2280_vm0 = vc.u32 %v2276_v3, 2454267026  ;;  %v4310_v52 = vadd.s32 %v4308_v51, %v4306_v38  ;;  %v10831_v5 = vadd.s32 24, %v439_v19  ;;  %v6912_v38 = vld [vmem:[%s13143_s2 + $0x190] sm:$0xff]  ;;  %v6911_v19 = vld [vmem:[%s13143_s2 + $0x188] sm:$0xff]  ;;  %7416 = vmatpush.msrb.mxu0 %v6902_v2 }
 0x2e6   : > { %v6687_v13 = vsel %vm3559_vm7, %v5415_v30, %v10822_v9  ;;  %v2278_v34 = vadd.s32 %v2277_v37, %v2267_v6  ;;  %v2281_v53 = vsel %vm2280_vm0, 1, %v13371_v32  ;;  %vm4313_vm4 = vc.u32 %v4309_v50, 2454267026  ;;  %v6928_v6 = vld [vmem:[%s13143_s2 + $0x210] sm:$0xff]  ;;  %7586 = vmatpush.msrb.mxu1 %v6912_v38  ;;  %v6910_v50 = vld [vmem:[%s13143_s2 + $0x180] sm:$0xff] }
 0x2e7   : > { %7160 = vmatmul.f32.gmra.mxu3 %v6687_v13  ;;  %v4311_v56 = vadd.s32 %v4310_v52, %v4300_v25  ;;  %v4314_v36 = vsel %vm4313_vm4, 1, %v13371_v32  ;;  %v2291_v11 = vand.u32 65535, %v10831_v5  ;;  %v2292_v46 = vshrl.u32 %v10831_v5, 16  ;;  %7750 = vmatpush.msrb.mxu2 %v6928_v6  ;;  %v5481_v51 = vld [vmem:[#allocation3 + $0x134] sm:$0xff]  ;;  %v6926_v30 = vld [vmem:[%s13143_s2 + $0x200] sm:$0xff]  ;;  %v10872_v52 = vpop.f32.mrf.mxu0 }
 0x2e8   : > { %v2279_v24 = vadd.s32 %v2278_v34, %v2269_v43  ;;  %v10849_v25 = vadd.f32 %v3320_v22, %v3132_v4  ;;  %v4324_v42 = vand.u32 65535, %v9453_v33  ;;  %v4325_v29 = vshrl.u32 %v9453_v33, 16  ;;  %v6927_v43 = vld [vmem:[%s13143_s2 + $0x208] sm:$0xff]  ;;  %7587 = vmatpush.msrb.mxu1 %v6911_v19  ;;  %6175 = vrot.lane.b32.xlu2 %v5481_v51, %s8586_s4 }
 0x2e9   : > { %v4312_v22 = vadd.s32 %v4311_v56, %v4302_v45  ;;  %v2294_v4 = vmul.u32 9362, %v2291_v11  ;;  %v10862_v3 = vmul.u32 37449, %v2291_v11  ;;  %v10864_v37 = vmul.u32 9362, %v2292_v46  ;;  %7751 = vmatpush.msrb.mxu2 %v6927_v43 }
 0x2ea   : > { %v2282_v13 = vadd.s32 %v2281_v53, %v2279_v24  ;;  %v2297_v34 = vmul.u32 37449, %v2292_v46  ;;  %v4327_v45 = vmul.u32 9362, %v4324_v42  ;;  %v10874_v56 = vmul.u32 37449, %v4324_v42  ;;  %7588 = vmatpush.msrb.mxu1 %v6910_v50  ;;  %v10884_v42 = vpop.f32.mrf.mxu3 }
 0x2eb   : > { %v4315_v11 = vadd.s32 %v4314_v36, %v4312_v22  ;;  %v2298_v38 = vshll.u32 %v10862_v3, 16  ;;  %v2299_v6 = vshrl.u32 %v10862_v3, 16  ;;  %v2300_v2 = vshll.u32 %v10864_v37, 16  ;;  %7752 = vmatpush.msrb.mxu2 %v6926_v30  ;;  %13421 = vst [vmem:[#allocation53_spill] sm:$0xff] %v10884_v42  ;;  %7589 = vmatmul.f32.vlgmr.msrb.gmra.mxu1 %v10163_v59  ;;  %v2432_v30 = vld [vmem:[#allocation2 + $0x1bf] sm:$0xff] }
 0x2ec   : > { %v2283_v7 = vshrl.u32 %v2282_v13, 4  ;;  %v2301_v60 = vshrl.u32 %v10864_v37, 16  ;;  %v10881_v58 = vmul.u32 9362, %v4325_v29  ;;  %v4330_v53 = vmul.u32 37449, %v4325_v29  ;;  %v5687_v42 = vld [vmem:[#allocation3 + $0x27] sm:$0xff] }
 0x2ed   : > { %v4316_v46 = vshrl.u32 %v4315_v11, 4  ;;  %vm2302_vm8 = vc.u32 %v2294_v4, %v2298_v38  ;;  %v2304_v24 = vadd.s32 %v2298_v38, %v2294_v4  ;;  %v4331_v36 = vshll.u32 %v10874_v56, 16  ;;  %v2774_v4 = vld [vmem:[#allocation2 + $0x1c1] sm:$0xff] }
 0x2ee   : > { %v2284_v19 = vmul.u32 28, %v2283_v7  ;;  %v2303_v43 = vsel %vm2302_vm8, 1, %v13371_v32  ;;  %v4332_v22 = vshrl.u32 %v10874_v56, 16  ;;  %v4333_v3 = vshll.u32 %v10881_v58, 16  ;;  %v5271_v7 = vld [vmem:[#allocation3 + $0xb3] sm:$0xff] }
 0x2ef   : > { %v4317_v37 = vmul.u32 28, %v4316_v46  ;;  %v2305_v29 = vadd.s32 %v2303_v43, %v2297_v34  ;;  %vm2306_vm12 = vc.u32 %v2304_v24, %v2300_v2  ;;  %v2308_v51 = vadd.s32 %v2304_v24, %v2300_v2  ;;  %v3511_v34 = vpop.f32.mrf.mxu2  ;;  %v3326_v46 = vpop.f32.mrf.mxu1 }
 0x2f0   : > { %v2285_v50 = vsub.s32 %v10785_v14, %v2284_v19  ;;  %v2307_v13 = vsel %vm2306_vm12, 1, %v13371_v32  ;;  %v4334_v11 = vshrl.u32 %v10881_v58, 16  ;;  %vm4335_vm0 = vc.u32 %v4327_v45, %v4331_v36  ;;  %v6885_v14 = vld [vmem:[%s13143_s2 + $0xb8] sm:$0xff]  ;;  %v10900_v2 = vpop.permute.xlu1 %6143 }
 0x2f1   : > { %v10894_v59 = vsub.s32 %v9433_v18, %v4317_v37  ;;  %v2309_v56 = vadd.s32 %v2307_v13, %v2305_v29  ;;  %vm2312_vm4 = vc.u32 %v2308_v51, 2454267026  ;;  %v4336_v38 = vsel %vm4335_vm0, 1, %v13371_v32  ;;  %v5499_v18 = vld [vmem:[#allocation3 + $0x3d] sm:$0xff]  ;;  %7253 = vmatpush.msrb.mxu3 %v6885_v14  ;;  %v3138_v29 = vpop.f32.mrf.mxu0 }
 0x2f2   : > { %vm2717_vm8 = vcmp.ne.s32.totalorder %v2285_v50, 27  ;;  %vm2375_vm12 = vcmp.ne.s32.totalorder %v2285_v50, 0  ;;  %v2313_v58 = vsel %vm2312_vm4, 1, %v13371_v32  ;;  %v4337_v24 = vadd.s32 %v4331_v36, %v4327_v45  ;;  %v10922_v13 = vpop.f32.mrf.mxu3 }
 0x2f3   : > { %13422 = vst [vmem:[#allocation54_spill] sm:$0xff] %v10894_v59  ;;  %8113 = vmatmul.msk.f32.gmra.mxu2 %vm2717_vm8, %v2774_v4  ;;  %vm13226_vm14 = vcmp.ne.s32.totalorder %v10894_v59, 0  ;;  %8056 = vmatmul.msk.f32.gmra.mxu0 %vm2375_vm12, %v2432_v30  ;;  %v2310_v19 = vadd.s32 %v2309_v56, %v2299_v6  ;;  %v4338_v43 = vadd.s32 %v4336_v38, %v4330_v53  ;;  %vm13254_vm4 = vcmp.ne.s32.totalorder %v9914_v62, 27 }
 0x2f4   : > { %v3509_v37 = vadd.f32 %v10839_v39, %v10849_v25  ;;  %v5416_v51 = vsel %vm13226_vm14, %v5271_v7, 0.0  ;;  %vm4339_vm0 = vc.u32 %v4337_v24, %v4333_v3  ;;  %v4341_v50 = vadd.s32 %v4337_v24, %v4333_v3  ;;  %13423 = vst [vmem:[#allocation55_spill] sm:$0xff] %v10922_v13  ;;  %v8462_v7 = vld [vmem:[#allocation3 + $0x43] sm:$0xff] }
 0x2f5   : > { %v6688_v45 = vsel %vm3559_vm7, %v5416_v51, %v10900_v2  ;;  %v2311_v36 = vadd.s32 %v2310_v19, %v2301_v60  ;;  %v4340_v4 = vsel %vm4339_vm0, 1, %v13371_v32  ;;  %v10915_v6 = vsel %vm13254_vm4, %v5499_v18, 0.0  ;;  %v5500_v19 = vld [vmem:[#allocation3 + $0x45] sm:$0xff] }
 0x2f6   : > { %3600 = vst.msk [vmem:[#allocation3 + $0x140] sm:$0xff] %vm3559_vm7, %v3509_v37  ;;  %7163 = vmatmul.f32.gmra.mxu3 %v6688_v45  ;;  %v4342_v39 = vadd.s32 %v4340_v4, %v4338_v43  ;;  %vm4345_vm8 = vc.u32 %v4341_v50, 2454267026  ;;  %v3324_v25 = vadd.f32 %v10847_v27, %v10872_v52  ;;  %v4356_v53 = vand.u32 65535, %v9492_v10 }
 0x2f7   : > { %v2314_v3 = vadd.s32 %v2313_v58, %v2311_v36  ;;  %v4346_v30 = vsel %vm4345_vm8, 1, %v13371_v32  ;;  %v4357_v60 = vshrl.u32 %v9492_v10, 16  ;;  %v5939_v56 = vsel %vm5154_vm5, %v8462_v7, 0.0  ;;  %v3514_v37 = vpop.f32.mrf.mxu2  ;;  %v2775_v7 = vld [vmem:[#allocation2 + $0x1c9] sm:$0xff] }
 0x2f8   : > { %v4343_v38 = vadd.s32 %v4342_v39, %v4332_v22  ;;  %v4359_v14 = vmul.u32 9362, %v4356_v53  ;;  %v4360_v24 = vmul.u32 37449, %v4356_v53  ;;  %v3512_v18 = vadd.f32 %v3511_v34, %v3324_v25  ;;  %v10938_v39 = vpop.f32.mrf.mxu1 }
 0x2f9   : > { %v2315_v43 = vshrl.u32 %v2314_v3, 4  ;;  %v10926_v27 = vmul.u32 9362, %v4357_v60  ;;  %v4362_v52 = vmul.u32 37449, %v4357_v60  ;;  %v6814_v58 = vsel %vm3559_vm7, %v5939_v56, %v10265_v0  ;;  %v10940_v0 = vpop.f32.mrf.mxu0  ;;  %v2433_v56 = vld [vmem:[#allocation2 + $0x1c7] sm:$0xff] }
 0x2fa   : > { %v4344_v51 = vadd.s32 %v4343_v38, %v4334_v11  ;;  %v4363_v50 = vshll.u32 %v4360_v24, 16  ;;  %v4364_v45 = vshrl.u32 %v4360_v24, 16  ;;  %3601 = vst.msk [vmem:[#allocation3 + $0x148] sm:$0xff] %vm3559_vm7, %v3512_v18  ;;  %7592 = vmatmul.f32.gmra.mxu1 %v6814_v58  ;;  %vm13253_vm12 = vcmp.ne.s32.totalorder %v9973_v61, 27 }
 0x2fb   : > { %v2316_v22 = vmul.u32 28, %v2315_v43  ;;  %v4365_v34 = vshll.u32 %v10926_v27, 16  ;;  %v4366_v36 = vshrl.u32 %v10926_v27, 16  ;;  %v10936_v4 = vsel %vm13253_vm12, %v5500_v19, 0.0 }
 0x2fc   : > { %v4347_v11 = vadd.s32 %v4346_v30, %v4344_v51  ;;  %vm4367_vm0 = vc.u32 %v4359_v14, %v4363_v50  ;;  %v4369_v25 = vadd.s32 %v4363_v50, %v4359_v14  ;;  %v3327_v3 = vadd.f32 %v3326_v46, %v3138_v29 }
 0x2fd   : > { %v5482_v53 = vld [vmem:[#allocation3 + $0x13c] sm:$0xff]  ;;  %v2317_v60 = vsub.s32 %v10831_v5, %v2316_v22  ;;  %v4368_v38 = vsel %vm4367_vm0, 1, %v13371_v32  ;;  %v4388_v24 = vand.u32 65535, %v9505_v17  ;;  %v4389_v18 = vshrl.u32 %v9505_v17, 16 }
 0x2fe   : > { %6177 = vrot.lane.b32.xlu0 %v5482_v53, %s8586_s4  ;;  %v4348_v19 = vshrl.u32 %v4347_v11, 4  ;;  %v4370_v43 = vadd.s32 %v4368_v38, %v4362_v52  ;;  %vm4371_vm8 = vc.u32 %v4369_v25, %v4365_v34  ;;  %v4373_v30 = vadd.s32 %v4369_v25, %v4365_v34  ;;  %v10951_v52 = vpop.f32.mrf.mxu3  ;;  %v5272_v25 = vld [vmem:[#allocation3 + $0xbb] sm:$0xff] }
 0x2ff   : > { %vm2718_vm14 = vcmp.ne.s32.totalorder %v2317_v60, 27  ;;  %vm2376_vm9 = vcmp.ne.s32.totalorder %v2317_v60, 0  ;;  %v4372_v46 = vsel %vm4371_vm8, 1, %v13371_v32  ;;  %v4391_v29 = vmul.u32 9362, %v4388_v24  ;;  %13424 = vst [vmem:[#allocation56_spill] sm:$0xff] %v10951_v52  ;;  %v3517_v38 = vpop.f32.mrf.mxu2 }
 0x300   : > { %8114 = vmatmul.msk.f32.gmra.mxu2 %vm2718_vm14, %v2775_v7  ;;  %v4349_v5 = vmul.u32 28, %v4348_v19  ;;  %8057 = vmatmul.msk.f32.gmra.mxu0 %vm2376_vm9, %v2433_v56  ;;  %v4374_v14 = vadd.s32 %v4372_v46, %v4370_v43  ;;  %vm4377_vm0 = vc.u32 %v4373_v30, 2454267026  ;;  %v4392_v27 = vmul.u32 37449, %v4388_v24  ;;  %v5501_v56 = vld [vmem:[#allocation3 + $0x4d] sm:$0xff]  ;;  %v6901_v24 = vld [vmem:[%s13143_s2 + $0x138] sm:$0xff] }
 0x301   : > { %v4378_v58 = vsel %vm4377_vm0, 1, %v13371_v32  ;;  %v10949_v51 = vmul.u32 9362, %v4389_v18  ;;  %v4394_v50 = vmul.u32 37449, %v4389_v18  ;;  %v3515_v22 = vadd.f32 %v3514_v37, %v3327_v3  ;;  %v5483_v34 = vld [vmem:[#allocation3 + $0x144] sm:$0xff]  ;;  %v10960_v18 = vpop.permute.xlu2 %6145  ;;  %7417 = vmatpush.msrb.mxu0 %v6901_v24  ;;  %v3144_v30 = vpop.f32.mrf.mxu0 }
 0x302   : > { %v10954_v11 = vsub.s32 %v9453_v33, %v4349_v5  ;;  %v4375_v53 = vadd.s32 %v4374_v14, %v4364_v45  ;;  %v4395_v60 = vshll.u32 %v4392_v27, 16  ;;  %v4396_v7 = vshrl.u32 %v4392_v27, 16  ;;  %6179 = vrot.lane.b32.xlu1 %v5483_v34, %s8586_s4  ;;  %v8463_v33 = vld [vmem:[#allocation3 + $0x4b] sm:$0xff] }
 0x303   : > { %v4397_v37 = vshll.u32 %v10949_v51, 16  ;;  %v4398_v3 = vshrl.u32 %v10949_v51, 16  ;;  %3602 = vst.msk [vmem:[#allocation3 + $0x150] sm:$0xff] %vm3559_vm7, %v3515_v22  ;;  %v5940_v45 = vsel %vm5155_vm6, %v8463_v33, 0.0  ;;  %vm13234_vm9 = vcmp.ne.s32.totalorder %v10038_v31, 27  ;;  %v3332_v51 = vpop.f32.mrf.mxu1 }
 0x304   : > { %13425 = vst [vmem:[#allocation57_spill] sm:$0xff] %v10954_v11  ;;  %vm13228_vm14 = vcmp.ne.s32.totalorder %v10954_v11, 0  ;;  %v4376_v19 = vadd.s32 %v4375_v53, %v4366_v36  ;;  %vm4399_vm8 = vc.u32 %v4391_v29, %v4395_v60  ;;  %v4401_v43 = vadd.s32 %v4395_v60, %v4391_v29 }
 0x305   : > { %v5417_v46 = vsel %vm13228_vm14, %v5272_v25, 0.0  ;;  %v4400_v5 = vsel %vm4399_vm8, 1, %v13371_v32  ;;  %v6815_v14 = vsel %vm3559_vm7, %v5940_v45, %v10303_v35  ;;  %v10976_v27 = vsel %vm13234_vm9, %v5501_v56, 0.0 }
 0x306   : > { %v6689_v22 = vsel %vm3559_vm7, %v5417_v46, %v10960_v18  ;;  %v4379_v36 = vadd.s32 %v4378_v58, %v4376_v19  ;;  %v4402_v34 = vadd.s32 %v4400_v5, %v4394_v50  ;;  %vm4403_vm0 = vc.u32 %v4401_v43, %v4397_v37  ;;  %7595 = vmatmul.f32.gmra.mxu1 %v6815_v14  ;;  %v8464_v58 = vld [vmem:[#allocation3 + $0x53] sm:$0xff] }
 0x307   : > { %7166 = vmatmul.f32.gmra.mxu3 %v6689_v22  ;;  %v4404_v29 = vsel %vm4403_vm0, 1, %v13371_v32  ;;  %v4405_v25 = vadd.s32 %v4401_v43, %v4397_v37  ;;  %v3330_v53 = vadd.f32 %v10938_v39, %v10940_v0  ;;  %v4420_v35 = vand.u32 65535, %v9532_v41  ;;  %v5502_v5 = vld [vmem:[#allocation3 + $0x55] sm:$0xff] }
 0x308   : > { %8115 = vmatmul.msk.f32.vlgmr.msrb.gmra.mxu2 %vm3559_vm7, %v10915_v6  ;;  %v4380_v60 = vshrl.u32 %v4379_v36, 4  ;;  %v4406_v56 = vadd.s32 %v4404_v29, %v4402_v34  ;;  %v4421_v24 = vshrl.u32 %v9532_v41, 16  ;;  %v5941_v50 = vsel %vm2320_vm11, %v8464_v58, 0.0  ;;  %v6884_v6 = vld [vmem:[%s13143_s2 + $0xb0] sm:$0xff]  ;;  %v10994_v34 = vpop.f32.mrf.mxu3 }
 0x309   : > { %vm4409_vm8 = vc.u32 %v4405_v25, 2454267026  ;;  %v4423_v33 = vmul.u32 9362, %v4420_v35  ;;  %v4424_v45 = vmul.u32 37449, %v4420_v35  ;;  %v3518_v37 = vadd.f32 %v3517_v38, %v3330_v53  ;;  %13426 = vst [vmem:[#allocation58_spill] sm:$0xff] %v10994_v34  ;;  %v3520_v38 = vpop.f32.mrf.mxu2  ;;  %7254 = vmatpush.msrb.mxu3 %v6884_v6  ;;  %v5273_v25 = vld [vmem:[#allocation3 + $0xc3] sm:$0xff] }
 0x30a   : > { %v4381_v19 = vmul.u32 28, %v4380_v60  ;;  %v4407_v43 = vadd.s32 %v4406_v56, %v4396_v7  ;;  %v4410_v39 = vsel %vm4409_vm8, 1, %v13371_v32  ;;  %v4425_v0 = vmul.u32 9362, %v4421_v24  ;;  %v5484_v46 = vld [vmem:[#allocation3 + $0x14c] sm:$0xff]  ;;  %v11002_v56 = vpop.permute.xlu0 %6147 }
 0x30b   : > { %v4426_v14 = vmul.u32 37449, %v4421_v24  ;;  %v4427_v22 = vshll.u32 %v4424_v45, 16  ;;  %v4428_v36 = vshrl.u32 %v4424_v45, 16  ;;  %3603 = vst.msk [vmem:[#allocation3 + $0x158] sm:$0xff] %vm3559_vm7, %v3518_v37  ;;  %6181 = vrot.lane.b32.xlu2 %v5484_v46, %s8586_s4  ;;  %v6816_v7 = vsel %vm3559_vm7, %v5941_v50, %v10349_v26  ;;  %v3147_v37 = vpop.f32.mrf.mxu0 }
 0x30c   : > { %v11000_v29 = vsub.s32 %v9492_v10, %v4381_v19  ;;  %v4408_v53 = vadd.s32 %v4407_v43, %v4398_v3  ;;  %v4429_v35 = vshll.u32 %v4425_v0, 16  ;;  %v4430_v60 = vshrl.u32 %v4425_v0, 16  ;;  %v3335_v43 = vpop.f32.mrf.mxu1 }
 0x30d   : > { %vm4431_vm0 = vc.u32 %v4423_v33, %v4427_v22  ;;  %v4433_v24 = vadd.s32 %v4427_v22, %v4423_v33  ;;  %v11006_v58 = vsel %vm13246_vm10, %v5502_v5, 0.0  ;;  %v3333_v45 = vadd.f32 %v3332_v51, %v3144_v30 }
 0x30e   : > { %13427 = vst [vmem:[#allocation59_spill] sm:$0xff] %v11000_v29  ;;  %vm13229_vm8 = vcmp.ne.s32.totalorder %v11000_v29, 0  ;;  %v4411_v26 = vadd.s32 %v4410_v39, %v4408_v53  ;;  %v4432_v10 = vsel %vm4431_vm0, 1, %v13371_v32  ;;  %7598 = vmatmul.f32.gmra.mxu1 %v6816_v7  ;;  %v4452_v3 = vand.u32 65535, %v9566_v16 }
 0x30f   : > { %v5418_v50 = vsel %vm13229_vm8, %v5273_v25, 0.0  ;;  %v4434_v19 = vadd.s32 %v4432_v10, %v4426_v14  ;;  %vm4435_vm14 = vc.u32 %v4433_v24, %v4429_v35  ;;  %v4437_v33 = vadd.s32 %v4433_v24, %v4429_v35  ;;  %v11023_v10 = vpop.permute.xlu1 %6149 }
 0x310   : > { %v6690_v0 = vsel %vm3559_vm7, %v5418_v50, %v11002_v56  ;;  %8116 = vmatmul.msk.f32.gmra.mxu2 %vm3559_vm7, %v10936_v4  ;;  %v4412_v30 = vshrl.u32 %v4411_v26, 4  ;;  %v4436_v51 = vsel %vm4435_vm14, 1, %v13371_v32  ;;  %v4453_v39 = vshrl.u32 %v9566_v16, 16 }
 0x311   : > { %7169 = vmatmul.f32.gmra.mxu3 %v6690_v0  ;;  %v4438_v46 = vadd.s32 %v4436_v51, %v4434_v19  ;;  %vm4441_vm0 = vc.u32 %v4437_v33, 2454267026  ;;  %v4455_v5 = vmul.u32 9362, %v4452_v3  ;;  %v4456_v6 = vmul.u32 37449, %v4452_v3  ;;  %v5274_v19 = vld [vmem:[#allocation3 + $0xcb] sm:$0xff]  ;;  %v8465_v0 = vld [vmem:[#allocation3 + $0x5b] sm:$0xff] }
 0x312   : > { %v4413_v14 = vmul.u32 28, %v4412_v30  ;;  %v4442_v22 = vsel %vm4441_vm0, 1, %v13371_v32  ;;  %v11020_v7 = vmul.u32 9362, %v4453_v39  ;;  %v4458_v25 = vmul.u32 37449, %v4453_v39  ;;  %v5485_v53 = vld [vmem:[#allocation3 + $0x154] sm:$0xff]  ;;  %v3523_v39 = vpop.f32.mrf.mxu2 }
 0x313   : > { %v4439_v35 = vadd.s32 %v4438_v46, %v4428_v36  ;;  %v4459_v24 = vshll.u32 %v4456_v6, 16  ;;  %v4460_v4 = vshrl.u32 %v4456_v6, 16  ;;  %v3521_v26 = vadd.f32 %v3520_v38, %v3333_v45  ;;  %6183 = vrot.lane.b32.xlu0 %v5485_v53, %s8586_s4  ;;  %v11033_v38 = vpop.f32.mrf.mxu3  ;;  %v5503_v45 = vld [vmem:[#allocation3 + $0x5d] sm:$0xff] }
 0x314   : > { %v11026_v50 = vsub.s32 %v9505_v17, %v4413_v14  ;;  %v4461_v3 = vshll.u32 %v11020_v7, 16  ;;  %v4462_v33 = vshrl.u32 %v11020_v7, 16  ;;  %v5942_v30 = vsel %vm5156_vm15, %v8465_v0, 0.0  ;;  %13428 = vst [vmem:[#allocation60_spill] sm:$0xff] %v11033_v38  ;;  %v3150_v7 = vpop.f32.mrf.mxu0  ;;  %v8466_v0 = vld [vmem:[#allocation3 + $0x63] sm:$0xff] }
 0x315   : > { %v4440_v36 = vadd.s32 %v4439_v35, %v4430_v60  ;;  %vm4463_vm14 = vc.u32 %v4455_v5, %v4459_v24  ;;  %v4465_v51 = vadd.s32 %v4459_v24, %v4455_v5  ;;  %3604 = vst.msk [vmem:[#allocation3 + $0x160] sm:$0xff] %vm3559_vm7, %v3521_v26  ;;  %v6817_v17 = vsel %vm3559_vm7, %v5942_v30, %v10389_v55  ;;  %v3338_v26 = vpop.f32.mrf.mxu1 }
 0x316   : > { %vm13231_vm0 = vcmp.ne.s32.totalorder %v11026_v50, 0  ;;  %v4464_v46 = vsel %vm4463_vm14, 1, %v13371_v32  ;;  %7601 = vmatmul.f32.gmra.mxu1 %v6817_v17  ;;  %vm13237_vm8 = vcmp.ne.s32.totalorder %v10100_v57, 27  ;;  %v3336_v6 = vadd.f32 %v3335_v43, %v3147_v37 }
 0x317   : > { %v5419_v60 = vsel %vm13231_vm0, %v5274_v19, 0.0  ;;  %v4443_v5 = vadd.s32 %v4442_v22, %v4440_v36  ;;  %v4466_v14 = vadd.s32 %v4464_v46, %v4458_v25  ;;  %vm4467_vm2 = vc.u32 %v4465_v51, %v4461_v3 }
 0x318   : > { %v6691_v55 = vsel %vm3559_vm7, %v5419_v60, %v11023_v10  ;;  %8117 = vmatmul.msk.f32.gmra.mxu2 %vm3559_vm7, %v10976_v27  ;;  %v4468_v53 = vsel %vm4467_vm2, 1, %v13371_v32  ;;  %v4469_v35 = vadd.s32 %v4465_v51, %v4461_v3  ;;  %v11049_v24 = vsel %vm13237_vm8, %v5503_v45, 0.0  ;;  %v5504_v3 = vld [vmem:[#allocation3 + $0x65] sm:$0xff] }
 0x319   : > { %7172 = vmatmul.f32.gmra.mxu3 %v6691_v55  ;;  %v4444_v37 = vshrl.u32 %v4443_v5, 4  ;;  %v4470_v43 = vadd.s32 %v4468_v53, %v4466_v14  ;;  %v4484_v22 = vand.u32 65535, %v9579_v47  ;;  %v4485_v25 = vshrl.u32 %v9579_v47, 16  ;;  %v5275_v14 = vld [vmem:[#allocation3 + $0xd3] sm:$0xff] }
 0x31a   : > { %vm4473_vm14 = vc.u32 %v4469_v35, 2454267026  ;;  %v3524_v19 = vadd.f32 %v3523_v39, %v3336_v6  ;;  %v5943_v27 = vsel %vm5157_vm13, %v8466_v0, 0.0  ;;  %vm13232_vm2 = vcmp.ne.s32.totalorder %v10138_v40, 27  ;;  %v3526_v35 = vpop.f32.mrf.mxu2 }
 0x31b   : > { %v4445_v30 = vmul.u32 28, %v4444_v37  ;;  %v4471_v36 = vadd.s32 %v4470_v43, %v4460_v4  ;;  %v4474_v51 = vsel %vm4473_vm14, 1, %v13371_v32  ;;  %v4487_v17 = vmul.u32 9362, %v4484_v22  ;;  %v11070_v37 = vpop.permute.xlu2 %6151 }
 0x31c   : > { %v4488_v45 = vmul.u32 37449, %v4484_v22  ;;  %v11057_v46 = vmul.u32 9362, %v4485_v25  ;;  %v4490_v60 = vmul.u32 37449, %v4485_v25  ;;  %3605 = vst.msk [vmem:[#allocation3 + $0x168] sm:$0xff] %vm3559_vm7, %v3524_v19  ;;  %v5486_v5 = vld [vmem:[#allocation3 + $0x15c] sm:$0xff]  ;;  %v6818_v39 = vsel %vm3559_vm7, %v5943_v27, %v10432_v28  ;;  %v13430_v19 = vld [vmem:[#allocation5_spill] sm:$0xff] }
 0x31d   : > { %v11063_v6 = vsub.s32 %v9532_v41, %v4445_v30  ;;  %v4472_v55 = vadd.s32 %v4471_v36, %v4462_v33  ;;  %6185 = vrot.lane.b32.xlu1 %v5486_v5, %s8586_s4  ;;  %v11068_v4 = vsel %vm13232_vm2, %v5504_v3, 0.0  ;;  %v3339_v53 = vadd.f32 %v3338_v26, %v3150_v7  ;;  %v11075_v33 = vpop.f32.mrf.mxu3 }
 0x31e   : > { %v4491_v43 = vshll.u32 %v4488_v45, 16  ;;  %v4492_v22 = vshrl.u32 %v4488_v45, 16  ;;  %v4493_v25 = vshll.u32 %v11057_v46, 16  ;;  %v4494_v28 = vshrl.u32 %v11057_v46, 16  ;;  %7604 = vmatmul.f32.gmra.mxu1 %v6818_v39  ;;  %13429 = vst [vmem:[#allocation61_spill] sm:$0xff] %v11075_v33  ;;  %v3153_v46 = vpop.f32.mrf.mxu0 }
 0x31f   : > { %vm13233_vm14 = vcmp.ne.s32.totalorder %v11063_v6, 0  ;;  %v4475_v41 = vadd.s32 %v4474_v51, %v4472_v55  ;;  %v4516_v0 = vand.u32 65535, %v13430_v19  ;;  %v4517_v27 = vshrl.u32 %v13430_v19, 16 }
 0x320   : > { %v5420_v7 = vsel %vm13233_vm14, %v5275_v14, 0.0  ;;  %8118 = vmatmul.msk.f32.gmra.mxu2 %vm3559_vm7, %v11006_v58  ;;  %vm4495_vm0 = vc.u32 %v4487_v17, %v4491_v43  ;;  %v4497_v26 = vadd.s32 %v4491_v43, %v4487_v17  ;;  %v3527_v3 = vadd.f32 %v3526_v35, %v3339_v53  ;;  %v3341_v35 = vpop.f32.mrf.mxu1 }
 0x321   : > { %v6692_v30 = vsel %vm3559_vm7, %v5420_v7, %v11070_v37  ;;  %v4476_v36 = vshrl.u32 %v4475_v41, 4  ;;  %v4496_v51 = vsel %vm4495_vm0, 1, %v13371_v32  ;;  %v4519_v45 = vmul.u32 9362, %v4516_v0 }
 0x322   : > { %7175 = vmatmul.f32.gmra.mxu3 %v6692_v30  ;;  %v4498_v5 = vadd.s32 %v4496_v51, %v4490_v60  ;;  %vm4499_vm2 = vc.u32 %v4497_v26, %v4493_v25  ;;  %v4501_v39 = vadd.s32 %v4497_v26, %v4493_v25  ;;  %v4520_v55 = vmul.u32 37449, %v4516_v0  ;;  %3606 = vst.msk [vmem:[#allocation3 + $0x170] sm:$0xff] %vm3559_vm7, %v3527_v3  ;;  %v5276_v25 = vld [vmem:[#allocation3 + $0xdb] sm:$0xff]  ;;  %v11097_v30 = vpop.permute.xlu0 %6153  ;;  %v8467_v51 = vld [vmem:[#allocation3 + $0x6b] sm:$0xff] }
 0x323   : > { %v4477_v14 = vmul.u32 28, %v4476_v36  ;;  %v4500_v58 = vsel %vm4499_vm2, 1, %v13371_v32  ;;  %v11088_v17 = vmul.u32 9362, %v4517_v27  ;;  %v4522_v53 = vmul.u32 37449, %v4517_v27  ;;  %v5487_v43 = vld [vmem:[#allocation3 + $0x164] sm:$0xff] }
 0x324   : > { %v4502_v41 = vadd.s32 %v4500_v58, %v4498_v5  ;;  %vm4505_vm14 = vc.u32 %v4501_v39, 2454267026  ;;  %v4523_v7 = vshll.u32 %v4520_v55, 16  ;;  %v4524_v33 = vshrl.u32 %v4520_v55, 16  ;;  %6187 = vrot.lane.b32.xlu2 %v5487_v43, %s8586_s4  ;;  %v5505_v39 = vld [vmem:[#allocation3 + $0x6d] sm:$0xff]  ;;  %v3529_v55 = vpop.f32.mrf.mxu2 }
 0x325   : > { %v11092_v60 = vsub.s32 %v9566_v16, %v4477_v14  ;;  %v4506_v0 = vsel %vm4505_vm14, 1, %v13371_v32  ;;  %v4525_v26 = vshll.u32 %v11088_v17, 16  ;;  %v4526_v3 = vshrl.u32 %v11088_v17, 16  ;;  %v6900_v16 = vld [vmem:[%s13143_s2 + $0x130] sm:$0xff]  ;;  %v6883_v14 = vld [vmem:[%s13143_s2 + $0xa8] sm:$0xff] }
 0x326   : > { %v4503_v27 = vadd.s32 %v4502_v41, %v4492_v22  ;;  %vm4527_vm0 = vc.u32 %v4519_v45, %v4523_v7  ;;  %v4529_v36 = vadd.s32 %v4523_v7, %v4519_v45  ;;  %v5944_v5 = vsel %vm5158_vm1, %v8467_v51, 0.0  ;;  %7418 = vmatpush.msrb.mxu0 %v6900_v16  ;;  %7255 = vmatpush.msrb.mxu3 %v6883_v14  ;;  %v11119_v51 = vpop.f32.mrf.mxu3 }
 0x327   : > { %vm13235_vm2 = vcmp.ne.s32.totalorder %v11092_v60, 0  ;;  %v4528_v22 = vsel %vm4527_vm0, 1, %v13371_v32  ;;  %v6819_v45 = vsel %vm3559_vm7, %v5944_v5, %v10469_v1  ;;  %vm13245_vm14 = vcmp.ne.s32.totalorder %v10185_v23, 27  ;;  %13431 = vst [vmem:[#allocation5_spill] sm:$0xff] %v11119_v51 }
 0x328   : > { %v5421_v58 = vsel %vm13235_vm2, %v5276_v25, 0.0  ;;  %8119 = vmatmul.msk.f32.gmra.mxu2 %vm3559_vm7, %v11049_v24  ;;  %v4504_v17 = vadd.s32 %v4503_v27, %v4494_v28  ;;  %v4530_v43 = vadd.s32 %v4528_v22, %v4522_v53  ;;  %vm4531_vm9 = vc.u32 %v4529_v36, %v4525_v26  ;;  %7607 = vmatmul.f32.gmra.mxu1 %v6819_v45  ;;  %v13432_v53 = vld [vmem:[#allocation6_spill] sm:$0xff] }
 0x329   : > { %v6693_v41 = vsel %vm3559_vm7, %v5421_v58, %v11097_v30  ;;  %v4532_v7 = vsel %vm4531_vm9, 1, %v13371_v32  ;;  %v4533_v1 = vadd.s32 %v4529_v36, %v4525_v26  ;;  %v11123_v5 = vsel %vm13245_vm14, %v5505_v39, 0.0  ;;  %v5488_v25 = vld [vmem:[#allocation3 + $0x16c] sm:$0xff]  ;;  %v5506_v36 = vld [vmem:[#allocation3 + $0x75] sm:$0xff]  ;;  %v3156_v39 = vpop.f32.mrf.mxu0 }
 0x32a   : > { %7178 = vmatmul.f32.gmra.mxu3 %v6693_v41  ;;  %v4507_v16 = vadd.s32 %v4506_v0, %v4504_v17  ;;  %v4534_v24 = vadd.s32 %v4532_v7, %v4530_v43  ;;  %v3342_v28 = vadd.f32 %v3341_v35, %v3153_v46  ;;  %v4548_v27 = vand.u32 65535, %v13432_v53  ;;  %6189 = vrot.lane.b32.xlu0 %v5488_v25, %s8586_s4  ;;  %v8468_v22 = vld [vmem:[#allocation3 + $0x73] sm:$0xff]  ;;  %v3344_v7 = vpop.f32.mrf.mxu1 }
 0x32b   : > { %vm4537_vm0 = vc.u32 %v4533_v1, 2454267026  ;;  %v4549_v14 = vshrl.u32 %v13432_v53, 16  ;;  %v5945_v26 = vsel %vm5159_vm3, %v8468_v22, 0.0  ;;  %vm13236_vm9 = vcmp.ne.s32.totalorder %v10219_v15, 27 }
 0x32c   : > { %v4508_v45 = vshrl.u32 %v4507_v16, 4  ;;  %v4535_v58 = vadd.s32 %v4534_v24, %v4524_v33  ;;  %v4538_v0 = vsel %vm4537_vm0, 1, %v13371_v32  ;;  %v4551_v46 = vmul.u32 9362, %v4548_v27 }
 0x32d   : > { %v4552_v35 = vmul.u32 37449, %v4548_v27  ;;  %v11132_v17 = vmul.u32 9362, %v4549_v14  ;;  %v4554_v43 = vmul.u32 37449, %v4549_v14  ;;  %v3530_v41 = vadd.f32 %v3529_v55, %v3342_v28  ;;  %v5277_v28 = vld [vmem:[#allocation3 + $0xe3] sm:$0xff] }
 0x32e   : > { %v4509_v1 = vmul.u32 28, %v4508_v45  ;;  %v4536_v25 = vadd.s32 %v4535_v58, %v4526_v3  ;;  %v6820_v22 = vsel %vm3559_vm7, %v5945_v26, %v10514_v12  ;;  %v11138_v51 = vsel %vm13236_vm9, %v5506_v36, 0.0  ;;  %v13434_v14 = vld [vmem:[#allocation7_spill] sm:$0xff]  ;;  %v3532_v36 = vpop.f32.mrf.mxu2  ;;  %v11149_v45 = vpop.permute.xlu1 %6155 }
 0x32f   : > { %v4555_v16 = vshll.u32 %v4552_v35, 16  ;;  %v4556_v33 = vshrl.u32 %v4552_v35, 16  ;;  %v4557_v24 = vshll.u32 %v11132_v17, 16  ;;  %v4558_v27 = vshrl.u32 %v11132_v17, 16  ;;  %3607 = vst.msk [vmem:[#allocation3 + $0x178] sm:$0xff] %vm3559_vm7, %v3530_v41  ;;  %v8469_v17 = vld [vmem:[#allocation3 + $0x7b] sm:$0xff] }
 0x330   : > { %v11144_v55 = vsub.s32 %v9579_v47, %v4509_v1  ;;  %8120 = vmatmul.msk.f32.gmra.mxu2 %vm3559_vm7, %v11068_v4  ;;  %v4539_v12 = vadd.s32 %v4538_v0, %v4536_v25  ;;  %7610 = vmatmul.f32.gmra.mxu1 %v6820_v22  ;;  %v3345_v3 = vadd.f32 %v3344_v7, %v3156_v39  ;;  %v4580_v26 = vand.u32 65535, %v13434_v14  ;;  %v11158_v25 = vpop.f32.mrf.mxu3 }
 0x331   : > { %vm4559_vm0 = vc.u32 %v4551_v46, %v4555_v16  ;;  %v4561_v58 = vadd.s32 %v4555_v16, %v4551_v46  ;;  %v4581_v35 = vshrl.u32 %v13434_v14, 16  ;;  %vm13435_vm2 = vcmp.ne.s32.totalorder %v10263_v20, 0  ;;  %13436 = vst [vmem:[#allocation7_spill] sm:$0xff] %v11158_v25  ;;  %v3159_v52 = vpop.f32.mrf.mxu0 }
 0x332   : > { %13433 = vst [vmem:[#allocation6_spill] sm:$0xff] %v11144_v55  ;;  %v5946_v47 = vsel %vm13435_vm2, %v8469_v17, 0.0  ;;  %vm13238_vm9 = vcmp.ne.s32.totalorder %v11144_v55, 0  ;;  %v4540_v41 = vshrl.u32 %v4539_v12, 4  ;;  %v4560_v4 = vsel %vm4559_vm0, 1, %v13371_v32 }
 0x333   : > { %v4583_v0 = vmul.u32 9362, %v4580_v26  ;;  %v5422_v39 = vsel %vm13238_vm9, %v5277_v28, 0.0  ;;  %v4562_v7 = vadd.s32 %v4560_v4, %v4554_v43  ;;  %vm4563_vm8 = vc.u32 %v4561_v58, %v4557_v24 }
 0x334   : > { %v4565_v1 = vadd.s32 %v4561_v58, %v4557_v24  ;;  %v6694_v46 = vsel %vm3559_vm7, %v5422_v39, %v11149_v45  ;;  %v4541_v22 = vmul.u32 28, %v4540_v41  ;;  %v4564_v16 = vsel %vm4563_vm8, 1, %v13371_v32  ;;  %v5278_v24 = vld [vmem:[#allocation3 + $0xeb] sm:$0xff]  ;;  %v11169_v41 = vpop.permute.xlu2 %6157 }
 0x335   : > { %v4584_v17 = vmul.u32 37449, %v4580_v26  ;;  %7181 = vmatmul.f32.gmra.mxu3 %v6694_v46  ;;  %v4566_v12 = vadd.s32 %v4564_v16, %v4562_v7  ;;  %v11163_v38 = vmul.u32 9362, %v4581_v35  ;;  %v4586_v34 = vmul.u32 37449, %v4581_v35  ;;  %v3347_v46 = vpop.f32.mrf.mxu1 }
 0x336   : > { %vm4569_vm2 = vc.u32 %v4565_v1, 2454267026  ;;  %v11166_v43 = vsub.s32 %v13430_v19, %v4541_v22  ;;  %v5489_v39 = vld [vmem:[#allocation3 + $0x174] sm:$0xff]  ;;  %v3533_v1 = vadd.f32 %v3532_v36, %v3345_v3  ;;  %v6821_v35 = vsel %vm3559_vm7, %v5946_v47, %v10552_v63  ;;  %v5507_v22 = vld [vmem:[#allocation3 + $0x7d] sm:$0xff] }
 0x337   : > { %v4570_v28 = vsel %vm4569_vm2, 1, %v13371_v32  ;;  %v4587_v58 = vshll.u32 %v4584_v17, 16  ;;  %v4588_v4 = vshrl.u32 %v4584_v17, 16  ;;  %v4567_v25 = vadd.s32 %v4566_v12, %v4556_v33  ;;  %6191 = vrot.lane.b32.xlu1 %v5489_v39, %s8586_s4  ;;  %v5686_v63 = vld [vmem:[#allocation3 + $0x1f] sm:$0xff] }
 0x338   : > { %13437 = vst [vmem:[#allocation62_spill] sm:$0xff] %v11166_v43  ;;  %v4589_v26 = vshll.u32 %v11163_v38, 16  ;;  %v4590_v7 = vshrl.u32 %v11163_v38, 16  ;;  %vm13239_vm8 = vcmp.ne.s32.totalorder %v11166_v43, 0  ;;  %8121 = vmatmul.msk.f32.gmra.mxu2 %vm3559_vm7, %v11123_v5  ;;  %7613 = vmatmul.f32.gmra.mxu1 %v6821_v35  ;;  %vm13240_vm2 = vcmp.ne.s32.totalorder %v10263_v20, 27 }
 0x339   : > { %vm4591_vm0 = vc.u32 %v4583_v0, %v4587_v58  ;;  %v4593_v19 = vadd.s32 %v4587_v58, %v4583_v0  ;;  %v5423_v33 = vsel %vm13239_vm8, %v5278_v24, 0.0  ;;  %v4568_v16 = vadd.s32 %v4567_v25, %v4558_v27  ;;  %3608 = vst.msk [vmem:[#allocation3 + $0x180] sm:$0xff] %vm3559_vm7, %v3533_v1  ;;  %v3535_v0 = vpop.f32.mrf.mxu2  ;;  %v13438_v24 = vld [vmem:[#allocation8_spill] sm:$0xff]  ;;  %v11194_v1 = vpop.f32.mrf.mxu3 }
 0x33a   : > { %v4592_v38 = vsel %vm4591_vm0, 1, %v13371_v32  ;;  %v6695_v5 = vsel %vm3559_vm7, %v5423_v33, %v11169_v41  ;;  %v11189_v27 = vsel %vm13240_vm2, %v5507_v22, 0.0  ;;  %v3348_v25 = vadd.f32 %v3347_v46, %v3159_v52  ;;  %13439 = vst [vmem:[#allocation8_spill] sm:$0xff] %v11194_v1  ;;  %v5508_v46 = vld [vmem:[#allocation3 + $0x85] sm:$0xff] }
 0x33b   : > { %v4594_v3 = vadd.s32 %v4592_v38, %v4586_v34  ;;  %vm4595_vm9 = vc.u32 %v4593_v19, %v4589_v26  ;;  %v4597_v36 = vadd.s32 %v4593_v19, %v4589_v26  ;;  %v4571_v47 = vadd.s32 %v4570_v28, %v4568_v16 }
 0x33c   : > { %v4596_v17 = vsel %vm4595_vm9, 1, %v13371_v32  ;;  %v4612_v58 = vand.u32 65535, %v13438_v24  ;;  %v4613_v39 = vshrl.u32 %v13438_v24, 16  ;;  %v3536_v28 = vadd.f32 %v3535_v0, %v3348_v25  ;;  %v3162_v0 = vpop.f32.mrf.mxu0 }
 0x33d   : > { %v4598_v12 = vadd.s32 %v4596_v17, %v4594_v3  ;;  %vm4601_vm0 = vc.u32 %v4597_v36, 2454267026  ;;  %7184 = vmatmul.f32.gmra.mxu3 %v6695_v5  ;;  %v4572_v34 = vshrl.u32 %v4571_v47, 4  ;;  %vm13440_vm9 = vcmp.ne.s32.totalorder %v9914_v62, 0  ;;  %v8470_v5 = vld [vmem:[#allocation3 + $0x83] sm:$0xff] }
 0x33e   : > { %v4602_v26 = vsel %vm4601_vm0, 1, %v13371_v32  ;;  %v5735_v19 = vsel %vm13440_vm9, %v5686_v63, 0.0  ;;  %v4615_v22 = vmul.u32 9362, %v4612_v58  ;;  %v11198_v33 = vmul.u32 37449, %v4612_v58  ;;  %3609 = vst.msk [vmem:[#allocation3 + $0x188] sm:$0xff] %vm3559_vm7, %v3536_v28  ;;  %v13441_v3 = vld [vmem:[#allocation28_spill] sm:$0xff] }
 0x33f   : > { %v4599_v35 = vadd.s32 %v4598_v12, %v4588_v4  ;;  %v11200_v52 = vmul.u32 9362, %v4613_v39  ;;  %v4573_v16 = vmul.u32 28, %v4572_v34  ;;  %v4618_v38 = vmul.u32 37449, %v4613_v39  ;;  %6295 = vrot.lane.b32.xlu1 %v5735_v19, %s8586_s4  ;;  %v6882_v4 = vld [vmem:[%s13143_s2 + $0xa0] sm:$0xff]  ;;  %v6899_v58 = vld [vmem:[%s13143_s2 + $0x128] sm:$0xff] }
 0x340   : > { %vm13442_vm0 = vcmp.ne.s32.totalorder %v13441_v3, 0  ;;  %vm13252_vm8 = vcmp.ne.s32.totalorder %v13441_v3, 27  ;;  %8122 = vmatmul.msk.f32.gmra.mxu2 %vm3559_vm7, %v11138_v51  ;;  %v4619_v47 = vshll.u32 %v11198_v33, 16  ;;  %v4620_v17 = vshrl.u32 %v11198_v33, 16  ;;  %v5490_v12 = vld [vmem:[#allocation3 + $0x17c] sm:$0xff]  ;;  %7256 = vmatpush.msrb.mxu3 %v6882_v4  ;;  %v5279_v34 = vld [vmem:[#allocation3 + $0xf3] sm:$0xff]  ;;  %v3350_v51 = vpop.f32.mrf.mxu1 }
 0x341   : > { %v5947_v36 = vsel %vm13442_vm0, %v8470_v5, 0.0  ;;  %v4600_v63 = vadd.s32 %v4599_v35, %v4590_v7  ;;  %v4621_v25 = vshll.u32 %v11200_v52, 16  ;;  %v11219_v39 = vsub.s32 %v13432_v53, %v4573_v16  ;;  %6193 = vrot.lane.b32.xlu2 %v5490_v12, %s8586_s4  ;;  %7419 = vmatpush.msrb.mxu0 %v6899_v58  ;;  %v11229_v35 = vpop.permute.xlu0 %6159  ;;  %v13444_v5 = vld [vmem:[#allocation9_spill] sm:$0xff]  ;;  %v3538_v58 = vpop.f32.mrf.mxu2 }
 0x342   : > { %v4622_v28 = vshrl.u32 %v11200_v52, 16  ;;  %v6822_v7 = vsel %vm3559_vm7, %v5947_v36, %v10592_v54  ;;  %v11227_v19 = vsel %vm13252_vm8, %v5508_v46, 0.0  ;;  %vm4623_vm9 = vc.u32 %v4615_v22, %v4619_v47 }
 0x343   : > { %13443 = vst [vmem:[#allocation63_spill] sm:$0xff] %v11219_v39  ;;  %v4603_v33 = vadd.s32 %v4602_v26, %v4600_v63  ;;  %v4625_v53 = vadd.s32 %v4619_v47, %v4615_v22  ;;  %7616 = vmatmul.f32.gmra.mxu1 %v6822_v7  ;;  %v3351_v16 = vadd.f32 %v3350_v51, %v3162_v0  ;;  %vm13241_vm0 = vcmp.ne.s32.totalorder %v11219_v39, 0  ;;  %v5689_v26 = vld [vmem:[#allocation3 + $0x37] sm:$0xff] }
 0x344   : > { %v4624_v52 = vsel %vm4623_vm9, 1, %v13371_v32  ;;  %v4644_v4 = vand.u32 65535, %v13444_v5  ;;  %v4645_v54 = vshrl.u32 %v13444_v5, 16  ;;  %v5424_v46 = vsel %vm13241_vm0, %v5279_v34, 0.0 }
 0x345   : > { %v4604_v36 = vshrl.u32 %v4603_v33, 4  ;;  %v4626_v12 = vadd.s32 %v4624_v52, %v4618_v38  ;;  %vm4627_vm2 = vc.u32 %v4625_v53, %v4621_v25  ;;  %v6696_v22 = vsel %vm3559_vm7, %v5424_v46, %v11229_v35  ;;  %v5491_v34 = vld [vmem:[#allocation3 + $0x184] sm:$0xff]  ;;  %v11242_v38 = vpop.f32.mrf.mxu3 }
 0x346   : > { %v4628_v0 = vsel %vm4627_vm2, 1, %v13371_v32  ;;  %v4629_v63 = vadd.s32 %v4625_v53, %v4621_v25  ;;  %v4647_v47 = vmul.u32 9362, %v4644_v4  ;;  %7187 = vmatmul.f32.gmra.mxu3 %v6696_v22  ;;  %v4648_v1 = vmul.u32 37449, %v4644_v4  ;;  %13445 = vst [vmem:[#allocation9_spill] sm:$0xff] %v11242_v38  ;;  %6195 = vrot.lane.b32.xlu0 %v5491_v34, %s8586_s4  ;;  %v5280_v53 = vld [vmem:[#allocation3 + $0xfb] sm:$0xff]  ;;  %v5509_v22 = vld [vmem:[#allocation3 + $0x8d] sm:$0xff] }
 0x347   : > { %v4605_v51 = vmul.u32 28, %v4604_v36  ;;  %v4630_v7 = vadd.s32 %v4628_v0, %v4626_v12  ;;  %v11240_v13 = vmul.u32 9362, %v4645_v54  ;;  %v4650_v33 = vmul.u32 37449, %v4645_v54  ;;  %v11254_v54 = vpop.permute.xlu1 %6161  ;;  %v5692_v34 = vld [vmem:[#allocation3 + $0x4f] sm:$0xff] }
 0x348   : > { %vm4633_vm9 = vc.u32 %v4629_v63, 2454267026  ;;  %v3539_v52 = vadd.f32 %v3538_v58, %v3351_v16  ;;  %v5738_v46 = vsel %vm2320_vm11, %v5689_v26, 0.0  ;;  %8123 = vmatmul.msk.f32.gmra.mxu2 %vm3559_vm7, %v11189_v27  ;;  %v4651_v12 = vshll.u32 %v4648_v1, 16  ;;  %13447 = vst [vmem:[#allocation65_spill] sm:$0xff] %v11254_v54  ;;  %v8471_v63 = vld [vmem:[#allocation3 + $0x8b] sm:$0xff] }
 0x349   : > { %v11248_v25 = vsub.s32 %v13434_v14, %v4605_v51  ;;  %v4631_v4 = vadd.s32 %v4630_v7, %v4620_v17  ;;  %v4634_v36 = vsel %vm4633_vm9, 1, %v13371_v32  ;;  %6301 = vrot.lane.b32.xlu1 %v5738_v46, %s8586_s4  ;;  %v4652_v16 = vshrl.u32 %v4648_v1, 16 }
 0x34a   : > { %v4653_v58 = vshll.u32 %v11240_v13, 16  ;;  %v4654_v26 = vshrl.u32 %v11240_v13, 16  ;;  %3610 = vst.msk [vmem:[#allocation3 + $0x190] sm:$0xff] %vm3559_vm7, %v3539_v52  ;;  %v5736_v14 = vsel %vm5154_vm5, %v5687_v42, 0.0  ;;  %vm4655_vm2 = vc.u32 %v4647_v47, %v4651_v12  ;;  %v13448_v13 = vld [vmem:[#allocation30_spill] sm:$0xff]  ;;  %v3165_v42 = vpop.f32.mrf.mxu0  ;;  %v5833_v52 = vld [vmem:[#allocation3 + $0x21] sm:$0xff] }
 0x34b   : > { %13446 = vst [vmem:[#allocation64_spill] sm:$0xff] %v11248_v25  ;;  %vm13288_vm11 = vcmp.ne.s32.totalorder %v11248_v25, 0  ;;  %v4632_v27 = vadd.s32 %v4631_v4, %v4622_v28  ;;  %v4657_v17 = vadd.s32 %v4651_v12, %v4647_v47  ;;  %6297 = vrot.lane.b32.xlu2 %v5736_v14, %s8586_s4  ;;  %v4656_v0 = vsel %vm4655_vm2, 1, %v13371_v32  ;;  %v3353_v4 = vpop.f32.mrf.mxu1 }
 0x34c   : > { %v5425_v1 = vsel %vm13288_vm11, %v5280_v53, 0.0  ;;  %vm13449_vm9 = vcmp.ne.s32.totalorder %v13448_v13, 0  ;;  %vm13270_vm0 = vcmp.ne.s32.totalorder %v13448_v13, 27  ;;  %v4658_v47 = vadd.s32 %v4656_v0, %v4650_v33 }
 0x34d   : > { %v5948_v51 = vsel %vm13449_vm9, %v8471_v63, 0.0  ;;  %v6697_v28 = vsel %vm3559_vm7, %v5425_v1, %v11254_v54  ;;  %v4635_v7 = vadd.s32 %v4634_v36, %v4632_v27  ;;  %vm4659_vm5 = vc.u32 %v4657_v17, %v4653_v58  ;;  %v13450_v36 = vld [vmem:[#allocation10_spill] sm:$0xff]  ;;  %v3541_v27 = vpop.f32.mrf.mxu2 }
 0x34e   : > { %v4660_v46 = vsel %vm4659_vm5, 1, %v13371_v32  ;;  %v4661_v53 = vadd.s32 %v4657_v17, %v4653_v58  ;;  %v6823_v12 = vsel %vm3559_vm7, %v5948_v51, %v10635_v21  ;;  %v6011_v14 = vsel %vm13270_vm0, %v5509_v22, 0.0  ;;  %7190 = vmatmul.f32.gmra.mxu3 %v6697_v28  ;;  %v5690_v17 = vld [vmem:[#allocation3 + $0x3f] sm:$0xff] }
 0x34f   : > { %v4636_v63 = vshrl.u32 %v4635_v7, 4  ;;  %v4662_v38 = vadd.s32 %v4660_v46, %v4658_v47  ;;  %7619 = vmatmul.f32.gmra.mxu1 %v6823_v12  ;;  %v3354_v1 = vadd.f32 %v3353_v4, %v3165_v42  ;;  %v4676_v33 = vand.u32 65535, %v13450_v36  ;;  %v11285_v7 = vpop.f32.mrf.mxu3 }
 0x350   : > { %vm4665_vm2 = vc.u32 %v4661_v53, 2454267026  ;;  %v4677_v0 = vshrl.u32 %v13450_v36, 16  ;;  %v5741_v58 = vsel %vm5158_vm1, %v5692_v34, 0.0  ;;  %v5882_v21 = vsel %vm13254_vm4, %v5833_v52, 0.0  ;;  %8124 = vmatmul.msk.f32.gmra.mxu2 %vm3559_vm7, %v11227_v19  ;;  %13451 = vst [vmem:[#allocation10_spill] sm:$0xff] %v11285_v7 }
 0x351   : > { %v4637_v51 = vmul.u32 28, %v4636_v63  ;;  %v4663_v22 = vadd.s32 %v4662_v38, %v4652_v16  ;;  %v4666_v42 = vsel %vm4665_vm2, 1, %v13371_v32  ;;  %v4679_v28 = vmul.u32 9362, %v4676_v33  ;;  %v5688_v34 = vld [vmem:[#allocation3 + $0x2f] sm:$0xff]  ;;  %v5281_v52 = vld [vmem:[#allocation3 + $0x103] sm:$0xff]  ;;  %v11294_v38 = vpop.permute.xlu2 %6163 }
 0x352   : > { %v4680_v47 = vmul.u32 37449, %v4676_v33  ;;  %v11287_v46 = vmul.u32 9362, %v4677_v0  ;;  %v4682_v53 = vmul.u32 37449, %v4677_v0  ;;  %v3542_v4 = vadd.f32 %v3541_v27, %v3354_v1  ;;  %13453 = vst [vmem:[#allocation67_spill] sm:$0xff] %v11294_v38  ;;  %v8472_v1 = vld [vmem:[#allocation3 + $0x93] sm:$0xff]  ;;  %v13454_v27 = vld [vmem:[#allocation32_spill] sm:$0xff] }
 0x353   : > { %v11290_v12 = vsub.s32 %v13438_v24, %v4637_v51  ;;  %v4664_v63 = vadd.s32 %v4663_v22, %v4654_v26  ;;  %v8217_v62 = vpack.i.bf16 %v5882_v21, %v5741_v58  ;;  %v5739_v19 = vsel %vm5156_vm15, %v5690_v17, 0.0  ;;  %v5510_v58 = vld [vmem:[#allocation3 + $0x95] sm:$0xff]  ;;  %v3168_v22 = vpop.f32.mrf.mxu0 }
 0x354   : > { %v4683_v16 = vshll.u32 %v4680_v47, 16  ;;  %v4684_v54 = vshrl.u32 %v4680_v47, 16  ;;  %v4685_v33 = vshll.u32 %v11287_v46, 16  ;;  %v4686_v7 = vshrl.u32 %v11287_v46, 16  ;;  %3611 = vst.msk [vmem:[#allocation3 + $0x198] sm:$0xff] %vm3559_vm7, %v3542_v4  ;;  %6303 = vrot.lane.b32.xlu2 %v5739_v19, %s8586_s4  ;;  %v5695_v46 = vld [vmem:[#allocation3 + $0x67] sm:$0xff] }
 0x355   : > { %13452 = vst [vmem:[#allocation66_spill] sm:$0xff] %v11290_v12  ;;  %vm5184_vm1 = vcmp.ne.s32.totalorder %v11290_v12, 0  ;;  %v4667_v24 = vadd.s32 %v4666_v42, %v4664_v63  ;;  %8218 = vrot.lane.b32.xlu1 %v8217_v62, %s8586_s4  ;;  %v5737_v26 = vsel %vm5155_vm6, %v5688_v34, 0.0  ;;  %vm13455_vm15 = vcmp.ne.s32.totalorder %v13454_v27, 0  ;;  %v3356_v34 = vpop.f32.mrf.mxu1 }
 0x356   : > { %v5949_v0 = vsel %vm13455_vm15, %v8472_v1, 0.0  ;;  %v5426_v21 = vsel %vm5184_vm1, %v5281_v52, 0.0  ;;  %vm4687_vm9 = vc.u32 %v4679_v28, %v4683_v16  ;;  %v4689_v17 = vadd.s32 %v4683_v16, %v4679_v28  ;;  %6299 = vrot.lane.b32.xlu0 %v5737_v26, %s8586_s4  ;;  %v13456_v16 = vld [vmem:[#allocation12_spill] sm:$0xff]  ;;  %v3544_v26 = vpop.f32.mrf.mxu2 }
 0x357   : > { %v6824_v51 = vsel %vm3559_vm7, %v5949_v0, %v10681_v48  ;;  %v6698_v62 = vsel %vm3559_vm7, %v5426_v21, %v11294_v38  ;;  %v4668_v42 = vshrl.u32 %v4667_v24, 4  ;;  %v4688_v47 = vsel %vm4687_vm9, 1, %v13371_v32 }
 0x358   : > { %7622 = vmatmul.f32.gmra.mxu1 %v6824_v51  ;;  %vm13266_vm6 = vcmp.ne.s32.totalorder %v13454_v27, 27  ;;  %7193 = vmatmul.f32.gmra.mxu3 %v6698_v62  ;;  %v4690_v4 = vadd.s32 %v4688_v47, %v4682_v53  ;;  %vm4691_vm5 = vc.u32 %v4689_v17, %v4685_v33  ;;  %v4693_v28 = vadd.s32 %v4689_v17, %v4685_v33  ;;  %v5836_v33 = vld [vmem:[#allocation3 + $0x39] sm:$0xff] }
 0x359   : > { %v6012_v52 = vsel %vm13266_vm6, %v5510_v58, 0.0  ;;  %v4669_v48 = vmul.u32 28, %v4668_v42  ;;  %8125 = vmatmul.msk.f32.gmra.mxu2 %vm3559_vm7, %v6011_v14  ;;  %v4692_v63 = vsel %vm4691_vm5, 1, %v13371_v32  ;;  %v3357_v19 = vadd.f32 %v3356_v34, %v3168_v22  ;;  %v5282_v58 = vld [vmem:[#allocation3 + $0x10b] sm:$0xff]  ;;  %v11327_v22 = vpop.permute.xlu0 %6165  ;;  %v11329_v42 = vpop.f32.mrf.mxu3 }
 0x35a   : > { %v4708_v24 = vand.u32 65535, %v13456_v16  ;;  %v4694_v1 = vadd.s32 %v4692_v63, %v4690_v4  ;;  %vm4697_vm2 = vc.u32 %v4693_v28, 2454267026  ;;  %v4709_v0 = vshrl.u32 %v13456_v16, 16  ;;  %13459 = vst [vmem:[#allocation68_spill] sm:$0xff] %v11329_v42  ;;  %v5834_v63 = vld [vmem:[#allocation3 + $0x29] sm:$0xff] }
 0x35b   : > { %vm13457_vm15 = vcmp.ne.s32.totalorder %v13441_v3, 0  ;;  %v11324_v21 = vsub.s32 %v13444_v5, %v4669_v48  ;;  %v4698_v14 = vsel %vm4697_vm2, 1, %v13371_v32  ;;  %v3545_v28 = vadd.f32 %v3544_v26, %v3357_v19  ;;  %v5693_v48 = vld [vmem:[#allocation3 + $0x57] sm:$0xff]  ;;  %v5691_v19 = vld [vmem:[#allocation3 + $0x47] sm:$0xff] }
 0x35c   : > { %v5744_v53 = vsel %vm13457_vm15, %v5695_v46, 0.0  ;;  %v4711_v17 = vmul.u32 9362, %v4708_v24  ;;  %v4712_v51 = vmul.u32 37449, %v4708_v24  ;;  %v4695_v62 = vadd.s32 %v4694_v1, %v4684_v54 }
 0x35d   : > { %13458 = vst [vmem:[#allocation12_spill] sm:$0xff] %v11324_v21  ;;  %v11331_v47 = vmul.u32 9362, %v4709_v0  ;;  %v4714_v4 = vmul.u32 37449, %v4709_v0  ;;  %vm13280_vm9 = vcmp.ne.s32.totalorder %v11324_v21, 0  ;;  %v5885_v5 = vsel %vm13246_vm10, %v5836_v33, 0.0 }
 0x35e   : > { %v4715_v46 = vshll.u32 %v4712_v51, 16  ;;  %v4716_v34 = vshrl.u32 %v4712_v51, 16  ;;  %v5427_v24 = vsel %vm13280_vm9, %v5282_v58, 0.0  ;;  %v4696_v38 = vadd.s32 %v4695_v62, %v4686_v7  ;;  %3612 = vst.msk [vmem:[#allocation3 + $0x1a0] sm:$0xff] %vm3559_vm7, %v3545_v28 }
 0x35f   : > { %v4717_v54 = vshll.u32 %v11331_v47, 16  ;;  %v4718_v1 = vshrl.u32 %v11331_v47, 16  ;;  %v6699_v26 = vsel %vm3559_vm7, %v5427_v24, %v11327_v22  ;;  %v8232_v51 = vpack.i.bf16 %v5885_v5, %v5744_v53  ;;  %v3359_v24 = vpop.f32.mrf.mxu1 }
 0x360   : > { %vm4719_vm5 = vc.u32 %v4711_v17, %v4715_v46  ;;  %v4721_v0 = vadd.s32 %v4715_v46, %v4711_v17  ;;  %7196 = vmatmul.f32.gmra.mxu3 %v6699_v26  ;;  %v4699_v33 = vadd.s32 %v4698_v14, %v4696_v38  ;;  %v5742_v7 = vsel %vm5159_vm3, %v5693_v48, 0.0  ;;  %v5511_v17 = vld [vmem:[#allocation3 + $0x9d] sm:$0xff]  ;;  %v3171_v38 = vpop.f32.mrf.mxu0  ;;  %v5839_v26 = vld [vmem:[#allocation3 + $0x51] sm:$0xff] }
 0x361   : > { %v4720_v42 = vsel %vm4719_vm5, 1, %v13371_v32  ;;  %v5883_v58 = vsel %vm13253_vm12, %v5834_v63, 0.0  ;;  %8126 = vmatmul.msk.f32.gmra.mxu2 %vm3559_vm7, %v6012_v52  ;;  %8233 = vrot.lane.b32.xlu1 %v8232_v51, %s8586_s4  ;;  %v5740_v53 = vsel %vm5157_vm13, %v5691_v19, 0.0  ;;  %v6881_v14 = vld [vmem:[%s13143_s2 + $0x98] sm:$0xff]  ;;  %v3547_v19 = vpop.f32.mrf.mxu2  ;;  %vm13480_vm12 = vcmp.ne.s32.totalorder %v10138_v40, 27  ;;  %v13488_v40 = vld [vmem:[#allocation40_spill] sm:$0xff] }
 0x362   : > { %v4722_v62 = vadd.s32 %v4720_v42, %v4714_v4  ;;  %vm4723_vm2 = vc.u32 %v4721_v0, %v4717_v54  ;;  %v4725_v47 = vadd.s32 %v4721_v0, %v4717_v54  ;;  %v4700_v28 = vshrl.u32 %v4699_v33, 4  ;;  %6305 = vrot.lane.b32.xlu0 %v5740_v53, %s8586_s4  ;;  %v8473_v52 = vld [vmem:[#allocation3 + $0x9b] sm:$0xff]  ;;  %7257 = vmatpush.msrb.mxu3 %v6881_v14  ;;  %v5696_v0 = vld [vmem:[#allocation3 + $0x6f] sm:$0xff] }
 0x363   : > { %v4724_v46 = vsel %vm4723_vm2, 1, %v13371_v32  ;;  %v8222_v5 = vpack.i.bf16 %v5883_v58, %v5742_v7  ;;  %v13460_v42 = vld [vmem:[#allocation35_spill] sm:$0xff]  ;;  %v3360_v58 = vadd.f32 %v3359_v24, %v3171_v38  ;;  %vm13466_vm2 = vcmp.ne.s32.totalorder %v13448_v13, 0  ;;  %v11379_v38 = vpop.permute.xlu1 %6167 }
 0x364   : > { %vm13461_vm3 = vcmp.ne.s32.totalorder %v13460_v42, 0  ;;  %v5698_v48 = vld [vmem:[#allocation3 + $0x7f] sm:$0xff]  ;;  %v4726_v63 = vadd.s32 %v4724_v46, %v4722_v62  ;;  %vm4729_vm13 = vc.u32 %v4725_v47, 2454267026  ;;  %vm13258_vm15 = vcmp.ne.s32.totalorder %v13460_v42, 27  ;;  %v13462_v47 = vld [vmem:[#allocation13_spill] sm:$0xff] }
 0x365   : > { %v5950_v4 = vsel %vm13461_vm3, %v8473_v52, 0.0  ;;  %v4701_v51 = vmul.u32 28, %v4700_v28  ;;  %v4730_v33 = vsel %vm4729_vm13, 1, %v13371_v32  ;;  %8223 = vrot.lane.b32.xlu2 %v8222_v5, %s8586_s4  ;;  %v6013_v7 = vsel %vm13258_vm15, %v5511_v17, 0.0  ;;  %vm13463_vm5 = vmmov %vm13461_vm3  ;;  %v5837_v46 = vld [vmem:[#allocation3 + $0x41] sm:$0xff]  ;;  %v5283_v52 = vld [vmem:[#allocation3 + $0x113] sm:$0xff] }
 0x366   : > { %v6825_v54 = vsel %vm3559_vm7, %v5950_v4, %v10716_v8  ;;  %v4727_v62 = vadd.s32 %v4726_v63, %v4716_v34  ;;  %v4740_v53 = vand.u32 65535, %v13462_v47  ;;  %v4741_v8 = vshrl.u32 %v13462_v47, 16  ;;  %v11373_v4 = vpop.f32.mrf.mxu3 }
 0x367   : > { %7625 = vmatmul.f32.gmra.mxu1 %v6825_v54  ;;  %v5747_v14 = vsel %vm13463_vm5, %v5698_v48, 0.0  ;;  %v11371_v28 = vsub.s32 %v13450_v36, %v4701_v51  ;;  %13465 = vst [vmem:[#allocation69_spill] sm:$0xff] %v11373_v4  ;;  %v3548_v5 = vadd.f32 %v3547_v19, %v3360_v58  ;;  %v5888_v17 = vsel %vm13245_vm14, %v5839_v26, 0.0  ;;  %v5694_v26 = vld [vmem:[#allocation3 + $0x5f] sm:$0xff] }
 0x368   : > { %v5745_v34 = vsel %vm13466_vm2, %v5696_v0, 0.0  ;;  %v4728_v63 = vadd.s32 %v4727_v62, %v4718_v1  ;;  %v4743_v24 = vmul.u32 9362, %v4740_v53  ;;  %v4744_v54 = vmul.u32 37449, %v4740_v53  ;;  %v5835_v53 = vld [vmem:[#allocation3 + $0x31] sm:$0xff]  ;;  %v3174_v23 = vpop.f32.mrf.mxu0 }
 0x369   : > { %13464 = vst [vmem:[#allocation13_spill] sm:$0xff] %v11371_v28  ;;  %v11381_v48 = vmul.u32 9362, %v4741_v8  ;;  %vm13289_vm3 = vcmp.ne.s32.totalorder %v11371_v28, 0  ;;  %v4746_v36 = vmul.u32 37449, %v4741_v8  ;;  %v8247_v51 = vpack.i.bf16 %v5888_v17, %v5747_v14  ;;  %8127 = vmatmul.msk.f32.gmra.mxu2 %vm3559_vm7, %v6013_v7  ;;  %v5512_v7 = vld [vmem:[#allocation3 + $0xa5] sm:$0xff] }
 0x36a   : > { %3613 = vst.msk [vmem:[#allocation3 + $0x1a8] sm:$0xff] %vm3559_vm7, %v3548_v5  ;;  %vm13467_vm13 = vcmp.ne.s32.totalorder %v10100_v57, 27  ;;  %v5428_v0 = vsel %vm13289_vm3, %v5283_v52, 0.0  ;;  %v4731_v58 = vadd.s32 %v4730_v33, %v4728_v63  ;;  %v4747_v1 = vshll.u32 %v4744_v54, 16  ;;  %v6898_v17 = vld [vmem:[%s13143_s2 + $0x120] sm:$0xff]  ;;  %v11412_v57 = vpop.permute.xlu2 %6169 }
 0x36b   : > { %v5886_v19 = vsel %vm13467_vm13, %v5837_v46, 0.0  ;;  %v4748_v62 = vshrl.u32 %v4744_v54, 16  ;;  %v6700_v4 = vsel %vm3559_vm7, %v5428_v0, %v11379_v38  ;;  %v4749_v8 = vshll.u32 %v11381_v48, 16  ;;  %8248 = vrot.lane.b32.xlu1 %v8247_v51, %s8586_s4  ;;  %7420 = vmatpush.msrb.mxu0 %v6898_v17 }
 0x36c   : > { %v4750_v14 = vshrl.u32 %v11381_v48, 16  ;;  %v8237_v46 = vpack.i.bf16 %v5886_v19, %v5745_v34  ;;  %7199 = vmatmul.f32.gmra.mxu3 %v6700_v4  ;;  %v4732_v5 = vshrl.u32 %v4731_v58, 4  ;;  %vm4751_vm5 = vc.u32 %v4743_v24, %v4747_v1  ;;  %v8474_v34 = vld [vmem:[#allocation3 + $0xa3] sm:$0xff]  ;;  %v3362_v58 = vpop.f32.mrf.mxu1 }
 0x36d   : > { %v4753_v52 = vadd.s32 %v4747_v1, %v4743_v24  ;;  %vm13468_vm2 = vcmp.ne.s32.totalorder %v10263_v20, 0  ;;  %v4752_v63 = vsel %vm4751_vm5, 1, %v13371_v32  ;;  %vm13469_vm13 = vcmp.ne.s32.totalorder %v10038_v31, 27  ;;  %v13470_v4 = vld [vmem:[#allocation36_spill] sm:$0xff] }
 0x36e   : > { %v5743_v33 = vsel %vm13468_vm2, %v5694_v26, 0.0  ;;  %8238 = vrot.lane.b32.xlu2 %v8237_v46, %s8586_s4  ;;  %v5884_v54 = vsel %vm13469_vm13, %v5835_v53, 0.0  ;;  %vm13471_vm14 = vcmp.ne.s32.totalorder %v13470_v4, 0  ;;  %vm13265_vm10 = vcmp.ne.s32.totalorder %v13470_v4, 27  ;;  %v5701_v26 = vld [vmem:[#allocation3 + $0x97] sm:$0xff]  ;;  %v11418_v17 = vpop.f32.mrf.mxu3 }
 0x36f   : > { %v5951_v48 = vsel %vm13471_vm14, %v8474_v34, 0.0  ;;  %v4733_v24 = vmul.u32 28, %v4732_v5  ;;  %v4754_v51 = vadd.s32 %v4752_v63, %v4746_v36  ;;  %vm4755_vm2 = vc.u32 %v4753_v52, %v4749_v8  ;;  %v5842_v34 = vld [vmem:[#allocation3 + $0x69] sm:$0xff]  ;;  %v5284_v36 = vld [vmem:[#allocation3 + $0x11b] sm:$0xff]  ;;  %13473 = vst [vmem:[#allocation71_spill] sm:$0xff] %v11418_v17 }
 0x370   : > { %v4757_v19 = vadd.s32 %v4753_v52, %v4749_v8  ;;  %v4756_v0 = vsel %vm4755_vm2, 1, %v13371_v32  ;;  %v8227_v1 = vpack.i.bf16 %v5884_v54, %v5743_v33  ;;  %v6826_v46 = vsel %vm3559_vm7, %v5951_v48, %v10766_v44  ;;  %v13474_v44 = vld [vmem:[#allocation15_spill] sm:$0xff]  ;;  %v3550_v54 = vpop.f32.mrf.mxu2 }
 0x371   : > { %v6014_v53 = vsel %vm13265_vm10, %v5512_v7, 0.0  ;;  %v11415_v5 = vsub.s32 %v13456_v16, %v4733_v24  ;;  %v4758_v8 = vadd.s32 %v4756_v0, %v4754_v51  ;;  %7628 = vmatmul.f32.gmra.mxu1 %v6826_v46  ;;  %v3363_v52 = vadd.f32 %v3362_v58, %v3174_v23  ;;  %v13475_v48 = vld [vmem:[#allocation39_spill] sm:$0xff] }
 0x372   : > { %vm4761_vm14 = vc.u32 %v4757_v19, 2454267026  ;;  %8228 = vrot.lane.b32.xlu0 %v8227_v1, %s8586_s4  ;;  %v4772_v7 = vand.u32 65535, %v13474_v44  ;;  %v4773_v63 = vshrl.u32 %v13474_v44, 16  ;;  %vm13476_vm5 = vcmp.ne.s32.totalorder %v13475_v48, 0  ;;  %8128 = vmatmul.msk.f32.gmra.mxu2 %vm3559_vm7, %v6014_v53  ;;  %v5699_v19 = vld [vmem:[#allocation3 + $0x87] sm:$0xff] }
 0x373   : > { %13472 = vst [vmem:[#allocation70_spill] sm:$0xff] %v11415_v5  ;;  %v4762_v33 = vsel %vm4761_vm14, 1, %v13371_v32  ;;  %v5750_v16 = vsel %vm13476_vm5, %v5701_v26, 0.0  ;;  %vm13272_vm13 = vcmp.ne.s32.totalorder %v11415_v5, 0  ;;  %v4759_v24 = vadd.s32 %v4758_v8, %v4748_v62  ;;  %v5840_v17 = vld [vmem:[#allocation3 + $0x59] sm:$0xff] }
 0x374   : > { %v3551_v23 = vadd.f32 %v3550_v54, %v3363_v52  ;;  %v5891_v51 = vsel %vm13252_vm8, %v5842_v34, 0.0  ;;  %v5429_v0 = vsel %vm13272_vm13, %v5284_v36, 0.0  ;;  %v4775_v58 = vmul.u32 9362, %v4772_v7  ;;  %v5838_v52 = vld [vmem:[#allocation3 + $0x49] sm:$0xff] }
 0x375   : > { %v4776_v1 = vmul.u32 37449, %v4772_v7  ;;  %v11431_v46 = vmul.u32 9362, %v4773_v63  ;;  %v6701_v26 = vsel %vm3559_vm7, %v5429_v0, %v11412_v57  ;;  %v4760_v62 = vadd.s32 %v4759_v24, %v4750_v14 }
 0x376   : > { %v4778_v8 = vmul.u32 37449, %v4773_v63  ;;  %3614 = vst.msk [vmem:[#allocation3 + $0x1b0] sm:$0xff] %vm3559_vm7, %v3551_v23  ;;  %v8262_v53 = vpack.i.bf16 %v5891_v51, %v5750_v16  ;;  %7202 = vmatmul.f32.gmra.mxu3 %v6701_v26  ;;  %vm13477_vm2 = vcmp.ne.s32.totalorder %v13470_v4, 0  ;;  %vm13478_vm14 = vcmp.ne.s32.totalorder %v10219_v15, 27  ;;  %v5513_v26 = vld [vmem:[#allocation3 + $0xad] sm:$0xff] }
 0x377   : > { %v4779_v34 = vshll.u32 %v4776_v1, 16  ;;  %v4780_v54 = vshrl.u32 %v4776_v1, 16  ;;  %v4781_v36 = vshll.u32 %v11431_v46, 16  ;;  %v4782_v7 = vshrl.u32 %v11431_v46, 16  ;;  %v8475_v1 = vld [vmem:[#allocation3 + $0xab] sm:$0xff]  ;;  %v13481_v46 = vld [vmem:[#allocation38_spill] sm:$0xff] }
 0x378   : > { %v4763_v3 = vadd.s32 %v4762_v33, %v4760_v62  ;;  %8263 = vrot.lane.b32.xlu1 %v8262_v53, %s8586_s4  ;;  %v5748_v31 = vsel %vm13477_vm2, %v5699_v19, 0.0  ;;  %v5889_v14 = vsel %vm13478_vm14, %v5840_v17, 0.0  ;;  %vm13479_vm5 = vcmp.ne.s32.totalorder %v13454_v27, 0  ;;  %v3365_v53 = vpop.f32.mrf.mxu1 }
 0x379   : > { %v5746_v63 = vsel %vm13479_vm5, %v5697_v49, 0.0  ;;  %vm4783_vm8 = vc.u32 %v4775_v58, %v4779_v34  ;;  %v4785_v16 = vadd.s32 %v4779_v34, %v4775_v58  ;;  %v8252_v24 = vpack.i.bf16 %v5889_v14, %v5748_v31  ;;  %v3177_v31 = vpop.f32.mrf.mxu0  ;;  %v5704_v34 = vld [vmem:[#allocation3 + $0xaf] sm:$0xff] }
 0x37a   : > { %v5887_v23 = vsel %vm13480_vm12, %v5838_v52, 0.0  ;;  %v4764_v51 = vshrl.u32 %v4763_v3, 4  ;;  %v4784_v33 = vsel %vm4783_vm8, 1, %v13371_v32  ;;  %vm13482_vm4 = vcmp.ne.s32.totalorder %v13481_v46, 0 }
 0x37b   : > { %v8242_v0 = vpack.i.bf16 %v5887_v23, %v5746_v63  ;;  %v5952_v19 = vsel %vm13482_vm4, %v8475_v1, 0.0  ;;  %v4786_v62 = vadd.s32 %v4784_v33, %v4778_v8  ;;  %vm4787_vm2 = vc.u32 %v4785_v16, %v4781_v36  ;;  %8253 = vrot.lane.b32.xlu2 %v8252_v24, %s8586_s4  ;;  %v13484_v63 = vld [vmem:[#allocation17_spill] sm:$0xff]  ;;  %v5845_v24 = vld [vmem:[#allocation3 + $0x81] sm:$0xff] }
 0x37c   : > { %v4789_v17 = vadd.s32 %v4785_v16, %v4781_v36  ;;  %v6827_v49 = vsel %vm3559_vm7, %v5952_v19, %v10822_v9  ;;  %v4765_v58 = vmul.u32 28, %v4764_v51  ;;  %v4788_v3 = vsel %vm4787_vm2, 1, %v13371_v32  ;;  %v11456_v36 = vpop.f32.mrf.mxu3  ;;  %v3553_v16 = vpop.f32.mrf.mxu2  ;;  %v5285_v51 = vld [vmem:[#allocation3 + $0x123] sm:$0xff] }
 0x37d   : > { %8243 = vrot.lane.b32.xlu0 %v8242_v0, %s8586_s4  ;;  %7631 = vmatmul.f32.gmra.mxu1 %v6827_v49  ;;  %vm13268_vm12 = vcmp.ne.s32.totalorder %v13481_v46, 27  ;;  %v3366_v52 = vadd.f32 %v3365_v53, %v3177_v31  ;;  %v4790_v8 = vadd.s32 %v4788_v3, %v4786_v62  ;;  %13483 = vst [vmem:[#allocation15_spill] sm:$0xff] %v11456_v36  ;;  %v4804_v9 = vand.u32 65535, %v13484_v63  ;;  %v11467_v19 = vpop.permute.xlu0 %6171  ;;  %v13486_v53 = vld [vmem:[#allocation44_spill] sm:$0xff]  ;;  %v5702_v3 = vld [vmem:[#allocation3 + $0x9f] sm:$0xff] }
 0x37e   : > { %vm4793_vm4 = vc.u32 %v4789_v17, 2454267026  ;;  %v6015_v14 = vsel %vm13268_vm12, %v5513_v26, 0.0  ;;  %v11462_v23 = vsub.s32 %v13462_v47, %v4765_v58  ;;  %v4805_v0 = vshrl.u32 %v13484_v63, 16 }
 0x37f   : > { %v4794_v33 = vsel %vm4793_vm4, 1, %v13371_v32  ;;  %8129 = vmatmul.msk.f32.gmra.mxu2 %vm3559_vm7, %v6015_v14  ;;  %v3554_v1 = vadd.f32 %v3553_v16, %v3366_v52  ;;  %v4791_v62 = vadd.s32 %v4790_v8, %v4780_v54  ;;  %v4807_v17 = vmul.u32 9362, %v4804_v9  ;;  %v5700_v16 = vld [vmem:[#allocation3 + $0x8f] sm:$0xff] }
 0x380   : > { %13485 = vst [vmem:[#allocation17_spill] sm:$0xff] %v11462_v23  ;;  %v4808_v26 = vmul.u32 37449, %v4804_v9  ;;  %vm13487_vm8 = vcmp.ne.s32.totalorder %v13486_v53, 0  ;;  %vm13286_vm14 = vcmp.ne.s32.totalorder %v11462_v23, 0  ;;  %v11472_v47 = vmul.u32 9362, %v4805_v0  ;;  %v5843_v9 = vld [vmem:[#allocation3 + $0x71] sm:$0xff] }
 0x381   : > { %v5753_v49 = vsel %vm13487_vm8, %v5704_v34, 0.0  ;;  %v4810_v31 = vmul.u32 37449, %v4805_v0  ;;  %3615 = vst.msk [vmem:[#allocation3 + $0x1b8] sm:$0xff] %vm3559_vm7, %v3554_v1  ;;  %v5894_v58 = vsel %vm13258_vm15, %v5845_v24, 0.0  ;;  %v5430_v52 = vsel %vm13286_vm14, %v5285_v51, 0.0  ;;  %v5841_v34 = vld [vmem:[#allocation3 + $0x61] sm:$0xff] }
 0x382   : > { %v4792_v54 = vadd.s32 %v4791_v62, %v4782_v7  ;;  %v4811_v8 = vshll.u32 %v4808_v26, 16  ;;  %v4812_v14 = vshrl.u32 %v4808_v26, 16  ;;  %v6702_v36 = vsel %vm3559_vm7, %v5430_v52, %v11467_v19 }
 0x383   : > { %v4813_v0 = vshll.u32 %v11472_v47, 16  ;;  %v4814_v1 = vshrl.u32 %v11472_v47, 16  ;;  %v8277_v15 = vpack.i.bf16 %v5894_v58, %v5753_v49  ;;  %7205 = vmatmul.f32.gmra.mxu3 %v6702_v36  ;;  %vm13489_vm2 = vcmp.ne.s32.totalorder %v13488_v40, 0  ;;  %v3180_v47 = vpop.f32.mrf.mxu0  ;;  %v6880_v58 = vld [vmem:[%s13143_s2 + $0x90] sm:$0xff] }
 0x384   : > { %v4795_v24 = vadd.s32 %v4794_v33, %v4792_v54  ;;  %vm4815_vm5 = vc.u32 %v4807_v17, %v4811_v8  ;;  %v4817_v42 = vadd.s32 %v4811_v8, %v4807_v17  ;;  %v5751_v7 = vsel %vm13489_vm2, %v5702_v3, 0.0  ;;  %v3368_v3 = vpop.f32.mrf.mxu1  ;;  %v8476_v8 = vld [vmem:[#allocation3 + $0xb3] sm:$0xff]  ;;  %7258 = vmatpush.msrb.mxu3 %v6880_v58 }
 0x385   : > { %v4816_v51 = vsel %vm4815_vm5, 1, %v13371_v32  ;;  %8278 = vrot.lane.b32.xlu1 %v8277_v15, %s8586_s4  ;;  %v5892_v62 = vsel %vm13270_vm0, %v5843_v9, 0.0  ;;  %vm13490_vm4 = vcmp.ne.s32.totalorder %v13481_v46, 0  ;;  %vm13491_vm8 = vcmp.ne.s32.totalorder %v10263_v20, 27  ;;  %v5848_v58 = vld [vmem:[#allocation3 + $0x99] sm:$0xff] }
 0x386   : > { %v5749_v26 = vsel %vm13490_vm4, %v5700_v16, 0.0  ;;  %v5890_v49 = vsel %vm13491_vm8, %v5841_v34, 0.0  ;;  %v4796_v36 = vshrl.u32 %v4795_v24, 4  ;;  %v4818_v33 = vadd.s32 %v4816_v51, %v4810_v31  ;;  %v5514_v16 = vld [vmem:[#allocation3 + $0xb5] sm:$0xff]  ;;  %v3556_v24 = vpop.f32.mrf.mxu2  ;;  %v5707_v51 = vld [vmem:[#allocation3 + $0xc7] sm:$0xff] }
 0x387   : > { %vm4819_vm15 = vc.u32 %v4817_v42, %v4813_v0  ;;  %v4821_v17 = vadd.s32 %v4817_v42, %v4813_v0  ;;  %v8267_v52 = vpack.i.bf16 %v5892_v62, %v5751_v7  ;;  %v8257_v54 = vpack.i.bf16 %v5890_v49, %v5749_v26  ;;  %v11499_v42 = vpop.f32.mrf.mxu3  ;;  %v13494_v62 = vld [vmem:[#allocation18_spill] sm:$0xff] }
 0x388   : > { %v4820_v15 = vsel %vm4819_vm15, 1, %v13371_v32  ;;  %vm13492_vm5 = vcmp.ne.s32.totalorder %v13475_v48, 0  ;;  %v4797_v34 = vmul.u32 28, %v4796_v36  ;;  %13493 = vst [vmem:[#allocation72_spill] sm:$0xff] %v11499_v42  ;;  %vm13263_vm15 = vcmp.ne.s32.totalorder %v13475_v48, 27  ;;  %v5286_v36 = vld [vmem:[#allocation3 + $0x12b] sm:$0xff] }
 0x389   : > { %v5953_v9 = vsel %vm13492_vm5, %v8476_v8, 0.0  ;;  %v4822_v31 = vadd.s32 %v4820_v15, %v4818_v33  ;;  %vm4825_vm2 = vc.u32 %v4821_v17, 2454267026  ;;  %8268 = vrot.lane.b32.xlu2 %v8267_v52, %s8586_s4  ;;  %8258 = vrot.lane.b32.xlu0 %v8257_v54, %s8586_s4  ;;  %v3369_v7 = vadd.f32 %v3368_v3, %v3180_v47  ;;  %v11514_v15 = vpop.permute.xlu1 %6173  ;;  %v13496_v54 = vld [vmem:[#allocation51_spill] sm:$0xff]  ;;  %v13498_v20 = vld [vmem:[#allocation46_spill] sm:$0xff]  ;;  %v13500_v48 = vld [vmem:[#allocation41_spill] sm:$0xff] }
 0x38a   : > { %v6828_v0 = vsel %vm3559_vm7, %v5953_v9, %v10900_v2  ;;  %v4826_v13 = vsel %vm4825_vm2, 1, %v13371_v32  ;;  %v4836_v26 = vand.u32 65535, %v13494_v62  ;;  %v11509_v49 = vsub.s32 %v13474_v44, %v4797_v34  ;;  %v5705_v34 = vld [vmem:[#allocation3 + $0xb7] sm:$0xff] }
 0x38b   : > { %v4823_v33 = vadd.s32 %v4822_v31, %v4812_v14  ;;  %7634 = vmatmul.f32.gmra.mxu1 %v6828_v0  ;;  %v6016_v2 = vsel %vm13263_vm15, %v5514_v16, 0.0  ;;  %v4837_v17 = vshrl.u32 %v13494_v62, 16  ;;  %v3557_v3 = vadd.f32 %v3556_v24, %v3369_v7  ;;  %v5846_v16 = vld [vmem:[#allocation3 + $0x89] sm:$0xff] }
 0x38c   : > { %13495 = vst [vmem:[#allocation18_spill] sm:$0xff] %v11509_v49  ;;  %8130 = vmatmul.msk.f32.gmra.mxu2 %vm3559_vm7, %v6016_v2  ;;  %v4839_v52 = vmul.u32 9362, %v4836_v26  ;;  %v4840_v47 = vmul.u32 37449, %v4836_v26  ;;  %vm13497_vm4 = vcmp.ne.s32.totalorder %v13496_v54, 0  ;;  %vm13293_vm8 = vcmp.ne.s32.totalorder %v11509_v49, 0  ;;  %v5703_v7 = vld [vmem:[#allocation3 + $0xa7] sm:$0xff] }
 0x38d   : > { %v5756_v44 = vsel %vm13497_vm4, %v5707_v51, 0.0  ;;  %v4824_v14 = vadd.s32 %v4823_v33, %v4814_v1  ;;  %v4841_v8 = vmul.u32 9362, %v4837_v17  ;;  %v4842_v9 = vmul.u32 37449, %v4837_v17  ;;  %3616 = vst.msk [vmem:[#allocation3 + $0x1c0] sm:$0xff] %vm3559_vm7, %v3557_v3 }
 0x38e   : > { %v5431_v31 = vsel %vm13293_vm8, %v5286_v36, 0.0  ;;  %v4843_v0 = vshll.u32 %v4840_v47, 16  ;;  %v4844_v42 = vshrl.u32 %v4840_v47, 16  ;;  %v5897_v24 = vsel %vm13263_vm15, %v5848_v58, 0.0  ;;  %v5844_v47 = vld [vmem:[#allocation3 + $0x79] sm:$0xff] }
 0x38f   : > { %v6703_v51 = vsel %vm3559_vm7, %v5431_v31, %v11514_v15  ;;  %v4827_v26 = vadd.s32 %v4826_v13, %v4824_v14  ;;  %v4845_v1 = vshll.u32 %v4841_v8, 16  ;;  %v4846_v33 = vshrl.u32 %v4841_v8, 16 }
 0x390   : > { %7208 = vmatmul.f32.gmra.mxu3 %v6703_v51  ;;  %vm4847_vm5 = vc.u32 %v4839_v52, %v4843_v0  ;;  %v4849_v2 = vadd.s32 %v4843_v0, %v4839_v52  ;;  %v8292_v17 = vpack.i.bf16 %v5897_v24, %v5756_v44  ;;  %vm13499_vm2 = vcmp.ne.s32.totalorder %v13498_v20, 0  ;;  %v8477_v24 = vld [vmem:[#allocation3 + $0xbb] sm:$0xff] }
 0x391   : > { %v5754_v36 = vsel %vm13499_vm2, %v5705_v34, 0.0  ;;  %v4828_v61 = vshrl.u32 %v4827_v26, 4  ;;  %v4848_v3 = vsel %vm4847_vm5, 1, %v13371_v32  ;;  %v5895_v58 = vsel %vm13265_vm10, %v5846_v16, 0.0  ;;  %v11536_v34 = vpop.f32.mrf.mxu3  ;;  %v5515_v51 = vld [vmem:[#allocation3 + $0xbd] sm:$0xff] }
 0x392   : > { %vm13501_vm4 = vcmp.ne.s32.totalorder %v13500_v48, 0  ;;  %v4850_v13 = vadd.s32 %v4848_v3, %v4842_v9  ;;  %vm4851_vm15 = vc.u32 %v4849_v2, %v4845_v1  ;;  %v4853_v14 = vadd.s32 %v4849_v2, %v4845_v1  ;;  %8293 = vrot.lane.b32.xlu1 %v8292_v17, %s8586_s4  ;;  %13502 = vst [vmem:[#allocation73_spill] sm:$0xff] %v11536_v34  ;;  %v5710_v26 = vld [vmem:[#allocation3 + $0xdf] sm:$0xff]  ;;  %v5287_v2 = vld [vmem:[#allocation3 + $0x133] sm:$0xff]  ;;  %v11551_v3 = vpop.permute.xlu2 %6175 }
 0x393   : > { %v5752_v31 = vsel %vm13501_vm4, %v5703_v7, 0.0  ;;  %v8282_v52 = vpack.i.bf16 %v5895_v58, %v5754_v36  ;;  %v4829_v44 = vmul.u32 28, %v4828_v61  ;;  %v4852_v8 = vsel %vm4851_vm15, 1, %v13371_v32  ;;  %v13505_v36 = vld [vmem:[#allocation21_spill] sm:$0xff] }
 0x394   : > { %v5893_v0 = vsel %vm13266_vm6, %v5844_v47, 0.0  ;;  %vm13503_vm5 = vcmp.ne.s32.totalorder %v13488_v40, 0  ;;  %v4854_v7 = vadd.s32 %v4852_v8, %v4850_v13  ;;  %vm4857_vm2 = vc.u32 %v4853_v14, 2454267026 }
 0x395   : > { %v5954_v16 = vsel %vm13503_vm5, %v8477_v24, 0.0  ;;  %8283 = vrot.lane.b32.xlu2 %v8282_v52, %s8586_s4  ;;  %v8272_v9 = vpack.i.bf16 %v5893_v0, %v5752_v31  ;;  %v11546_v1 = vsub.s32 %v13484_v63, %v4829_v44  ;;  %v4858_v17 = vsel %vm4857_vm2, 1, %v13371_v32  ;;  %v5851_v63 = vld [vmem:[#allocation3 + $0xb1] sm:$0xff] }
 0x396   : > { %v6829_v61 = vsel %vm3559_vm7, %v5954_v16, %v10960_v18  ;;  %vm13267_vm15 = vcmp.ne.s32.totalorder %v13488_v40, 27  ;;  %v4868_v47 = vand.u32 65535, %v13505_v36  ;;  %v4855_v58 = vadd.s32 %v4854_v7, %v4844_v42  ;;  %v5708_v24 = vld [vmem:[#allocation3 + $0xcf] sm:$0xff]  ;;  %v5849_v16 = vld [vmem:[#allocation3 + $0xa1] sm:$0xff] }
 0x397   : > { %13504 = vst [vmem:[#allocation74_spill] sm:$0xff] %v11546_v1  ;;  %7637 = vmatmul.f32.gmra.mxu1 %v6829_v61  ;;  %8273 = vrot.lane.b32.xlu0 %v8272_v9, %s8586_s4  ;;  %v6017_v18 = vsel %vm13267_vm15, %v5515_v51, 0.0  ;;  %v4869_v31 = vshrl.u32 %v13505_v36, 16  ;;  %vm13275_vm4 = vcmp.ne.s32.totalorder %v13486_v53, 27  ;;  %vm13271_vm5 = vcmp.ne.s32.totalorder %v11546_v1, 0 }
 0x398   : > { %8131 = vmatmul.msk.f32.gmra.mxu2 %vm3559_vm7, %v6017_v18  ;;  %v4871_v13 = vmul.u32 9362, %v4868_v47  ;;  %v4872_v14 = vmul.u32 37449, %v4868_v47  ;;  %vm13506_vm2 = vcmp.ne.s32.totalorder %v11000_v29, 0  ;;  %v5432_v42 = vsel %vm13271_vm5, %v5287_v2, 0.0  ;;  %v5706_v47 = vld [vmem:[#allocation3 + $0xbf] sm:$0xff]  ;;  %v5847_v2 = vld [vmem:[#allocation3 + $0x91] sm:$0xff] }
 0x399   : > { %v5759_v52 = vsel %vm13506_vm2, %v5710_v26, 0.0  ;;  %v4856_v44 = vadd.s32 %v4855_v58, %v4846_v33  ;;  %v4873_v8 = vmul.u32 9362, %v4869_v31  ;;  %v4874_v0 = vmul.u32 37449, %v4869_v31 }
 0x39a   : > { %v6704_v51 = vsel %vm3559_vm7, %v5432_v42, %v11551_v3  ;;  %v4875_v7 = vshll.u32 %v4872_v14, 16  ;;  %v4876_v9 = vshrl.u32 %v4872_v14, 16  ;;  %v5900_v61 = vsel %vm13275_vm4, %v5851_v63, 0.0  ;;  %v11575_v14 = vld [vmem:[%s13143_s2 + $0x118] sm:$0xff]  ;;  %v13508_v42 = vld [vmem:[#allocation49_spill] sm:$0xff] }
 0x39b   : > { %7211 = vmatmul.f32.gmra.mxu3 %v6704_v51  ;;  %v4859_v18 = vadd.s32 %v4858_v17, %v4856_v44  ;;  %v4877_v26 = vshll.u32 %v4873_v8, 16  ;;  %v4878_v34 = vshrl.u32 %v4873_v8, 16  ;;  %v8307_v4 = vpack.i.bf16 %v5900_v61, %v5759_v52  ;;  %7421 = vmatpush.msrb.mxu0 %v11575_v14  ;;  %v5516_v51 = vld [vmem:[#allocation3 + $0xc5] sm:$0xff] }
 0x39c   : > { %vm4879_vm2 = vc.u32 %v4871_v13, %v4875_v7  ;;  %v4881_v33 = vadd.s32 %v4875_v7, %v4871_v13  ;;  %vm13507_vm10 = vcmp.ne.s32.totalorder %v10894_v59, 0  ;;  %v5898_v31 = vsel %vm13267_vm15, %v5849_v16, 0.0 }
 0x39d   : > { %v5757_v58 = vsel %vm13507_vm10, %v5708_v24, 0.0  ;;  %v4860_v63 = vshrl.u32 %v4859_v18, 4  ;;  %v4880_v17 = vsel %vm4879_vm2, 1, %v13371_v32  ;;  %8308 = vrot.lane.b32.xlu1 %v8307_v4, %s8586_s4  ;;  %vm13509_vm6 = vcmp.ne.s32.totalorder %v13508_v42, 0  ;;  %v11582_v24 = vpop.f32.mrf.mxu3  ;;  %v8478_v18 = vld [vmem:[#allocation3 + $0xc3] sm:$0xff] }
 0x39e   : > { %v8297_v52 = vpack.i.bf16 %v5898_v31, %v5757_v58  ;;  %v5755_v13 = vsel %vm13509_vm6, %v5706_v47, 0.0  ;;  %v4882_v44 = vadd.s32 %v4880_v17, %v4874_v0  ;;  %vm4883_vm10 = vc.u32 %v4881_v33, %v4877_v26  ;;  %13510 = vst [vmem:[#allocation21_spill] sm:$0xff] %v11582_v24  ;;  %v5713_v58 = vld [vmem:[#allocation3 + $0xf7] sm:$0xff] }
 0x39f   : > { %v4885_v8 = vadd.s32 %v4881_v33, %v4877_v26  ;;  %v5896_v16 = vsel %vm13268_vm12, %v5847_v2, 0.0  ;;  %v4861_v7 = vmul.u32 28, %v4860_v63  ;;  %v4884_v61 = vsel %vm4883_vm10, 1, %v13371_v32  ;;  %v5288_v33 = vld [vmem:[#allocation3 + $0x13b] sm:$0xff] }
 0x3a0   : > { %8298 = vrot.lane.b32.xlu2 %v8297_v52, %s8586_s4  ;;  %v8287_v4 = vpack.i.bf16 %v5896_v16, %v5755_v13  ;;  %vm13511_vm6 = vcmp.ne.s32.totalorder %v13500_v48, 0  ;;  %v4886_v0 = vadd.s32 %v4884_v61, %v4882_v44  ;;  %vm13276_vm15 = vcmp.ne.s32.totalorder %v13500_v48, 27  ;;  %v13513_v63 = vld [vmem:[#allocation23_spill] sm:$0xff]  ;;  %v5854_v52 = vld [vmem:[#allocation3 + $0xc9] sm:$0xff]  ;;  %v11600_v13 = vpop.permute.xlu0 %6177 }
 0x3a1   : > { %v5955_v47 = vsel %vm13511_vm6, %v8478_v18, 0.0  ;;  %vm4889_vm2 = vc.u32 %v4885_v8, 2454267026  ;;  %v11594_v2 = vsub.s32 %v13494_v62, %v4861_v7  ;;  %v6018_v31 = vsel %vm13276_vm15, %v5516_v51, 0.0  ;;  %v5711_v18 = vld [vmem:[#allocation3 + $0xe7] sm:$0xff] }
 0x3a2   : > { %v6830_v26 = vsel %vm3559_vm7, %v5955_v47, %v11002_v56  ;;  %8288 = vrot.lane.b32.xlu0 %v8287_v4, %s8586_s4  ;;  %v4900_v17 = vand.u32 65535, %v13513_v63  ;;  %v4887_v44 = vadd.s32 %v4886_v0, %v4876_v9  ;;  %v4890_v56 = vsel %vm4889_vm2, 1, %v13371_v32  ;;  %8132 = vmatmul.msk.f32.gmra.mxu2 %vm3559_vm7, %v6018_v31  ;;  %v5852_v47 = vld [vmem:[#allocation3 + $0xb9] sm:$0xff] }
 0x3a3   : > { %13512 = vst [vmem:[#allocation75_spill] sm:$0xff] %v11594_v2  ;;  %7640 = vmatmul.f32.gmra.mxu1 %v6830_v26  ;;  %v4901_v62 = vshrl.u32 %v13513_v63, 16  ;;  %vm13514_vm10 = vcmp.ne.s32.totalorder %v11092_v60, 0  ;;  %vm13292_vm6 = vcmp.ne.s32.totalorder %v11594_v2, 0  ;;  %vm13291_vm12 = vcmp.ne.s32.totalorder %v13496_v54, 27 }
 0x3a4   : > { %v5762_v8 = vsel %vm13514_vm10, %v5713_v58, 0.0  ;;  %v4903_v16 = vmul.u32 9362, %v4900_v17  ;;  %v4904_v7 = vmul.u32 37449, %v4900_v17  ;;  %v5433_v51 = vsel %vm13292_vm6, %v5288_v33, 0.0  ;;  %v5709_v17 = vld [vmem:[#allocation3 + $0xd7] sm:$0xff] }
 0x3a5   : > { %v4888_v61 = vadd.s32 %v4887_v44, %v4878_v34  ;;  %v11611_v9 = vmul.u32 9362, %v4901_v62  ;;  %v5903_v4 = vsel %vm13291_vm12, %v5854_v52, 0.0  ;;  %v6705_v58 = vsel %vm3559_vm7, %v5433_v51, %v11600_v13  ;;  %v5850_v34 = vld [vmem:[#allocation3 + $0xa9] sm:$0xff] }
 0x3a6   : > { %v4906_v0 = vmul.u32 37449, %v4901_v62  ;;  %v4907_v26 = vshll.u32 %v4904_v7, 16  ;;  %v8322_v31 = vpack.i.bf16 %v5903_v4, %v5762_v8  ;;  %7214 = vmatmul.f32.gmra.mxu3 %v6705_v58  ;;  %v4908_v40 = vshrl.u32 %v4904_v7, 16 }
 0x3a7   : > { %v4891_v24 = vadd.s32 %v4890_v56, %v4888_v61  ;;  %v4909_v33 = vshll.u32 %v11611_v9, 16  ;;  %vm13279_vm2 = vcmp.ne.s32.totalorder %v13498_v20, 27  ;;  %vm13515_vm0 = vcmp.ne.s32.totalorder %v11026_v50, 0  ;;  %v11625_v56 = vpop.f32.mrf.mxu3 }
 0x3a8   : > { %vm4911_vm10 = vc.u32 %v4903_v16, %v4907_v26  ;;  %v4913_v44 = vadd.s32 %v4907_v26, %v4903_v16  ;;  %8323 = vrot.lane.b32.xlu1 %v8322_v31, %s8586_s4  ;;  %v5760_v52 = vsel %vm13515_vm0, %v5711_v18, 0.0  ;;  %v5901_v62 = vsel %vm13279_vm2, %v5852_v47, 0.0  ;;  %13516 = vst [vmem:[#allocation23_spill] sm:$0xff] %v11625_v56  ;;  %v5517_v26 = vld [vmem:[#allocation3 + $0xcd] sm:$0xff] }
 0x3a9   : > { %v4892_v8 = vshrl.u32 %v4891_v24, 4  ;;  %v4912_v51 = vsel %vm4911_vm10, 1, %v13371_v32  ;;  %v8312_v7 = vpack.i.bf16 %v5901_v62, %v5760_v52  ;;  %vm13517_vm5 = vcmp.ne.s32.totalorder %v10954_v11, 0  ;;  %v6879_v18 = vld [vmem:[%s13143_s2 + $0x88] sm:$0xff] }
 0x3aa   : > { %v5758_v61 = vsel %vm13517_vm5, %v5709_v17, 0.0  ;;  %v4914_v4 = vadd.s32 %v4912_v51, %v4906_v0  ;;  %vm4915_vm13 = vc.u32 %v4913_v44, %v4909_v33  ;;  %v4917_v16 = vadd.s32 %v4913_v44, %v4909_v33  ;;  %v8479_v52 = vld [vmem:[#allocation3 + $0xcb] sm:$0xff]  ;;  %7259 = vmatpush.msrb.mxu3 %v6879_v18 }
 0x3ab   : > { %v5899_v58 = vsel %vm13276_vm15, %v5850_v34, 0.0  ;;  %v4893_v24 = vmul.u32 28, %v4892_v8  ;;  %v4916_v47 = vsel %vm4915_vm13, 1, %v13371_v32  ;;  %8313 = vrot.lane.b32.xlu2 %v8312_v7, %s8586_s4  ;;  %vm13518_vm0 = vcmp.ne.s32.totalorder %v13486_v53, 0  ;;  %v5716_v17 = vld [vmem:[#allocation3 + $0x10f] sm:$0xff]  ;;  %v5289_v8 = vld [vmem:[#allocation3 + $0x143] sm:$0xff] }
 0x3ac   : > { %v8302_v31 = vpack.i.bf16 %v5899_v58, %v5758_v61  ;;  %v5956_v0 = vsel %vm13518_vm0, %v8479_v52, 0.0  ;;  %v4910_v33 = vshrl.u32 %v11611_v9, 16  ;;  %v4918_v34 = vadd.s32 %v4916_v47, %v4914_v4  ;;  %v13520_v7 = vld [vmem:[#allocation25_spill] sm:$0xff]  ;;  %v11649_v9 = vpop.permute.xlu1 %6179  ;;  %v5714_v47 = vld [vmem:[#allocation3 + $0xff] sm:$0xff] }
 0x3ad   : > { %vm4921_vm5 = vc.u32 %v4917_v16, 2454267026  ;;  %v6831_v44 = vsel %vm3559_vm7, %v5956_v0, %v11023_v10  ;;  %v11642_v62 = vsub.s32 %v13505_v36, %v4893_v24  ;;  %v6019_v51 = vsel %vm13275_vm4, %v5517_v26, 0.0  ;;  %v5857_v36 = vld [vmem:[#allocation3 + $0xe1] sm:$0xff]  ;;  %v5855_v0 = vld [vmem:[#allocation3 + $0xd1] sm:$0xff] }
 0x3ae   : > { %8303 = vrot.lane.b32.xlu0 %v8302_v31, %s8586_s4  ;;  %7643 = vmatmul.f32.gmra.mxu1 %v6831_v44  ;;  %v4932_v61 = vand.u32 65535, %v13520_v7  ;;  %v4933_v58 = vshrl.u32 %v13520_v7, 16  ;;  %v4919_v4 = vadd.s32 %v4918_v34, %v4908_v40  ;;  %v4922_v16 = vsel %vm4921_vm5, 1, %v13371_v32 }
 0x3af   : > { %13519 = vst [vmem:[#allocation76_spill] sm:$0xff] %v11642_v62  ;;  %8133 = vmatmul.msk.f32.gmra.mxu2 %vm3559_vm7, %v6019_v51  ;;  %vm13278_vm13 = vcmp.ne.s32.totalorder %v11000_v29, 27  ;;  %vm13521_vm10 = vcmp.ne.s32.totalorder %v11219_v39, 0  ;;  %vm13301_vm0 = vcmp.ne.s32.totalorder %v11642_v62, 0  ;;  %vm13297_vm5 = vcmp.ne.s32.totalorder %v10894_v59, 27 }
 0x3b0   : > { %v5765_v10 = vsel %vm13521_vm10, %v5716_v17, 0.0  ;;  %v4935_v26 = vmul.u32 9362, %v4932_v61  ;;  %v4936_v18 = vmul.u32 37449, %v4932_v61  ;;  %v11657_v24 = vmul.u32 9362, %v4933_v58  ;;  %v5712_v61 = vld [vmem:[#allocation3 + $0xef] sm:$0xff] }
 0x3b1   : > { %v5434_v40 = vsel %vm13301_vm0, %v5289_v8, 0.0  ;;  %v4920_v31 = vadd.s32 %v4919_v4, %v4910_v33  ;;  %v4938_v52 = vmul.u32 37449, %v4933_v58  ;;  %v5906_v51 = vsel %vm13278_vm13, %v5857_v36, 0.0  ;;  %v5853_v8 = vld [vmem:[#allocation3 + $0xc1] sm:$0xff]  ;;  %v11669_v4 = vpop.f32.mrf.mxu3 }
 0x3b2   : > { %v6706_v34 = vsel %vm3559_vm7, %v5434_v40, %v11649_v9  ;;  %v4939_v17 = vshll.u32 %v4936_v18, 16  ;;  %v4941_v44 = vshll.u32 %v11657_v24, 16  ;;  %v4940_v53 = vshrl.u32 %v4936_v18, 16  ;;  %13523 = vst [vmem:[#allocation25_spill] sm:$0xff] %v11669_v4 }
 0x3b3   : > { %7217 = vmatmul.f32.gmra.mxu3 %v6706_v34  ;;  %v4923_v56 = vadd.s32 %v4922_v16, %v4920_v31  ;;  %v8337_v48 = vpack.i.bf16 %v5906_v51, %v5765_v10  ;;  %vm13522_vm10 = vcmp.ne.s32.totalorder %v11144_v55, 0  ;;  %v5904_v40 = vsel %vm13297_vm5, %v5855_v0, 0.0  ;;  %v5518_v31 = vld [vmem:[#allocation3 + $0xd5] sm:$0xff]  ;;  %v5719_v51 = vld [vmem:[#allocation3 + $0x127] sm:$0xff] }
 0x3b4   : > { %v5763_v33 = vsel %vm13522_vm10, %v5714_v47, 0.0  ;;  %vm4943_vm4 = vc.u32 %v4935_v26, %v4939_v17  ;;  %v4945_v58 = vadd.s32 %v4939_v17, %v4935_v26  ;;  %vm13285_vm15 = vcmp.ne.s32.totalorder %v13508_v42, 27  ;;  %v8480_v17 = vld [vmem:[#allocation3 + $0xd3] sm:$0xff] }
 0x3b5   : > { %v4924_v46 = vshrl.u32 %v4923_v56, 4  ;;  %v4944_v36 = vsel %vm4943_vm4, 1, %v13371_v32  ;;  %8338 = vrot.lane.b32.xlu1 %v8337_v48, %s8586_s4  ;;  %v8327_v16 = vpack.i.bf16 %v5904_v40, %v5763_v33  ;;  %vm13524_vm13 = vcmp.ne.s32.totalorder %v11063_v6, 0 }
 0x3b6   : > { %v5761_v10 = vsel %vm13524_vm13, %v5712_v61, 0.0  ;;  %v4946_v18 = vadd.s32 %v4944_v36, %v4938_v52  ;;  %vm4947_vm10 = vc.u32 %v4945_v58, %v4941_v44  ;;  %v4949_v47 = vadd.s32 %v4945_v58, %v4941_v44  ;;  %v13527_v58 = vld [vmem:[#allocation26_spill] sm:$0xff] }
 0x3b7   : > { %v5902_v26 = vsel %vm13285_vm15, %v5853_v8, 0.0  ;;  %v4925_v34 = vmul.u32 28, %v4924_v46  ;;  %v4948_v0 = vsel %vm4947_vm10, 1, %v13371_v32  ;;  %8328 = vrot.lane.b32.xlu2 %v8327_v16, %s8586_s4  ;;  %vm13525_vm4 = vcmp.ne.s32.totalorder %v13498_v20, 0  ;;  %v5290_v46 = vld [vmem:[#allocation3 + $0x14b] sm:$0xff] }
 0x3b8   : > { %v8317_v56 = vpack.i.bf16 %v5902_v26, %v5761_v10  ;;  %v5957_v48 = vsel %vm13525_vm4, %v8480_v17, 0.0  ;;  %v4942_v61 = vshrl.u32 %v11657_v24, 16  ;;  %v4950_v52 = vadd.s32 %v4948_v0, %v4946_v18  ;;  %v11695_v24 = vpop.permute.xlu2 %6181 }
 0x3b9   : > { %vm4953_vm13 = vc.u32 %v4949_v47, 2454267026  ;;  %v6832_v44 = vsel %vm3559_vm7, %v5957_v48, %v11070_v37  ;;  %v11688_v33 = vsub.s32 %v13513_v63, %v4925_v34  ;;  %v6020_v8 = vsel %vm13279_vm2, %v5518_v31, 0.0  ;;  %v5860_v63 = vld [vmem:[#allocation3 + $0xf9] sm:$0xff]  ;;  %v11713_v4 = vpop.f32.mrf.mxu3 }
 0x3ba   : > { %8318 = vrot.lane.b32.xlu0 %v8317_v56, %s8586_s4  ;;  %7646 = vmatmul.f32.gmra.mxu1 %v6832_v44  ;;  %v4964_v40 = vand.u32 65535, %v13527_v58  ;;  %v4965_v36 = vshrl.u32 %v13527_v58, 16  ;;  %v4951_v16 = vadd.s32 %v4950_v52, %v4940_v53  ;;  %v4954_v10 = vsel %vm4953_vm13, 1, %v13371_v32  ;;  %v5717_v31 = vld [vmem:[#allocation3 + $0x117] sm:$0xff]  ;;  %v5858_v56 = vld [vmem:[#allocation3 + $0xe9] sm:$0xff]  ;;  %13528 = vst [vmem:[#allocation26_spill] sm:$0xff] %v11713_v4 }
 0x3bb   : > { %13526 = vst [vmem:[#allocation77_spill] sm:$0xff] %v11688_v33  ;;  %8134 = vmatmul.msk.f32.gmra.mxu2 %vm3559_vm7, %v6020_v8  ;;  %vm13282_vm10 = vcmp.ne.s32.totalorder %v11092_v60, 27  ;;  %v5768_v37 = vsel %vm13280_vm9, %v5719_v51, 0.0  ;;  %vm13283_vm4 = vcmp.ne.s32.totalorder %v11688_v33, 0  ;;  %vm13323_vm13 = vcmp.ne.s32.totalorder %v11026_v50, 27  ;;  %v5715_v44 = vld [vmem:[#allocation3 + $0x107] sm:$0xff] }
 0x3bc   : > { %v4967_v18 = vmul.u32 9362, %v4964_v40  ;;  %v4968_v47 = vmul.u32 37449, %v4964_v40  ;;  %v11703_v26 = vmul.u32 9362, %v4965_v36  ;;  %v5435_v53 = vsel %vm13283_vm4, %v5290_v46, 0.0 }
 0x3bd   : > { %v4952_v34 = vadd.s32 %v4951_v16, %v4942_v61  ;;  %v4970_v0 = vmul.u32 37449, %v4965_v36  ;;  %v6707_v17 = vsel %vm3559_vm7, %v5435_v53, %v11695_v24  ;;  %v5909_v52 = vsel %vm13282_vm10, %v5860_v63, 0.0  ;;  %v5856_v36 = vld [vmem:[#allocation3 + $0xd9] sm:$0xff] }
 0x3be   : > { %v4971_v48 = vshll.u32 %v4968_v47, 16  ;;  %v4973_v51 = vshll.u32 %v11703_v26, 16  ;;  %7220 = vmatmul.f32.gmra.mxu3 %v6707_v17  ;;  %v4972_v40 = vshrl.u32 %v4968_v47, 16  ;;  %v8352_v61 = vpack.i.bf16 %v5909_v52, %v5768_v37 }
 0x3bf   : > { %v4955_v8 = vadd.s32 %v4954_v10, %v4952_v34  ;;  %v5766_v46 = vsel %vm13288_vm11, %v5717_v31, 0.0  ;;  %v5907_v53 = vsel %vm13323_vm13, %v5858_v56, 0.0  ;;  %vm13305_vm9 = vcmp.ne.s32.totalorder %v10954_v11, 27  ;;  %v5519_v34 = vld [vmem:[#allocation3 + $0xdd] sm:$0xff] }
 0x3c0   : > { %vm4975_vm2 = vc.u32 %v4967_v18, %v4971_v48  ;;  %v4977_v16 = vadd.s32 %v4971_v48, %v4967_v18  ;;  %8353 = vrot.lane.b32.xlu1 %v8352_v61, %s8586_s4  ;;  %v8342_v10 = vpack.i.bf16 %v5907_v53, %v5766_v46  ;;  %vm13529_vm10 = vcmp.ne.s32.totalorder %v11166_v43, 0  ;;  %v11729_v56 = vld [vmem:[%s13143_s2 + $0x110] sm:$0xff] }
 0x3c1   : > { %v4956_v20 = vshrl.u32 %v4955_v8, 4  ;;  %v4976_v63 = vsel %vm4975_vm2, 1, %v13371_v32  ;;  %v5764_v37 = vsel %vm13529_vm10, %v5715_v44, 0.0  ;;  %v5905_v18 = vsel %vm13305_vm9, %v5856_v36, 0.0  ;;  %v8481_v8 = vld [vmem:[#allocation3 + $0xdb] sm:$0xff]  ;;  %7422 = vmatpush.msrb.mxu0 %v11729_v56  ;;  %v11767_v4 = vpop.f32.mrf.mxu3 }
 0x3c2   : > { %v4978_v47 = vadd.s32 %v4976_v63, %v4970_v0  ;;  %vm4979_vm4 = vc.u32 %v4977_v16, %v4973_v51  ;;  %v4981_v31 = vadd.s32 %v4977_v16, %v4973_v51  ;;  %8343 = vrot.lane.b32.xlu2 %v8342_v10, %s8586_s4  ;;  %v8332_v52 = vpack.i.bf16 %v5905_v18, %v5764_v37  ;;  %v5722_v51 = vld [vmem:[#allocation3 + $0x13f] sm:$0xff]  ;;  %v5291_v16 = vld [vmem:[#allocation3 + $0x153] sm:$0xff]  ;;  %v11749_v37 = vpop.f32.mrf.mxu2 }
 0x3c3   : > { %v4957_v17 = vmul.u32 28, %v4956_v20  ;;  %v4980_v48 = vsel %vm4979_vm4, 1, %v13371_v32  ;;  %vm13530_vm2 = vcmp.ne.s32.totalorder %v13508_v42, 0  ;;  %v4974_v44 = vshrl.u32 %v11703_v26, 16  ;;  %v11739_v20 = vpop.f32.mrf.mxu1  ;;  %v13533_v63 = vld [vmem:[#allocation29_spill] sm:$0xff]  ;;  %13535 = vst [vmem:[#allocation80_spill] sm:$0xff] %v11767_v4 }
 0x3c4   : > { %v5958_v0 = vsel %vm13530_vm2, %v8481_v8, 0.0  ;;  %v4982_v61 = vadd.s32 %v4980_v48, %v4978_v47  ;;  %vm4985_vm10 = vc.u32 %v4981_v31, 2454267026  ;;  %13531 = vst [vmem:[#allocation78_spill] sm:$0xff] %v11739_v20  ;;  %8333 = vrot.lane.b32.xlu0 %v8332_v52, %s8586_s4  ;;  %v6021_v53 = vsel %vm13285_vm15, %v5519_v34, 0.0  ;;  %v11751_v47 = vpop.permute.xlu0 %6183  ;;  %v5863_v18 = vld [vmem:[#allocation3 + $0x111] sm:$0xff] }
 0x3c5   : > { %v6833_v46 = vsel %vm3559_vm7, %v5958_v0, %v11097_v30  ;;  %v11742_v36 = vsub.s32 %v13520_v7, %v4957_v17  ;;  %v4996_v10 = vand.u32 65535, %v13533_v63  ;;  %v4997_v26 = vshrl.u32 %v13533_v63, 16  ;;  %13534 = vst [vmem:[#allocation29_spill] sm:$0xff] %v11749_v37  ;;  %8135 = vmatmul.msk.f32.gmra.mxu2 %vm3559_vm7, %v6021_v53  ;;  %v5720_v52 = vld [vmem:[#allocation3 + $0x12f] sm:$0xff]  ;;  %v5718_v42 = vld [vmem:[#allocation3 + $0x11f] sm:$0xff] }
 0x3c6   : > { %7649 = vmatmul.f32.gmra.mxu1 %v6833_v46  ;;  %v4983_v30 = vadd.s32 %v4982_v61, %v4972_v40  ;;  %v4986_v31 = vsel %vm4985_vm10, 1, %v13371_v32  ;;  %vm5230_vm4 = vcmp.ne.s32.totalorder %v11219_v39, 27  ;;  %v5771_v7 = vsel %vm13286_vm14, %v5722_v51, 0.0  ;;  %v5861_v61 = vld [vmem:[#allocation3 + $0x101] sm:$0xff] }
 0x3c7   : > { %13532 = vst [vmem:[#allocation79_spill] sm:$0xff] %v11742_v36  ;;  %vm13299_vm2 = vcmp.ne.s32.totalorder %v11742_v36, 0  ;;  %v4999_v34 = vmul.u32 9362, %v4996_v10  ;;  %v5000_v17 = vmul.u32 37449, %v4996_v10  ;;  %v11759_v48 = vmul.u32 9362, %v4997_v26 }
 0x3c8   : > { %v5436_v40 = vsel %vm13299_vm2, %v5291_v16, 0.0  ;;  %v4984_v8 = vadd.s32 %v4983_v30, %v4974_v44  ;;  %v5002_v0 = vmul.u32 37449, %v4997_v26  ;;  %vm13334_vm10 = vcmp.ne.s32.totalorder %v11144_v55, 27  ;;  %v5859_v30 = vld [vmem:[#allocation3 + $0xf1] sm:$0xff] }
 0x3c9   : > { %v6708_v46 = vsel %vm3559_vm7, %v5436_v40, %v11751_v47  ;;  %v5003_v51 = vshll.u32 %v5000_v17, 16  ;;  %v5005_v53 = vshll.u32 %v11759_v48, 16  ;;  %v5912_v10 = vsel %vm5230_vm4, %v5863_v18, 0.0 }
 0x3ca   : > { %7223 = vmatmul.f32.gmra.mxu3 %v6708_v46  ;;  %v4987_v37 = vadd.s32 %v4986_v31, %v4984_v8  ;;  %v5004_v16 = vshrl.u32 %v5000_v17, 16  ;;  %v8367_v44 = vpack.i.bf16 %v5912_v10, %v5771_v7  ;;  %v5769_v26 = vsel %vm13289_vm3, %v5720_v52, 0.0  ;;  %v5520_v52 = vld [vmem:[#allocation3 + $0xe5] sm:$0xff]  ;;  %v5725_v10 = vld [vmem:[#allocation3 + $0x157] sm:$0xff] }
 0x3cb   : > { %vm5007_vm15 = vc.u32 %v4999_v34, %v5003_v51  ;;  %v5009_v20 = vadd.s32 %v5003_v51, %v4999_v34  ;;  %v5910_v40 = vsel %vm13334_vm10, %v5861_v61, 0.0  ;;  %vm13325_vm14 = vcmp.ne.s32.totalorder %v11063_v6, 27  ;;  %v8482_v46 = vld [vmem:[#allocation3 + $0xe3] sm:$0xff] }
 0x3cc   : > { %v4988_v4 = vshrl.u32 %v4987_v37, 4  ;;  %v5008_v27 = vsel %vm5007_vm15, 1, %v13371_v32  ;;  %8368 = vrot.lane.b32.xlu1 %v8367_v44, %s8586_s4  ;;  %v8357_v18 = vpack.i.bf16 %v5910_v40, %v5769_v26  ;;  %v5767_v31 = vsel %vm5184_vm1, %v5718_v42, 0.0  ;;  %v11786_v44 = vpop.permute.xlu1 %6185  ;;  %v5292_v26 = vld [vmem:[#allocation3 + $0x15b] sm:$0xff] }
 0x3cd   : > { %v5010_v7 = vadd.s32 %v5008_v27, %v5002_v0  ;;  %vm5011_vm11 = vc.u32 %v5009_v20, %v5005_v53  ;;  %v5013_v17 = vadd.s32 %v5009_v20, %v5005_v53  ;;  %v5908_v34 = vsel %vm13325_vm14, %v5859_v30, 0.0  ;;  %13537 = vst [vmem:[#allocation81_spill] sm:$0xff] %v11786_v44  ;;  %v11793_v0 = vpop.f32.mrf.mxu2 }
 0x3ce   : > { %v4989_v8 = vmul.u32 28, %v4988_v4  ;;  %v5012_v61 = vsel %vm5011_vm11, 1, %v13371_v32  ;;  %8358 = vrot.lane.b32.xlu2 %v8357_v18, %s8586_s4  ;;  %v8347_v37 = vpack.i.bf16 %v5908_v34, %v5767_v31  ;;  %vm13536_vm15 = vcmp.ne.s32.totalorder %v13496_v54, 0  ;;  %v11791_v4 = vpop.f32.mrf.mxu1  ;;  %13539 = vst [vmem:[#allocation83_spill] sm:$0xff] %v11793_v0  ;;  %v5721_v54 = vld [vmem:[#allocation3 + $0x137] sm:$0xff] }
 0x3cf   : > { %v5959_v51 = vsel %vm13536_vm15, %v8482_v46, 0.0  ;;  %v5006_v27 = vshrl.u32 %v11759_v48, 16  ;;  %v5014_v42 = vadd.s32 %v5012_v61, %v5010_v7  ;;  %vm5017_vm3 = vc.u32 %v5013_v17, 2454267026  ;;  %13538 = vst [vmem:[#allocation82_spill] sm:$0xff] %v11791_v4  ;;  %v13541_v48 = vld [vmem:[#allocation31_spill] sm:$0xff]  ;;  %v11813_v61 = vpop.permute.xlu2 %6187 }
 0x3d0   : > { %v6834_v20 = vsel %vm3559_vm7, %v5959_v51, %v11149_v45  ;;  %v11796_v53 = vsub.s32 %v13527_v58, %v4989_v8  ;;  %8348 = vrot.lane.b32.xlu0 %v8347_v37, %s8586_s4  ;;  %v6022_v30 = vsel %vm13291_vm12, %v5520_v52, 0.0  ;;  %v5028_v40 = vand.u32 65535, %v13541_v48  ;;  %v5866_v7 = vld [vmem:[#allocation3 + $0x129] sm:$0xff]  ;;  %13542 = vst [vmem:[#allocation31_spill] sm:$0xff] %v11813_v61  ;;  %v11817_v51 = vpop.f32.mrf.mxu3 }
 0x3d1   : > { %7652 = vmatmul.f32.gmra.mxu1 %v6834_v20  ;;  %v5029_v18 = vshrl.u32 %v13541_v48, 16  ;;  %v5015_v31 = vadd.s32 %v5014_v42, %v5004_v16  ;;  %v5018_v45 = vsel %vm5017_vm3, 1, %v13371_v32  ;;  %8136 = vmatmul.msk.f32.gmra.mxu2 %vm3559_vm7, %v6022_v30  ;;  %vm13294_vm11 = vcmp.ne.s32.totalorder %v11324_v21, 27  ;;  %v5723_v8 = vld [vmem:[#allocation3 + $0x147] sm:$0xff]  ;;  %13543 = vst [vmem:[#allocation85_spill] sm:$0xff] %v11817_v51 }
 0x3d2   : > { %13540 = vst [vmem:[#allocation84_spill] sm:$0xff] %v11796_v53  ;;  %v5774_v58 = vsel %vm13292_vm6, %v5725_v10, 0.0  ;;  %vm13308_vm15 = vcmp.ne.s32.totalorder %v11796_v53, 0  ;;  %v5031_v17 = vmul.u32 9362, %v5028_v40  ;;  %v11809_v34 = vmul.u32 37449, %v5028_v40  ;;  %v5864_v10 = vld [vmem:[#allocation3 + $0x119] sm:$0xff] }
 0x3d3   : > { %v11811_v52 = vmul.u32 9362, %v5029_v18  ;;  %v5437_v16 = vsel %vm13308_vm15, %v5292_v26, 0.0  ;;  %v5016_v37 = vadd.s32 %v5015_v31, %v5006_v27  ;;  %v5034_v46 = vmul.u32 37449, %v5029_v18  ;;  %v5862_v51 = vld [vmem:[#allocation3 + $0x109] sm:$0xff] }
 0x3d4   : > { %vm5231_vm3 = vcmp.ne.s32.totalorder %v11248_v25, 27  ;;  %v6709_v42 = vsel %vm3559_vm7, %v5437_v16, %v11786_v44  ;;  %v5035_v20 = vshll.u32 %v11809_v34, 16  ;;  %v5915_v40 = vsel %vm13294_vm11, %v5866_v7, 0.0  ;;  %v6878_v7 = vld [vmem:[%s13143_s2 + $0x80] sm:$0xff] }
 0x3d5   : > { %v5037_v30 = vshll.u32 %v11811_v52, 16  ;;  %7226 = vmatmul.f32.gmra.mxu3 %v6709_v42  ;;  %v5019_v26 = vadd.s32 %v5018_v45, %v5016_v37  ;;  %v5036_v27 = vshrl.u32 %v11809_v34, 16  ;;  %v8382_v18 = vpack.i.bf16 %v5915_v40, %v5774_v58  ;;  %v8483_v40 = vld [vmem:[%s13143_s2 + $0x178] sm:$0xff] }
 0x3d6   : > { %v5772_v31 = vsel %vm13293_vm8, %v5723_v8, 0.0  ;;  %vm5039_vm12 = vc.u32 %v5031_v17, %v5035_v20  ;;  %v5041_v0 = vadd.s32 %v5035_v20, %v5031_v17  ;;  %v5913_v16 = vsel %vm5231_vm3, %v5864_v10, 0.0  ;;  %v11839_v8 = vpop.permute.xlu1 %6191  ;;  %7260 = vmatpush.msrb.mxu3 %v6878_v7  ;;  %v5521_v20 = vld [vmem:[#allocation3 + $0xed] sm:$0xff] }
 0x3d7   : > { %vm5229_vm6 = vcmp.ne.s32.totalorder %v11166_v43, 27  ;;  %v5020_v42 = vshrl.u32 %v5019_v26, 4  ;;  %v5040_v45 = vsel %vm5039_vm12, 1, %v13371_v32  ;;  %8383 = vrot.lane.b32.xlu1 %v8382_v18, %s8586_s4  ;;  %v8372_v58 = vpack.i.bf16 %v5913_v16, %v5772_v31  ;;  %13545 = vst [vmem:[#allocation86_spill] sm:$0xff] %v11839_v8  ;;  %v8484_v31 = vld [vmem:[#allocation3 + $0xeb] sm:$0xff] }
 0x3d8   : > { %vm13544_vm8 = vcmp.ne.s32.totalorder %v11415_v5, 0  ;;  %v5042_v17 = vadd.s32 %v5040_v45, %v5034_v46  ;;  %vm5043_vm11 = vc.u32 %v5041_v0, %v5037_v30  ;;  %v5045_v37 = vadd.s32 %v5041_v0, %v5037_v30  ;;  %8166 = vmatpush.msra.mxu3 %v8483_v40  ;;  %v5728_v0 = vld [vmem:[#allocation3 + $0x16f] sm:$0xff]  ;;  %v11850_v30 = vpop.f32.mrf.mxu1  ;;  %v8485_v45 = vld [vmem:[%s13143_s2 + $0x170] sm:$0xff] }
 0x3d9   : > { %v5770_v34 = vsel %vm13544_vm8, %v5721_v54, 0.0  ;;  %v5911_v10 = vsel %vm5229_vm6, %v5862_v51, 0.0  ;;  %v5021_v26 = vmul.u32 28, %v5020_v42  ;;  %v5044_v18 = vsel %vm5043_vm11, 1, %v13371_v32  ;;  %8373 = vrot.lane.b32.xlu2 %v8372_v58, %s8586_s4  ;;  %13547 = vst [vmem:[#allocation87_spill] sm:$0xff] %v11850_v30  ;;  %v11852_v51 = vpop.f32.mrf.mxu2  ;;  %v11860_v58 = vpop.permute.xlu2 %6193 }
 0x3da   : > { %v8362_v54 = vpack.i.bf16 %v5911_v10, %v5770_v34  ;;  %vm13546_vm12 = vcmp.ne.s32.totalorder %v10894_v59, 0  ;;  %13548 = vst [vmem:[#allocation88_spill] sm:$0xff] %v11852_v51  ;;  %v5038_v16 = vshrl.u32 %v11811_v52, 16  ;;  %v5046_v7 = vadd.s32 %v5044_v18, %v5042_v17  ;;  %8167 = vmatpush.msra.mxu3 %v8485_v45  ;;  %v11865_v10 = vld [vmem:[#allocation3 + $0x163] sm:$0xff]  ;;  %v13551_v17 = vld [vmem:[#allocation33_spill] sm:$0xff]  ;;  %v11896_v59 = vpop.permute.xlu0 %6189 }
 0x3db   : > { %v5960_v46 = vsel %vm13546_vm12, %v8484_v31, 0.0  ;;  %vm5049_vm8 = vc.u32 %v5045_v37, 2454267026  ;;  %v11863_v34 = vsub.s32 %v13533_v63, %v5021_v26  ;;  %13550 = vst [vmem:[#allocation90_spill] sm:$0xff] %v11865_v10  ;;  %v6023_v52 = vsel %vm13297_vm5, %v5521_v20, 0.0  ;;  %v5869_v26 = vld [vmem:[#allocation3 + $0x141] sm:$0xff] }
 0x3dc   : > { %v6835_v42 = vsel %vm3559_vm7, %v5960_v46, %v11169_v41  ;;  %8363 = vrot.lane.b32.xlu0 %v8362_v54, %s8586_s4  ;;  %v5060_v41 = vand.u32 65535, %v13551_v17  ;;  %v5061_v37 = vshrl.u32 %v13551_v17, 16  ;;  %v5047_v40 = vadd.s32 %v5046_v7, %v5036_v27  ;;  %8137 = vmatmul.msk.f32.gmra.mxu2 %vm3559_vm7, %v6023_v52  ;;  %v8486_v54 = vld [vmem:[%s13143_s2 + $0x168] sm:$0xff]  ;;  %v11885_v46 = vpop.f32.mrf.mxu3  ;;  %v5726_v7 = vld [vmem:[#allocation3 + $0x15f] sm:$0xff]  ;;  %13553 = vst [vmem:[#allocation91_spill] sm:$0xff] %v11896_v59 }
 0x3dd   : > { %13549 = vst [vmem:[#allocation89_spill] sm:$0xff] %v11863_v34  ;;  %7655 = vmatmul.f32.gmra.mxu1 %v6835_v42  ;;  %v5050_v18 = vsel %vm5049_vm8, 1, %v13371_v32  ;;  %vm13302_vm11 = vcmp.ne.s32.totalorder %v11462_v23, 27  ;;  %v5777_v63 = vsel %vm13299_vm2, %v5728_v0, 0.0  ;;  %8168 = vmatpush.msra.mxu3 %v8486_v54  ;;  %vm13318_vm12 = vcmp.ne.s32.totalorder %v11863_v34, 0  ;;  %v5867_v52 = vld [vmem:[#allocation3 + $0x131] sm:$0xff] }
 0x3de   : > { %v5063_v20 = vmul.u32 9362, %v5060_v41  ;;  %v11881_v31 = vmul.u32 37449, %v5060_v41  ;;  %v11883_v27 = vmul.u32 9362, %v5061_v37  ;;  %13552 = vst [vmem:[#allocation33_spill] sm:$0xff] %v11885_v46  ;;  %v5438_v0 = vsel %vm13318_vm12, %v11865_v10, 0.0  ;;  %v8487_v54 = vld [vmem:[%s13143_s2 + $0x160] sm:$0xff]  ;;  %v11908_v44 = vpop.permute.xlu1 %6295 }
 0x3df   : > { %v5048_v42 = vadd.s32 %v5047_v40, %v5038_v16  ;;  %v5066_v45 = vmul.u32 37449, %v5061_v37  ;;  %vm5234_vm8 = vcmp.ne.s32.totalorder %v11371_v28, 27  ;;  %8169 = vmatpush.msra.mxu3 %v8487_v54  ;;  %v6710_v41 = vsel %vm3559_vm7, %v5438_v0, %v11813_v61  ;;  %v5724_v37 = vld [vmem:[#allocation3 + $0x14f] sm:$0xff]  ;;  %v5865_v10 = vld [vmem:[#allocation3 + $0x121] sm:$0xff] }
 0x3e0   : > { %v5067_v46 = vshll.u32 %v11881_v31, 16  ;;  %v5069_v51 = vshll.u32 %v11883_v27, 16  ;;  %v5918_v16 = vsel %vm13302_vm11, %v5869_v26, 0.0  ;;  %7229 = vmatmul.f32.gmra.mxu3 %v6710_v41  ;;  %v5068_v30 = vshrl.u32 %v11881_v31, 16  ;;  %v8489_v41 = vld [vmem:[%s13143_s2 + $0x150] sm:$0xff] }
 0x3e1   : > { %v5051_v40 = vadd.s32 %v5050_v18, %v5048_v42  ;;  %v8397_v4 = vpack.i.bf16 %v5918_v16, %v5777_v63  ;;  %v5775_v54 = vsel %vm13301_vm0, %v5726_v7, 0.0  ;;  %v5916_v61 = vsel %vm5234_vm8, %v5867_v52, 0.0  ;;  %v8488_v18 = vld [vmem:[%s13143_s2 + $0x158] sm:$0xff]  ;;  %v5522_v52 = vld [vmem:[#allocation3 + $0xf5] sm:$0xff]  ;;  %v11922_v16 = vpop.f32.mrf.mxu1 }
 0x3e2   : > { %vm5071_vm5 = vc.u32 %v5063_v20, %v5067_v46  ;;  %v5073_v0 = vadd.s32 %v5067_v46, %v5063_v20  ;;  %vm5232_vm2 = vcmp.ne.s32.totalorder %v11290_v12, 27  ;;  %8170 = vmatpush.msra.mxu3 %v8488_v18  ;;  %v8387_v31 = vpack.i.bf16 %v5916_v61, %v5775_v54  ;;  %13555 = vst [vmem:[#allocation92_spill] sm:$0xff] %v11922_v16  ;;  %v5727_v16 = vld [vmem:[#allocation3 + $0x167] sm:$0xff] }
 0x3e3   : > { %v5052_v26 = vshrl.u32 %v5051_v40, 4  ;;  %v5072_v63 = vsel %vm5071_vm5, 1, %v13371_v32  ;;  %8398 = vrot.lane.b32.xlu1 %v8397_v4, %s8586_s4  ;;  %vm13554_vm0 = vcmp.ne.s32.totalorder %v11546_v1, 0  ;;  %v5914_v42 = vsel %vm5232_vm2, %v5865_v10, 0.0  ;;  %v11924_v40 = vpop.f32.mrf.mxu2  ;;  %v8522_v12 = vld [vmem:[#allocation3 + $0x143] sm:$0xff] }
 0x3e4   : > { %v5773_v20 = vsel %vm13554_vm0, %v5724_v37, 0.0  ;;  %v5074_v46 = vadd.s32 %v5072_v63, %v5066_v45  ;;  %vm5075_vm11 = vc.u32 %v5073_v0, %v5069_v51  ;;  %v5077_v7 = vadd.s32 %v5073_v0, %v5069_v51  ;;  %8171 = vmatpush.msra.mxu3 %v8489_v41  ;;  %13556 = vst [vmem:[#allocation93_spill] sm:$0xff] %v11924_v40  ;;  %v8490_v51 = vld [vmem:[#allocation3 + $0xf3] sm:$0xff]  ;;  %v11930_v37 = vpop.permute.xlu2 %6297  ;;  %v11949_v41 = vpop.f32.mrf.mxu3 }
 0x3e5   : > { %v5053_v4 = vmul.u32 28, %v5052_v26  ;;  %v5076_v61 = vsel %vm5075_vm11, 1, %v13371_v32  ;;  %8388 = vrot.lane.b32.xlu2 %v8387_v31, %s8586_s4  ;;  %v8377_v45 = vpack.i.bf16 %v5914_v42, %v5773_v20  ;;  %vm13557_vm0 = vcmp.ne.s32.totalorder %v10954_v11, 0  ;;  %v5729_v63 = vld [vmem:[#allocation3 + $0x177] sm:$0xff]  ;;  %v11941_v20 = vld [vmem:[#allocation3 + $0x16b] sm:$0xff] }
 0x3e6   : > { %v5961_v10 = vsel %vm13557_vm0, %v8490_v51, 0.0  ;;  %v5070_v54 = vshrl.u32 %v11883_v27, 16  ;;  %v5078_v0 = vadd.s32 %v5076_v61, %v5074_v46  ;;  %vm5081_vm5 = vc.u32 %v5077_v7, 2454267026  ;;  %v8491_v26 = vld [vmem:[%s13143_s2 + $0x148] sm:$0xff]  ;;  %13559 = vst [vmem:[#allocation95_spill] sm:$0xff] %v11941_v20 }
 0x3e7   : > { %v6836_v18 = vsel %vm3559_vm7, %v5961_v10, %v11229_v35  ;;  %8172 = vmatpush.msra.mxu3 %v8491_v26  ;;  %v11939_v31 = vsub.s32 %v13541_v48, %v5053_v4  ;;  %8378 = vrot.lane.b32.xlu0 %v8377_v45, %s8586_s4  ;;  %v6024_v27 = vsel %vm13305_vm9, %v5522_v52, 0.0  ;;  %v5082_v35 = vsel %vm5081_vm5, 1, %v13371_v32  ;;  %v13560_v7 = vld [vmem:[#allocation34_spill] sm:$0xff]  ;;  %v5870_v61 = vld [vmem:[#allocation3 + $0x149] sm:$0xff]  ;;  %v11951_v48 = vpop.permute.xlu0 %6195  ;;  %v8493_v26 = vld [vmem:[%s13143_s2 + $0x138] sm:$0xff] }
 0x3e8   : > { %7658 = vmatmul.f32.gmra.mxu1 %v6836_v18  ;;  %v5079_v46 = vadd.s32 %v5078_v0, %v5068_v30  ;;  %8138 = vmatmul.msk.f32.gmra.mxu2 %vm3559_vm7, %v6024_v27  ;;  %v5092_v42 = vand.u32 65535, %v13560_v7  ;;  %13561 = vst [vmem:[#allocation34_spill] sm:$0xff] %v11949_v41  ;;  %v8492_v4 = vld [vmem:[%s13143_s2 + $0x140] sm:$0xff]  ;;  %v5093_v30 = vshrl.u32 %v13560_v7, 16  ;;  %vm5237_vm0 = vcmp.ne.s32.totalorder %v11509_v49, 27  ;;  %v5872_v11 = vld [vmem:[#allocation3 + $0x159] sm:$0xff] }
 0x3e9   : > { %13558 = vst [vmem:[#allocation94_spill] sm:$0xff] %v11939_v31  ;;  %8173 = vmatpush.msra.mxu3 %v8492_v4  ;;  %vm13307_vm11 = vcmp.ne.s32.totalorder %v11939_v31, 0  ;;  %v5778_v52 = vsel %vm13308_vm15, %v5729_v63, 0.0  ;;  %v5731_v18 = vld [vmem:[#allocation3 + $0x187] sm:$0xff]  ;;  %v5919_v41 = vsel %vm5237_vm0, %v5870_v61, 0.0  ;;  %vm13309_vm5 = vcmp.ne.s32.totalorder %v11594_v2, 27 }
 0x3ea   : > { %v5439_v45 = vsel %vm13307_vm11, %v11941_v20, 0.0  ;;  %v5080_v51 = vadd.s32 %v5079_v46, %v5070_v54  ;;  %v5095_v10 = vmul.u32 9362, %v5092_v42  ;;  %v11964_v0 = vmul.u32 37449, %v5092_v42  ;;  %v11977_v20 = vpop.permute.xlu1 %6301  ;;  %v8498_v49 = vld [vmem:[#allocation3 + $0x103] sm:$0xff] }
 0x3eb   : > { %8174 = vmatpush.msra.mxu3 %v8493_v26  ;;  %v6711_v27 = vsel %vm3559_vm7, %v5439_v45, %v11896_v59  ;;  %v11971_v4 = vmul.u32 9362, %v5093_v30  ;;  %v5098_v63 = vmul.u32 37449, %v5093_v30  ;;  %v8402_v40 = vpack.i.bf16 %v5919_v41, %v5778_v52 }
 0x3ec   : > { %7232 = vmatmul.f32.gmra.mxu3 %v6711_v27  ;;  %v5083_v54 = vadd.s32 %v5082_v35, %v5080_v51  ;;  %v5099_v46 = vshll.u32 %v11964_v0, 16  ;;  %v5100_v42 = vshrl.u32 %v11964_v0, 16  ;;  %v5780_v61 = vsel %vm13307_vm11, %v5731_v18, 0.0  ;;  %v8494_v35 = vld [vmem:[%s13143_s2 + $0x130] sm:$0xff]  ;;  %v11990_v27 = vpop.f32.mrf.mxu1 }
 0x3ed   : > { %v5101_v26 = vshll.u32 %v11971_v4, 16  ;;  %v5102_v45 = vshrl.u32 %v11971_v4, 16  ;;  %8175 = vmatpush.msra.mxu3 %v8494_v35  ;;  %8403 = vrot.lane.b32.xlu2 %v8402_v40, %s8586_s4  ;;  %v5921_v52 = vsel %vm13309_vm5, %v5872_v11, 0.0  ;;  %v5868_v51 = vld [vmem:[#allocation3 + $0x139] sm:$0xff]  ;;  %13562 = vst [vmem:[#allocation96_spill] sm:$0xff] %v11990_v27  ;;  %v11992_v4 = vpop.f32.mrf.mxu2  ;;  %vm5235_vm11 = vcmp.ne.s32.totalorder %v11415_v5, 27 }
 0x3ee   : > { %v5084_v30 = vshrl.u32 %v5083_v54, 4  ;;  %vm5103_vm9 = vc.u32 %v5095_v10, %v5099_v46  ;;  %v5105_v41 = vadd.s32 %v5099_v46, %v5095_v10  ;;  %v5523_v0 = vld [vmem:[#allocation3 + $0xfd] sm:$0xff]  ;;  %13563 = vst [vmem:[#allocation97_spill] sm:$0xff] %v11992_v4  ;;  %v8412_v59 = vpack.i.bf16 %v5921_v52, %v5780_v61  ;;  %v6895_v40 = vld [vmem:[%s13143_s2 + $0x108] sm:$0xff]  ;;  %v12004_v10 = vpop.permute.xlu2 %6303 }
 0x3ef   : > { %v5104_v18 = vsel %vm5103_vm9, 1, %v13371_v32  ;;  %vm13564_vm15 = vcmp.ne.s32.totalorder %v11688_v33, 0  ;;  %v8495_v11 = vld [vmem:[%s13143_s2 + $0x128] sm:$0xff]  ;;  %7423 = vmatpush.msrb.mxu0 %v6895_v40  ;;  %v8496_v4 = vld [vmem:[#allocation3 + $0xfb] sm:$0xff]  ;;  %vm13566_vm5 = vcmp.ne.s32.totalorder %v11000_v29, 27 }
 0x3f0   : > { %v5776_v54 = vsel %vm13564_vm15, %v5727_v16, 0.0  ;;  %8176 = vmatpush.msra.mxu3 %v8495_v11  ;;  %v5085_v46 = vmul.u32 28, %v5084_v30  ;;  %v5106_v35 = vadd.s32 %v5104_v18, %v5098_v63  ;;  %vm5107_vm9 = vc.u32 %v5105_v41, %v5101_v26  ;;  %8413 = vrot.lane.b32.xlu1 %v8412_v59, %s8586_s4  ;;  %v8497_v63 = vld [vmem:[%s13143_s2 + $0x120] sm:$0xff]  ;;  %v12020_v30 = vld [vmem:[#allocation3 + $0x173] sm:$0xff]  ;;  %v12025_v18 = vpop.permute.xlu0 %6299 }
 0x3f1   : > { %v5109_v61 = vadd.s32 %v5105_v41, %v5101_v26  ;;  %v5108_v52 = vsel %vm5107_vm9, 1, %v13371_v32  ;;  %v5917_v16 = vsel %vm5235_vm11, %v5868_v51, 0.0  ;;  %vm13565_vm15 = vcmp.ne.s32.totalorder %v11000_v29, 0  ;;  %13568 = vst [vmem:[#allocation99_spill] sm:$0xff] %v12020_v30  ;;  %v12023_v51 = vpop.f32.mrf.mxu3 }
 0x3f2   : > { %v5962_v27 = vsel %vm13565_vm15, %v8496_v4, 0.0  ;;  %v6025_v11 = vsel %vm13566_vm5, %v5523_v0, 0.0  ;;  %8177 = vmatpush.msra.mxu3 %v8497_v63  ;;  %v12018_v26 = vsub.s32 %v13551_v17, %v5085_v46  ;;  %v5110_v59 = vadd.s32 %v5108_v52, %v5106_v35  ;;  %13569 = vst [vmem:[#allocation100_spill] sm:$0xff] %v12023_v51  ;;  %v5730_v4 = vld [vmem:[#allocation3 + $0x17f] sm:$0xff]  ;;  %v13570_v0 = vld [vmem:[#allocation65_spill] sm:$0xff] }
 0x3f3   : > { %vm5113_vm9 = vc.u32 %v5109_v61, 2454267026  ;;  %v8392_v41 = vpack.i.bf16 %v5917_v16, %v5776_v54  ;;  %8139 = vmatmul.msk.f32.gmra.mxu2 %vm3559_vm7, %v6025_v11  ;;  %v6837_v29 = vsel %vm3559_vm7, %v5962_v27, %v13570_v0  ;;  %v13571_v46 = vld [vmem:[#allocation37_spill] sm:$0xff]  ;;  %vm5238_vm15 = vcmp.ne.s32.totalorder %v11546_v1, 27  ;;  %v12045_v0 = vpop.permute.xlu1 %8218 }
 0x3f4   : > { %13567 = vst [vmem:[#allocation98_spill] sm:$0xff] %v12018_v26  ;;  %8178 = vmatpush.msra.mxu3 %v11575_v14  ;;  %vm13317_vm5 = vcmp.ne.s32.totalorder %v12018_v26, 0  ;;  %v5111_v17 = vadd.s32 %v5110_v59, %v5100_v42  ;;  %7661 = vmatmul.f32.gmra.mxu1 %v6837_v29  ;;  %v5124_v54 = vand.u32 65535, %v13571_v46  ;;  %v5125_v35 = vshrl.u32 %v13571_v46, 16  ;;  %v5732_v52 = vld [vmem:[#allocation3 + $0x18f] sm:$0xff] }
 0x3f5   : > { %8393 = vrot.lane.b32.xlu0 %v8392_v41, %s8586_s4  ;;  %v5440_v16 = vsel %vm13317_vm5, %v12020_v30, 0.0  ;;  %v5114_v27 = vsel %vm5113_vm9, 1, %v13371_v32  ;;  %v5779_v14 = vsel %vm13318_vm12, %v5730_v4, 0.0  ;;  %v5871_v42 = vld [vmem:[#allocation3 + $0x151] sm:$0xff]  ;;  %v5873_v41 = vld [vmem:[#allocation3 + $0x161] sm:$0xff]  ;;  %vm13324_vm9 = vcmp.ne.s32.totalorder %v11642_v62, 27 }
 0x3f6   : > { %8179 = vmatpush.msra.mxu3 %v11729_v56  ;;  %v6712_v29 = vsel %vm3559_vm7, %v5440_v16, %v11839_v8  ;;  %v5112_v11 = vadd.s32 %v5111_v17, %v5102_v45  ;;  %v5127_v63 = vmul.u32 9362, %v5124_v54  ;;  %v5128_v59 = vmul.u32 37449, %v5124_v54  ;;  %v6894_v56 = vld [vmem:[%s13143_s2 + $0x100] sm:$0xff] }
 0x3f7   : > { %7235 = vmatmul.f32.gmra.mxu3 %v6712_v29  ;;  %v12047_v61 = vmul.u32 9362, %v5125_v35  ;;  %v5130_v51 = vmul.u32 37449, %v5125_v35  ;;  %v5781_v4 = vsel %vm13317_vm5, %v5732_v52, 0.0  ;;  %v5920_v54 = vsel %vm5238_vm15, %v5871_v42, 0.0  ;;  %v5524_v8 = vld [vmem:[#allocation3 + $0x105] sm:$0xff]  ;;  %7424 = vmatpush.msrb.mxu0 %v6894_v56  ;;  %v12057_v29 = vpop.f32.mrf.mxu1  ;;  %v12059_v35 = vpop.f32.mrf.mxu2 }
 0x3f8   : > { %v5115_v16 = vadd.s32 %v5114_v27, %v5112_v11  ;;  %v5131_v45 = vshll.u32 %v5128_v59, 16  ;;  %v5132_v17 = vshrl.u32 %v5128_v59, 16  ;;  %8180 = vmatpush.msra.mxu3 %v6895_v40  ;;  %13572 = vst [vmem:[#allocation65_spill] sm:$0xff] %v12057_v29  ;;  %v8407_v52 = vpack.i.bf16 %v5920_v54, %v5779_v14  ;;  %v12066_v11 = vpop.permute.xlu2 %8223 }
 0x3f9   : > { %13573 = vst [vmem:[#allocation37_spill] sm:$0xff] %v12059_v35  ;;  %v5133_v2 = vshll.u32 %v12047_v61, 16  ;;  %v5922_v30 = vsel %vm13324_vm9, %v5873_v41, 0.0  ;;  %vm13574_vm5 = vcmp.ne.s32.totalorder %v11026_v50, 0  ;;  %v13575_v35 = vld [vmem:[#allocation67_spill] sm:$0xff]  ;;  %v6026_v14 = vsel %vm13323_vm13, %v5524_v8, 0.0 }
 0x3fa   : > { %v5963_v27 = vsel %vm13574_vm5, %v8498_v49, 0.0  ;;  %v5116_v42 = vshrl.u32 %v5115_v16, 4  ;;  %vm5135_vm12 = vc.u32 %v5127_v63, %v5131_v45  ;;  %v5137_v59 = vadd.s32 %v5131_v45, %v5127_v63  ;;  %8181 = vmatpush.msra.mxu3 %v6894_v56  ;;  %v12078_v63 = vpop.permute.xlu0 %6305 }
 0x3fb   : > { %v8417_v40 = vpack.i.bf16 %v5922_v30, %v5781_v4  ;;  %v5136_v29 = vsel %vm5135_vm12, 1, %v13371_v32  ;;  %v6838_v1 = vsel %vm3559_vm7, %v5963_v27, %v13575_v35  ;;  %v8221_v41 = vunpack.i.h.bf16 %v12045_v0  ;;  %v12076_v30 = vpop.f32.mrf.mxu3  ;;  %v12080_v4 = vld [vmem:[#allocation3 + $0x17b] sm:$0xff]  ;;  %8140 = vmatmul.msk.f32.gmra.mxu2 %vm3559_vm7, %v6026_v14 }
 0x3fc   : > { %v5117_v54 = vmul.u32 28, %v5116_v42  ;;  %v5138_v62 = vadd.s32 %v5136_v29, %v5130_v51  ;;  %vm5139_vm5 = vc.u32 %v5137_v59, %v5133_v2  ;;  %v5141_v49 = vadd.s32 %v5137_v59, %v5133_v2  ;;  %13576 = vst [vmem:[#allocation67_spill] sm:$0xff] %v12076_v30  ;;  %7664 = vmatmul.f32.gmra.mxu1 %v6838_v1  ;;  %v5784_v51 = vld [vmem:[#allocation3 + $0x20] sm:$0xff]  ;;  %v5875_v29 = vld [vmem:[#allocation3 + $0x171] sm:$0xff] }
 0x3fd   : > { %8408 = vrot.lane.b32.xlu0 %v8407_v52, %s8586_s4  ;;  %8418 = vrot.lane.b32.xlu2 %v8417_v40, %s8586_s4  ;;  %v5134_v56 = vshrl.u32 %v12047_v61, 16  ;;  %v5140_v8 = vsel %vm5139_vm5, 1, %v13371_v32  ;;  %v6764_v45 = vsel %vm3559_vm7, %v5784_v51, %v8221_v41  ;;  %v5733_v35 = vld [vmem:[#allocation3 + $0x197] sm:$0xff]  ;;  %v5874_v52 = vld [vmem:[#allocation3 + $0x169] sm:$0xff]  ;;  %v8226_v27 = vunpack.i.h.bf16 %v12066_v11 }
 0x3fe   : > { %v12086_v2 = vsub.s32 %v13560_v7, %v5117_v54  ;;  %v5142_v16 = vadd.s32 %v5140_v8, %v5138_v62  ;;  %vm5145_vm12 = vc.u32 %v5141_v49, 2454267026  ;;  %7425 = vmatmul.f32.vlgmr.msrb.gmra.mxu0 %v6764_v45  ;;  %v5988_v42 = vld [vmem:[#allocation3 + $0x194] sm:$0xff]  ;;  %vm5242_vm13 = vcmp.ne.s32.totalorder %v11742_v36, 27  ;;  %v12094_v62 = vpop.permute.xlu1 %8233 }
 0x3ff   : > { %v5146_v61 = vsel %vm5145_vm12, 1, %v13371_v32  ;;  %vm5241_vm9 = vcmp.ne.s32.totalorder %v11688_v33, 27  ;;  %v5924_v59 = vsel %vm5242_vm13, %v5875_v29, 0.0  ;;  %v12107_v8 = vpop.f32.mrf.mxu1  ;;  %v12109_v51 = vpop.f32.mrf.mxu2  ;;  %vm13578_vm12 = vcmp.ne.s32.totalorder %v11063_v6, 0 }
 0x400   : > { %13577 = vst [vmem:[#allocation101_spill] sm:$0xff] %v12086_v2  ;;  %vm13326_vm5 = vcmp.ne.s32.totalorder %v12086_v2, 0  ;;  %v5143_v1 = vadd.s32 %v5142_v16, %v5132_v17  ;;  %v5923_v40 = vsel %vm5241_vm9, %v5874_v52, 0.0  ;;  %v5525_v17 = vld [vmem:[#allocation3 + $0x10d] sm:$0xff]  ;;  %v8432_v54 = vpack.i.bf16 %v5988_v42, %v5924_v59  ;;  %v12113_v29 = vpop.permute.xlu2 %8238  ;;  %v5880_v42 = vld [vmem:[#allocation3 + $0x199] sm:$0xff] }
 0x401   : > { %v5441_v7 = vsel %vm13326_vm5, %v12080_v4, 0.0  ;;  %v5782_v32 = vsel %vm13326_vm5, %v5733_v35, 0.0  ;;  %v8499_v16 = vld [vmem:[#allocation3 + $0x10b] sm:$0xff]  ;;  %v6027_v52 = vsel %vm13325_vm14, %v5525_v17, 0.0  ;;  %vm13329_vm14 = vcmp.ne.s32.totalorder %v11796_v53, 27 }
 0x402   : > { %v6713_v14 = vsel %vm3559_vm7, %v5441_v7, %v11860_v58  ;;  %v5144_v41 = vadd.s32 %v5143_v1, %v5134_v56  ;;  %v8422_v49 = vpack.i.bf16 %v5923_v40, %v5782_v32  ;;  %v5964_v45 = vsel %vm13578_vm12, %v8499_v16, 0.0  ;;  %v5785_v1 = vld [vmem:[#allocation3 + $0x28] sm:$0xff] }
 0x403   : > { %7238 = vmatmul.f32.gmra.mxu3 %v6713_v14  ;;  %v6839_v56 = vsel %vm3559_vm7, %v5964_v45, %v11327_v22  ;;  %8141 = vmatmul.msk.f32.gmra.mxu2 %vm3559_vm7, %v6027_v52  ;;  %v6765_v59 = vsel %vm3559_vm7, %v5785_v1, %v8226_v27  ;;  %v12123_v32 = vpop.f32.mrf.mxu3  ;;  %vm13327_vm12 = vcmp.ne.s32.totalorder %v12086_v2, 27  ;;  %v5877_v40 = vld [vmem:[#allocation3 + $0x181] sm:$0xff]  ;;  %v12126_v14 = vpop.permute.xlu0 %8228  ;;  %vm13328_vm5 = vcmp.ne.s32.totalorder %v11863_v34, 27 }
 0x404   : > { %v5147_v35 = vadd.s32 %v5146_v61, %v5144_v41  ;;  %7667 = vmatmul.f32.gmra.mxu1 %v6839_v56  ;;  %13579 = vst [vmem:[#allocation102_spill] sm:$0xff] %v12123_v32  ;;  %v5876_v61 = vld [vmem:[#allocation3 + $0x179] sm:$0xff]  ;;  %v5929_v22 = vsel %vm13327_vm12, %v5880_v42, 0.0  ;;  %v5990_v17 = vld [vmem:[#allocation3 + $0x1a4] sm:$0xff]  ;;  %v8231_v16 = vunpack.i.h.bf16 %v12126_v14  ;;  %vm13581_vm12 = vcmp.ne.s32.totalorder %v11092_v60, 0 }
 0x405   : > { %8433 = vrot.lane.b32.xlu2 %v8432_v54, %s8586_s4  ;;  %8423 = vrot.lane.b32.xlu0 %v8422_v49, %s8586_s4  ;;  %v5925_v27 = vsel %vm13329_vm14, %v5876_v61, 0.0  ;;  %v5926_v54 = vsel %vm13328_vm5, %v5877_v40, 0.0  ;;  %v5526_v49 = vld [vmem:[#allocation3 + $0x115] sm:$0xff]  ;;  %v5734_v56 = vld [vmem:[#allocation3 + $0x19f] sm:$0xff]  ;;  %vm13582_vm14 = vcmp.ne.s32.totalorder %v11092_v60, 27 }
 0x406   : > { %v5148_v7 = vshrl.u32 %v5147_v35, 4  ;;  %7428 = vmatmul.f32.gmra.mxu0 %v6765_v59  ;;  %v12140_v35 = vld [vmem:[#allocation3 + $0x183] sm:$0xff]  ;;  %v8437_v52 = vpack.i.bf16 %v5925_v27, %v5929_v22  ;;  %v8447_v42 = vpack.i.bf16 %v5990_v17, %v5926_v54  ;;  %v12142_v1 = vpop.permute.xlu1 %8248  ;;  %v5786_v61 = vld [vmem:[#allocation3 + $0x30] sm:$0xff]  ;;  %v6028_v40 = vsel %vm13582_vm14, %v5526_v49, 0.0 }
 0x407   : > { %v6766_v22 = vsel %vm3559_vm7, %v5786_v61, %v8231_v16  ;;  %v12154_v17 = vpop.f32.mrf.mxu1 }
 0x408   : > { %v5149_v41 = vmul.u32 28, %v5148_v7  ;;  %v8500_v7 = vld [vmem:[#allocation3 + $0x113] sm:$0xff]  ;;  %v12166_v16 = vpop.permute.xlu2 %8253 }
 0x409   : > { %v5965_v59 = vsel %vm13581_vm12, %v8500_v7, 0.0  ;;  %v5878_v7 = vld [vmem:[#allocation3 + $0x189] sm:$0xff]  ;;  %vm5245_vm12 = vcmp.ne.s32.totalorder %v11939_v31, 27 }
 0x40a   : > { %v12138_v45 = vsub.s32 %v13571_v46, %v5149_v41  ;;  %v6840_v46 = vsel %vm3559_vm7, %v5965_v59, %v11379_v38  ;;  %v12156_v41 = vpop.f32.mrf.mxu2  ;;  %v5993_v59 = vld [vmem:[#allocation3 + $0x1bc] sm:$0xff] }
 0x40b   : > { %8142 = vmatmul.msk.f32.gmra.mxu2 %vm3559_vm7, %v6028_v40  ;;  %v5927_v40 = vsel %vm5245_vm12, %v5878_v7, 0.0  ;;  %v13585_v7 = vld [vmem:[#allocation11_spill] sm:$0xff] }
 0x40c   : > { %13580 = vst [vmem:[#allocation103_spill] sm:$0xff] %v12138_v45  ;;  %vm13330_vm5 = vcmp.ne.s32.totalorder %v12138_v45, 0  ;;  %7670 = vmatmul.f32.gmra.mxu1 %v6840_v46  ;;  %vm13331_vm14 = vcmp.ne.s32.totalorder %v12138_v45, 27  ;;  %v5989_v46 = vld [vmem:[#allocation3 + $0x19c] sm:$0xff] }
 0x40d   : > { %8438 = vrot.lane.b32.xlu0 %v8437_v52, %s8586_s4  ;;  %8448 = vrot.lane.b32.xlu2 %v8447_v42, %s8586_s4  ;;  %v5442_v27 = vsel %vm13330_vm5, %v12140_v35, 0.0  ;;  %v5783_v54 = vsel %vm13330_vm5, %v5734_v56, 0.0  ;;  %v5987_v52 = vld [vmem:[#allocation3 + $0x18c] sm:$0xff]  ;;  %v5881_v42 = vld [vmem:[#allocation3 + $0x1a1] sm:$0xff]  ;;  %v12170_v56 = vpop.f32.mrf.mxu3  ;;  %vm13584_vm5 = vcmp.ne.s32.totalorder %v11144_v55, 0 }
 0x40e   : > { %v6714_v38 = vsel %vm3559_vm7, %v5442_v27, %v11951_v48  ;;  %v8427_v49 = vpack.i.bf16 %v5783_v54, %v5987_v52  ;;  %7431 = vmatmul.f32.gmra.mxu0 %v6766_v22  ;;  %13583 = vst [vmem:[#allocation104_spill] sm:$0xff] %v12170_v56  ;;  %v5930_v61 = vsel %vm13331_vm14, %v5881_v42, 0.0  ;;  %v5527_v27 = vld [vmem:[#allocation3 + $0x11d] sm:$0xff]  ;;  %v5492_v54 = vld [vmem:[#allocation3 + $0x5] sm:$0xff]  ;;  %v8236_v22 = vunpack.i.h.bf16 %v12094_v62  ;;  %v12185_v30 = vpop.permute.xlu1 %8263 }
 0x40f   : > { %7241 = vmatmul.f32.gmra.mxu3 %v6714_v38  ;;  %v8452_v52 = vpack.i.bf16 %v5927_v40, %v5993_v59  ;;  %v8501_v38 = vld [vmem:[#allocation3 + $0x11b] sm:$0xff]  ;;  %v8442_v32 = vpack.i.bf16 %v5930_v61, %v5989_v46  ;;  %v6029_v42 = vsel %vm13334_vm10, %v5527_v27, 0.0  ;;  %vm13586_vm14 = vcmp.ne.s32.totalorder %v13585_v7, 27  ;;  %v12193_v40 = vpop.f32.mrf.mxu1  ;;  %v5879_v27 = vld [vmem:[#allocation3 + $0x191] sm:$0xff] }
 0x410   : > { %8428 = vrot.lane.b32.xlu1 %v8427_v49, %s8586_s4  ;;  %v5966_v49 = vsel %vm13584_vm5, %v8501_v38, 0.0  ;;  %v5637_v45 = vsel %vm13586_vm14, %v5492_v54, 0.0  ;;  %v5787_v59 = vld [vmem:[#allocation3 + $0x38] sm:$0xff]  ;;  %vm5246_vm5 = vcmp.ne.s32.totalorder %v12018_v26, 27  ;;  %v12198_v54 = vpop.permute.xlu2 %8268  ;;  %v8241_v38 = vunpack.i.h.bf16 %v12113_v29 }
 0x411   : > { %v6841_v56 = vsel %vm3559_vm7, %v5966_v49, %v11412_v57  ;;  %v6715_v61 = vsel %vm3559_vm7, %v5637_v45, %v11908_v44  ;;  %v6767_v46 = vsel %vm3559_vm7, %v5787_v59, %v8236_v22  ;;  %v8502_v44 = vld [vmem:[%s13143_s2 + $0x1f8] sm:$0xff]  ;;  %v5493_v49 = vld [vmem:[#allocation3 + $0xd] sm:$0xff]  ;;  %v8503_v7 = vld [vmem:[%s13143_s2 + $0x1f0] sm:$0xff]  ;;  %vm13588_vm14 = vcmp.ne.s32.totalorder %v11166_v43, 0 }
 0x412   : > { %v12195_v57 = vpop.f32.mrf.mxu2  ;;  %v5528_v45 = vld [vmem:[#allocation3 + $0x125] sm:$0xff] }
 0x413   : > { %8143 = vmatmul.msk.f32.gmra.mxu2 %vm3559_vm7, %v6029_v42 }
 0x414   : > { %7673 = vmatmul.f32.gmra.mxu1 %v6841_v56  ;;  %v5928_v56 = vsel %vm5246_vm5, %v5879_v27, 0.0  ;;  %v8505_v27 = vld [vmem:[%s13143_s2 + $0x1e8] sm:$0xff] }
 0x415   : > { %8453 = vrot.lane.b32.xlu0 %v8452_v52, %s8586_s4  ;;  %v5992_v52 = vld [vmem:[#allocation3 + $0x1b4] sm:$0xff]  ;;  %v12207_v42 = vpop.f32.mrf.mxu3 }
 0x416   : > { %7434 = vmatmul.f32.gmra.mxu0 %v6767_v46  ;;  %v8457_v22 = vpack.i.bf16 %v5992_v52, %v5928_v56  ;;  %13587 = vst [vmem:[#allocation11_spill] sm:$0xff] %v12207_v42  ;;  %v6030_v46 = vsel %vm5229_vm6, %v5528_v45, 0.0  ;;  %v13589_v52 = vld [vmem:[#allocation14_spill] sm:$0xff]  ;;  %v13593_v42 = vld [vmem:[#allocation16_spill] sm:$0xff] }
 0x417   : > { %7261 = vmatmul.f32.vlgmr.msrb.gmra.mxu3 %v6715_v61  ;;  %vm13590_vm10 = vcmp.ne.s32.totalorder %v13589_v52, 27 }
 0x418   : > { %8443 = vrot.lane.b32.xlu1 %v8442_v32, %s8586_s4  ;;  %8182 = vmatpush.msrb.mxu3 %v8502_v44  ;;  %v8504_v32 = vld [vmem:[#allocation3 + $0x123] sm:$0xff]  ;;  %v5638_v56 = vsel %vm13590_vm10, %v5493_v49, 0.0  ;;  %vm13591_vm10 = vcmp.ne.s32.totalorder %v11219_v39, 0 }
 0x419   : > { %v5967_v59 = vsel %vm13588_vm14, %v8504_v32, 0.0  ;;  %8458 = vrot.lane.b32.xlu2 %v8457_v22, %s8586_s4  ;;  %v5788_v44 = vld [vmem:[#allocation3 + $0x40] sm:$0xff]  ;;  %v6716_v22 = vsel %vm3559_vm7, %v5638_v56, %v11930_v37  ;;  %v8506_v32 = vld [vmem:[%s13143_s2 + $0x1e0] sm:$0xff]  ;;  %v12239_v37 = vpop.f32.mrf.mxu1  ;;  %v8508_v56 = vld [vmem:[%s13143_s2 + $0x1d0] sm:$0xff]  ;;  %vm13594_vm14 = vcmp.ne.s32.totalorder %v13593_v42, 27 }
 0x41a   : > { %8183 = vmatpush.msrb.mxu3 %v8503_v7  ;;  %v6842_v61 = vsel %vm3559_vm7, %v5967_v59, %v11467_v19  ;;  %v5991_v7 = vld [vmem:[#allocation3 + $0x1ac] sm:$0xff]  ;;  %v12227_v19 = vpop.permute.xlu1 %8278  ;;  %v6768_v45 = vsel %vm3559_vm7, %v5788_v44, %v8241_v38  ;;  %v12233_v59 = vpop.permute.xlu0 %8243  ;;  %v8507_v49 = vld [vmem:[%s13143_s2 + $0x1d8] sm:$0xff] }
 0x41b   : > { %8144 = vmatmul.msk.f32.gmra.mxu2 %vm3559_vm7, %v6030_v46  ;;  %v5529_v38 = vld [vmem:[#allocation3 + $0x12d] sm:$0xff]  ;;  %v12243_v46 = vpop.permute.xlu2 %8283  ;;  %v8246_v52 = vunpack.i.h.bf16 %v12233_v59  ;;  %v8512_v42 = vld [vmem:[%s13143_s2 + $0x1b8] sm:$0xff] }
 0x41c   : > { %8184 = vmatpush.msrb.mxu3 %v8505_v27  ;;  %7676 = vmatmul.f32.gmra.mxu1 %v6842_v61  ;;  %v12241_v61 = vpop.f32.mrf.mxu2  ;;  %v5494_v27 = vld [vmem:[#allocation3 + $0x15] sm:$0xff]  ;;  %v8509_v44 = vld [vmem:[#allocation3 + $0x12b] sm:$0xff] }
 0x41e   : > { %8185 = vmatpush.msrb.mxu3 %v8506_v32  ;;  %7437 = vmatmul.f32.gmra.mxu0 %v6768_v45  ;;  %v6031_v32 = vsel %vm5230_vm4, %v5529_v38, 0.0  ;;  %v8511_v38 = vld [vmem:[%s13143_s2 + $0x1c0] sm:$0xff] }
 0x41f   : > { %7264 = vmatmul.f32.gmra.mxu3 %v6716_v22  ;;  %v12251_v22 = vpop.f32.mrf.mxu3 }
 0x420   : > { %6653 = vrot.lane.b32.xlu1 %v5991_v7, %s8586_s4  ;;  %8186 = vmatpush.msrb.mxu3 %v8507_v49  ;;  %v5968_v7 = vsel %vm13591_vm10, %v8509_v44, 0.0  ;;  %13592 = vst [vmem:[#allocation14_spill] sm:$0xff] %v12251_v22  ;;  %v8510_v49 = vld [vmem:[%s13143_s2 + $0x1c8] sm:$0xff]  ;;  %v5789_v44 = vld [vmem:[#allocation3 + $0x48] sm:$0xff]  ;;  %vm13595_vm10 = vcmp.ne.s32.totalorder %v11248_v25, 0 }
 0x421   : > { %v6843_v45 = vsel %vm3559_vm7, %v5968_v7, %v11514_v15  ;;  %v6769_v15 = vsel %vm3559_vm7, %v5789_v44, %v8246_v52  ;;  %v8513_v52 = vld [vmem:[%s13143_s2 + $0x1b0] sm:$0xff] }
 0x422   : > { %8187 = vmatpush.msrb.mxu3 %v8508_v56  ;;  %v5639_v56 = vsel %vm13594_vm14, %v5494_v27, 0.0  ;;  %v12269_v7 = vpop.permute.xlu1 %8293  ;;  %v5530_v27 = vld [vmem:[#allocation3 + $0x135] sm:$0xff] }
 0x423   : > { %8145 = vmatmul.msk.f32.gmra.mxu2 %vm3559_vm7, %v6031_v32  ;;  %v6717_v22 = vsel %vm3559_vm7, %v5639_v56, %v12025_v18  ;;  %v5495_v18 = vld [vmem:[#allocation3 + $0x1d] sm:$0xff]  ;;  %v12278_v32 = vpop.f32.mrf.mxu1  ;;  %v12284_v44 = vpop.permute.xlu2 %8298 }
 0x424   : > { %8188 = vmatpush.msrb.mxu3 %v8510_v49  ;;  %7679 = vmatmul.f32.gmra.mxu1 %v6843_v45  ;;  %v8251_v45 = vunpack.i.h.bf16 %v12142_v1  ;;  %v8514_v49 = vld [vmem:[#allocation3 + $0x133] sm:$0xff] }
 0x425   : > { %v5969_v56 = vsel %vm13595_vm10, %v8514_v49, 0.0  ;;  %v5790_v49 = vld [vmem:[#allocation3 + $0x50] sm:$0xff] }
 0x426   : > { %8189 = vmatpush.msrb.mxu3 %v8511_v38  ;;  %7440 = vmatmul.f32.gmra.mxu0 %v6769_v15  ;;  %v6844_v15 = vsel %vm3559_vm7, %v5969_v56, %v11551_v3  ;;  %v6032_v38 = vsel %vm5231_vm3, %v5530_v27, 0.0  ;;  %v6770_v3 = vsel %vm3559_vm7, %v5790_v49, %v8251_v45  ;;  %v8516_v27 = vld [vmem:[%s13143_s2 + $0x1a0] sm:$0xff]  ;;  %v5531_v56 = vld [vmem:[#allocation3 + $0x13d] sm:$0xff]  ;;  %v8520_v49 = vld [vmem:[%s13143_s2 + $0x188] sm:$0xff] }
 0x427   : > { %7267 = vmatmul.f32.gmra.mxu3 %v6717_v22  ;;  %v12280_v22 = vpop.f32.mrf.mxu2  ;;  %v12298_v55 = vpop.f32.mrf.mxu3  ;;  %v8518_v45 = vld [vmem:[%s13143_s2 + $0x190] sm:$0xff] }
 0x428   : > { %8190 = vmatpush.msrb.mxu3 %v8512_v42  ;;  %v8515_v42 = vld [vmem:[%s13143_s2 + $0x1a8] sm:$0xff]  ;;  %13598 = vst [vmem:[#allocation16_spill] sm:$0xff] %v12298_v55  ;;  %v12337_v55 = vpop.permute.xlu0 %8258 }
 0x42a   : > { %8191 = vmatpush.msrb.mxu3 %v8513_v52  ;;  %v13596_v52 = vld [vmem:[#allocation4_spill] sm:$0xff] }
 0x42b   : > { %vm13597_vm14 = vcmp.ne.s32.totalorder %v13596_v52, 27  ;;  %8146 = vmatmul.msk.f32.gmra.mxu2 %vm3559_vm7, %v6032_v38  ;;  %v8519_v38 = vld [vmem:[#allocation3 + $0x13b] sm:$0xff]  ;;  %v6033_v52 = vsel %vm5232_vm2, %v5531_v56, 0.0 }
 0x42c   : > { %8192 = vmatpush.msrb.mxu3 %v8515_v42  ;;  %v5640_v39 = vsel %vm13597_vm14, %v5495_v18, 0.0  ;;  %7682 = vmatmul.f32.gmra.mxu1 %v6844_v15  ;;  %v8517_v18 = vld [vmem:[%s13143_s2 + $0x198] sm:$0xff]  ;;  %v8256_v15 = vunpack.i.h.bf16 %v12166_v16  ;;  %vm13604_vm14 = vcmp.ne.s32.totalorder %v11324_v21, 27 }
 0x42d   : > { %v6718_v43 = vsel %vm3559_vm7, %v5640_v39, %v11977_v20  ;;  %v5496_v39 = vld [vmem:[#allocation3 + $0x25] sm:$0xff]  ;;  %v12308_v20 = vpop.permute.xlu1 %8308 }
 0x42e   : > { %8193 = vmatpush.msrb.mxu3 %v8516_v27  ;;  %7443 = vmatmul.f32.gmra.mxu0 %v6770_v3  ;;  %v12322_v3 = vpop.f32.mrf.mxu1 }
 0x42f   : > { %7270 = vmatmul.f32.gmra.mxu3 %v6718_v43  ;;  %v5970_v43 = vsel %vm5184_vm1, %v8519_v38, 0.0  ;;  %v12324_v27 = vpop.f32.mrf.mxu2  ;;  %v5791_v38 = vld [vmem:[#allocation3 + $0x58] sm:$0xff]  ;;  %vm13603_vm1 = vcmp.ne.s32.totalorder %v11324_v21, 0 }
 0x430   : > { %8194 = vmatpush.msrb.mxu3 %v8517_v18  ;;  %v6845_v42 = vsel %vm3559_vm7, %v5970_v43, %v11600_v13  ;;  %13599 = vst [vmem:[#allocation4_spill] sm:$0xff] %v12324_v27  ;;  %v13600_v18 = vld [vmem:[#allocation19_spill] sm:$0xff]  ;;  %v12329_v13 = vpop.permute.xlu2 %8313  ;;  %v6771_v43 = vsel %vm3559_vm7, %v5791_v38, %v8256_v15 }
 0x431   : > { %vm13601_vm10 = vcmp.ne.s32.totalorder %v13600_v18, 27  ;;  %v5497_v18 = vld [vmem:[#allocation3 + $0x2d] sm:$0xff] }
 0x432   : > { %8195 = vmatpush.msrb.mxu3 %v8518_v45  ;;  %v5641_v45 = vsel %vm13601_vm10, %v5496_v39, 0.0  ;;  %v12339_v39 = vpop.f32.mrf.mxu3 }
 0x433   : > { %8147 = vmatmul.msk.f32.gmra.mxu2 %vm3559_vm7, %v6033_v52  ;;  %v6719_v56 = vsel %vm3559_vm7, %v5641_v45, %v12004_v10  ;;  %13602 = vst [vmem:[#allocation19_spill] sm:$0xff] %v12339_v39  ;;  %v8261_v52 = vunpack.i.h.bf16 %v12337_v55  ;;  %v5971_v10 = vsel %vm13603_vm1, %v8522_v12, 0.0  ;;  %vm13608_vm1 = vcmp.ne.s32.totalorder %v11371_v28, 0 }
 0x434   : > { %8196 = vmatpush.msrb.mxu3 %v8520_v49  ;;  %7685 = vmatmul.f32.gmra.mxu1 %v6845_v42  ;;  %v8521_v49 = vld [vmem:[%s13143_s2 + $0x180] sm:$0xff]  ;;  %v6846_v45 = vsel %vm3559_vm7, %v5971_v10, %v11649_v9  ;;  %v8266_v10 = vunpack.i.h.bf16 %v12185_v30 }
 0x435   : > { %v5532_v42 = vld [vmem:[#allocation3 + $0x145] sm:$0xff]  ;;  %v12344_v15 = vpop.permute.xlu1 %8323 }
 0x436   : > { %8197 = vmatpush.msrb.mxu3 %v8521_v49  ;;  %7446 = vmatmul.f32.gmra.mxu0 %v6771_v43  ;;  %v6034_v38 = vsel %vm13604_vm14, %v5532_v42, 0.0  ;;  %v5792_v49 = vld [vmem:[#allocation3 + $0x60] sm:$0xff]  ;;  %v12356_v25 = vpop.f32.mrf.mxu1  ;;  %v5533_v42 = vld [vmem:[#allocation3 + $0x14d] sm:$0xff] }
 0x437   : > { %7273 = vmatmul.f32.gmra.mxu3 %v6719_v56  ;;  %v13605_v56 = vld [vmem:[#allocation20_spill] sm:$0xff]  ;;  %v6772_v12 = vsel %vm3559_vm7, %v5792_v49, %v8261_v52  ;;  %v12358_v27 = vpop.f32.mrf.mxu2 }
 0x438   : > { %vm13606_vm10 = vcmp.ne.s32.totalorder %v13605_v56, 27  ;;  %v12360_v9 = vpop.permute.xlu2 %8328  ;;  %v8523_v56 = vld [vmem:[#allocation3 + $0x14b] sm:$0xff] }
 0x439   : > { %v5642_v43 = vsel %vm13606_vm10, %v5497_v18, 0.0  ;;  %v8220_v18 = vunpack.i.l.bf16 %v12045_v0  ;;  %v5793_v0 = vld [vmem:[#allocation3 + $0x68] sm:$0xff]  ;;  %vm13613_vm10 = vcmp.ne.s32.totalorder %v11415_v5, 0  ;;  %v5795_v5 = vld [vmem:[#allocation3 + $0x78] sm:$0xff] }
 0x43a   : > { %v6720_v39 = vsel %vm3559_vm7, %v5642_v43, %v12078_v63  ;;  %v5972_v63 = vsel %vm13608_vm1, %v8523_v56, 0.0  ;;  %v13609_v43 = vld [vmem:[#allocation22_spill] sm:$0xff]  ;;  %v6773_v21 = vsel %vm3559_vm7, %v5793_v0, %v8266_v10  ;;  %v13615_v0 = vld [vmem:[#allocation24_spill] sm:$0xff] }
 0x43b   : > { %8148 = vmatmul.msk.f32.gmra.mxu2 %vm3559_vm7, %v6034_v38  ;;  %v12364_v38 = vpop.f32.mrf.mxu3  ;;  %v6847_v52 = vsel %vm3559_vm7, %v5972_v63, %v11695_v24  ;;  %vm13610_vm14 = vcmp.ne.s32.totalorder %v13609_v43, 27  ;;  %v8225_v63 = vunpack.i.l.bf16 %v12066_v11  ;;  %vm13616_vm1 = vcmp.ne.s32.totalorder %v13615_v0, 27 }
 0x43c   : > { %7688 = vmatmul.f32.gmra.mxu1 %v6846_v45  ;;  %v5498_v45 = vld [vmem:[#allocation3 + $0x35] sm:$0xff]  ;;  %13607 = vst [vmem:[#allocation20_spill] sm:$0xff] %v12364_v38 }
 0x43d   : > { %v5643_v49 = vsel %vm13610_vm14, %v5498_v45, 0.0  ;;  %v12376_v38 = vpop.permute.xlu1 %8338  ;;  %v8271_v45 = vunpack.i.h.bf16 %v12198_v54  ;;  %vm13619_vm14 = vcmp.ne.s32.totalorder %v11462_v23, 0 }
 0x43e   : > { %7449 = vmatmul.f32.gmra.mxu0 %v6772_v12  ;;  %v6721_v12 = vsel %vm3559_vm7, %v5643_v49, %v8220_v18  ;;  %v12379_v56 = vpop.f32.mrf.mxu1  ;;  %v8525_v49 = vld [vmem:[#allocation3 + $0x3d] sm:$0xff] }
 0x43f   : > { %7276 = vmatmul.f32.gmra.mxu3 %v6720_v39  ;;  %v6035_v39 = vsel %vm5234_vm8, %v5533_v42, 0.0  ;;  %13611 = vst [vmem:[#allocation22_spill] sm:$0xff] %v12379_v56  ;;  %v12381_v24 = vpop.f32.mrf.mxu2  ;;  %v5534_v42 = vld [vmem:[#allocation3 + $0x155] sm:$0xff]  ;;  %v5644_v11 = vsel %vm13616_vm1, %v8525_v49, 0.0 }
 0x440   : > { %13612 = vst [vmem:[#allocation105_spill] sm:$0xff] %v12381_v24  ;;  %v6036_v10 = vsel %vm5235_vm11, %v5534_v42, 0.0  ;;  %v6722_v28 = vsel %vm3559_vm7, %v5644_v11, %v8225_v63  ;;  %v12400_v24 = vpop.permute.xlu0 %8273  ;;  %v8230_v42 = vunpack.i.l.bf16 %v12126_v14  ;;  %v13620_v11 = vld [vmem:[#allocation81_spill] sm:$0xff]  ;;  %v13622_v14 = vld [vmem:[#allocation27_spill] sm:$0xff] }
 0x441   : > { %v8276_v0 = vunpack.i.h.bf16 %v12400_v24  ;;  %vm13623_vm1 = vcmp.ne.s32.totalorder %v13622_v14, 27  ;;  %v13628_v14 = vld [vmem:[#allocation31_spill] sm:$0xff] }
 0x443   : > { %8149 = vmatmul.msk.f32.gmra.mxu2 %vm3559_vm7, %v6035_v39  ;;  %v8524_v39 = vld [vmem:[#allocation3 + $0x153] sm:$0xff]  ;;  %v12389_v43 = vpop.f32.mrf.mxu3 }
 0x444   : > { %7691 = vmatmul.f32.gmra.mxu1 %v6847_v52  ;;  %v12385_v52 = vpop.permute.xlu2 %8343  ;;  %v5973_v18 = vsel %vm13613_vm10, %v8524_v39, 0.0  ;;  %13614 = vst [vmem:[#allocation106_spill] sm:$0xff] %v12389_v43  ;;  %vm13621_vm10 = vcmp.ne.s32.totalorder %v11462_v23, 27 }
 0x446   : > { %7452 = vmatmul.f32.gmra.mxu0 %v6773_v21  ;;  %v6848_v21 = vsel %vm3559_vm7, %v5973_v18, %v11751_v47  ;;  %v12402_v47 = vpop.permute.xlu1 %8353  ;;  %v5535_v18 = vld [vmem:[#allocation3 + $0x15d] sm:$0xff]  ;;  %v12406_v49 = vpop.f32.mrf.mxu1 }
 0x447   : > { %7279 = vmatmul.f32.gmra.mxu3 %v6721_v12  ;;  %v5794_v12 = vld [vmem:[#allocation3 + $0x70] sm:$0xff]  ;;  %13617 = vst [vmem:[#allocation24_spill] sm:$0xff] %v12406_v49 }
 0x448   : > { %v6774_v39 = vsel %vm3559_vm7, %v5794_v12, %v8271_v45  ;;  %v6037_v12 = vsel %vm13621_vm10, %v5535_v18, 0.0  ;;  %v8281_v18 = vunpack.i.h.bf16 %v12227_v19 }
 0x44b   : > { %8150 = vmatmul.msk.f32.gmra.mxu2 %vm3559_vm7, %v6036_v10  ;;  %v8526_v10 = vld [vmem:[#allocation3 + $0x15b] sm:$0xff] }
 0x44c   : > { %7694 = vmatmul.f32.gmra.mxu1 %v6848_v21  ;;  %v12408_v21 = vpop.f32.mrf.mxu2  ;;  %v5974_v63 = vsel %vm13619_vm14, %v8526_v10, 0.0  ;;  %v12412_v45 = vpop.permute.xlu2 %8358  ;;  %v6775_v10 = vsel %vm3559_vm7, %v5795_v5, %v8276_v0 }
 0x44d   : > { %13618 = vst [vmem:[#allocation107_spill] sm:$0xff] %v12408_v21  ;;  %v12422_v49 = vpop.f32.mrf.mxu3 }
 0x44e   : > { %7455 = vmatmul.f32.gmra.mxu0 %v6774_v39  ;;  %v8527_v39 = vld [vmem:[#allocation3 + $0x45] sm:$0xff]  ;;  %13624 = vst [vmem:[#allocation81_spill] sm:$0xff] %v12422_v49  ;;  %v12427_v23 = vpop.permute.xlu1 %8368  ;;  %v12436_v5 = vpop.f32.mrf.mxu1 }
 0x44f   : > { %7282 = vmatmul.f32.gmra.mxu3 %v6722_v28  ;;  %v6849_v28 = vsel %vm3559_vm7, %v5974_v63, %v13620_v11  ;;  %v5645_v43 = vsel %vm13623_vm1, %v8527_v39, 0.0  ;;  %v5536_v63 = vld [vmem:[#allocation3 + $0x165] sm:$0xff]  ;;  %v8235_v11 = vunpack.i.l.bf16 %v12094_v62  ;;  %v13625_v39 = vld [vmem:[#allocation90_spill] sm:$0xff]  ;;  %13629 = vst [vmem:[#allocation27_spill] sm:$0xff] %v12436_v5 }
 0x450   : > { %v6723_v21 = vsel %vm3559_vm7, %v5645_v43, %v8230_v42  ;;  %v6038_v42 = vsel %vm5237_vm0, %v5536_v63, 0.0  ;;  %v13631_v62 = vld [vmem:[#allocation28_spill] sm:$0xff]  ;;  %v5796_v49 = vld [vmem:[#allocation3 + $0x80] sm:$0xff] }
 0x451   : > { %vm13632_vm10 = vcmp.ne.s32.totalorder %v13631_v62, 27  ;;  %v8286_v62 = vunpack.i.h.bf16 %v12243_v46  ;;  %v13638_v5 = vld [vmem:[#allocation91_spill] sm:$0xff] }
 0x453   : > { %8151 = vmatmul.msk.f32.gmra.mxu2 %vm3559_vm7, %v6037_v12 }
 0x454   : > { %7697 = vmatmul.f32.gmra.mxu1 %v6849_v28  ;;  %v13626_v28 = vld [vmem:[#allocation18_spill] sm:$0xff]  ;;  %v12438_v0 = vpop.f32.mrf.mxu2  ;;  %v12443_v56 = vpop.permute.xlu2 %8373 }
 0x455   : > { %vm13627_vm14 = vcmp.ne.s32.totalorder %v13626_v28, 0  ;;  %13630 = vst [vmem:[#allocation90_spill] sm:$0xff] %v12438_v0  ;;  %v8240_v28 = vunpack.i.l.bf16 %v12113_v29  ;;  %v5797_v29 = vld [vmem:[#allocation3 + $0x88] sm:$0xff] }
 0x456   : > { %7458 = vmatmul.f32.gmra.mxu0 %v6775_v10  ;;  %v5975_v12 = vsel %vm13627_vm14, %v13625_v39, 0.0  ;;  %v12454_v0 = vpop.permute.xlu1 %8383 }
 0x457   : > { %7285 = vmatmul.f32.gmra.mxu3 %v6723_v21  ;;  %v6850_v43 = vsel %vm3559_vm7, %v5975_v12, %v13628_v14  ;;  %v8528_v21 = vld [vmem:[#allocation3 + $0x4d] sm:$0xff]  ;;  %v6776_v12 = vsel %vm3559_vm7, %v5796_v49, %v8281_v18  ;;  %13637 = vst [vmem:[#allocation28_spill] sm:$0xff] %v12454_v0  ;;  %v8529_v18 = vld [vmem:[#allocation3 + $0x55] sm:$0xff]  ;;  %v12467_v0 = vpop.f32.mrf.mxu1 }
 0x458   : > { %v5646_v10 = vsel %vm13632_vm10, %v8528_v21, 0.0  ;;  %v12447_v63 = vpop.f32.mrf.mxu3  ;;  %v5537_v14 = vld [vmem:[#allocation3 + $0x16d] sm:$0xff]  ;;  %v13634_v21 = vld [vmem:[#allocation95_spill] sm:$0xff] }
 0x459   : > { %v6724_v39 = vsel %vm3559_vm7, %v5646_v10, %v8235_v11  ;;  %13633 = vst [vmem:[#allocation31_spill] sm:$0xff] %v12447_v63  ;;  %v6039_v49 = vsel %vm5238_vm15, %v5537_v14, 0.0  ;;  %v13639_v10 = vld [vmem:[#allocation30_spill] sm:$0xff]  ;;  %v6777_v63 = vsel %vm3559_vm7, %v5797_v29, %v8286_v62 }
 0x45a   : > { %vm13640_vm14 = vcmp.ne.s32.totalorder %v13639_v10, 27  ;;  %13641 = vst [vmem:[#allocation95_spill] sm:$0xff] %v12467_v0  ;;  %v13644_v10 = vld [vmem:[#allocation99_spill] sm:$0xff]  ;;  %v13647_v62 = vld [vmem:[#allocation86_spill] sm:$0xff] }
 0x45b   : > { %8152 = vmatmul.msk.f32.gmra.mxu2 %vm3559_vm7, %v6038_v42 }
 0x45c   : > { %7700 = vmatmul.f32.gmra.mxu1 %v6850_v43  ;;  %v13635_v43 = vld [vmem:[#allocation74_spill] sm:$0xff]  ;;  %v12471_v14 = vpop.permute.xlu2 %8388 }
 0x45d   : > { %vm13636_vm1 = vcmp.ne.s32.totalorder %v13635_v43, 0  ;;  %v13645_v43 = vld [vmem:[#allocation75_spill] sm:$0xff] }
 0x45e   : > { %7461 = vmatmul.f32.gmra.mxu0 %v6776_v12  ;;  %v5976_v42 = vsel %vm13636_vm1, %v13634_v21, 0.0  ;;  %v12463_v12 = vpop.permute.xlu0 %8288  ;;  %vm13646_vm10 = vcmp.ne.s32.totalorder %v13645_v43, 0  ;;  %vm13648_vm1 = vcmp.ne.s32.totalorder %v13645_v43, 27  ;;  %v12488_v0 = vpop.permute.xlu1 %8398  ;;  %v5799_v43 = vld [vmem:[#allocation3 + $0x98] sm:$0xff] }
 0x45f   : > { %7288 = vmatmul.f32.gmra.mxu3 %v6724_v39  ;;  %v6851_v11 = vsel %vm3559_vm7, %v5976_v42, %v13638_v5  ;;  %v5647_v39 = vsel %vm13640_vm14, %v8529_v18, 0.0  ;;  %v12469_v5 = vpop.f32.mrf.mxu2  ;;  %v5538_v42 = vld [vmem:[#allocation3 + $0x175] sm:$0xff] }
 0x460   : > { %v6725_v21 = vsel %vm3559_vm7, %v5647_v39, %v8240_v28  ;;  %13642 = vst [vmem:[#allocation91_spill] sm:$0xff] %v12469_v5  ;;  %v5977_v28 = vsel %vm13646_vm10, %v13644_v10, 0.0  ;;  %v6040_v29 = vsel %vm13648_vm1, %v5538_v42, 0.0  ;;  %v5539_v42 = vld [vmem:[#allocation3 + $0x17d] sm:$0xff] }
 0x461   : > { %v6852_v39 = vsel %vm3559_vm7, %v5977_v28, %v13647_v62  ;;  %v12491_v28 = vpop.f32.mrf.mxu1 }
 0x463   : > { %8153 = vmatmul.msk.f32.gmra.mxu2 %vm3559_vm7, %v6039_v49  ;;  %v8291_v49 = vunpack.i.h.bf16 %v12463_v12  ;;  %v12475_v18 = vpop.f32.mrf.mxu3 }
 0x464   : > { %7703 = vmatmul.f32.gmra.mxu1 %v6851_v11  ;;  %v8245_v11 = vunpack.i.l.bf16 %v12233_v59  ;;  %13643 = vst [vmem:[#allocation30_spill] sm:$0xff] %v12475_v18  ;;  %v5798_v59 = vld [vmem:[#allocation3 + $0x90] sm:$0xff] }
 0x465   : > { %v6778_v10 = vsel %vm3559_vm7, %v5798_v59, %v8291_v49  ;;  %v8531_v59 = vld [vmem:[#allocation3 + $0x65] sm:$0xff] }
 0x466   : > { %7464 = vmatmul.f32.gmra.mxu0 %v6777_v63  ;;  %v8530_v63 = vld [vmem:[#allocation3 + $0x5d] sm:$0xff] }
 0x467   : > { %7291 = vmatmul.f32.gmra.mxu3 %v6725_v21  ;;  %v13649_v21 = vld [vmem:[#allocation32_spill] sm:$0xff]  ;;  %v12493_v62 = vpop.f32.mrf.mxu2 }
 0x468   : > { %vm13650_vm14 = vcmp.ne.s32.totalorder %v13649_v21, 27  ;;  %13651 = vst [vmem:[#allocation99_spill] sm:$0xff] %v12493_v62  ;;  %v8250_v21 = vunpack.i.l.bf16 %v12142_v1 }
 0x469   : > { %v5648_v5 = vsel %vm13650_vm14, %v8530_v63, 0.0  ;;  %v12497_v63 = vpop.permute.xlu2 %8403 }
 0x46a   : > { %v6726_v18 = vsel %vm3559_vm7, %v5648_v5, %v8245_v11 }
 0x46b   : > { %8154 = vmatmul.msk.f32.gmra.mxu2 %vm3559_vm7, %v6040_v29  ;;  %v13652_v29 = vld [vmem:[#allocation76_spill] sm:$0xff] }
 0x46c   : > { %7706 = vmatmul.f32.gmra.mxu1 %v6852_v39  ;;  %v8296_v39 = vunpack.i.h.bf16 %v12269_v7  ;;  %vm13653_vm10 = vcmp.ne.s32.totalorder %v13652_v29, 0  ;;  %vm13655_vm1 = vcmp.ne.s32.totalorder %v13652_v29, 27  ;;  %v12517_v29 = vpop.f32.mrf.mxu1 }
 0x46d   : > { %v5978_v5 = vsel %vm13653_vm10, %v12080_v4, 0.0  ;;  %vm13659_vm10 = vcmp.ne.s32.totalorder %v11688_v33, 0 }
 0x46e   : > { %7467 = vmatmul.f32.gmra.mxu0 %v6778_v10  ;;  %v6853_v49 = vsel %vm3559_vm7, %v5978_v5, %v11860_v58  ;;  %v13656_v10 = vld [vmem:[#allocation35_spill] sm:$0xff]  ;;  %v6779_v4 = vsel %vm3559_vm7, %v5799_v43, %v8296_v39  ;;  %v8255_v5 = vunpack.i.l.bf16 %v12166_v16  ;;  %v8532_v16 = vld [vmem:[#allocation3 + $0x6d] sm:$0xff] }
 0x46f   : > { %7294 = vmatmul.f32.gmra.mxu3 %v6726_v18  ;;  %v12502_v11 = vpop.f32.mrf.mxu3  ;;  %v6041_v18 = vsel %vm13655_vm1, %v5539_v42, 0.0  ;;  %vm13657_vm14 = vcmp.ne.s32.totalorder %v13656_v10, 27  ;;  %v5540_v58 = vld [vmem:[#allocation3 + $0x185] sm:$0xff]  ;;  %v8301_v42 = vunpack.i.h.bf16 %v12284_v44 }
 0x470   : > { %13654 = vst [vmem:[#allocation86_spill] sm:$0xff] %v12502_v11  ;;  %v5649_v1 = vsel %vm13657_vm14, %v8531_v59, 0.0  ;;  %v12513_v11 = vpop.permute.xlu1 %8413  ;;  %v12519_v59 = vpop.f32.mrf.mxu2  ;;  %vm13665_vm14 = vcmp.ne.s32.totalorder %v11742_v36, 0 }
 0x471   : > { %v6727_v62 = vsel %vm3559_vm7, %v5649_v1, %v8250_v21  ;;  %13658 = vst [vmem:[#allocation32_spill] sm:$0xff] %v12513_v11  ;;  %v12524_v21 = vpop.permute.xlu2 %8418  ;;  %v5800_v1 = vld [vmem:[#allocation3 + $0xa0] sm:$0xff] }
 0x472   : > { %13660 = vst [vmem:[#allocation35_spill] sm:$0xff] %v12524_v21  ;;  %v6780_v21 = vsel %vm3559_vm7, %v5800_v1, %v8301_v42 }
 0x473   : > { %8155 = vmatmul.msk.f32.gmra.mxu2 %vm3559_vm7, %v6041_v18  ;;  %v13661_v18 = vld [vmem:[#allocation36_spill] sm:$0xff] }
 0x474   : > { %7709 = vmatmul.f32.gmra.mxu1 %v6853_v49  ;;  %v5979_v49 = vsel %vm13659_vm10, %v12140_v35, 0.0  ;;  %vm13662_vm1 = vcmp.ne.s32.totalorder %v13661_v18, 27  ;;  %v12558_v33 = vpop.f32.mrf.mxu1 }
 0x475   : > { %v6854_v43 = vsel %vm3559_vm7, %v5979_v49, %v11951_v48  ;;  %v5650_v10 = vsel %vm13662_vm1, %v8532_v16, 0.0  ;;  %v12539_v48 = vpop.permute.xlu0 %8303  ;;  %v5994_v16 = vld [vmem:[#allocation3 + $0x18d] sm:$0xff]  ;;  %vm13671_vm1 = vcmp.ne.s32.totalorder %v11796_v53, 0 }
 0x476   : > { %7470 = vmatmul.f32.gmra.mxu0 %v6779_v4  ;;  %v6728_v35 = vsel %vm3559_vm7, %v5650_v10, %v8255_v5  ;;  %v8306_v49 = vunpack.i.h.bf16 %v12539_v48  ;;  %v6043_v42 = vsel %vm5242_vm13, %v5994_v16, 0.0 }
 0x477   : > { %7297 = vmatmul.f32.gmra.mxu3 %v6727_v62  ;;  %v6042_v62 = vsel %vm5241_vm9, %v5540_v58, 0.0  ;;  %v8260_v58 = vunpack.i.l.bf16 %v12337_v55  ;;  %v13667_v55 = vld [vmem:[#allocation38_spill] sm:$0xff] }
 0x478   : > { %v12552_v1 = vpop.f32.mrf.mxu2  ;;  %vm13668_vm10 = vcmp.ne.s32.totalorder %v13667_v55, 27  ;;  %v5995_v55 = vld [vmem:[#allocation3 + $0x195] sm:$0xff] }
 0x479   : > { %13666 = vst [vmem:[#allocation109_spill] sm:$0xff] %v12552_v1  ;;  %v12560_v11 = vpop.permute.xlu2 %8433 }
 0x47a   : > { %v12536_v4 = vpop.f32.mrf.mxu3  ;;  %13669 = vst [vmem:[#allocation38_spill] sm:$0xff] %v12560_v11 }
 0x47b   : > { %v12530_v39 = vpop.f32.mrf.mxu0  ;;  %8156 = vmatmul.msk.f32.gmra.mxu2 %vm3559_vm7, %v6042_v62  ;;  %13663 = vst [vmem:[#allocation36_spill] sm:$0xff] %v12536_v4  ;;  %v5931_v62 = vld [vmem:[#allocation3 + $0x18b] sm:$0xff] }
 0x47c   : > { %7712 = vmatmul.f32.gmra.mxu1 %v6854_v43  ;;  %v5980_v5 = vsel %vm13665_vm14, %v5931_v62, 0.0  ;;  %vm13672_vm14 = vcmp.ne.s32.totalorder %v11796_v53, 27 }
 0x47e   : > { %7473 = vmatmul.f32.gmra.mxu0 %v6780_v21  ;;  %v8533_v21 = vld [vmem:[#allocation3 + $0x75] sm:$0xff] }
 0x47f   : > { %7300 = vmatmul.f32.gmra.mxu3 %v6728_v35  ;;  %v5651_v35 = vsel %vm13668_vm10, %v8533_v21, 0.0  ;;  %v8436_v21 = vunpack.i.h.bf16 %v12560_v11 }
 0x480   : > { %v6729_v62 = vsel %vm3559_vm7, %v5651_v35, %v8260_v58  ;;  %v12583_v53 = vpop.f32.mrf.mxu2 }
 0x481   : > { %13676 = vst [vmem:[#allocation111_spill] sm:$0xff] %v12583_v53  ;;  %v13686_v53 = vld [vmem:[#allocation42_spill] sm:$0xff] }
 0x482   : > { %v12543_v18 = vpop.permute.xlu1 %8428 }
 0x483   : > { %13664 = vst [vmem:[#allocation108_spill] sm:$0xff] %v12543_v18  ;;  %v8430_v43 = vunpack.i.l.bf16 %v12543_v18  ;;  %v12550_v10 = vpop.f32.mrf.mxu0  ;;  %8157 = vmatmul.msk.f32.gmra.mxu2 %vm3559_vm7, %v6043_v42  ;;  %v5801_v18 = vld [vmem:[#allocation3 + $0xa8] sm:$0xff]  ;;  %v5932_v42 = vld [vmem:[#allocation3 + $0x193] sm:$0xff] }
 0x484   : > { %v6781_v16 = vsel %vm3559_vm7, %v5801_v18, %v8306_v49  ;;  %v5981_v1 = vsel %vm13671_vm1, %v5932_v42, 0.0  ;;  %v8534_v49 = vld [vmem:[#allocation3 + $0x7d] sm:$0xff]  ;;  %vm13679_vm1 = vcmp.ne.s32.totalorder %v11863_v34, 0 }
 0x485   : > { %v6855_v4 = vsel %vm3559_vm7, %v5980_v5, %v8430_v43  ;;  %v8265_v43 = vunpack.i.l.bf16 %v12185_v30  ;;  %v8311_v5 = vunpack.i.h.bf16 %v12308_v20  ;;  %v13673_v18 = vld [vmem:[#allocation39_spill] sm:$0xff]  ;;  %v5802_v30 = vld [vmem:[#allocation3 + $0xb0] sm:$0xff] }
 0x486   : > { %7715 = vmatmul.f32.gmra.mxu1 %v6855_v4  ;;  %7476 = vmatmul.f32.gmra.mxu0 %v6781_v16  ;;  %v12564_v36 = vpop.f32.mrf.mxu3  ;;  %v6044_v4 = vsel %vm13672_vm14, %v5995_v55, 0.0  ;;  %vm13674_vm10 = vcmp.ne.s32.totalorder %v13673_v18, 27  ;;  %v12585_v55 = vpop.f32.mrf.mxu1  ;;  %v5996_v18 = vld [vmem:[#allocation3 + $0x19d] sm:$0xff]  ;;  %vm13680_vm14 = vcmp.ne.s32.totalorder %v11863_v34, 27 }
 0x487   : > { %7303 = vmatmul.f32.gmra.mxu3 %v6729_v62  ;;  %13670 = vst [vmem:[#allocation110_spill] sm:$0xff] %v12564_v36  ;;  %v5652_v35 = vsel %vm13674_vm10, %v8534_v49, 0.0  ;;  %v6856_v62 = vsel %vm3559_vm7, %v5981_v1, %v8436_v21  ;;  %v6782_v42 = vsel %vm3559_vm7, %v5802_v30, %v8311_v5  ;;  %v8270_v1 = vunpack.i.l.bf16 %v12198_v54  ;;  %v8535_v30 = vld [vmem:[#allocation3 + $0x85] sm:$0xff]  ;;  %v12606_v34 = vpop.permute.xlu0 %8318 }
 0x488   : > { %v6730_v16 = vsel %vm3559_vm7, %v5652_v35, %v8265_v43  ;;  %13677 = vst [vmem:[#allocation112_spill] sm:$0xff] %v12585_v55  ;;  %v8316_v21 = vunpack.i.h.bf16 %v12329_v13  ;;  %v5933_v43 = vld [vmem:[#allocation3 + $0x19b] sm:$0xff]  ;;  %v6045_v5 = vsel %vm13680_vm14, %v5996_v18, 0.0  ;;  %v12608_v18 = vpop.f32.mrf.mxu2 }
 0x489   : > { %v5982_v35 = vsel %vm13679_vm1, %v5933_v43, 0.0  ;;  %13684 = vst [vmem:[#allocation114_spill] sm:$0xff] %v12608_v18  ;;  %vm13687_vm1 = vcmp.ne.s32.totalorder %v11939_v31, 0 }
 0x48a   : > { %v12580_v36 = vpop.permute.xlu1 %8443 }
 0x48b   : > { %v12573_v58 = vpop.f32.mrf.mxu0  ;;  %8158 = vmatmul.msk.f32.gmra.mxu2 %vm3559_vm7, %v6044_v4  ;;  %13675 = vst [vmem:[#allocation39_spill] sm:$0xff] %v12580_v36  ;;  %v8445_v49 = vunpack.i.l.bf16 %v12580_v36  ;;  %v5803_v36 = vld [vmem:[#allocation3 + $0xb8] sm:$0xff] }
 0x48c   : > { %v6783_v43 = vsel %vm3559_vm7, %v5803_v36, %v8316_v21 }
 0x48d   : > { %v6857_v54 = vsel %vm3559_vm7, %v5982_v35, %v8445_v49  ;;  %v8275_v49 = vunpack.i.l.bf16 %v12400_v24  ;;  %v8321_v35 = vunpack.i.h.bf16 %v12606_v34  ;;  %v8536_v24 = vld [vmem:[#allocation3 + $0x8d] sm:$0xff] }
 0x48e   : > { %7718 = vmatmul.f32.gmra.mxu1 %v6856_v62  ;;  %7479 = vmatmul.f32.gmra.mxu0 %v6782_v42 }
 0x48f   : > { %7306 = vmatmul.f32.gmra.mxu3 %v6730_v16  ;;  %v13681_v16 = vld [vmem:[#allocation40_spill] sm:$0xff] }
 0x490   : > { %vm13682_vm10 = vcmp.ne.s32.totalorder %v13681_v16, 27 }
 0x491   : > { %v5653_v42 = vsel %vm13682_vm10, %v8535_v30, 0.0  ;;  %vm13693_vm10 = vcmp.ne.s32.totalorder %v12018_v26, 0  ;;  %v13705_v26 = vld [vmem:[#allocation47_spill] sm:$0xff] }
 0x492   : > { %v12590_v4 = vpop.f32.mrf.mxu3  ;;  %v6731_v11 = vsel %vm3559_vm7, %v5653_v42, %v8270_v1  ;;  %v5934_v42 = vld [vmem:[#allocation3 + $0x1a3] sm:$0xff] }
 0x493   : > { %13678 = vst [vmem:[#allocation113_spill] sm:$0xff] %v12590_v4  ;;  %v12596_v62 = vpop.f32.mrf.mxu0  ;;  %8159 = vmatmul.msk.f32.gmra.mxu2 %vm3559_vm7, %v6045_v5  ;;  %v12602_v4 = vpop.permute.xlu2 %8448  ;;  %v5983_v36 = vsel %vm13687_vm1, %v5934_v42, 0.0 }
 0x494   : > { %13683 = vst [vmem:[#allocation40_spill] sm:$0xff] %v12602_v4  ;;  %v8451_v30 = vunpack.i.h.bf16 %v12602_v4  ;;  %v12613_v5 = vpop.f32.mrf.mxu1  ;;  %v13688_v4 = vld [vmem:[#allocation41_spill] sm:$0xff] }
 0x495   : > { %13685 = vst [vmem:[#allocation115_spill] sm:$0xff] %v12613_v5  ;;  %vm13689_vm14 = vcmp.ne.s32.totalorder %v13688_v4, 27  ;;  %v8280_v4 = vunpack.i.l.bf16 %v12227_v19 }
 0x496   : > { %7721 = vmatmul.f32.gmra.mxu1 %v6857_v54  ;;  %7482 = vmatmul.f32.gmra.mxu0 %v6783_v43  ;;  %v5997_v54 = vld [vmem:[#allocation3 + $0x1a5] sm:$0xff]  ;;  %v5654_v18 = vsel %vm13689_vm14, %v8536_v24, 0.0  ;;  %v6858_v5 = vsel %vm3559_vm7, %v5983_v36, %v8451_v30  ;;  %v8326_v24 = vunpack.i.h.bf16 %v12344_v15  ;;  %v6654_v30 = vpop.permute.xlu1 %6653  ;;  %v12633_v36 = vpop.f32.mrf.mxu2  ;;  %vm13699_vm14 = vcmp.ne.s32.totalorder %v12086_v2, 0 }
 0x497   : > { %7309 = vmatmul.f32.gmra.mxu3 %v6731_v11  ;;  %v6046_v11 = vsel %vm5245_vm12, %v5997_v54, 0.0  ;;  %v13690_v54 = vld [vmem:[#allocation78_spill] sm:$0xff] }
 0x49a   : > { %v7262_v16 = vpop.f32.mrf.mxu3 }
 0x49b   : > { %v7263_v1 = vadd.f32 %v7262_v16, %v13686_v53  ;;  %v12620_v21 = vpop.f32.mrf.mxu0  ;;  %8160 = vmatmul.msk.f32.gmra.mxu2 %vm3559_vm7, %v6046_v11  ;;  %v5804_v53 = vld [vmem:[#allocation3 + $0xc0] sm:$0xff]  ;;  %v6732_v16 = vsel %vm3559_vm7, %v5654_v18, %v8275_v49  ;;  %v5935_v49 = vld [vmem:[#allocation3 + $0x1ab] sm:$0xff] }
 0x49c   : > { %v6784_v42 = vsel %vm3559_vm7, %v5804_v53, %v8321_v35  ;;  %v13692_v11 = vld [vmem:[#allocation43_spill] sm:$0xff]  ;;  %v12637_v35 = vpop.f32.mrf.mxu1 }
 0x49d   : > { %v7427_v43 = vadd.f32 %v12530_v39, %v7263_v1  ;;  %v13691_v39 = vld [vmem:[#allocation29_spill] sm:$0xff] }
 0x49e   : > { %7724 = vmatmul.f32.gmra.mxu1 %v6858_v5  ;;  %7485 = vmatmul.f32.gmra.mxu0 %v6784_v42  ;;  %v5998_v5 = vld [vmem:[#allocation3 + $0x1ad] sm:$0xff] }
 0x49f   : > { %v7591_v31 = vadd.f32 %v13690_v54, %v7427_v43  ;;  %7312 = vmatmul.f32.gmra.mxu3 %v6732_v16  ;;  %v5984_v43 = vsel %vm13693_vm10, %v5935_v49, 0.0  ;;  %v8537_v16 = vld [vmem:[#allocation3 + $0x95] sm:$0xff]  ;;  %v13694_v42 = vld [vmem:[#allocation44_spill] sm:$0xff]  ;;  %vm13700_vm10 = vcmp.ne.s32.totalorder %v12086_v2, 27  ;;  %v12678_v2 = vpop.permute.xlu0 %8333 }
 0x4a0   : > { %vm13695_vm1 = vcmp.ne.s32.totalorder %v13694_v42, 27  ;;  %v13696_v49 = vld [vmem:[#allocation82_spill] sm:$0xff] }
 0x4a1   : > { %v7755_v1 = vadd.f32 %v13691_v39, %v7591_v31  ;;  %v6047_v31 = vsel %vm5246_vm5, %v5998_v5, 0.0  ;;  %v5655_v54 = vsel %vm13695_vm1, %v8537_v16, 0.0  ;;  %v5805_v39 = vld [vmem:[#allocation3 + $0xc8] sm:$0xff]  ;;  %v13697_v16 = vld [vmem:[#allocation83_spill] sm:$0xff] }
 0x4a2   : > { %v7265_v55 = vpop.f32.mrf.mxu3 }
 0x4a3   : > { %7901 = vst [vmem:[%s8621_s18] sm:$0xff] %v7755_v1  ;;  %v7266_v18 = vadd.f32 %v7265_v55, %v13692_v11  ;;  %v12643_v19 = vpop.f32.mrf.mxu0  ;;  %v6859_v55 = vsel %vm3559_vm7, %v5984_v43, %v6654_v30  ;;  %8161 = vmatmul.msk.f32.gmra.mxu2 %vm3559_vm7, %v6047_v31  ;;  %v6733_v1 = vsel %vm3559_vm7, %v5655_v54, %v8280_v4  ;;  %v8285_v30 = vunpack.i.l.bf16 %v12243_v46  ;;  %v13698_v4 = vld [vmem:[#allocation45_spill] sm:$0xff] }
 0x4a4   : > { %v6785_v11 = vsel %vm3559_vm7, %v5805_v39, %v8326_v24  ;;  %v8331_v43 = vunpack.i.h.bf16 %v12360_v9  ;;  %v5999_v24 = vld [vmem:[#allocation3 + $0x1b5] sm:$0xff] }
 0x4a5   : > { %v7430_v53 = vadd.f32 %v12550_v10, %v7266_v18  ;;  %v12653_v10 = vpop.permute.xlu2 %8458  ;;  %v6048_v39 = vsel %vm13700_vm10, %v5999_v24, 0.0 }
 0x4a6   : > { %7727 = vmatmul.f32.gmra.mxu1 %v6859_v55  ;;  %7488 = vmatmul.f32.gmra.mxu0 %v6785_v11  ;;  %v8461_v18 = vunpack.i.h.bf16 %v12653_v10  ;;  %v5936_v55 = vld [vmem:[#allocation3 + $0x1b3] sm:$0xff]  ;;  %v12667_v11 = vpop.f32.mrf.mxu2 }
 0x4a7   : > { %v7594_v5 = vadd.f32 %v13696_v49, %v7430_v53  ;;  %7315 = vmatmul.f32.gmra.mxu3 %v6733_v1  ;;  %v5985_v53 = vsel %vm13699_vm14, %v5936_v55, 0.0  ;;  %v8538_v49 = vld [vmem:[#allocation3 + $0x9d] sm:$0xff] }
 0x4a9   : > { %v7758_v42 = vadd.f32 %v13697_v16, %v7594_v5  ;;  %v13701_v5 = vld [vmem:[#allocation46_spill] sm:$0xff] }
 0x4aa   : > { %v7268_v31 = vpop.f32.mrf.mxu3  ;;  %vm13702_vm1 = vcmp.ne.s32.totalorder %v13701_v5, 27 }
 0x4ab   : > { %7902 = vst [vmem:[%s8621_s18 + $0x8] sm:$0xff] %v7758_v42  ;;  %v7269_v54 = vadd.f32 %v7268_v31, %v13698_v4  ;;  %v12665_v1 = vpop.f32.mrf.mxu0  ;;  %v5656_v16 = vsel %vm13702_vm1, %v8538_v49, 0.0  ;;  %v6860_v42 = vsel %vm3559_vm7, %v5985_v53, %v8461_v18  ;;  %8162 = vmatmul.msk.f32.gmra.mxu2 %vm3559_vm7, %v6048_v39  ;;  %v5806_v31 = vld [vmem:[#allocation3 + $0xd0] sm:$0xff]  ;;  %v12674_v4 = vpop.f32.mrf.mxu1  ;;  %v13704_v49 = vld [vmem:[#allocation88_spill] sm:$0xff]  ;;  %v8290_v18 = vunpack.i.l.bf16 %v12463_v12 }
 0x4ac   : > { %v6734_v55 = vsel %vm3559_vm7, %v5656_v16, %v8285_v30  ;;  %v6786_v24 = vsel %vm3559_vm7, %v5806_v31, %v8331_v43  ;;  %v8336_v53 = vunpack.i.h.bf16 %v12678_v2  ;;  %v13706_v31 = vld [vmem:[#allocation49_spill] sm:$0xff] }
 0x4ad   : > { %v7433_v46 = vadd.f32 %v12573_v58, %v7269_v54  ;;  %v13703_v58 = vld [vmem:[#allocation87_spill] sm:$0xff]  ;;  %vm13707_vm14 = vcmp.ne.s32.totalorder %v13706_v31, 27 }
 0x4ae   : > { %7730 = vmatmul.f32.gmra.mxu1 %v6860_v42  ;;  %7491 = vmatmul.f32.gmra.mxu0 %v6786_v24  ;;  %v8539_v42 = vld [vmem:[#allocation3 + $0xa5] sm:$0xff] }
 0x4af   : > { %v7597_v54 = vadd.f32 %v13703_v58, %v7433_v46  ;;  %7318 = vmatmul.f32.gmra.mxu3 %v6734_v55  ;;  %v5657_v46 = vsel %vm13707_vm14, %v8539_v42, 0.0  ;;  %v5807_v55 = vld [vmem:[#allocation3 + $0xd8] sm:$0xff]  ;;  %v13708_v58 = vld [vmem:[#allocation92_spill] sm:$0xff] }
 0x4b0   : > { %v6735_v24 = vsel %vm3559_vm7, %v5657_v46, %v8290_v18  ;;  %v6787_v12 = vsel %vm3559_vm7, %v5807_v55, %v8336_v53  ;;  %v8540_v53 = vld [vmem:[#allocation3 + $0xad] sm:$0xff]  ;;  %v13711_v46 = vld [vmem:[#allocation51_spill] sm:$0xff] }
 0x4b1   : > { %v7761_v5 = vadd.f32 %v13704_v49, %v7597_v54  ;;  %v13709_v49 = vld [vmem:[#allocation93_spill] sm:$0xff]  ;;  %vm13712_vm10 = vcmp.ne.s32.totalorder %v13711_v46, 27  ;;  %v5808_v55 = vld [vmem:[#allocation3 + $0xe0] sm:$0xff]  ;;  %v13716_v46 = vld [vmem:[#allocation54_spill] sm:$0xff] }
 0x4b2   : > { %v7271_v39 = vpop.f32.mrf.mxu3  ;;  %vm13717_vm1 = vcmp.ne.s32.totalorder %v13716_v46, 27  ;;  %v13721_v46 = vld [vmem:[#allocation57_spill] sm:$0xff] }
 0x4b3   : > { %7903 = vst [vmem:[%s8621_s18 + $0x10] sm:$0xff] %v7761_v5  ;;  %v7272_v30 = vadd.f32 %v7271_v39, %v13705_v26  ;;  %v12686_v16 = vpop.f32.mrf.mxu0  ;;  %v8295_v26 = vunpack.i.l.bf16 %v12269_v7  ;;  %v8341_v39 = vunpack.i.h.bf16 %v12376_v38  ;;  %vm13722_vm14 = vcmp.ne.s32.totalorder %v13721_v46, 27 }
 0x4b4   : > { %v8315_v46 = vunpack.i.l.bf16 %v12329_v13 }
 0x4b5   : > { %v7436_v43 = vadd.f32 %v12596_v62, %v7272_v30  ;;  %v13710_v30 = vld [vmem:[#allocation48_spill] sm:$0xff]  ;;  %v6788_v7 = vsel %vm3559_vm7, %v5808_v55, %v8341_v39  ;;  %v8541_v39 = vld [vmem:[#allocation3 + $0xb5] sm:$0xff] }
 0x4b6   : > { %7494 = vmatmul.f32.gmra.mxu0 %v6787_v12  ;;  %v13713_v12 = vld [vmem:[#allocation96_spill] sm:$0xff] }
 0x4b7   : > { %v7600_v54 = vadd.f32 %v13708_v58, %v7436_v43  ;;  %7321 = vmatmul.f32.gmra.mxu3 %v6735_v24  ;;  %v5658_v43 = vsel %vm13712_vm10, %v8540_v53, 0.0 }
 0x4b8   : > { %v6736_v24 = vsel %vm3559_vm7, %v5658_v43, %v8295_v26  ;;  %v5809_v43 = vld [vmem:[#allocation3 + $0xe8] sm:$0xff] }
 0x4b9   : > { %v7764_v5 = vadd.f32 %v13709_v49, %v7600_v54  ;;  %v13714_v54 = vld [vmem:[#allocation97_spill] sm:$0xff] }
 0x4ba   : > { %v7274_v62 = vpop.f32.mrf.mxu3 }
 0x4bb   : > { %7904 = vst [vmem:[%s8621_s18 + $0x18] sm:$0xff] %v7764_v5  ;;  %v7275_v42 = vadd.f32 %v7274_v62, %v13710_v30  ;;  %v12699_v31 = vpop.f32.mrf.mxu0  ;;  %v8300_v5 = vunpack.i.l.bf16 %v12284_v44  ;;  %v8346_v62 = vunpack.i.h.bf16 %v12385_v52  ;;  %v13715_v30 = vld [vmem:[#allocation50_spill] sm:$0xff] }
 0x4bd   : > { %v7439_v18 = vadd.f32 %v12620_v21, %v7275_v42  ;;  %v6789_v44 = vsel %vm3559_vm7, %v5809_v43, %v8346_v62 }
 0x4be   : > { %7497 = vmatmul.f32.gmra.mxu0 %v6788_v7  ;;  %v13718_v7 = vld [vmem:[#allocation65_spill] sm:$0xff] }
 0x4bf   : > { %v7603_v58 = vadd.f32 %v13713_v12, %v7439_v18  ;;  %7324 = vmatmul.f32.gmra.mxu3 %v6736_v24  ;;  %v5659_v18 = vsel %vm13717_vm1, %v8541_v39, 0.0  ;;  %v12719_v24 = vpop.permute.xlu0 %8348  ;;  %v8542_v39 = vld [vmem:[#allocation3 + $0xbd] sm:$0xff]  ;;  %vm13727_vm1 = vcmp.ne.s32.totalorder %v11026_v50, 27  ;;  %v13728_v50 = vld [vmem:[#allocation56_spill] sm:$0xff] }
 0x4c0   : > { %v6737_v55 = vsel %vm3559_vm7, %v5659_v18, %v8300_v5  ;;  %v5810_v18 = vld [vmem:[#allocation3 + $0xf0] sm:$0xff] }
 0x4c1   : > { %v7767_v49 = vadd.f32 %v13714_v54, %v7603_v58  ;;  %v13719_v58 = vld [vmem:[#allocation37_spill] sm:$0xff] }
 0x4c2   : > { %v7277_v21 = vpop.f32.mrf.mxu3 }
 0x4c3   : > { %7905 = vst [vmem:[%s8621_s18 + $0x20] sm:$0xff] %v7767_v49  ;;  %v7278_v42 = vadd.f32 %v7277_v21, %v13715_v30  ;;  %v12712_v53 = vpop.f32.mrf.mxu0  ;;  %v8305_v49 = vunpack.i.l.bf16 %v12539_v48  ;;  %v13720_v30 = vld [vmem:[#allocation52_spill] sm:$0xff] }
 0x4c5   : > { %v7442_v26 = vadd.f32 %v12643_v19, %v7278_v42  ;;  %v8351_v19 = vunpack.i.h.bf16 %v12719_v24 }
 0x4c6   : > { %7500 = vmatmul.f32.gmra.mxu0 %v6789_v44 }
 0x4c7   : > { %v7606_v12 = vadd.f32 %v13718_v7, %v7442_v26  ;;  %7327 = vmatmul.f32.gmra.mxu3 %v6737_v55  ;;  %v5660_v26 = vsel %vm13722_vm14, %v8542_v39, 0.0  ;;  %v6790_v48 = vsel %vm3559_vm7, %v5810_v18, %v8351_v19  ;;  %v8310_v7 = vunpack.i.l.bf16 %v12308_v20  ;;  %v8543_v19 = vld [vmem:[#allocation3 + $0xc5] sm:$0xff] }
 0x4c8   : > { %v6738_v43 = vsel %vm3559_vm7, %v5660_v26, %v8305_v49  ;;  %v8361_v26 = vunpack.i.h.bf16 %v12412_v45  ;;  %v13726_v18 = vld [vmem:[#allocation55_spill] sm:$0xff]  ;;  %vm13729_vm14 = vcmp.ne.s32.totalorder %v11063_v6, 27 }
 0x4c9   : > { %v7770_v54 = vadd.f32 %v13719_v58, %v7606_v12  ;;  %v8356_v12 = vunpack.i.h.bf16 %v12402_v47  ;;  %v13723_v58 = vld [vmem:[#allocation53_spill] sm:$0xff] }
 0x4ca   : > { %v7280_v21 = vpop.f32.mrf.mxu3 }
 0x4cb   : > { %7906 = vst [vmem:[%s8621_s18 + $0x28] sm:$0xff] %v7770_v54  ;;  %v7281_v42 = vadd.f32 %v7280_v21, %v13720_v30  ;;  %v12727_v5 = vpop.f32.mrf.mxu0  ;;  %v13724_v30 = vld [vmem:[#allocation59_spill] sm:$0xff] }
 0x4cc   : > { %vm13725_vm10 = vcmp.ne.s32.totalorder %v13724_v30, 27 }
 0x4cd   : > { %v7445_v62 = vadd.f32 %v12665_v1, %v7281_v42  ;;  %v5811_v42 = vld [vmem:[#allocation3 + $0xf8] sm:$0xff] }
 0x4ce   : > { %7503 = vmatmul.f32.gmra.mxu0 %v6790_v48  ;;  %v6791_v20 = vsel %vm3559_vm7, %v5811_v42, %v8356_v12  ;;  %v12760_v12 = vpop.permute.xlu0 %8363  ;;  %v8545_v42 = vld [vmem:[#allocation3 + $0xd5] sm:$0xff] }
 0x4cf   : > { %v7609_v55 = vadd.f32 %v12107_v8, %v7445_v62  ;;  %7330 = vmatmul.f32.gmra.mxu3 %v6738_v43  ;;  %v5661_v8 = vsel %vm13725_vm10, %v8543_v19, 0.0  ;;  %vm13731_vm10 = vcmp.ne.s32.totalorder %v11092_v60, 27 }
 0x4d1   : > { %v7773_v44 = vadd.f32 %v12109_v51, %v7609_v55  ;;  %v6739_v51 = vsel %vm3559_vm7, %v5661_v8, %v8310_v7  ;;  %v5812_v7 = vld [vmem:[#allocation3 + $0x100] sm:$0xff] }
 0x4d2   : > { %v7283_v1 = vpop.f32.mrf.mxu3  ;;  %v6792_v13 = vsel %vm3559_vm7, %v5812_v7, %v8361_v26  ;;  %v13730_v26 = vld [vmem:[#allocation58_spill] sm:$0xff]  ;;  %v8330_v7 = vunpack.i.l.bf16 %v12360_v9 }
 0x4d3   : > { %7907 = vst [vmem:[%s8621_s18 + $0x30] sm:$0xff] %v7773_v44  ;;  %v7284_v54 = vadd.f32 %v7283_v1, %v13723_v58  ;;  %v12740_v21 = vpop.f32.mrf.mxu0  ;;  %v8544_v44 = vld [vmem:[#allocation3 + $0xcd] sm:$0xff] }
 0x4d5   : > { %v7448_v49 = vadd.f32 %v12686_v16, %v7284_v54  ;;  %v8320_v54 = vunpack.i.l.bf16 %v12606_v34 }
 0x4d6   : > { %7506 = vmatmul.f32.gmra.mxu0 %v6791_v20 }
 0x4d7   : > { %v7612_v62 = vadd.f32 %v12154_v17, %v7448_v49  ;;  %7333 = vmatmul.f32.gmra.mxu3 %v6739_v51  ;;  %v5662_v17 = vsel %vm13727_vm1, %v8544_v44, 0.0  ;;  %v5813_v51 = vld [vmem:[#allocation3 + $0x108] sm:$0xff] }
 0x4d9   : > { %v7776_v39 = vadd.f32 %v12156_v41, %v7612_v62  ;;  %v6740_v41 = vsel %vm3559_vm7, %v5662_v17, %v8315_v46  ;;  %v8371_v46 = vunpack.i.h.bf16 %v12427_v23 }
 0x4da   : > { %v7286_v16 = vpop.f32.mrf.mxu3 }
 0x4db   : > { %7908 = vst [vmem:[%s8621_s18 + $0x38] sm:$0xff] %v7776_v39  ;;  %v7287_v43 = vadd.f32 %v7286_v16, %v13726_v18  ;;  %v12753_v48 = vpop.f32.mrf.mxu0  ;;  %v8325_v39 = vunpack.i.l.bf16 %v12344_v15 }
 0x4dd   : > { %v7451_v55 = vadd.f32 %v12699_v31, %v7287_v43  ;;  %v8366_v31 = vunpack.i.h.bf16 %v12760_v12  ;;  %v8546_v43 = vld [vmem:[#allocation3 + $0xdd] sm:$0xff] }
 0x4de   : > { %7509 = vmatmul.f32.gmra.mxu0 %v6792_v13  ;;  %v13732_v13 = vld [vmem:[#allocation60_spill] sm:$0xff] }
 0x4df   : > { %v7615_v1 = vadd.f32 %v12193_v40, %v7451_v55  ;;  %7336 = vmatmul.f32.gmra.mxu3 %v6740_v41  ;;  %v5663_v40 = vsel %vm13729_vm14, %v8545_v42, 0.0  ;;  %v6793_v34 = vsel %vm3559_vm7, %v5813_v51, %v8366_v31  ;;  %v5814_v55 = vld [vmem:[#allocation3 + $0x110] sm:$0xff]  ;;  %v8376_v41 = vunpack.i.h.bf16 %v12443_v56  ;;  %v13733_v31 = vld [vmem:[#allocation6_spill] sm:$0xff] }
 0x4e0   : > { %v6794_v15 = vsel %vm3559_vm7, %v5814_v55, %v8371_v46  ;;  %vm13734_vm1 = vcmp.ne.s32.totalorder %v13733_v31, 27  ;;  %v8345_v31 = vunpack.i.l.bf16 %v12385_v52 }
 0x4e1   : > { %v7779_v58 = vadd.f32 %v12195_v57, %v7615_v1  ;;  %v6741_v57 = vsel %vm3559_vm7, %v5663_v40, %v8320_v54  ;;  %v8547_v54 = vld [vmem:[#allocation3 + $0xe5] sm:$0xff]  ;;  %v8335_v40 = vunpack.i.l.bf16 %v12678_v2 }
 0x4e2   : > { %v7289_v49 = vpop.f32.mrf.mxu3 }
 0x4e3   : > { %7909 = vst [vmem:[%s8621_s18 + $0x40] sm:$0xff] %v7779_v58  ;;  %v7290_v19 = vadd.f32 %v7289_v49, %v13728_v50  ;;  %v12768_v30 = vpop.f32.mrf.mxu0  ;;  %v5815_v49 = vld [vmem:[#allocation3 + $0x118] sm:$0xff]  ;;  %v12801_v50 = vpop.permute.xlu0 %8378 }
 0x4e4   : > { %v6795_v9 = vsel %vm3559_vm7, %v5815_v49, %v8376_v41  ;;  %v13743_v49 = vld [vmem:[#allocation7_spill] sm:$0xff]  ;;  %v13750_v41 = vld [vmem:[#allocation90_spill] sm:$0xff] }
 0x4e5   : > { %v7454_v8 = vadd.f32 %v12712_v53, %v7290_v19 }
 0x4e6   : > { %7512 = vmatmul.f32.gmra.mxu0 %v6793_v34 }
 0x4e7   : > { %v7618_v20 = vadd.f32 %v12239_v37, %v7454_v8  ;;  %7339 = vmatmul.f32.gmra.mxu3 %v6741_v57  ;;  %v5664_v37 = vsel %vm13731_vm10, %v8546_v43, 0.0  ;;  %v13735_v8 = vld [vmem:[#allocation4_spill] sm:$0xff]  ;;  %v13736_v57 = vld [vmem:[#allocation61_spill] sm:$0xff]  ;;  %v8340_v43 = vunpack.i.l.bf16 %v12376_v38 }
 0x4e9   : > { %v7782_v62 = vadd.f32 %v12241_v61, %v7618_v20  ;;  %v6742_v61 = vsel %vm3559_vm7, %v5664_v37, %v8325_v39  ;;  %v8548_v39 = vld [vmem:[#allocation3 + $0xed] sm:$0xff] }
 0x4ea   : > { %v7292_v53 = vpop.f32.mrf.mxu3  ;;  %v13738_v37 = vld [vmem:[#allocation28_spill] sm:$0xff] }
 0x4eb   : > { %7910 = vst [vmem:[%s8621_s18 + $0x48] sm:$0xff] %v7782_v62  ;;  %v7293_v6 = vadd.f32 %v7292_v53, %v13730_v26  ;;  %v12781_v16 = vpop.f32.mrf.mxu0  ;;  %v5816_v53 = vld [vmem:[#allocation3 + $0x120] sm:$0xff]  ;;  %v8386_v55 = vunpack.i.h.bf16 %v13738_v37 }
 0x4ed   : > { %v7457_v18 = vadd.f32 %v12727_v5, %v7293_v6 }
 0x4ee   : > { %7515 = vmatmul.f32.gmra.mxu0 %v6794_v15 }
 0x4ef   : > { %v7621_v44 = vadd.f32 %v12278_v32, %v7457_v18  ;;  %7342 = vmatmul.f32.gmra.mxu3 %v6742_v61  ;;  %v5665_v32 = vsel %vm13734_vm1, %v8547_v54, 0.0  ;;  %v13739_v61 = vld [vmem:[#allocation5_spill] sm:$0xff] }
 0x4f1   : > { %v7785_v17 = vadd.f32 %v12280_v22, %v7621_v44  ;;  %v6743_v22 = vsel %vm3559_vm7, %v5665_v32, %v8330_v7  ;;  %v8549_v7 = vld [vmem:[#allocation3 + $0xf5] sm:$0xff]  ;;  %v8391_v32 = vunpack.i.h.bf16 %v12471_v14 }
 0x4f2   : > { %v7295_v5 = vpop.f32.mrf.mxu3 }
 0x4f3   : > { %7911 = vst [vmem:[%s8621_s18 + $0x50] sm:$0xff] %v7785_v17  ;;  %v7296_v60 = vadd.f32 %v7295_v5, %v13732_v13  ;;  %v12794_v1 = vpop.f32.mrf.mxu0  ;;  %v5817_v5 = vld [vmem:[#allocation3 + $0x128] sm:$0xff]  ;;  %v13741_v13 = vld [vmem:[#allocation22_spill] sm:$0xff] }
 0x4f4   : > { %v6797_v38 = vsel %vm3559_vm7, %v5817_v5, %v8386_v55  ;;  %v8355_v5 = vunpack.i.l.bf16 %v12402_v47  ;;  %v8365_v55 = vunpack.i.l.bf16 %v12760_v12 }
 0x4f5   : > { %v7460_v58 = vadd.f32 %v12740_v21, %v7296_v60  ;;  %v8381_v21 = vunpack.i.h.bf16 %v12801_v50 }
 0x4f6   : > { %7518 = vmatmul.f32.gmra.mxu0 %v6795_v9 }
 0x4f7   : > { %v7624_v19 = vadd.f32 %v12322_v3, %v7460_v58  ;;  %7345 = vmatmul.f32.gmra.mxu3 %v6743_v22  ;;  %v5666_v3 = vsel %vm5229_vm6, %v8548_v39, 0.0  ;;  %v6796_v2 = vsel %vm3559_vm7, %v5816_v53, %v8381_v21  ;;  %v13742_v58 = vld [vmem:[#allocation105_spill] sm:$0xff]  ;;  %v13746_v39 = vld [vmem:[#allocation107_spill] sm:$0xff] }
 0x4f8   : > { %v6744_v26 = vsel %vm3559_vm7, %v5666_v3, %v8335_v40  ;;  %v5818_v21 = vld [vmem:[#allocation3 + $0x130] sm:$0xff]  ;;  %v8350_v3 = vunpack.i.l.bf16 %v12719_v24 }
 0x4f9   : > { %v7788_v42 = vadd.f32 %v13735_v8, %v7624_v19  ;;  %v8550_v8 = vld [vmem:[#allocation3 + $0xfd] sm:$0xff]  ;;  %v6798_v52 = vsel %vm3559_vm7, %v5818_v21, %v8391_v32  ;;  %v8406_v21 = vunpack.i.h.bf16 %v12497_v63 }
 0x4fa   : > { %v7298_v51 = vpop.f32.mrf.mxu3  ;;  %v5668_v40 = vsel %vm5231_vm3, %v8550_v8, 0.0  ;;  %v13755_v8 = vld [vmem:[#allocation91_spill] sm:$0xff] }
 0x4fb   : > { %7912 = vst [vmem:[%s8621_s18 + $0x58] sm:$0xff] %v7788_v42  ;;  %v7299_v34 = vadd.f32 %v7298_v51, %v13736_v57  ;;  %v12809_v20 = vpop.f32.mrf.mxu0  ;;  %v6746_v51 = vsel %vm3559_vm7, %v5668_v40, %v8345_v31  ;;  %v12842_v57 = vpop.permute.xlu0 %8393  ;;  %v13752_v31 = vld [vmem:[#allocation12_spill] sm:$0xff]  ;;  %v8360_v40 = vunpack.i.l.bf16 %v12412_v45 }
 0x4fc   : > { %vm13753_vm6 = vcmp.ne.s32.totalorder %v13752_v31, 27  ;;  %v13762_v31 = vld [vmem:[#allocation69_spill] sm:$0xff] }
 0x4fd   : > { %v7463_v62 = vadd.f32 %v12753_v48, %v7299_v34  ;;  %v13745_v34 = vld [vmem:[#allocation24_spill] sm:$0xff] }
 0x4fe   : > { %7521 = vmatmul.f32.gmra.mxu0 %v6796_v2 }
 0x4ff   : > { %v7627_v6 = vadd.f32 %v12356_v25, %v7463_v62  ;;  %7348 = vmatmul.f32.gmra.mxu3 %v6744_v26  ;;  %v5667_v25 = vsel %vm5230_vm4, %v8549_v7, 0.0  ;;  %v13747_v26 = vld [vmem:[#allocation8_spill] sm:$0xff] }
 0x501   : > { %v7791_v18 = vadd.f32 %v12358_v27, %v7627_v6  ;;  %v6745_v27 = vsel %vm3559_vm7, %v5667_v25, %v8340_v43  ;;  %v8551_v43 = vld [vmem:[#allocation3 + $0x105] sm:$0xff] }
 0x502   : > { %v7301_v48 = vpop.f32.mrf.mxu3 }
 0x503   : > { %7913 = vst [vmem:[%s8621_s18 + $0x60] sm:$0xff] %v7791_v18  ;;  %v7302_v15 = vadd.f32 %v7301_v48, %v13739_v61  ;;  %v12822_v44 = vpop.f32.mrf.mxu0  ;;  %v5669_v48 = vsel %vm5232_vm2, %v8551_v43, 0.0  ;;  %v5819_v61 = vld [vmem:[#allocation3 + $0x138] sm:$0xff] }
 0x505   : > { %v7466_v17 = vadd.f32 %v12768_v30, %v7302_v15  ;;  %v6747_v15 = vsel %vm3559_vm7, %v5669_v48, %v8350_v3 }
 0x506   : > { %7524 = vmatmul.f32.gmra.mxu0 %v6797_v38  ;;  %v13751_v38 = vld [vmem:[#allocation9_spill] sm:$0xff] }
 0x507   : > { %v7630_v60 = vadd.f32 %v13741_v13, %v7466_v17  ;;  %7351 = vmatmul.f32.gmra.mxu3 %v6745_v27  ;;  %v13749_v17 = vld [vmem:[#allocation27_spill] sm:$0xff]  ;;  %v8401_v27 = vunpack.i.h.bf16 %v12488_v0 }
 0x509   : > { %v7794_v54 = vadd.f32 %v13742_v58, %v7630_v60 }
 0x50a   : > { %v7304_v30 = vpop.f32.mrf.mxu3 }
 0x50b   : > { %7914 = vst [vmem:[%s8621_s18 + $0x68] sm:$0xff] %v7794_v54  ;;  %v7305_v22 = vadd.f32 %v7304_v30, %v13743_v49  ;;  %v12835_v9 = vpop.f32.mrf.mxu0  ;;  %v8552_v54 = vld [vmem:[#allocation3 + $0x10d] sm:$0xff]  ;;  %v5820_v30 = vld [vmem:[#allocation3 + $0x140] sm:$0xff] }
 0x50c   : > { %v5670_v32 = vsel %vm13753_vm6, %v8552_v54, 0.0  ;;  %v6800_v47 = vsel %vm3559_vm7, %v5820_v30, %v8401_v27  ;;  %v12906_v30 = vpop.f32.mrf.mxu2 }
 0x50d   : > { %v7469_v19 = vadd.f32 %v12781_v16, %v7305_v22  ;;  %v8396_v16 = vunpack.i.h.bf16 %v12842_v57  ;;  %v6748_v49 = vsel %vm3559_vm7, %v5670_v32, %v8355_v5  ;;  %v13754_v22 = vld [vmem:[#allocation95_spill] sm:$0xff] }
 0x50e   : > { %7527 = vmatmul.f32.gmra.mxu0 %v6798_v52 }
 0x50f   : > { %v7633_v62 = vadd.f32 %v13745_v34, %v7469_v19  ;;  %7354 = vmatmul.f32.gmra.mxu3 %v6746_v51  ;;  %v6799_v24 = vsel %vm3559_vm7, %v5819_v61, %v8396_v16  ;;  %v13756_v51 = vld [vmem:[#allocation10_spill] sm:$0xff]  ;;  %v5821_v16 = vld [vmem:[#allocation3 + $0x148] sm:$0xff] }
 0x510   : > { %v6801_v45 = vsel %vm3559_vm7, %v5821_v16, %v8406_v21  ;;  %v13759_v61 = vld [vmem:[#allocation68_spill] sm:$0xff] }
 0x511   : > { %v7797_v46 = vadd.f32 %v13746_v39, %v7633_v62  ;;  %v8553_v39 = vld [vmem:[#allocation3 + $0x115] sm:$0xff] }
 0x512   : > { %v7307_v53 = vpop.f32.mrf.mxu3  ;;  %v5671_v3 = vsel %vm5234_vm8, %v8553_v39, 0.0 }
 0x513   : > { %7915 = vst [vmem:[%s8621_s18 + $0x70] sm:$0xff] %v7797_v46  ;;  %v7308_v2 = vadd.f32 %v7307_v53, %v13747_v26  ;;  %v12850_v6 = vpop.f32.mrf.mxu0  ;;  %v6749_v53 = vsel %vm3559_vm7, %v5671_v3, %v8360_v40  ;;  %v12883_v26 = vpop.permute.xlu0 %8408  ;;  %v13765_v40 = vld [vmem:[#allocation109_spill] sm:$0xff] }
 0x515   : > { %v7472_v18 = vadd.f32 %v12794_v1, %v7308_v2 }
 0x516   : > { %7530 = vmatmul.f32.gmra.mxu0 %v6799_v24 }
 0x517   : > { %v7636_v7 = vadd.f32 %v13749_v17, %v7472_v18  ;;  %7357 = vmatmul.f32.gmra.mxu3 %v6747_v15  ;;  %v13758_v18 = vld [vmem:[#allocation99_spill] sm:$0xff] }
 0x519   : > { %v7800_v25 = vadd.f32 %v13750_v41, %v7636_v7  ;;  %v8554_v7 = vld [vmem:[#allocation3 + $0x11d] sm:$0xff] }
 0x51a   : > { %v7310_v1 = vpop.f32.mrf.mxu3  ;;  %v13771_v41 = vld [vmem:[#allocation15_spill] sm:$0xff] }
 0x51b   : > { %7916 = vst [vmem:[%s8621_s18 + $0x78] sm:$0xff] %v7800_v25  ;;  %v7311_v13 = vadd.f32 %v7310_v1, %v13751_v38  ;;  %v12863_v60 = vpop.f32.mrf.mxu0  ;;  %v5822_v25 = vld [vmem:[#allocation3 + $0x150] sm:$0xff]  ;;  %v8370_v38 = vunpack.i.l.bf16 %v12427_v23  ;;  %v5823_v23 = vld [vmem:[#allocation3 + $0x158] sm:$0xff] }
 0x51d   : > { %v7475_v58 = vadd.f32 %v12809_v20, %v7311_v13  ;;  %v13761_v13 = vld [vmem:[#allocation32_spill] sm:$0xff] }
 0x51e   : > { %7533 = vmatmul.f32.gmra.mxu0 %v6800_v47  ;;  %v8555_v47 = vld [vmem:[#allocation3 + $0x125] sm:$0xff] }
 0x51f   : > { %v7639_v19 = vadd.f32 %v13754_v22, %v7475_v58  ;;  %7360 = vmatmul.f32.gmra.mxu3 %v6748_v49  ;;  %v8416_v58 = vunpack.i.h.bf16 %v13761_v13  ;;  %v13763_v22 = vld [vmem:[#allocation17_spill] sm:$0xff] }
 0x520   : > { %vm13764_vm4 = vcmp.ne.s32.totalorder %v13763_v22, 27 }
 0x521   : > { %v7803_v42 = vadd.f32 %v13755_v8, %v7639_v19  ;;  %v6803_v8 = vsel %vm3559_vm7, %v5823_v23, %v8416_v58 }
 0x522   : > { %v7313_v20 = vpop.f32.mrf.mxu3 }
 0x523   : > { %7917 = vst [vmem:[%s8621_s18 + $0x80] sm:$0xff] %v7803_v42  ;;  %v7314_v52 = vadd.f32 %v7313_v20, %v13756_v51  ;;  %v12876_v34 = vpop.f32.mrf.mxu0  ;;  %v8375_v20 = vunpack.i.l.bf16 %v12443_v56  ;;  %v13766_v51 = vld [vmem:[#allocation35_spill] sm:$0xff] }
 0x525   : > { %v7478_v62 = vadd.f32 %v12822_v44, %v7314_v52  ;;  %v8411_v44 = vunpack.i.h.bf16 %v12883_v26  ;;  %v8421_v52 = vunpack.i.h.bf16 %v13766_v51 }
 0x526   : > { %7536 = vmatmul.f32.gmra.mxu0 %v6801_v45 }
 0x527   : > { %v7642_v2 = vadd.f32 %v12491_v28, %v7478_v62  ;;  %7363 = vmatmul.f32.gmra.mxu3 %v6749_v53  ;;  %v5672_v28 = vsel %vm5235_vm11, %v8554_v7, 0.0  ;;  %v6802_v12 = vsel %vm3559_vm7, %v5822_v25, %v8411_v44  ;;  %v13767_v62 = vld [vmem:[#allocation71_spill] sm:$0xff]  ;;  %v13769_v44 = vld [vmem:[#allocation112_spill] sm:$0xff] }
 0x528   : > { %v6750_v5 = vsel %vm3559_vm7, %v5672_v28, %v8365_v55  ;;  %v12932_v55 = vpop.permute.xlu0 %8423 }
 0x529   : > { %v7806_v43 = vadd.f32 %v13758_v18, %v7642_v2  ;;  %v5824_v2 = vld [vmem:[#allocation3 + $0x160] sm:$0xff]  ;;  %v12928_v18 = vpop.f32.mrf.mxu2 }
 0x52a   : > { %v7316_v48 = vpop.f32.mrf.mxu3 }
 0x52b   : > { %7918 = vst [vmem:[%s8621_s18 + $0x88] sm:$0xff] %v7806_v43  ;;  %v7317_v15 = vadd.f32 %v7316_v48, %v13759_v61  ;;  %v12891_v24 = vpop.f32.mrf.mxu0  ;;  %v6804_v43 = vsel %vm3559_vm7, %v5824_v2, %v8421_v52  ;;  %v13770_v61 = vld [vmem:[#allocation111_spill] sm:$0xff] }
 0x52c   : > { %v13777_v52 = vld [vmem:[#allocation75_spill] sm:$0xff] }
 0x52d   : > { %v7481_v17 = vadd.f32 %v12835_v9, %v7317_v15  ;;  %v12902_v9 = vpop.f32.mrf.mxu1  ;;  %vm13778_vm2 = vcmp.ne.s32.totalorder %v13777_v52, 27 }
 0x52e   : > { %7539 = vmatmul.f32.gmra.mxu0 %v6802_v12  ;;  %v8557_v12 = vld [vmem:[#allocation3 + $0x135] sm:$0xff] }
 0x52f   : > { %v7645_v27 = vadd.f32 %v12517_v29, %v7481_v17  ;;  %7366 = vmatmul.f32.gmra.mxu3 %v6750_v5  ;;  %v8426_v17 = vunpack.i.h.bf16 %v12932_v55 }
 0x531   : > { %v7809_v1 = vadd.f32 %v12519_v59, %v7645_v27  ;;  %v5673_v59 = vsel %vm13764_vm4, %v8555_v47, 0.0  ;;  %v13774_v47 = vld [vmem:[#allocation114_spill] sm:$0xff] }
 0x532   : > { %v7319_v54 = vpop.f32.mrf.mxu3  ;;  %v6751_v19 = vsel %vm3559_vm7, %v5673_v59, %v8370_v38  ;;  %v5825_v38 = vld [vmem:[#allocation3 + $0x168] sm:$0xff]  ;;  %v13775_v59 = vld [vmem:[#allocation38_spill] sm:$0xff] }
 0x533   : > { %7919 = vst [vmem:[%s8621_s18 + $0x90] sm:$0xff] %v7809_v1  ;;  %v7320_v32 = vadd.f32 %v7319_v54, %v13762_v31  ;;  %v12908_v49 = vpop.f32.mrf.mxu0  ;;  %v5675_v1 = vsel %vm5238_vm15, %v8557_v12, 0.0  ;;  %v6805_v54 = vsel %vm3559_vm7, %v5825_v38, %v8426_v17  ;;  %v13773_v31 = vld [vmem:[#allocation115_spill] sm:$0xff]  ;;  %v8435_v23 = vunpack.i.l.bf16 %v13775_v59  ;;  %v13782_v12 = vld [vmem:[#allocation40_spill] sm:$0xff]  ;;  %v13783_v38 = vld [vmem:[#allocation21_spill] sm:$0xff] }
 0x534   : > { %v8450_v27 = vunpack.i.l.bf16 %v13782_v12  ;;  %v13790_v12 = vld [vmem:[#allocation26_spill] sm:$0xff] }
 0x535   : > { %v7484_v29 = vadd.f32 %v12850_v6, %v7320_v32  ;;  %v12921_v46 = vpop.f32.mrf.mxu1 }
 0x536   : > { %7542 = vmatmul.f32.gmra.mxu0 %v6803_v8  ;;  %v13776_v8 = vld [vmem:[#allocation72_spill] sm:$0xff] }
 0x537   : > { %v7648_v42 = vadd.f32 %v12558_v33, %v7484_v29  ;;  %7369 = vmatmul.f32.gmra.mxu3 %v6751_v19  ;;  %v8556_v33 = vld [vmem:[#allocation3 + $0x12d] sm:$0xff]  ;;  %v12950_v29 = vpop.f32.mrf.mxu2 }
 0x538   : > { %v5674_v45 = vsel %vm5237_vm0, %v8556_v33, 0.0 }
 0x539   : > { %v7812_v21 = vadd.f32 %v13765_v40, %v7648_v42  ;;  %v6752_v56 = vsel %vm3559_vm7, %v5674_v45, %v8375_v20  ;;  %v8558_v20 = vld [vmem:[#allocation3 + $0x13d] sm:$0xff]  ;;  %v8390_v45 = vunpack.i.l.bf16 %v12471_v14 }
 0x53a   : > { %v7322_v6 = vpop.f32.mrf.mxu3 }
 0x53b   : > { %7920 = vst [vmem:[%s8621_s18 + $0x98] sm:$0xff] %v7812_v21  ;;  %v7323_v39 = vadd.f32 %v7322_v6, %v13767_v62  ;;  %v12923_v3 = vpop.f32.mrf.mxu0  ;;  %v5676_v6 = vsel %vm13778_vm2, %v8558_v20, 0.0  ;;  %v5826_v62 = vld [vmem:[#allocation3 + $0x170] sm:$0xff] }
 0x53d   : > { %v7487_v16 = vadd.f32 %v12863_v60, %v7323_v39  ;;  %v8380_v60 = vunpack.i.l.bf16 %v12801_v50  ;;  %v12945_v58 = vpop.f32.mrf.mxu1 }
 0x53e   : > { %7545 = vmatmul.f32.gmra.mxu0 %v6804_v43 }
 0x53f   : > { %v7651_v48 = vadd.f32 %v13769_v44, %v7487_v16  ;;  %7372 = vmatmul.f32.gmra.mxu3 %v6752_v56  ;;  %v6753_v50 = vsel %vm3559_vm7, %v5675_v1, %v8380_v60  ;;  %v12964_v16 = vpop.permute.xlu0 %8438  ;;  %v12972_v56 = vpop.f32.mrf.mxu2  ;;  %v13779_v44 = vld [vmem:[#allocation73_spill] sm:$0xff]  ;;  %v13780_v60 = vld [vmem:[#allocation76_spill] sm:$0xff] }
 0x540   : > { %v8441_v2 = vunpack.i.h.bf16 %v12964_v16  ;;  %vm13781_vm3 = vcmp.ne.s32.totalorder %v13780_v60, 27 }
 0x541   : > { %v7815_v15 = vadd.f32 %v13770_v61, %v7651_v48 }
 0x542   : > { %v7325_v7 = vpop.f32.mrf.mxu3 }
 0x543   : > { %7921 = vst [vmem:[%s8621_s18 + $0xa0] sm:$0xff] %v7815_v15  ;;  %v7326_v28 = vadd.f32 %v7325_v7, %v13771_v41  ;;  %v12940_v25 = vpop.f32.mrf.mxu0  ;;  %v8559_v15 = vld [vmem:[#allocation3 + $0x145] sm:$0xff] }
 0x544   : > { %v5677_v17 = vsel %vm13781_vm3, %v8559_v15, 0.0  ;;  %v5830_v15 = vld [vmem:[#allocation3 + $0x190] sm:$0xff] }
 0x545   : > { %v7490_v5 = vadd.f32 %v12876_v34, %v7326_v28  ;;  %v8385_v34 = vunpack.i.l.bf16 %v13738_v37  ;;  %v6806_v37 = vsel %vm3559_vm7, %v5826_v62, %v8435_v23  ;;  %v12967_v53 = vpop.f32.mrf.mxu1  ;;  %v6755_v14 = vsel %vm3559_vm7, %v5677_v17, %v8390_v45 }
 0x546   : > { %7548 = vmatmul.f32.gmra.mxu0 %v6805_v54 }
 0x547   : > { %v7654_v32 = vadd.f32 %v13773_v31, %v7490_v5  ;;  %7375 = vmatmul.f32.gmra.mxu3 %v6753_v50  ;;  %v6754_v39 = vsel %vm3559_vm7, %v5676_v6, %v8385_v34  ;;  %v8395_v5 = vunpack.i.l.bf16 %v12842_v57  ;;  %v12991_v54 = vpop.f32.mrf.mxu2  ;;  %v5828_v57 = vld [vmem:[#allocation3 + $0x180] sm:$0xff]  ;;  %v13000_v59 = vpop.permute.xlu0 %8453 }
 0x548   : > { %v6808_v34 = vsel %vm3559_vm7, %v5828_v57, %v8450_v27 }
 0x549   : > { %v7818_v22 = vadd.f32 %v13774_v47, %v7654_v32  ;;  %v8560_v32 = vld [vmem:[#allocation3 + $0x14d] sm:$0xff] }
 0x54a   : > { %v7328_v19 = vpop.f32.mrf.mxu3 }
 0x54b   : > { %7922 = vst [vmem:[%s8621_s18 + $0xa8] sm:$0xff] %v7818_v22  ;;  %v7329_v42 = vadd.f32 %v7328_v19, %v13776_v8  ;;  %v12957_v40 = vpop.f32.mrf.mxu0  ;;  %v8400_v8 = vunpack.i.l.bf16 %v12488_v0 }
 0x54d   : > { %v7493_v21 = vadd.f32 %v12891_v24, %v7329_v42 }
 0x54e   : > { %7551 = vmatmul.f32.gmra.mxu0 %v6806_v37 }
 0x54f   : > { %v7657_v33 = vadd.f32 %v12637_v35, %v7493_v21  ;;  %7378 = vmatmul.f32.gmra.mxu3 %v6754_v39  ;;  %v13785_v21 = vld [vmem:[#allocation23_spill] sm:$0xff]  ;;  %v8561_v39 = vld [vmem:[#allocation3 + $0x155] sm:$0xff] }
 0x550   : > { %v5679_v37 = vsel %vm5242_vm13, %v8561_v39, 0.0  ;;  %v13795_v39 = vld [vmem:[#allocation85_spill] sm:$0xff] }
 0x551   : > { %v7821_v24 = vadd.f32 %v12633_v36, %v7657_v33  ;;  %v5827_v36 = vld [vmem:[#allocation3 + $0x178] sm:$0xff]  ;;  %v5829_v33 = vld [vmem:[#allocation3 + $0x188] sm:$0xff]  ;;  %v6757_v0 = vsel %vm3559_vm7, %v5679_v37, %v8400_v8 }
 0x552   : > { %v7331_v43 = vpop.f32.mrf.mxu3  ;;  %v6807_v7 = vsel %vm3559_vm7, %v5827_v36, %v8441_v2  ;;  %v8562_v36 = vld [vmem:[#allocation3 + $0x15d] sm:$0xff] }
 0x553   : > { %7923 = vst [vmem:[%s8621_s18 + $0xb0] sm:$0xff] %v7821_v24  ;;  %v7332_v48 = vadd.f32 %v7331_v43, %v13779_v44  ;;  %v12976_v61 = vpop.f32.mrf.mxu0  ;;  %v8405_v43 = vunpack.i.l.bf16 %v12497_v63 }
 0x555   : > { %v7496_v35 = vadd.f32 %v12908_v49, %v7332_v48  ;;  %v12987_v49 = vpop.f32.mrf.mxu1  ;;  %v13787_v48 = vld [vmem:[#allocation25_spill] sm:$0xff] }
 0x556   : > { %7554 = vmatmul.f32.gmra.mxu0 %v6807_v7 }
 0x557   : > { %v7660_v41 = vadd.f32 %v12674_v4, %v7496_v35  ;;  %7381 = vmatmul.f32.gmra.mxu3 %v6755_v14  ;;  %v13788_v14 = vld [vmem:[#allocation84_spill] sm:$0xff] }
 0x558   : > { %vm13789_vm13 = vcmp.ne.s32.totalorder %v13788_v14, 27 }
 0x559   : > { %v7824_v28 = vadd.f32 %v12667_v11, %v7660_v41  ;;  %v5678_v11 = vsel %vm5241_vm9, %v8560_v32, 0.0 }
 0x55a   : > { %v7334_v1 = vpop.f32.mrf.mxu3  ;;  %v6756_v22 = vsel %vm3559_vm7, %v5678_v11, %v8395_v5  ;;  %v8410_v5 = vunpack.i.l.bf16 %v12883_v26  ;;  %v8415_v11 = vunpack.i.l.bf16 %v13761_v13 }
 0x55b   : > { %7924 = vst [vmem:[%s8621_s18 + $0xb8] sm:$0xff] %v7824_v28  ;;  %v7335_v50 = vadd.f32 %v7334_v1, %v13783_v38  ;;  %v12993_v31 = vpop.f32.mrf.mxu0  ;;  %v8563_v38 = vld [vmem:[#allocation3 + $0x165] sm:$0xff] }
 0x55d   : > { %v7499_v4 = vadd.f32 %v12923_v3, %v7335_v50  ;;  %v8456_v3 = vunpack.i.h.bf16 %v13000_v59  ;;  %v13008_v52 = vpop.f32.mrf.mxu1  ;;  %v13791_v50 = vld [vmem:[#allocation89_spill] sm:$0xff] }
 0x55e   : > { %7557 = vmatmul.f32.gmra.mxu0 %v6808_v34  ;;  %vm13792_vm8 = vcmp.ne.s32.totalorder %v13791_v50, 27  ;;  %v8440_v50 = vunpack.i.l.bf16 %v12964_v16  ;;  %v13805_v16 = vld [vmem:[#allocation39_spill] sm:$0xff] }
 0x55f   : > { %v7663_v23 = vadd.f32 %v12902_v9, %v7499_v4  ;;  %7384 = vmatmul.f32.gmra.mxu3 %v6756_v22  ;;  %v6809_v24 = vsel %vm3559_vm7, %v5829_v33, %v8456_v3  ;;  %v5681_v4 = vsel %vm13792_vm8, %v8563_v38, 0.0  ;;  %v8565_v33 = vld [vmem:[#allocation3 + $0x175] sm:$0xff] }
 0x561   : > { %v7827_v19 = vadd.f32 %v12906_v30, %v7663_v23  ;;  %v13013_v30 = vpop.f32.mrf.mxu2 }
 0x562   : > { %v7337_v42 = vpop.f32.mrf.mxu3 }
 0x563   : > { %7925 = vst [vmem:[%s8621_s18 + $0xc0] sm:$0xff] %v7827_v19  ;;  %v7338_v20 = vadd.f32 %v7337_v42, %v13785_v21  ;;  %v7513_v6 = vpop.f32.mrf.mxu0  ;;  %v8564_v19 = vld [vmem:[#allocation3 + $0x16d] sm:$0xff]  ;;  %v8420_v21 = vunpack.i.l.bf16 %v13766_v51  ;;  %v8425_v51 = vunpack.i.l.bf16 %v12932_v55 }
 0x564   : > { %v5682_v3 = vsel %vm5245_vm12, %v8564_v19, 0.0 }
 0x565   : > { %v7502_v62 = vadd.f32 %v12940_v25, %v7338_v20  ;;  %v8460_v25 = vunpack.i.l.bf16 %v12653_v10  ;;  %v7680_v7 = vpop.f32.mrf.mxu1 }
 0x566   : > { %7560 = vmatmul.f32.gmra.mxu0 %v6809_v24  ;;  %v5683_v24 = vsel %vm5246_vm5, %v8565_v33, 0.0 }
 0x567   : > { %v7666_v45 = vadd.f32 %v12921_v46, %v7502_v62  ;;  %7387 = vmatmul.f32.gmra.mxu3 %v6757_v0  ;;  %v5680_v46 = vsel %vm13789_vm13, %v8562_v36, 0.0  ;;  %v6810_v63 = vsel %vm3559_vm7, %v5830_v15, %v8460_v25  ;;  %v13797_v25 = vld [vmem:[#allocation33_spill] sm:$0xff]  ;;  %v8455_v0 = vunpack.i.l.bf16 %v13000_v59 }
 0x568   : > { %v13798_v15 = vld [vmem:[#allocation101_spill] sm:$0xff] }
 0x569   : > { %v7830_v2 = vadd.f32 %v12928_v18, %v7666_v45  ;;  %v6758_v18 = vsel %vm3559_vm7, %v5680_v46, %v8405_v43  ;;  %v7844_v41 = vpop.f32.mrf.mxu2  ;;  %vm13799_vm11 = vcmp.ne.s32.totalorder %v13798_v15, 27  ;;  %v13800_v46 = vld [vmem:[#allocation108_spill] sm:$0xff] }
 0x56a   : > { %v7340_v44 = vpop.f32.mrf.mxu3  ;;  %v8431_v55 = vunpack.i.h.bf16 %v13800_v46 }
 0x56b   : > { %7926 = vst [vmem:[%s8621_s18 + $0xc8] sm:$0xff] %v7830_v2  ;;  %v7341_v35 = vadd.f32 %v7340_v44, %v13787_v48  ;;  %v7516_v60 = vpop.f32.mrf.mxu0 }
 0x56d   : > { %v7505_v17 = vadd.f32 %v12957_v40, %v7341_v35  ;;  %v8566_v35 = vld [vmem:[#allocation3 + $0x17d] sm:$0xff] }
 0x56e   : > { %7563 = vmatmul.f32.gmra.mxu0 %v6810_v63  ;;  %v13801_v63 = vld [vmem:[#allocation34_spill] sm:$0xff] }
 0x56f   : > { %v7669_v10 = vadd.f32 %v12945_v58, %v7505_v17  ;;  %7390 = vmatmul.f32.gmra.mxu3 %v6758_v18  ;;  %v6759_v58 = vsel %vm3559_vm7, %v5681_v4, %v8410_v5  ;;  %v5684_v17 = vsel %vm13799_vm11, %v8566_v35, 0.0 }
 0x571   : > { %v7833_v28 = vadd.f32 %v12950_v29, %v7669_v10  ;;  %v7683_v29 = vpop.f32.mrf.mxu1  ;;  %v7847_v57 = vpop.f32.mrf.mxu2 }
 0x572   : > { %v7343_v40 = vpop.f32.mrf.mxu3 }
 0x573   : > { %7927 = vst [vmem:[%s8621_s18 + $0xd0] sm:$0xff] %v7833_v28  ;;  %v7344_v27 = vadd.f32 %v7343_v40, %v13790_v12  ;;  %v7519_v32 = vpop.f32.mrf.mxu0  ;;  %v13802_v40 = vld [vmem:[#allocation103_spill] sm:$0xff] }
 0x574   : > { %vm13803_vm0 = vcmp.ne.s32.totalorder %v13802_v40, 27  ;;  %vm13807_vm15 = vcmp.ne.s32.totalorder %v13802_v40, 0 }
 0x575   : > { %v7508_v1 = vadd.f32 %v12976_v61, %v7344_v27  ;;  %v13793_v61 = vld [vmem:[#allocation80_spill] sm:$0xff]  ;;  %vm13810_vm9 = vmmov %vm13803_vm0 }
 0x577   : > { %v7672_v47 = vadd.f32 %v12967_v53, %v7508_v1  ;;  %7393 = vmatmul.f32.gmra.mxu3 %v6759_v58  ;;  %v6760_v53 = vsel %vm3559_vm7, %v5682_v3, %v8415_v11  ;;  %v13804_v58 = vld [vmem:[#allocation100_spill] sm:$0xff]  ;;  %v8569_v3 = vld [vmem:[%s13143_s2 + $0x230] sm:$0xff] }
 0x579   : > { %v7836_v26 = vadd.f32 %v12972_v56, %v7672_v47  ;;  %v7686_v20 = vpop.f32.mrf.mxu1  ;;  %v7850_v9 = vpop.f32.mrf.mxu2 }
 0x57a   : > { %v7346_v22 = vpop.f32.mrf.mxu3 }
 0x57b   : > { %7928 = vst [vmem:[%s8621_s18 + $0xd8] sm:$0xff] %v7836_v26  ;;  %v7347_v34 = vadd.f32 %v7346_v22, %v13793_v61  ;;  %v7522_v56 = vpop.f32.mrf.mxu0  ;;  %v5831_v26 = vld [vmem:[#allocation3 + $0x198] sm:$0xff] }
 0x57c   : > { %v6811_v11 = vsel %vm3559_vm7, %v5831_v26, %v8440_v50 }
 0x57d   : > { %v7511_v23 = vadd.f32 %v12993_v31, %v7347_v34 }
 0x57f   : > { %v7675_v42 = vadd.f32 %v12987_v49, %v7511_v23  ;;  %7396 = vmatmul.f32.gmra.mxu3 %v6760_v53  ;;  %v6761_v49 = vsel %vm3559_vm7, %v5683_v24, %v8420_v21  ;;  %v8446_v23 = vunpack.i.h.bf16 %v13805_v16  ;;  %v13806_v53 = vld [vmem:[#allocation67_spill] sm:$0xff] }
 0x581   : > { %v7839_v13 = vadd.f32 %v12991_v54, %v7675_v42  ;;  %v7853_v36 = vpop.f32.mrf.mxu2 }
 0x582   : > { %v7349_v62 = vpop.f32.mrf.mxu3 }
 0x583   : > { %7929 = vst [vmem:[%s8621_s18 + $0xe0] sm:$0xff] %v7839_v13  ;;  %v7350_v31 = vadd.f32 %v7349_v62, %v13795_v39  ;;  %v7525_v43 = vpop.f32.mrf.mxu0  ;;  %v8570_v13 = vld [vmem:[%s13143_s2 + $0x228] sm:$0xff]  ;;  %v8571_v62 = vld [vmem:[%s13143_s2 + $0x220] sm:$0xff] }
 0x585   : > { %v7514_v37 = vadd.f32 %v7513_v6, %v7350_v31  ;;  %v7689_v6 = vpop.f32.mrf.mxu1  ;;  %v5937_v31 = vld [vmem:[#allocation3 + $0x1bb] sm:$0xff] }
 0x587   : > { %v7678_v45 = vadd.f32 %v13008_v52, %v7514_v37  ;;  %7399 = vmatmul.f32.gmra.mxu3 %v6761_v49  ;;  %v6762_v52 = vsel %vm3559_vm7, %v5684_v17, %v8425_v51  ;;  %v13808_v51 = vld [vmem:[#allocation102_spill] sm:$0xff] }
 0x589   : > { %v7842_v54 = vadd.f32 %v13013_v30, %v7678_v45  ;;  %v8573_v45 = vld [vmem:[%s13143_s2 + $0x210] sm:$0xff] }
 0x58a   : > { %v7352_v2 = vpop.f32.mrf.mxu3 }
 0x58b   : > { %7930 = vst [vmem:[%s8621_s18 + $0xe8] sm:$0xff] %v7842_v54  ;;  %v7353_v44 = vadd.f32 %v7352_v2, %v13797_v25  ;;  %v7528_v28 = vpop.f32.mrf.mxu0  ;;  %v5986_v54 = vsel %vm13807_vm15, %v5937_v31, 0.0  ;;  %v8574_v25 = vld [vmem:[%s13143_s2 + $0x208] sm:$0xff]  ;;  %v13815_v31 = vld [vmem:[#allocation20_spill] sm:$0xff] }
 0x58d   : > { %v7517_v48 = vadd.f32 %v7516_v60, %v7353_v44  ;;  %v8567_v60 = vld [vmem:[#allocation3 + $0x185] sm:$0xff]  ;;  %v7692_v27 = vpop.f32.mrf.mxu1  ;;  %v6861_v44 = vsel %vm3559_vm7, %v5986_v54, %v8455_v0  ;;  %v13816_v54 = vld [vmem:[#allocation106_spill] sm:$0xff] }
 0x58e   : > { %v5685_v12 = vsel %vm13803_vm0, %v8567_v60, 0.0 }
 0x58f   : > { %v7681_v14 = vadd.f32 %v7680_v7, %v7517_v48  ;;  %7402 = vmatmul.f32.gmra.mxu3 %v6762_v52  ;;  %v6763_v1 = vsel %vm3559_vm7, %v5685_v12, %v8431_v55  ;;  %v7856_v7 = vpop.f32.mrf.mxu2 }
 0x591   : > { %v7845_v30 = vadd.f32 %v7844_v41, %v7681_v14  ;;  %v6000_v14 = vld [vmem:[#allocation3 + $0x1bd] sm:$0xff] }
 0x592   : > { %v7355_v18 = vpop.f32.mrf.mxu3 }
 0x593   : > { %7931 = vst [vmem:[%s8621_s18 + $0xf0] sm:$0xff] %v7845_v30  ;;  %v7356_v10 = vadd.f32 %v7355_v18, %v13801_v63  ;;  %v7531_v22 = vpop.f32.mrf.mxu0  ;;  %v6049_v18 = vsel %vm13810_vm9, %v6000_v14, 0.0 }
 0x595   : > { %v7520_v5 = vadd.f32 %v7519_v32, %v7356_v10  ;;  %v7695_v34 = vpop.f32.mrf.mxu1 }
 0x597   : > { %v7684_v38 = vadd.f32 %v7683_v29, %v7520_v5  ;;  %7405 = vmatmul.f32.gmra.mxu3 %v6763_v1  ;;  %v8568_v29 = vld [vmem:[%s13143_s2 + $0x238] sm:$0xff]  ;;  %v7859_v19 = vpop.f32.mrf.mxu2 }
 0x598   : > { %v13811_v5 = vld [vmem:[#allocation11_spill] sm:$0xff] }
 0x599   : > { %v7848_v41 = vadd.f32 %v7847_v57, %v7684_v38 }
 0x59a   : > { %v7358_v4 = vpop.f32.mrf.mxu3 }
 0x59b   : > { %7932 = vst [vmem:[%s8621_s18 + $0xf8] sm:$0xff] %v7848_v41  ;;  %v7359_v47 = vadd.f32 %v7358_v4, %v13804_v58  ;;  %v7534_v37 = vpop.f32.mrf.mxu0  ;;  %v13812_v4 = vld [vmem:[#allocation14_spill] sm:$0xff] }
 0x59d   : > { %v7523_v32 = vadd.f32 %v7522_v56, %v7359_v47  ;;  %v5832_v56 = vld [vmem:[#allocation3 + $0x1a0] sm:$0xff]  ;;  %v7698_v24 = vpop.f32.mrf.mxu1 }
 0x59f   : > { %v7687_v61 = vadd.f32 %v7686_v20, %v7523_v32  ;;  %7566 = vmatmul.f32.vlgmr.msra.gmra.mxu3 %v6811_v11  ;;  %v6812_v20 = vsel %vm3559_vm7, %v5832_v56, %v8446_v23 }
 0x5a0   : > { %8198 = vmatpush.msra.mxu3 %v8568_v29 }
 0x5a1   : > { %v7851_v57 = vadd.f32 %v7850_v9, %v7687_v61  ;;  %v8572_v9 = vld [vmem:[%s13143_s2 + $0x218] sm:$0xff] }
 0x5a2   : > { %v7361_v8 = vpop.f32.mrf.mxu3  ;;  %8199 = vmatpush.msra.mxu3 %v8569_v3 }
 0x5a3   : > { %7933 = vst [vmem:[%s8621_s18 + $0x100] sm:$0xff] %v7851_v57  ;;  %v7362_v42 = vadd.f32 %v7361_v8, %v13806_v53  ;;  %v7537_v17 = vpop.f32.mrf.mxu0  ;;  %v13814_v53 = vld [vmem:[#allocation19_spill] sm:$0xff] }
 0x5a4   : > { %8200 = vmatpush.msra.mxu3 %v8570_v13 }
 0x5a5   : > { %v7526_v21 = vadd.f32 %v7525_v43, %v7362_v42  ;;  %v7862_v43 = vpop.f32.mrf.mxu2  ;;  %v7701_v30 = vpop.f32.mrf.mxu1 }
 0x5a6   : > { %8201 = vmatpush.msra.mxu3 %v8571_v62 }
 0x5a7   : > { %v7690_v39 = vadd.f32 %v7689_v6, %v7526_v21  ;;  %7569 = vmatmul.f32.gmra.mxu3 %v6812_v20  ;;  %v8575_v6 = vld [vmem:[%s13143_s2 + $0x200] sm:$0xff] }
 0x5a8   : > { %8202 = vmatpush.msra.mxu3 %v8572_v9 }
 0x5a9   : > { %v7854_v33 = vadd.f32 %v7853_v36, %v7690_v39  ;;  %v13809_v36 = vld [vmem:[#allocation104_spill] sm:$0xff] }
 0x5aa   : > { %v7364_v49 = vpop.f32.mrf.mxu3  ;;  %8203 = vmatpush.msra.mxu3 %v8573_v45 }
 0x5ab   : > { %7934 = vst [vmem:[%s8621_s18 + $0x108] sm:$0xff] %v7854_v33  ;;  %v7365_v2 = vadd.f32 %v7364_v49, %v13808_v51  ;;  %v7540_v12 = vpop.f32.mrf.mxu0 }
 0x5ac   : > { %8204 = vmatpush.msra.mxu3 %v8574_v25 }
 0x5ad   : > { %v7529_v59 = vadd.f32 %v7528_v28, %v7365_v2  ;;  %v7865_v55 = vpop.f32.mrf.mxu2  ;;  %v7704_v1 = vpop.f32.mrf.mxu1 }
 0x5ae   : > { %8205 = vmatpush.msra.mxu3 %v8575_v6 }
 0x5af   : > { %v7693_v48 = vadd.f32 %v7692_v27, %v7529_v59  ;;  %7733 = vmatmul.f32.vlgmr.msrb.gmra.mxu3 %v6861_v44 }
 0x5b1   : > { %v7857_v35 = vadd.f32 %v7856_v7, %v7693_v48 }
 0x5b2   : > { %v7367_v15 = vpop.f32.mrf.mxu3 }
 0x5b3   : > { %7935 = vst [vmem:[%s8621_s18 + $0x110] sm:$0xff] %v7857_v35  ;;  %v7368_v52 = vadd.f32 %v7367_v15, %v13809_v36  ;;  %v7543_v47 = vpop.f32.mrf.mxu0  ;;  %v13817_v35 = vld [vmem:[#allocation81_spill] sm:$0xff] }
 0x5b5   : > { %v7532_v46 = vadd.f32 %v7531_v22, %v7368_v52  ;;  %v7868_v7 = vpop.f32.mrf.mxu2  ;;  %v7707_v32 = vpop.f32.mrf.mxu1 }
 0x5b7   : > { %v7696_v63 = vadd.f32 %v7695_v34, %v7532_v46  ;;  %8163 = vmatmul.msk.f32.vlgmr.msra.gmra.mxu3 %vm3559_vm7, %v6049_v18  ;;  %v13813_v34 = vld [vmem:[#allocation16_spill] sm:$0xff]  ;;  %v13818_v18 = vld [vmem:[#allocation31_spill] sm:$0xff] }
 0x5b9   : > { %v7860_v10 = vadd.f32 %v7859_v19, %v7696_v63 }
 0x5ba   : > { %v7370_v28 = vpop.f32.mrf.mxu3 }
 0x5bb   : > { %7936 = vst [vmem:[%s8621_s18 + $0x118] sm:$0xff] %v7860_v10  ;;  %v7371_v60 = vadd.f32 %v7370_v28, %v13811_v5  ;;  %v7546_v23 = vpop.f32.mrf.mxu0 }
 0x5bd   : > { %v7535_v27 = vadd.f32 %v7534_v37, %v7371_v60  ;;  %v7871_v22 = vpop.f32.mrf.mxu2  ;;  %v7710_v8 = vpop.f32.mrf.mxu1 }
 0x5bf   : > { %v7699_v38 = vadd.f32 %v7698_v24, %v7535_v27 }
 0x5c1   : > { %v7863_v41 = vadd.f32 %v7862_v43, %v7699_v38 }
 0x5c2   : > { %v7373_v50 = vpop.f32.mrf.mxu3 }
 0x5c3   : > { %7937 = vst [vmem:[%s8621_s18 + $0x120] sm:$0xff] %v7863_v41  ;;  %v7374_v40 = vadd.f32 %v7373_v50, %v13812_v4  ;;  %v7549_v39 = vpop.f32.mrf.mxu0 }
 0x5c5   : > { %v7538_v58 = vadd.f32 %v7537_v17, %v7374_v40  ;;  %v7874_v56 = vpop.f32.mrf.mxu2  ;;  %v7713_v37 = vpop.f32.mrf.mxu1 }
 0x5c7   : > { %v7702_v26 = vadd.f32 %v7701_v30, %v7538_v58 }
 0x5c9   : > { %v7866_v11 = vadd.f32 %v7865_v55, %v7702_v26 }
 0x5ca   : > { %v7376_v61 = vpop.f32.mrf.mxu3 }
 0x5cb   : > { %7938 = vst [vmem:[%s8621_s18 + $0x128] sm:$0xff] %v7866_v11  ;;  %v7377_v29 = vadd.f32 %v7376_v61, %v13813_v34  ;;  %v7552_v2 = vpop.f32.mrf.mxu0 }
 0x5cd   : > { %v7541_v57 = vadd.f32 %v7540_v12, %v7377_v29  ;;  %v7877_v0 = vpop.f32.mrf.mxu2  ;;  %v7716_v25 = vpop.f32.mrf.mxu1 }
 0x5cf   : > { %v7705_v16 = vadd.f32 %v7704_v1, %v7541_v57  ;;  %v13819_v1 = vld [vmem:[#allocation30_spill] sm:$0xff]  ;;  %v13821_v57 = vld [vmem:[#allocation36_spill] sm:$0xff] }
 0x5d1   : > { %v7869_v19 = vadd.f32 %v7868_v7, %v7705_v16 }
 0x5d2   : > { %v7379_v3 = vpop.f32.mrf.mxu3 }
 0x5d3   : > { %7939 = vst [vmem:[%s8621_s18 + $0x130] sm:$0xff] %v7869_v19  ;;  %v7380_v42 = vadd.f32 %v7379_v3, %v13814_v53  ;;  %v7555_v36 = vpop.f32.mrf.mxu0 }
 0x5d5   : > { %v7544_v13 = vadd.f32 %v7543_v47, %v7380_v42  ;;  %v7880_v44 = vpop.f32.mrf.mxu2  ;;  %v7719_v14 = vpop.f32.mrf.mxu1  ;;  %v13820_v47 = vld [vmem:[#allocation86_spill] sm:$0xff] }
 0x5d7   : > { %v7708_v21 = vadd.f32 %v7707_v32, %v7544_v13 }
 0x5d9   : > { %v7872_v20 = vadd.f32 %v7871_v22, %v7708_v21  ;;  %v13822_v21 = vld [vmem:[#allocation110_spill] sm:$0xff] }
 0x5da   : > { %v7382_v62 = vpop.f32.mrf.mxu3 }
 0x5db   : > { %7940 = vst [vmem:[%s8621_s18 + $0x138] sm:$0xff] %v7872_v20  ;;  %v7383_v9 = vadd.f32 %v7382_v62, %v13815_v31  ;;  %v7558_v5 = vpop.f32.mrf.mxu0 }
 0x5dd   : > { %v7547_v33 = vadd.f32 %v7546_v23, %v7383_v9  ;;  %v7883_v46 = vpop.f32.mrf.mxu2  ;;  %v7722_v12 = vpop.f32.mrf.mxu1 }
 0x5df   : > { %v7711_v24 = vadd.f32 %v7710_v8, %v7547_v33 }
 0x5e1   : > { %v7875_v49 = vadd.f32 %v7874_v56, %v7711_v24 }
 0x5e2   : > { %v7385_v45 = vpop.f32.mrf.mxu3 }
 0x5e3   : > { %7941 = vst [vmem:[%s8621_s18 + $0x140] sm:$0xff] %v7875_v49  ;;  %v7386_v51 = vadd.f32 %v7385_v45, %v13816_v54  ;;  %v7561_v40 = vpop.f32.mrf.mxu0  ;;  %v13823_v49 = vld [vmem:[#allocation113_spill] sm:$0xff] }
 0x5e5   : > { %v7550_v43 = vadd.f32 %v7549_v39, %v7386_v51  ;;  %v7886_v7 = vpop.f32.mrf.mxu2  ;;  %v7725_v32 = vpop.f32.mrf.mxu1 }
 0x5e7   : > { %v7714_v59 = vadd.f32 %v7713_v37, %v7550_v43 }
 0x5e9   : > { %v7878_v6 = vadd.f32 %v7877_v0, %v7714_v59 }
 0x5ea   : > { %v7388_v48 = vpop.f32.mrf.mxu3 }
 0x5eb   : > { %7942 = vst [vmem:[%s8621_s18 + $0x148] sm:$0xff] %v7878_v6  ;;  %v7389_v15 = vadd.f32 %v7388_v48, %v13817_v35  ;;  %v7564_v23 = vpop.f32.mrf.mxu0 }
 0x5ed   : > { %v7553_v17 = vadd.f32 %v7552_v2, %v7389_v15  ;;  %v7889_v22 = vpop.f32.mrf.mxu2  ;;  %v7728_v8 = vpop.f32.mrf.mxu1 }
 0x5ef   : > { %v7717_v52 = vadd.f32 %v7716_v25, %v7553_v17 }
 0x5f1   : > { %v7881_v30 = vadd.f32 %v7880_v44, %v7717_v52 }
 0x5f2   : > { %v7391_v55 = vpop.f32.mrf.mxu3 }
 0x5f3   : > { %7943 = vst [vmem:[%s8621_s18 + $0x150] sm:$0xff] %v7881_v30  ;;  %v7392_v63 = vadd.f32 %v7391_v55, %v13818_v18 }
 0x5f5   : > { %v7556_v10 = vadd.f32 %v7555_v36, %v7392_v63  ;;  %v7892_v53 = vpop.f32.mrf.mxu2  ;;  %v7731_v31 = vpop.f32.mrf.mxu1 }
 0x5f7   : > { %v7720_v28 = vadd.f32 %v7719_v14, %v7556_v10 }
 0x5f9   : > { %v7884_v60 = vadd.f32 %v7883_v46, %v7720_v28 }
 0x5fa   : > { %v7394_v27 = vpop.f32.mrf.mxu3 }
 0x5fb   : > { %7944 = vst [vmem:[%s8621_s18 + $0x158] sm:$0xff] %v7884_v60  ;;  %v7395_v38 = vadd.f32 %v7394_v27, %v13819_v1 }
 0x5fd   : > { %v7559_v41 = vadd.f32 %v7558_v5, %v7395_v38  ;;  %v7895_v37 = vpop.f32.mrf.mxu2 }
 0x5ff   : > { %v7723_v50 = vadd.f32 %v7722_v12, %v7559_v41 }
 0x601   : > { %v7887_v4 = vadd.f32 %v7886_v7, %v7723_v50 }
 0x602   : > { %v7397_v58 = vpop.f32.mrf.mxu3 }
 0x603   : > { %7945 = vst [vmem:[%s8621_s18 + $0x160] sm:$0xff] %v7887_v4  ;;  %v7398_v26 = vadd.f32 %v7397_v58, %v13820_v47 }
 0x605   : > { %v7562_v11 = vadd.f32 %v7561_v40, %v7398_v26 }
 0x607   : > { %v7726_v61 = vadd.f32 %v7725_v32, %v7562_v11 }
 0x609   : > { %v7890_v34 = vadd.f32 %v7889_v22, %v7726_v61 }
 0x60a   : > { %v7400_v29 = vpop.f32.mrf.mxu3 }
 0x60b   : > { %7946 = vst [vmem:[%s8621_s18 + $0x168] sm:$0xff] %v7890_v34  ;;  %v7401_v16 = vadd.f32 %v7400_v29, %v13821_v57 }
 0x60d   : > { %v7565_v19 = vadd.f32 %v7564_v23, %v7401_v16 }
 0x60f   : > { %v7729_v3 = vadd.f32 %v7728_v8, %v7565_v19 }
 0x611   : > { %v7893_v42 = vadd.f32 %v7892_v53, %v7729_v3 }
 0x612   : > { %v7403_v56 = vpop.f32.mrf.mxu3 }
 0x613   : > { %7947 = vst [vmem:[%s8621_s18 + $0x170] sm:$0xff] %v7893_v42  ;;  %v7404_v20 = vadd.f32 %v7403_v56, %v13822_v21 }
 0x61a   : > { %v7406_v13 = vpop.f32.mrf.mxu3 }
 0x61b   : > { %v7407_v45 = vadd.f32 %v7406_v13, %v13823_v49 }
 0x622   : > { %v7567_v62 = vpop.f32.mrf.mxu3 }
 0x623   : > { %v7568_v39 = vadd.f32 %v7567_v62, %v7404_v20 }
 0x625   : > { %v7732_v9 = vadd.f32 %v7731_v31, %v7568_v39 }
 0x627   : > { %v7896_v33 = vadd.f32 %v7895_v37, %v7732_v9 }
 0x629   : > { %7948 = vst [vmem:[%s8621_s18 + $0x178] sm:$0xff] %v7896_v33 }
 0x62a   : > { %v7570_v0 = vpop.f32.mrf.mxu3 }
 0x62b   : > { %v7571_v54 = vadd.f32 %v7570_v0, %v7407_v45 }
 0x632   : > { %v7734_v24 = vpop.f32.mrf.mxu3 }
 0x633   : > { %v7735_v51 = vadd.f32 %v7734_v24, %v7571_v54 }
 0x63a   : > { %v7898_v2 = vpop.f32.mrf.mxu3 }
 0x63b   : > { %v7899_v43 = vadd.f32 %v7898_v2, %v7735_v51 }
 0x63d   : > { %7949 = vst [vmem:[%s8621_s18 + $0x180] sm:$0xff] %v7899_v43 }
 0x63e PF: > { %s13_s12 = sadd.s32 1, %s8582_s12  }
 0x63f   : > { %p10_p6 = scmp.ge.s32.totalorder %s13_s12, 4  }
 0x641   :  { %12 = sbr.rel (!%p10_p6) target bundleno = 1 (0x1), region = 67 }

</bundles_post_ra>
